<compile_context>
chip_gen: v5e
topology: v5e:2x2
jax: 0.10.0
libtpu: 0.0.40
codegen_flags: <defaults>
</compile_context>

<pallas_src>
from functools import partial

import jax
import jax.numpy as jnp
from jax.experimental import pallas as pl
from jax.experimental.pallas import tpu as pltpu

# ----------------------------- configuration --------------------------------
BS, CTX = 2, 2                       # batch, context length  (4-D input path)
GRID_LEN = 16                        # bps_grid_len
PATCH = 4                            # patch_size
CHOIR_DIM = 2
EMBED = 128                          # embed_channels (lane-dense)
N_LAYERS = 4
N_HEADS = 8
HEAD_DIM = EMBED // N_HEADS          # 16
FF_DIM = 1024                        # dim_feedforward (default)
N_PATCHES = (GRID_LEN // PATCH) ** 3 # 64 tokens per sequence
PATCH_DIM = CHOIR_DIM * PATCH ** 3   # 128 (lane-dense)
LN_EPS = 1e-5
ATTN_SCALE = 1.0 / float(HEAD_DIM) ** 0.5


# ------------------------------ kernel helpers -------------------------------
def _gelu(x):
    # exact (erf) GELU, matching torch F.gelu default
    return 0.5 * x * (1.0 + jax.lax.erf(x * 0.7071067811865476))


def _layernorm(x, g, b):
    mu = jnp.mean(x, axis=-1, keepdims=True)
    d = x - mu
    var = jnp.mean(d * d, axis=-1, keepdims=True)
    return d * jax.lax.rsqrt(var + LN_EPS) * g + b


# --------------------------------- kernel ------------------------------------
def _encoder_kernel(tok_ref, pos_ref, pw_ref, pb_ref,
                    qkvw_ref, qkvb_ref, ow_ref, ob_ref,
                    ln1g_ref, ln1b_ref, ln2g_ref, ln2b_ref,
                    f1w_ref, f1b_ref, f2w_ref, f2b_ref,
                    o_ref, h_ref, attn_ref, *, n_heads, head_dim):
    """One grid step = one (sequence b, layer l) pair.

    h_ref   : (S, D) f32 scratch -- activations carried across the layer axis.
    attn_ref: (S, D) f32 scratch -- per-head outputs merged at lane offsets.
    """
    l = pl.program_id(1)
    d = EMBED
    bf16 = jnp.bfloat16

    # ---- layer 0: patch projection (Identity non-linearity) + pos embed -----
    @pl.when(l == 0)
    def _():
        h0 = jnp.dot(tok_ref[...].astype(bf16), pw_ref[...],
                     preferred_element_type=jnp.float32)
        h_ref[...] = h0 + pb_ref[...] + pos_ref[...]

    h = h_ref[...]                                       # (S, D) f32

    # ------------------------ multi-head self-attention ----------------------
    qkv = jnp.dot(h.astype(bf16), qkvw_ref[0],
                  preferred_element_type=jnp.float32) + qkvb_ref[0]  # (S, 3D)

    # Static 8-iteration head loop: per-head intermediates are tiny (64x64),
    # live ranges are bounded per grid step by the layer grid.
    for hh in range(n_heads):
        lo = hh * head_dim
        # 1/sqrt(head_dim) already folded into the Q weight/bias columns.
        qh = qkv[:, lo:lo + head_dim].astype(bf16)
        kh = qkv[:, d + lo:d + lo + head_dim].astype(bf16)
        vh = qkv[:, 2 * d + lo:2 * d + lo + head_dim].astype(bf16)
        s = jnp.einsum('nd,md->nm', qh, kh,
                       preferred_element_type=jnp.float32)          # (S, S) f32
        s = s - jnp.max(s, axis=-1, keepdims=True)
        e = jnp.exp(s)
        rsum = jnp.sum(e, axis=-1, keepdims=True)
        oh = jnp.dot(e.astype(bf16), vh,
                     preferred_element_type=jnp.float32)             # (S, hd)
        # normalise after the PV matmul (EUP reciprocal, no (SxS) divides);
        # merge heads by lane offset -> one K=128 output projection below.
        attn_ref[:, lo:lo + head_dim] = oh * pl.reciprocal(rsum, approx=True)

    attn = jnp.dot(attn_ref[...].astype(bf16), ow_ref[0],
                   preferred_element_type=jnp.float32) + ob_ref[0]
    h = _layernorm(h + attn, ln1g_ref[0], ln1b_ref[0])

    # ------------------------------ feed-forward ------------------------------
    f = jnp.dot(h.astype(bf16), f1w_ref[0],
                preferred_element_type=jnp.float32) + f1b_ref[0]
    f = _gelu(f)
    f = jnp.dot(f.astype(bf16), f2w_ref[0],
                preferred_element_type=jnp.float32) + f2b_ref[0]
    h = _layernorm(h + f, ln2g_ref[0], ln2b_ref[0])

    h_ref[...] = h

    @pl.when(l == pl.num_programs(1) - 1)
    def _():
        o_ref[...] = h


def _layer_spec(*tail):
    zeros = (0,) * len(tail)
    return pl.BlockSpec((1,) + tail, lambda b, l: (l,) + zeros)


def _shared_spec(*shape):
    zeros = (0,) * len(shape)
    return pl.BlockSpec(shape, lambda b, l: zeros)


def transformer_encoder(tokens, pos, params):
    nt = tokens.shape[0]
    n_seq = nt // N_PATCHES                     # B = number of sequences

    kernel = partial(_encoder_kernel, n_heads=N_HEADS, head_dim=HEAD_DIM)

    args = (tokens, pos,
            params["proj_w"], params["proj_b"],
            params["qkv_w"], params["qkv_b"],
            params["out_w"], params["out_b"],
            params["ln1_g"], params["ln1_b"],
            params["ln2_g"], params["ln2_b"],
            params["ff1_w"], params["ff1_b"],
            params["ff2_w"], params["ff2_b"])

    in_specs = [
        pl.BlockSpec((N_PATCHES, PATCH_DIM), lambda b, l: (b, 0)),   # tokens
        _shared_spec(N_PATCHES, EMBED),                              # pos
        _shared_spec(PATCH_DIM, EMBED),                              # proj_w
        _shared_spec(1, EMBED),                                      # proj_b
        _layer_spec(EMBED, 3 * EMBED),                               # qkv_w
        _layer_spec(1, 3 * EMBED),                                   # qkv_b
        _layer_spec(EMBED, EMBED),                                   # out_w
        _layer_spec(1, EMBED),                                       # out_b
        _layer_spec(1, EMBED),                                       # ln1_g
        _layer_spec(1, EMBED),                                       # ln1_b
        _layer_spec(1, EMBED),                                       # ln2_g
        _layer_spec(1, EMBED),                                       # ln2_b
        _layer_spec(EMBED, FF_DIM),                                  # ff1_w
        _layer_spec(1, FF_DIM),                                      # ff1_b
        _layer_spec(FF_DIM, EMBED),                                  # ff2_w
        _layer_spec(1, EMBED),                                       # ff2_b
    ]

    grid_spec = pltpu.PrefetchScalarGridSpec(
        num_scalar_prefetch=0,
        grid=(n_seq, N_LAYERS),
        in_specs=in_specs,
        out_specs=pl.BlockSpec((N_PATCHES, EMBED), lambda b, l: (b, 0)),
        scratch_shapes=[pltpu.VMEM((N_PATCHES, EMBED), jnp.float32),   # h carry
                        pltpu.VMEM((N_PATCHES, EMBED), jnp.float32)],  # head merge
    )

    return pl.pallas_call(
        kernel,
        out_shape=jax.ShapeDtypeStruct((nt, EMBED), jnp.float32),
        grid_spec=grid_spec,
        compiler_params=pltpu.CompilerParams(
            dimension_semantics=("parallel", "arbitrary"),
            vmem_limit_bytes=32 * 1024 * 1024),
    )(*args)


# ------------------------------ parameters -----------------------------------
def _dense(key, din, dout):
    kw, kb = jax.random.split(key)
    s = 1.0 / jnp.sqrt(jnp.float32(din))
    w = jax.random.uniform(kw, (din, dout), jnp.float32, -s, s)
    b = jax.random.uniform(kb, (1, dout), jnp.float32, -s, s)
    return w, b


def init_params(key):
    keys = jax.random.split(key, 1 + N_LAYERS)
    proj_w, proj_b = _dense(keys[0], PATCH_DIM, EMBED)
    qkv_w, qkv_b, out_w, out_b = [], [], [], []
    ff1_w, ff1_b, ff2_w, ff2_b = [], [], [], []
    for l in range(N_LAYERS):
        k0, k1, k2, k3 = jax.random.split(keys[1 + l], 4)
        w, b = _dense(k0, EMBED, 3 * EMBED)
        # fold the 1/sqrt(head_dim) attention scale into the Q projection
        w = w.at[:, :EMBED].multiply(ATTN_SCALE)
        b = b.at[:, :EMBED].multiply(ATTN_SCALE)
        qkv_w.append(w); qkv_b.append(b)
        w, b = _dense(k1, EMBED, EMBED);   out_w.append(w); out_b.append(b)
        w, b = _dense(k2, EMBED, FF_DIM);  ff1_w.append(w); ff1_b.append(b)
        w, b = _dense(k3, FF_DIM, EMBED);  ff2_w.append(w); ff2_b.append(b)
    stk = lambda xs: jnp.stack(xs, axis=0)
    bf = lambda w: w.astype(jnp.bfloat16)    # matmul operands: bf16 in HBM
    return {
        "proj_w": bf(proj_w), "proj_b": proj_b,
        "qkv_w": bf(stk(qkv_w)), "qkv_b": stk(qkv_b),
        "out_w": bf(stk(out_w)), "out_b": stk(out_b),
        "ff1_w": bf(stk(ff1_w)), "ff1_b": stk(ff1_b),
        "ff2_w": bf(stk(ff2_w)), "ff2_b": stk(ff2_b),
        "ln1_g": jnp.ones((N_LAYERS, 1, EMBED), jnp.float32),
        "ln1_b": jnp.zeros((N_LAYERS, 1, EMBED), jnp.float32),
        "ln2_g": jnp.ones((N_LAYERS, 1, EMBED), jnp.float32),
        "ln2_b": jnp.zeros((N_LAYERS, 1, EMBED), jnp.float32),
    }


# --------------------------- JAX layout glue ----------------------------------
def _patchify(x, B):
    """Replicates the torch view/permute/unfold/reshape/permute/flatten chain."""
    G, P, C = GRID_LEN, PATCH, CHOIR_DIM
    gp = G // P
    x = x.reshape(B, G, G, G, C)
    x = jnp.transpose(x, (0, 4, 1, 2, 3))                      # (B, C, G, G, G)
    x = x.reshape(B, C, gp, P, gp, P, gp, P)
    x = jnp.transpose(x, (0, 1, 2, 4, 6, 3, 5, 7))             # torch unfold layout
    x = x.reshape(B, C, P, P, P, N_PATCHES)                    # torch .reshape
    x = jnp.transpose(x, (0, 5, 1, 2, 3, 4)).reshape(B, N_PATCHES, C * P ** 3)
    return x


def _sinusoidal_pos_encoding(n_pos, dim):
    pos = jnp.arange(n_pos, dtype=jnp.float32)[:, None]
    i = jnp.arange(dim // 2, dtype=jnp.float32)[None, :]
    ang = pos * jnp.exp(-(jnp.log(10000.0) * 2.0 / dim) * i)
    pe = jnp.zeros((n_pos, dim), jnp.float32)
    pe = pe.at[:, 0::2].set(jnp.sin(ang))
    pe = pe.at[:, 1::2].set(jnp.cos(ang))
    return pe


# --------------------------------- forward ------------------------------------
def forward(params, x):
    if x.ndim == 3:
        bs, n, ctx = x.shape[0], 1, 1
    elif x.ndim == 4:
        bs, n, ctx = x.shape[0], 1, x.shape[1]
    else:
        bs, n, ctx = x.shape[0], x.shape[1], x.shape[2]
    B = bs * n * ctx
    xf = x.astype(jnp.float32)

    patches = _patchify(xf, B)                              # (B, S, C*P^3)
    tokens = patches.reshape(B * N_PATCHES, PATCH_DIM)      # lane-dense 2-D slab
    pos = _sinusoidal_pos_encoding(N_PATCHES, EMBED)        # (S, D), shared

    y = transformer_encoder(tokens, pos, params)            # (B*S, D)
    y = y.reshape(B, N_PATCHES, EMBED)

    # output path: global_pooling=False, spatialize_patches=False
    #   x.permute(0, 2, 1).view(bs*n, ctx, D, P, P, P).squeeze(dim=1)
    y = jnp.transpose(y, (0, 2, 1)).reshape(bs * n, ctx, EMBED, PATCH, PATCH, PATCH)
    if ctx == 1:
        y = y[:, 0]
    return y


# ----------------------------------- main --------------------------------------
if __name__ == "__main__":
    key = jax.random.PRNGKey(0)
    kx, kp = jax.random.split(key)

    # 4-D input path: (bs, ctx_len, grid_len**3, choir_dim)
    x = jax.random.normal(kx, (BS, CTX, GRID_LEN ** 3, CHOIR_DIM), jnp.float32)
    params = init_params(kp)

    out = jax.jit(forward)(params, x)
    jax.block_until_ready(out)

    assert out.shape == (BS, CTX, EMBED, PATCH, PATCH, PATCH), out.shape
    print("KERNEL_OK")
</pallas_src>

<mosaic_0001>
module attributes {stable_mosaic.version = 11 : i64} {
  func.func @_encoder_kernel(%arg0: i32, %arg1: i32, %arg2: memref<64x128xf32, #tpu.memory_space<vmem>>, %arg3: memref<64x128xf32, #tpu.memory_space<vmem>>, %arg4: memref<128x128xbf16, #tpu.memory_space<vmem>>, %arg5: memref<1x128xf32, #tpu.memory_space<vmem>>, %arg6: memref<1x128x384xbf16, #tpu.memory_space<vmem>>, %arg7: memref<1x1x384xf32, #tpu.memory_space<vmem>>, %arg8: memref<1x128x128xbf16, #tpu.memory_space<vmem>>, %arg9: memref<1x1x128xf32, #tpu.memory_space<vmem>>, %arg10: memref<1x1x128xf32, #tpu.memory_space<vmem>>, %arg11: memref<1x1x128xf32, #tpu.memory_space<vmem>>, %arg12: memref<1x1x128xf32, #tpu.memory_space<vmem>>, %arg13: memref<1x1x128xf32, #tpu.memory_space<vmem>>, %arg14: memref<1x128x1024xbf16, #tpu.memory_space<vmem>>, %arg15: memref<1x1x1024xf32, #tpu.memory_space<vmem>>, %arg16: memref<1x1024x128xbf16, #tpu.memory_space<vmem>>, %arg17: memref<1x1x128xf32, #tpu.memory_space<vmem>>, %arg18: memref<64x128xf32, #tpu.memory_space<vmem>>, %arg19: memref<64x128xf32, #tpu.memory_space<vmem>>, %arg20: memref<64x128xf32, #tpu.memory_space<vmem>>) attributes {dimension_semantics = [#tpu.dimension_semantics<parallel>, #tpu.dimension_semantics<arbitrary>], iteration_bounds = array<i64: 4, 4>, scalar_prefetch = 0 : i64, scratch_operands = 2 : i64, tpu.core_type = #tpu.core_type<tc>, window_params = [{transform_indices = @transform_0, window_bounds = array<i64: 64, 128>}, {pipeline_mode = #tpu.pipeline_mode<synchronous>, transform_indices = @transform_1, window_bounds = array<i64: 64, 128>}, {pipeline_mode = #tpu.pipeline_mode<synchronous>, transform_indices = @transform_2, window_bounds = array<i64: 128, 128>}, {pipeline_mode = #tpu.pipeline_mode<synchronous>, transform_indices = @transform_3, window_bounds = array<i64: 1, 128>}, {transform_indices = @transform_4, window_bounds = array<i64: 1, 128, 384>}, {transform_indices = @transform_5, window_bounds = array<i64: 1, 1, 384>}, {transform_indices = @transform_6, window_bounds = array<i64: 1, 128, 128>}, {transform_indices = @transform_7, window_bounds = array<i64: 1, 1, 128>}, {transform_indices = @transform_8, window_bounds = array<i64: 1, 1, 128>}, {transform_indices = @transform_9, window_bounds = array<i64: 1, 1, 128>}, {transform_indices = @transform_10, window_bounds = array<i64: 1, 1, 128>}, {transform_indices = @transform_11, window_bounds = array<i64: 1, 1, 128>}, {transform_indices = @transform_12, window_bounds = array<i64: 1, 128, 1024>}, {transform_indices = @transform_13, window_bounds = array<i64: 1, 1, 1024>}, {transform_indices = @transform_14, window_bounds = array<i64: 1, 1024, 128>}, {transform_indices = @transform_15, window_bounds = array<i64: 1, 1, 128>}, {transform_indices = @transform_16, window_bounds = array<i64: 64, 128>}]} {
    %c0_i32 = arith.constant 0 : i32
    %0 = arith.cmpi eq, %arg1, %c0_i32 : i32
    %1 = arith.extui %0 : i1 to i32
    %c0_i32_0 = arith.constant 0 : i32
    %2 = arith.cmpi ne, %1, %c0_i32_0 : i32
    scf.if %2 {
      %c0_100 = arith.constant 0 : index
      %c0_101 = arith.constant 0 : index
      %259 = vector.load %arg2[%c0_100, %c0_101] : memref<64x128xf32, #tpu.memory_space<vmem>>, vector<64x128xf32>
      %260 = arith.truncf %259 : vector<64x128xf32> to vector<64x128xbf16>
      %c0_102 = arith.constant 0 : index
      %c0_103 = arith.constant 0 : index
      %261 = vector.load %arg4[%c0_102, %c0_103] : memref<128x128xbf16, #tpu.memory_space<vmem>>, vector<128x128xbf16>
      %cst_104 = arith.constant dense<0.000000e+00> : vector<64x128xf32>
      %262 = tpu.matmul %260, %261, %cst_104 {dimension_numbers = #tpu.dot_dimension_numbers<[1], [0], [0], [1], [0, 0, 1, 1], [], []>} : vector<64x128xbf16>, vector<128x128xbf16>, vector<64x128xf32> -> vector<64x128xf32>
      %c0_105 = arith.constant 0 : index
      %c0_106 = arith.constant 0 : index
      %263 = vector.load %arg5[%c0_105, %c0_106] : memref<1x128xf32, #tpu.memory_space<vmem>>, vector<1x128xf32>
      %264 = vector.broadcast %263 : vector<1x128xf32> to vector<64x128xf32>
      %265 = arith.addf %262, %264 : vector<64x128xf32>
      %c0_107 = arith.constant 0 : index
      %c0_108 = arith.constant 0 : index
      %266 = vector.load %arg3[%c0_107, %c0_108] : memref<64x128xf32, #tpu.memory_space<vmem>>, vector<64x128xf32>
      %267 = arith.addf %265, %266 : vector<64x128xf32>
      %c0_109 = arith.constant 0 : index
      %c0_110 = arith.constant 0 : index
      %268 = vector.load %arg19[%c0_109, %c0_110] : memref<64x128xf32, #tpu.memory_space<vmem>>, vector<64x128xf32>
      tpu.vector_store %arg19[%c0_109, %c0_110], %267 {strides = array<i32>} : memref<64x128xf32, #tpu.memory_space<vmem>>, vector<64x128xf32>,
    } else {
    }
    %c0 = arith.constant 0 : index
    %c0_1 = arith.constant 0 : index
    %3 = vector.load %arg19[%c0, %c0_1] : memref<64x128xf32, #tpu.memory_space<vmem>>, vector<64x128xf32>
    %4 = arith.truncf %3 : vector<64x128xf32> to vector<64x128xbf16>
    %c0_2 = arith.constant 0 : index
    %c0_3 = arith.constant 0 : index
    %c0_4 = arith.constant 0 : index
    %5 = vector.load %arg6[%c0_2, %c0_3, %c0_4] : memref<1x128x384xbf16, #tpu.memory_space<vmem>>, vector<1x128x384xbf16>
    %6 = vector.shape_cast %5 : vector<1x128x384xbf16> to vector<128x384xbf16>
    %cst = arith.constant dense<0.000000e+00> : vector<64x384xf32>
    %7 = tpu.matmul %4, %6, %cst {dimension_numbers = #tpu.dot_dimension_numbers<[1], [0], [0], [1], [0, 0, 1, 1], [], []>} : vector<64x128xbf16>, vector<128x384xbf16>, vector<64x384xf32> -> vector<64x384xf32>
    %c0_5 = arith.constant 0 : index
    %c0_6 = arith.constant 0 : index
    %c0_7 = arith.constant 0 : index
    %8 = vector.load %arg7[%c0_5, %c0_6, %c0_7] : memref<1x1x384xf32, #tpu.memory_space<vmem>>, vector<1x1x384xf32>
    %9 = vector.shape_cast %8 : vector<1x1x384xf32> to vector<1x384xf32>
    %10 = vector.broadcast %9 : vector<1x384xf32> to vector<64x384xf32>
    %11 = arith.addf %7, %10 : vector<64x384xf32>
    %12 = vector.extract_strided_slice %11 {offsets = [0, 0], sizes = [64, 16], strides = [1, 1]} : vector<64x384xf32> to vector<64x16xf32>
    %13 = arith.truncf %12 : vector<64x16xf32> to vector<64x16xbf16>
    %14 = vector.extract_strided_slice %11 {offsets = [0, 128], sizes = [64, 16], strides = [1, 1]} : vector<64x384xf32> to vector<64x16xf32>
    %15 = arith.truncf %14 : vector<64x16xf32> to vector<64x16xbf16>
    %16 = vector.extract_strided_slice %11 {offsets = [0, 256], sizes = [64, 16], strides = [1, 1]} : vector<64x384xf32> to vector<64x16xf32>
    %17 = arith.truncf %16 : vector<64x16xf32> to vector<64x16xbf16>
    "tpu.trace_start"() <{level = 10 : i32, message = "nd,md->nm"}> : () -> ()
    %cst_8 = arith.constant dense<0.000000e+00> : vector<64x64xf32>
    %18 = tpu.matmul %13, %15, %cst_8 {dimension_numbers = #tpu.dot_dimension_numbers<[1], [1], [0], [0], [0, 0, 1, 0], [], []>} : vector<64x16xbf16>, vector<64x16xbf16>, vector<64x64xf32> -> vector<64x64xf32>
    "tpu.trace_stop"() : () -> ()
    %cst_9 = arith.constant dense<0xFF800000> : vector<64xf32>
    %19 = vector.multi_reduction <maximumf>, %18, %cst_9 [1] : vector<64x64xf32> to vector<64xf32>
    %20 = vector.shape_cast %19 : vector<64xf32> to vector<64x1xf32>
    %21 = vector.broadcast %20 : vector<64x1xf32> to vector<64x64xf32>
    %22 = arith.subf %18, %21 : vector<64x64xf32>
    %23 = math.exp %22 : vector<64x64xf32>
    %cst_10 = arith.constant dense<0.000000e+00> : vector<64xf32>
    %24 = vector.multi_reduction <add>, %23, %cst_10 [1] : vector<64x64xf32> to vector<64xf32>
    %25 = vector.shape_cast %24 : vector<64xf32> to vector<64x1xf32>
    %26 = arith.truncf %23 : vector<64x64xf32> to vector<64x64xbf16>
    %cst_11 = arith.constant dense<0.000000e+00> : vector<64x16xf32>
    %27 = tpu.matmul %26, %17, %cst_11 {dimension_numbers = #tpu.dot_dimension_numbers<[1], [0], [0], [1], [0, 0, 1, 1], [], []>} : vector<64x64xbf16>, vector<64x16xbf16>, vector<64x16xf32> -> vector<64x16xf32>
    %28 = tpu.reciprocal %25 {approx = true} : vector<64x1xf32> -> vector<64x1xf32>
    %29 = vector.broadcast %28 : vector<64x1xf32> to vector<64x16xf32>
    %30 = arith.mulf %27, %29 : vector<64x16xf32>
    %c0_12 = arith.constant 0 : index
    %c0_13 = arith.constant 0 : index
    %31 = vector.load %arg20[%c0_12, %c0_13] : memref<64x128xf32, #tpu.memory_space<vmem>>, vector<64x16xf32>
    tpu.vector_store %arg20[%c0_12, %c0_13], %30 {strides = array<i32>} : memref<64x128xf32, #tpu.memory_space<vmem>>, vector<64x16xf32>,
    %32 = vector.extract_strided_slice %11 {offsets = [0, 16], sizes = [64, 16], strides = [1, 1]} : vector<64x384xf32> to vector<64x16xf32>
    %33 = arith.truncf %32 : vector<64x16xf32> to vector<64x16xbf16>
    %34 = vector.extract_strided_slice %11 {offsets = [0, 144], sizes = [64, 16], strides = [1, 1]} : vector<64x384xf32> to vector<64x16xf32>
    %35 = arith.truncf %34 : vector<64x16xf32> to vector<64x16xbf16>
    %36 = vector.extract_strided_slice %11 {offsets = [0, 272], sizes = [64, 16], strides = [1, 1]} : vector<64x384xf32> to vector<64x16xf32>
    %37 = arith.truncf %36 : vector<64x16xf32> to vector<64x16xbf16>
    "tpu.trace_start"() <{level = 10 : i32, message = "nd,md->nm"}> : () -> ()
    %cst_14 = arith.constant dense<0.000000e+00> : vector<64x64xf32>
    %38 = tpu.matmul %33, %35, %cst_14 {dimension_numbers = #tpu.dot_dimension_numbers<[1], [1], [0], [0], [0, 0, 1, 0], [], []>} : vector<64x16xbf16>, vector<64x16xbf16>, vector<64x64xf32> -> vector<64x64xf32>
    "tpu.trace_stop"() : () -> ()
    %cst_15 = arith.constant dense<0xFF800000> : vector<64xf32>
    %39 = vector.multi_reduction <maximumf>, %38, %cst_15 [1] : vector<64x64xf32> to vector<64xf32>
    %40 = vector.shape_cast %39 : vector<64xf32> to vector<64x1xf32>
    %41 = vector.broadcast %40 : vector<64x1xf32> to vector<64x64xf32>
    %42 = arith.subf %38, %41 : vector<64x64xf32>
    %43 = math.exp %42 : vector<64x64xf32>
    %cst_16 = arith.constant dense<0.000000e+00> : vector<64xf32>
    %44 = vector.multi_reduction <add>, %43, %cst_16 [1] : vector<64x64xf32> to vector<64xf32>
    %45 = vector.shape_cast %44 : vector<64xf32> to vector<64x1xf32>
    %46 = arith.truncf %43 : vector<64x64xf32> to vector<64x64xbf16>
    %cst_17 = arith.constant dense<0.000000e+00> : vector<64x16xf32>
    %47 = tpu.matmul %46, %37, %cst_17 {dimension_numbers = #tpu.dot_dimension_numbers<[1], [0], [0], [1], [0, 0, 1, 1], [], []>} : vector<64x64xbf16>, vector<64x16xbf16>, vector<64x16xf32> -> vector<64x16xf32>
    %48 = tpu.reciprocal %45 {approx = true} : vector<64x1xf32> -> vector<64x1xf32>
    %49 = vector.broadcast %48 : vector<64x1xf32> to vector<64x16xf32>
    %50 = arith.mulf %47, %49 : vector<64x16xf32>
    %c0_18 = arith.constant 0 : index
    %c16 = arith.constant 16 : index
    %51 = vector.load %arg20[%c0_18, %c16] : memref<64x128xf32, #tpu.memory_space<vmem>>, vector<64x16xf32>
    tpu.vector_store %arg20[%c0_18, %c16], %50 {strides = array<i32>} : memref<64x128xf32, #tpu.memory_space<vmem>>, vector<64x16xf32>,
    %52 = vector.extract_strided_slice %11 {offsets = [0, 32], sizes = [64, 16], strides = [1, 1]} : vector<64x384xf32> to vector<64x16xf32>
    %53 = arith.truncf %52 : vector<64x16xf32> to vector<64x16xbf16>
    %54 = vector.extract_strided_slice %11 {offsets = [0, 160], sizes = [64, 16], strides = [1, 1]} : vector<64x384xf32> to vector<64x16xf32>
    %55 = arith.truncf %54 : vector<64x16xf32> to vector<64x16xbf16>
    %56 = vector.extract_strided_slice %11 {offsets = [0, 288], sizes = [64, 16], strides = [1, 1]} : vector<64x384xf32> to vector<64x16xf32>
    %57 = arith.truncf %56 : vector<64x16xf32> to vector<64x16xbf16>
    "tpu.trace_start"() <{level = 10 : i32, message = "nd,md->nm"}> : () -> ()
    %cst_19 = arith.constant dense<0.000000e+00> : vector<64x64xf32>
    %58 = tpu.matmul %53, %55, %cst_19 {dimension_numbers = #tpu.dot_dimension_numbers<[1], [1], [0], [0], [0, 0, 1, 0], [], []>} : vector<64x16xbf16>, vector<64x16xbf16>, vector<64x64xf32> -> vector<64x64xf32>
    "tpu.trace_stop"() : () -> ()
    %cst_20 = arith.constant dense<0xFF800000> : vector<64xf32>
    %59 = vector.multi_reduction <maximumf>, %58, %cst_20 [1] : vector<64x64xf32> to vector<64xf32>
    %60 = vector.shape_cast %59 : vector<64xf32> to vector<64x1xf32>
    %61 = vector.broadcast %60 : vector<64x1xf32> to vector<64x64xf32>
    %62 = arith.subf %58, %61 : vector<64x64xf32>
    %63 = math.exp %62 : vector<64x64xf32>
    %cst_21 = arith.constant dense<0.000000e+00> : vector<64xf32>
    %64 = vector.multi_reduction <add>, %63, %cst_21 [1] : vector<64x64xf32> to vector<64xf32>
    %65 = vector.shape_cast %64 : vector<64xf32> to vector<64x1xf32>
    %66 = arith.truncf %63 : vector<64x64xf32> to vector<64x64xbf16>
    %cst_22 = arith.constant dense<0.000000e+00> : vector<64x16xf32>
    %67 = tpu.matmul %66, %57, %cst_22 {dimension_numbers = #tpu.dot_dimension_numbers<[1], [0], [0], [1], [0, 0, 1, 1], [], []>} : vector<64x64xbf16>, vector<64x16xbf16>, vector<64x16xf32> -> vector<64x16xf32>
    %68 = tpu.reciprocal %65 {approx = true} : vector<64x1xf32> -> vector<64x1xf32>
    %69 = vector.broadcast %68 : vector<64x1xf32> to vector<64x16xf32>
    %70 = arith.mulf %67, %69 : vector<64x16xf32>
    %c0_23 = arith.constant 0 : index
    %c32 = arith.constant 32 : index
    %71 = vector.load %arg20[%c0_23, %c32] : memref<64x128xf32, #tpu.memory_space<vmem>>, vector<64x16xf32>
    tpu.vector_store %arg20[%c0_23, %c32], %70 {strides = array<i32>} : memref<64x128xf32, #tpu.memory_space<vmem>>, vector<64x16xf32>,
    %72 = vector.extract_strided_slice %11 {offsets = [0, 48], sizes = [64, 16], strides = [1, 1]} : vector<64x384xf32> to vector<64x16xf32>
    %73 = arith.truncf %72 : vector<64x16xf32> to vector<64x16xbf16>
    %74 = vector.extract_strided_slice %11 {offsets = [0, 176], sizes = [64, 16], strides = [1, 1]} : vector<64x384xf32> to vector<64x16xf32>
    %75 = arith.truncf %74 : vector<64x16xf32> to vector<64x16xbf16>
    %76 = vector.extract_strided_slice %11 {offsets = [0, 304], sizes = [64, 16], strides = [1, 1]} : vector<64x384xf32> to vector<64x16xf32>
    %77 = arith.truncf %76 : vector<64x16xf32> to vector<64x16xbf16>
    "tpu.trace_start"() <{level = 10 : i32, message = "nd,md->nm"}> : () -> ()
    %cst_24 = arith.constant dense<0.000000e+00> : vector<64x64xf32>
    %78 = tpu.matmul %73, %75, %cst_24 {dimension_numbers = #tpu.dot_dimension_numbers<[1], [1], [0], [0], [0, 0, 1, 0], [], []>} : vector<64x16xbf16>, vector<64x16xbf16>, vector<64x64xf32> -> vector<64x64xf32>
    "tpu.trace_stop"() : () -> ()
    %cst_25 = arith.constant dense<0xFF800000> : vector<64xf32>
    %79 = vector.multi_reduction <maximumf>, %78, %cst_25 [1] : vector<64x64xf32> to vector<64xf32>
    %80 = vector.shape_cast %79 : vector<64xf32> to vector<64x1xf32>
    %81 = vector.broadcast %80 : vector<64x1xf32> to vector<64x64xf32>
    %82 = arith.subf %78, %81 : vector<64x64xf32>
    %83 = math.exp %82 : vector<64x64xf32>
    %cst_26 = arith.constant dense<0.000000e+00> : vector<64xf32>
    %84 = vector.multi_reduction <add>, %83, %cst_26 [1] : vector<64x64xf32> to vector<64xf32>
    %85 = vector.shape_cast %84 : vector<64xf32> to vector<64x1xf32>
    %86 = arith.truncf %83 : vector<64x64xf32> to vector<64x64xbf16>
    %cst_27 = arith.constant dense<0.000000e+00> : vector<64x16xf32>
    %87 = tpu.matmul %86, %77, %cst_27 {dimension_numbers = #tpu.dot_dimension_numbers<[1], [0], [0], [1], [0, 0, 1, 1], [], []>} : vector<64x64xbf16>, vector<64x16xbf16>, vector<64x16xf32> -> vector<64x16xf32>
    %88 = tpu.reciprocal %85 {approx = true} : vector<64x1xf32> -> vector<64x1xf32>
    %89 = vector.broadcast %88 : vector<64x1xf32> to vector<64x16xf32>
    %90 = arith.mulf %87, %89 : vector<64x16xf32>
    %c0_28 = arith.constant 0 : index
    %c48 = arith.constant 48 : index
    %91 = vector.load %arg20[%c0_28, %c48] : memref<64x128xf32, #tpu.memory_space<vmem>>, vector<64x16xf32>
    tpu.vector_store %arg20[%c0_28, %c48], %90 {strides = array<i32>} : memref<64x128xf32, #tpu.memory_space<vmem>>, vector<64x16xf32>,
    %92 = vector.extract_strided_slice %11 {offsets = [0, 64], sizes = [64, 16], strides = [1, 1]} : vector<64x384xf32> to vector<64x16xf32>
    %93 = arith.truncf %92 : vector<64x16xf32> to vector<64x16xbf16>
    %94 = vector.extract_strided_slice %11 {offsets = [0, 192], sizes = [64, 16], strides = [1, 1]} : vector<64x384xf32> to vector<64x16xf32>
    %95 = arith.truncf %94 : vector<64x16xf32> to vector<64x16xbf16>
    %96 = vector.extract_strided_slice %11 {offsets = [0, 320], sizes = [64, 16], strides = [1, 1]} : vector<64x384xf32> to vector<64x16xf32>
    %97 = arith.truncf %96 : vector<64x16xf32> to vector<64x16xbf16>
    "tpu.trace_start"() <{level = 10 : i32, message = "nd,md->nm"}> : () -> ()
    %cst_29 = arith.constant dense<0.000000e+00> : vector<64x64xf32>
    %98 = tpu.matmul %93, %95, %cst_29 {dimension_numbers = #tpu.dot_dimension_numbers<[1], [1], [0], [0], [0, 0, 1, 0], [], []>} : vector<64x16xbf16>, vector<64x16xbf16>, vector<64x64xf32> -> vector<64x64xf32>
    "tpu.trace_stop"() : () -> ()
    %cst_30 = arith.constant dense<0xFF800000> : vector<64xf32>
    %99 = vector.multi_reduction <maximumf>, %98, %cst_30 [1] : vector<64x64xf32> to vector<64xf32>
    %100 = vector.shape_cast %99 : vector<64xf32> to vector<64x1xf32>
    %101 = vector.broadcast %100 : vector<64x1xf32> to vector<64x64xf32>
    %102 = arith.subf %98, %101 : vector<64x64xf32>
    %103 = math.exp %102 : vector<64x64xf32>
    %cst_31 = arith.constant dense<0.000000e+00> : vector<64xf32>
    %104 = vector.multi_reduction <add>, %103, %cst_31 [1] : vector<64x64xf32> to vector<64xf32>
    %105 = vector.shape_cast %104 : vector<64xf32> to vector<64x1xf32>
    %106 = arith.truncf %103 : vector<64x64xf32> to vector<64x64xbf16>
    %cst_32 = arith.constant dense<0.000000e+00> : vector<64x16xf32>
    %107 = tpu.matmul %106, %97, %cst_32 {dimension_numbers = #tpu.dot_dimension_numbers<[1], [0], [0], [1], [0, 0, 1, 1], [], []>} : vector<64x64xbf16>, vector<64x16xbf16>, vector<64x16xf32> -> vector<64x16xf32>
    %108 = tpu.reciprocal %105 {approx = true} : vector<64x1xf32> -> vector<64x1xf32>
    %109 = vector.broadcast %108 : vector<64x1xf32> to vector<64x16xf32>
    %110 = arith.mulf %107, %109 : vector<64x16xf32>
    %c0_33 = arith.constant 0 : index
    %c64 = arith.constant 64 : index
    %111 = vector.load %arg20[%c0_33, %c64] : memref<64x128xf32, #tpu.memory_space<vmem>>, vector<64x16xf32>
    tpu.vector_store %arg20[%c0_33, %c64], %110 {strides = array<i32>} : memref<64x128xf32, #tpu.memory_space<vmem>>, vector<64x16xf32>,
    %112 = vector.extract_strided_slice %11 {offsets = [0, 80], sizes = [64, 16], strides = [1, 1]} : vector<64x384xf32> to vector<64x16xf32>
    %113 = arith.truncf %112 : vector<64x16xf32> to vector<64x16xbf16>
    %114 = vector.extract_strided_slice %11 {offsets = [0, 208], sizes = [64, 16], strides = [1, 1]} : vector<64x384xf32> to vector<64x16xf32>
    %115 = arith.truncf %114 : vector<64x16xf32> to vector<64x16xbf16>
    %116 = vector.extract_strided_slice %11 {offsets = [0, 336], sizes = [64, 16], strides = [1, 1]} : vector<64x384xf32> to vector<64x16xf32>
    %117 = arith.truncf %116 : vector<64x16xf32> to vector<64x16xbf16>
    "tpu.trace_start"() <{level = 10 : i32, message = "nd,md->nm"}> : () -> ()
    %cst_34 = arith.constant dense<0.000000e+00> : vector<64x64xf32>
    %118 = tpu.matmul %113, %115, %cst_34 {dimension_numbers = #tpu.dot_dimension_numbers<[1], [1], [0], [0], [0, 0, 1, 0], [], []>} : vector<64x16xbf16>, vector<64x16xbf16>, vector<64x64xf32> -> vector<64x64xf32>
    "tpu.trace_stop"() : () -> ()
    %cst_35 = arith.constant dense<0xFF800000> : vector<64xf32>
    %119 = vector.multi_reduction <maximumf>, %118, %cst_35 [1] : vector<64x64xf32> to vector<64xf32>
    %120 = vector.shape_cast %119 : vector<64xf32> to vector<64x1xf32>
    %121 = vector.broadcast %120 : vector<64x1xf32> to vector<64x64xf32>
    %122 = arith.subf %118, %121 : vector<64x64xf32>
    %123 = math.exp %122 : vector<64x64xf32>
    %cst_36 = arith.constant dense<0.000000e+00> : vector<64xf32>
    %124 = vector.multi_reduction <add>, %123, %cst_36 [1] : vector<64x64xf32> to vector<64xf32>
    %125 = vector.shape_cast %124 : vector<64xf32> to vector<64x1xf32>
    %126 = arith.truncf %123 : vector<64x64xf32> to vector<64x64xbf16>
    %cst_37 = arith.constant dense<0.000000e+00> : vector<64x16xf32>
    %127 = tpu.matmul %126, %117, %cst_37 {dimension_numbers = #tpu.dot_dimension_numbers<[1], [0], [0], [1], [0, 0, 1, 1], [], []>} : vector<64x64xbf16>, vector<64x16xbf16>, vector<64x16xf32> -> vector<64x16xf32>
    %128 = tpu.reciprocal %125 {approx = true} : vector<64x1xf32> -> vector<64x1xf32>
    %129 = vector.broadcast %128 : vector<64x1xf32> to vector<64x16xf32>
    %130 = arith.mulf %127, %129 : vector<64x16xf32>
    %c0_38 = arith.constant 0 : index
    %c80 = arith.constant 80 : index
    %131 = vector.load %arg20[%c0_38, %c80] : memref<64x128xf32, #tpu.memory_space<vmem>>, vector<64x16xf32>
    tpu.vector_store %arg20[%c0_38, %c80], %130 {strides = array<i32>} : memref<64x128xf32, #tpu.memory_space<vmem>>, vector<64x16xf32>,
    %132 = vector.extract_strided_slice %11 {offsets = [0, 96], sizes = [64, 16], strides = [1, 1]} : vector<64x384xf32> to vector<64x16xf32>
    %133 = arith.truncf %132 : vector<64x16xf32> to vector<64x16xbf16>
    %134 = vector.extract_strided_slice %11 {offsets = [0, 224], sizes = [64, 16], strides = [1, 1]} : vector<64x384xf32> to vector<64x16xf32>
    %135 = arith.truncf %134 : vector<64x16xf32> to vector<64x16xbf16>
    %136 = vector.extract_strided_slice %11 {offsets = [0, 352], sizes = [64, 16], strides = [1, 1]} : vector<64x384xf32> to vector<64x16xf32>
    %137 = arith.truncf %136 : vector<64x16xf32> to vector<64x16xbf16>
    "tpu.trace_start"() <{level = 10 : i32, message = "nd,md->nm"}> : () -> ()
    %cst_39 = arith.constant dense<0.000000e+00> : vector<64x64xf32>
    %138 = tpu.matmul %133, %135, %cst_39 {dimension_numbers = #tpu.dot_dimension_numbers<[1], [1], [0], [0], [0, 0, 1, 0], [], []>} : vector<64x16xbf16>, vector<64x16xbf16>, vector<64x64xf32> -> vector<64x64xf32>
    "tpu.trace_stop"() : () -> ()
    %cst_40 = arith.constant dense<0xFF800000> : vector<64xf32>
    %139 = vector.multi_reduction <maximumf>, %138, %cst_40 [1] : vector<64x64xf32> to vector<64xf32>
    %140 = vector.shape_cast %139 : vector<64xf32> to vector<64x1xf32>
    %141 = vector.broadcast %140 : vector<64x1xf32> to vector<64x64xf32>
    %142 = arith.subf %138, %141 : vector<64x64xf32>
    %143 = math.exp %142 : vector<64x64xf32>
    %cst_41 = arith.constant dense<0.000000e+00> : vector<64xf32>
    %144 = vector.multi_reduction <add>, %143, %cst_41 [1] : vector<64x64xf32> to vector<64xf32>
    %145 = vector.shape_cast %144 : vector<64xf32> to vector<64x1xf32>
    %146 = arith.truncf %143 : vector<64x64xf32> to vector<64x64xbf16>
    %cst_42 = arith.constant dense<0.000000e+00> : vector<64x16xf32>
    %147 = tpu.matmul %146, %137, %cst_42 {dimension_numbers = #tpu.dot_dimension_numbers<[1], [0], [0], [1], [0, 0, 1, 1], [], []>} : vector<64x64xbf16>, vector<64x16xbf16>, vector<64x16xf32> -> vector<64x16xf32>
    %148 = tpu.reciprocal %145 {approx = true} : vector<64x1xf32> -> vector<64x1xf32>
    %149 = vector.broadcast %148 : vector<64x1xf32> to vector<64x16xf32>
    %150 = arith.mulf %147, %149 : vector<64x16xf32>
    %c0_43 = arith.constant 0 : index
    %c96 = arith.constant 96 : index
    %151 = vector.load %arg20[%c0_43, %c96] : memref<64x128xf32, #tpu.memory_space<vmem>>, vector<64x16xf32>
    tpu.vector_store %arg20[%c0_43, %c96], %150 {strides = array<i32>} : memref<64x128xf32, #tpu.memory_space<vmem>>, vector<64x16xf32>,
    %152 = vector.extract_strided_slice %11 {offsets = [0, 112], sizes = [64, 16], strides = [1, 1]} : vector<64x384xf32> to vector<64x16xf32>
    %153 = arith.truncf %152 : vector<64x16xf32> to vector<64x16xbf16>
    %154 = vector.extract_strided_slice %11 {offsets = [0, 240], sizes = [64, 16], strides = [1, 1]} : vector<64x384xf32> to vector<64x16xf32>
    %155 = arith.truncf %154 : vector<64x16xf32> to vector<64x16xbf16>
    %156 = vector.extract_strided_slice %11 {offsets = [0, 368], sizes = [64, 16], strides = [1, 1]} : vector<64x384xf32> to vector<64x16xf32>
    %157 = arith.truncf %156 : vector<64x16xf32> to vector<64x16xbf16>
    "tpu.trace_start"() <{level = 10 : i32, message = "nd,md->nm"}> : () -> ()
    %cst_44 = arith.constant dense<0.000000e+00> : vector<64x64xf32>
    %158 = tpu.matmul %153, %155, %cst_44 {dimension_numbers = #tpu.dot_dimension_numbers<[1], [1], [0], [0], [0, 0, 1, 0], [], []>} : vector<64x16xbf16>, vector<64x16xbf16>, vector<64x64xf32> -> vector<64x64xf32>
    "tpu.trace_stop"() : () -> ()
    %cst_45 = arith.constant dense<0xFF800000> : vector<64xf32>
    %159 = vector.multi_reduction <maximumf>, %158, %cst_45 [1] : vector<64x64xf32> to vector<64xf32>
    %160 = vector.shape_cast %159 : vector<64xf32> to vector<64x1xf32>
    %161 = vector.broadcast %160 : vector<64x1xf32> to vector<64x64xf32>
    %162 = arith.subf %158, %161 : vector<64x64xf32>
    %163 = math.exp %162 : vector<64x64xf32>
    %cst_46 = arith.constant dense<0.000000e+00> : vector<64xf32>
    %164 = vector.multi_reduction <add>, %163, %cst_46 [1] : vector<64x64xf32> to vector<64xf32>
    %165 = vector.shape_cast %164 : vector<64xf32> to vector<64x1xf32>
    %166 = arith.truncf %163 : vector<64x64xf32> to vector<64x64xbf16>
    %cst_47 = arith.constant dense<0.000000e+00> : vector<64x16xf32>
    %167 = tpu.matmul %166, %157, %cst_47 {dimension_numbers = #tpu.dot_dimension_numbers<[1], [0], [0], [1], [0, 0, 1, 1], [], []>} : vector<64x64xbf16>, vector<64x16xbf16>, vector<64x16xf32> -> vector<64x16xf32>
    %168 = tpu.reciprocal %165 {approx = true} : vector<64x1xf32> -> vector<64x1xf32>
    %169 = vector.broadcast %168 : vector<64x1xf32> to vector<64x16xf32>
    %170 = arith.mulf %167, %169 : vector<64x16xf32>
    %c0_48 = arith.constant 0 : index
    %c112 = arith.constant 112 : index
    %171 = vector.load %arg20[%c0_48, %c112] : memref<64x128xf32, #tpu.memory_space<vmem>>, vector<64x16xf32>
    tpu.vector_store %arg20[%c0_48, %c112], %170 {strides = array<i32>} : memref<64x128xf32, #tpu.memory_space<vmem>>, vector<64x16xf32>,
    %c0_49 = arith.constant 0 : index
    %c0_50 = arith.constant 0 : index
    %172 = vector.load %arg20[%c0_49, %c0_50] : memref<64x128xf32, #tpu.memory_space<vmem>>, vector<64x128xf32>
    %173 = arith.truncf %172 : vector<64x128xf32> to vector<64x128xbf16>
    %c0_51 = arith.constant 0 : index
    %c0_52 = arith.constant 0 : index
    %c0_53 = arith.constant 0 : index
    %174 = vector.load %arg8[%c0_51, %c0_52, %c0_53] : memref<1x128x128xbf16, #tpu.memory_space<vmem>>, vector<1x128x128xbf16>
    %175 = vector.shape_cast %174 : vector<1x128x128xbf16> to vector<128x128xbf16>
    %cst_54 = arith.constant dense<0.000000e+00> : vector<64x128xf32>
    %176 = tpu.matmul %173, %175, %cst_54 {dimension_numbers = #tpu.dot_dimension_numbers<[1], [0], [0], [1], [0, 0, 1, 1], [], []>} : vector<64x128xbf16>, vector<128x128xbf16>, vector<64x128xf32> -> vector<64x128xf32>
    %c0_55 = arith.constant 0 : index
    %c0_56 = arith.constant 0 : index
    %c0_57 = arith.constant 0 : index
    %177 = vector.load %arg9[%c0_55, %c0_56, %c0_57] : memref<1x1x128xf32, #tpu.memory_space<vmem>>, vector<1x1x128xf32>
    %178 = vector.shape_cast %177 : vector<1x1x128xf32> to vector<1x128xf32>
    %179 = vector.broadcast %178 : vector<1x128xf32> to vector<64x128xf32>
    %180 = arith.addf %176, %179 : vector<64x128xf32>
    %181 = arith.addf %3, %180 : vector<64x128xf32>
    %c0_58 = arith.constant 0 : index
    %c0_59 = arith.constant 0 : index
    %c0_60 = arith.constant 0 : index
    %182 = vector.load %arg10[%c0_58, %c0_59, %c0_60] : memref<1x1x128xf32, #tpu.memory_space<vmem>>, vector<1x1x128xf32>
    %183 = vector.shape_cast %182 : vector<1x1x128xf32> to vector<1x128xf32>
    %c0_61 = arith.constant 0 : index
    %c0_62 = arith.constant 0 : index
    %c0_63 = arith.constant 0 : index
    %184 = vector.load %arg11[%c0_61, %c0_62, %c0_63] : memref<1x1x128xf32, #tpu.memory_space<vmem>>, vector<1x1x128xf32>
    %185 = vector.shape_cast %184 : vector<1x1x128xf32> to vector<1x128xf32>
    %cst_64 = arith.constant dense<0.000000e+00> : vector<64xf32>
    %186 = vector.multi_reduction <add>, %181, %cst_64 [1] : vector<64x128xf32> to vector<64xf32>
    %187 = vector.shape_cast %186 : vector<64xf32> to vector<64x1xf32>
    %cst_65 = arith.constant 1.280000e+02 : f32
    %188 = vector.broadcast %cst_65 : f32 to vector<64x1xf32>
    %189 = arith.divf %187, %188 : vector<64x1xf32>
    %190 = vector.broadcast %189 : vector<64x1xf32> to vector<64x128xf32>
    %191 = arith.subf %181, %190 : vector<64x128xf32>
    %192 = arith.mulf %191, %191 : vector<64x128xf32>
    %cst_66 = arith.constant dense<0.000000e+00> : vector<64xf32>
    %193 = vector.multi_reduction <add>, %192, %cst_66 [1] : vector<64x128xf32> to vector<64xf32>
    %194 = vector.shape_cast %193 : vector<64xf32> to vector<64x1xf32>
    %cst_67 = arith.constant 1.280000e+02 : f32
    %195 = vector.broadcast %cst_67 : f32 to vector<64x1xf32>
    %196 = arith.divf %194, %195 : vector<64x1xf32>
    %cst_68 = arith.constant 9.99999974E-6 : f32
    %197 = vector.broadcast %cst_68 : f32 to vector<64x1xf32>
    %198 = arith.addf %196, %197 : vector<64x1xf32>
    %199 = math.rsqrt %198 : vector<64x1xf32>
    %200 = vector.broadcast %199 : vector<64x1xf32> to vector<64x128xf32>
    %201 = arith.mulf %191, %200 : vector<64x128xf32>
    %202 = vector.broadcast %183 : vector<1x128xf32> to vector<64x128xf32>
    %203 = arith.mulf %201, %202 : vector<64x128xf32>
    %204 = vector.broadcast %185 : vector<1x128xf32> to vector<64x128xf32>
    %205 = arith.addf %203, %204 : vector<64x128xf32>
    %206 = arith.truncf %205 : vector<64x128xf32> to vector<64x128xbf16>
    %c0_69 = arith.constant 0 : index
    %c0_70 = arith.constant 0 : index
    %c0_71 = arith.constant 0 : index
    %207 = vector.load %arg14[%c0_69, %c0_70, %c0_71] : memref<1x128x1024xbf16, #tpu.memory_space<vmem>>, vector<1x128x1024xbf16>
    %208 = vector.shape_cast %207 : vector<1x128x1024xbf16> to vector<128x1024xbf16>
    %cst_72 = arith.constant dense<0.000000e+00> : vector<64x1024xf32>
    %209 = tpu.matmul %206, %208, %cst_72 {dimension_numbers = #tpu.dot_dimension_numbers<[1], [0], [0], [1], [0, 0, 1, 1], [], []>} : vector<64x128xbf16>, vector<128x1024xbf16>, vector<64x1024xf32> -> vector<64x1024xf32>
    %c0_73 = arith.constant 0 : index
    %c0_74 = arith.constant 0 : index
    %c0_75 = arith.constant 0 : index
    %210 = vector.load %arg15[%c0_73, %c0_74, %c0_75] : memref<1x1x1024xf32, #tpu.memory_space<vmem>>, vector<1x1x1024xf32>
    %211 = vector.shape_cast %210 : vector<1x1x1024xf32> to vector<1x1024xf32>
    %212 = vector.broadcast %211 : vector<1x1024xf32> to vector<64x1024xf32>
    %213 = arith.addf %209, %212 : vector<64x1024xf32>
    %cst_76 = arith.constant 5.000000e-01 : f32
    %214 = vector.broadcast %cst_76 : f32 to vector<64x1024xf32>
    %215 = arith.mulf %214, %213 : vector<64x1024xf32>
    %cst_77 = arith.constant 0.707106769 : f32
    %216 = vector.broadcast %cst_77 : f32 to vector<64x1024xf32>
    %217 = arith.mulf %213, %216 : vector<64x1024xf32>
    %218 = math.erf %217 : vector<64x1024xf32>
    %cst_78 = arith.constant 1.000000e+00 : f32
    %219 = vector.broadcast %cst_78 : f32 to vector<64x1024xf32>
    %220 = arith.addf %219, %218 : vector<64x1024xf32>
    %221 = arith.mulf %215, %220 : vector<64x1024xf32>
    %222 = arith.truncf %221 : vector<64x1024xf32> to vector<64x1024xbf16>
    %c0_79 = arith.constant 0 : index
    %c0_80 = arith.constant 0 : index
    %c0_81 = arith.constant 0 : index
    %223 = vector.load %arg16[%c0_79, %c0_80, %c0_81] : memref<1x1024x128xbf16, #tpu.memory_space<vmem>>, vector<1x1024x128xbf16>
    %224 = vector.shape_cast %223 : vector<1x1024x128xbf16> to vector<1024x128xbf16>
    %cst_82 = arith.constant dense<0.000000e+00> : vector<64x128xf32>
    %225 = tpu.matmul %222, %224, %cst_82 {dimension_numbers = #tpu.dot_dimension_numbers<[1], [0], [0], [1], [0, 0, 1, 1], [], []>} : vector<64x1024xbf16>, vector<1024x128xbf16>, vector<64x128xf32> -> vector<64x128xf32>
    %c0_83 = arith.constant 0 : index
    %c0_84 = arith.constant 0 : index
    %c0_85 = arith.constant 0 : index
    %226 = vector.load %arg17[%c0_83, %c0_84, %c0_85] : memref<1x1x128xf32, #tpu.memory_space<vmem>>, vector<1x1x128xf32>
    %227 = vector.shape_cast %226 : vector<1x1x128xf32> to vector<1x128xf32>
    %228 = vector.broadcast %227 : vector<1x128xf32> to vector<64x128xf32>
    %229 = arith.addf %225, %228 : vector<64x128xf32>
    %230 = arith.addf %205, %229 : vector<64x128xf32>
    %c0_86 = arith.constant 0 : index
    %c0_87 = arith.constant 0 : index
    %c0_88 = arith.constant 0 : index
    %231 = vector.load %arg12[%c0_86, %c0_87, %c0_88] : memref<1x1x128xf32, #tpu.memory_space<vmem>>, vector<1x1x128xf32>
    %232 = vector.shape_cast %231 : vector<1x1x128xf32> to vector<1x128xf32>
    %c0_89 = arith.constant 0 : index
    %c0_90 = arith.constant 0 : index
    %c0_91 = arith.constant 0 : index
    %233 = vector.load %arg13[%c0_89, %c0_90, %c0_91] : memref<1x1x128xf32, #tpu.memory_space<vmem>>, vector<1x1x128xf32>
    %234 = vector.shape_cast %233 : vector<1x1x128xf32> to vector<1x128xf32>
    %cst_92 = arith.constant dense<0.000000e+00> : vector<64xf32>
    %235 = vector.multi_reduction <add>, %230, %cst_92 [1] : vector<64x128xf32> to vector<64xf32>
    %236 = vector.shape_cast %235 : vector<64xf32> to vector<64x1xf32>
    %cst_93 = arith.constant 1.280000e+02 : f32
    %237 = vector.broadcast %cst_93 : f32 to vector<64x1xf32>
    %238 = arith.divf %236, %237 : vector<64x1xf32>
    %239 = vector.broadcast %238 : vector<64x1xf32> to vector<64x128xf32>
    %240 = arith.subf %230, %239 : vector<64x128xf32>
    %241 = arith.mulf %240, %240 : vector<64x128xf32>
    %cst_94 = arith.constant dense<0.000000e+00> : vector<64xf32>
    %242 = vector.multi_reduction <add>, %241, %cst_94 [1] : vector<64x128xf32> to vector<64xf32>
    %243 = vector.shape_cast %242 : vector<64xf32> to vector<64x1xf32>
    %cst_95 = arith.constant 1.280000e+02 : f32
    %244 = vector.broadcast %cst_95 : f32 to vector<64x1xf32>
    %245 = arith.divf %243, %244 : vector<64x1xf32>
    %cst_96 = arith.constant 9.99999974E-6 : f32
    %246 = vector.broadcast %cst_96 : f32 to vector<64x1xf32>
    %247 = arith.addf %245, %246 : vector<64x1xf32>
    %248 = math.rsqrt %247 : vector<64x1xf32>
    %249 = vector.broadcast %248 : vector<64x1xf32> to vector<64x128xf32>
    %250 = arith.mulf %240, %249 : vector<64x128xf32>
    %251 = vector.broadcast %232 : vector<1x128xf32> to vector<64x128xf32>
    %252 = arith.mulf %250, %251 : vector<64x128xf32>
    %253 = vector.broadcast %234 : vector<1x128xf32> to vector<64x128xf32>
    %254 = arith.addf %252, %253 : vector<64x128xf32>
    %c0_97 = arith.constant 0 : index
    %c0_98 = arith.constant 0 : index
    %255 = vector.load %arg19[%c0_97, %c0_98] : memref<64x128xf32, #tpu.memory_space<vmem>>, vector<64x128xf32>
    tpu.vector_store %arg19[%c0_97, %c0_98], %254 {strides = array<i32>} : memref<64x128xf32, #tpu.memory_space<vmem>>, vector<64x128xf32>,
    %c3_i32 = arith.constant 3 : i32
    %256 = arith.cmpi eq, %arg1, %c3_i32 : i32
    %257 = arith.extui %256 : i1 to i32
    %c0_i32_99 = arith.constant 0 : i32
    %258 = arith.cmpi ne, %257, %c0_i32_99 : i32
    scf.if %258 {
      %c0_100 = arith.constant 0 : index
      %c0_101 = arith.constant 0 : index
      %259 = vector.load %arg18[%c0_100, %c0_101] : memref<64x128xf32, #tpu.memory_space<vmem>>, vector<64x128xf32>
      tpu.vector_store %arg18[%c0_100, %c0_101], %254 {strides = array<i32>} : memref<64x128xf32, #tpu.memory_space<vmem>>, vector<64x128xf32>,
    } else {
    }
    return
  }
  func.func @transform_0(%arg0: i32, %arg1: i32) -> (i32, i32) {
    %c0_i32 = arith.constant 0 : i32
    %c0_i32_0 = arith.constant 0 : i32
    return %arg0, %c0_i32 : i32, i32
  }
  func.func @transform_1(%arg0: i32, %arg1: i32) -> (i32, i32) {
    %c0_i32 = arith.constant 0 : i32
    %c0_i32_0 = arith.constant 0 : i32
    %c0_i32_1 = arith.constant 0 : i32
    return %c0_i32, %c0_i32_0 : i32, i32
  }
  func.func @transform_2(%arg0: i32, %arg1: i32) -> (i32, i32) {
    %c0_i32 = arith.constant 0 : i32
    %c0_i32_0 = arith.constant 0 : i32
    %c0_i32_1 = arith.constant 0 : i32
    return %c0_i32, %c0_i32_0 : i32, i32
  }
  func.func @transform_3(%arg0: i32, %arg1: i32) -> (i32, i32) {
    %c0_i32 = arith.constant 0 : i32
    %c0_i32_0 = arith.constant 0 : i32
    %c0_i32_1 = arith.constant 0 : i32
    return %c0_i32, %c0_i32_0 : i32, i32
  }
  func.func @transform_4(%arg0: i32, %arg1: i32) -> (i32, i32, i32) {
    %c0_i32 = arith.constant 0 : i32
    %c0_i32_0 = arith.constant 0 : i32
    %c0_i32_1 = arith.constant 0 : i32
    return %arg1, %c0_i32, %c0_i32_0 : i32, i32, i32
  }
  func.func @transform_5(%arg0: i32, %arg1: i32) -> (i32, i32, i32) {
    %c0_i32 = arith.constant 0 : i32
    %c0_i32_0 = arith.constant 0 : i32
    %c0_i32_1 = arith.constant 0 : i32
    return %arg1, %c0_i32, %c0_i32_0 : i32, i32, i32
  }
  func.func @transform_6(%arg0: i32, %arg1: i32) -> (i32, i32, i32) {
    %c0_i32 = arith.constant 0 : i32
    %c0_i32_0 = arith.constant 0 : i32
    %c0_i32_1 = arith.constant 0 : i32
    return %arg1, %c0_i32, %c0_i32_0 : i32, i32, i32
  }
  func.func @transform_7(%arg0: i32, %arg1: i32) -> (i32, i32, i32) {
    %c0_i32 = arith.constant 0 : i32
    %c0_i32_0 = arith.constant 0 : i32
    %c0_i32_1 = arith.constant 0 : i32
    return %arg1, %c0_i32, %c0_i32_0 : i32, i32, i32
  }
  func.func @transform_8(%arg0: i32, %arg1: i32) -> (i32, i32, i32) {
    %c0_i32 = arith.constant 0 : i32
    %c0_i32_0 = arith.constant 0 : i32
    %c0_i32_1 = arith.constant 0 : i32
    return %arg1, %c0_i32, %c0_i32_0 : i32, i32, i32
  }
  func.func @transform_9(%arg0: i32, %arg1: i32) -> (i32, i32, i32) {
    %c0_i32 = arith.constant 0 : i32
    %c0_i32_0 = arith.constant 0 : i32
    %c0_i32_1 = arith.constant 0 : i32
    return %arg1, %c0_i32, %c0_i32_0 : i32, i32, i32
  }
  func.func @transform_10(%arg0: i32, %arg1: i32) -> (i32, i32, i32) {
    %c0_i32 = arith.constant 0 : i32
    %c0_i32_0 = arith.constant 0 : i32
    %c0_i32_1 = arith.constant 0 : i32
    return %arg1, %c0_i32, %c0_i32_0 : i32, i32, i32
  }
  func.func @transform_11(%arg0: i32, %arg1: i32) -> (i32, i32, i32) {
    %c0_i32 = arith.constant 0 : i32
    %c0_i32_0 = arith.constant 0 : i32
    %c0_i32_1 = arith.constant 0 : i32
    return %arg1, %c0_i32, %c0_i32_0 : i32, i32, i32
  }
  func.func @transform_12(%arg0: i32, %arg1: i32) -> (i32, i32, i32) {
    %c0_i32 = arith.constant 0 : i32
    %c0_i32_0 = arith.constant 0 : i32
    %c0_i32_1 = arith.constant 0 : i32
    return %arg1, %c0_i32, %c0_i32_0 : i32, i32, i32
  }
  func.func @transform_13(%arg0: i32, %arg1: i32) -> (i32, i32, i32) {
    %c0_i32 = arith.constant 0 : i32
    %c0_i32_0 = arith.constant 0 : i32
    %c0_i32_1 = arith.constant 0 : i32
    return %arg1, %c0_i32, %c0_i32_0 : i32, i32, i32
  }
  func.func @transform_14(%arg0: i32, %arg1: i32) -> (i32, i32, i32) {
    %c0_i32 = arith.constant 0 : i32
    %c0_i32_0 = arith.constant 0 : i32
    %c0_i32_1 = arith.constant 0 : i32
    return %arg1, %c0_i32, %c0_i32_0 : i32, i32, i32
  }
  func.func @transform_15(%arg0: i32, %arg1: i32) -> (i32, i32, i32) {
    %c0_i32 = arith.constant 0 : i32
    %c0_i32_0 = arith.constant 0 : i32
    %c0_i32_1 = arith.constant 0 : i32
    return %arg1, %c0_i32, %c0_i32_0 : i32, i32, i32
  }
  func.func @transform_16(%arg0: i32, %arg1: i32) -> (i32, i32) {
    %c0_i32 = arith.constant 0 : i32
    %c0_i32_0 = arith.constant 0 : i32
    return %arg0, %c0_i32 : i32, i32
  }
}

</mosaic_0001>

<bundles_post_ra>
// kernel: forward.1
= control target key start
LH: loop header
LB: loop body
LE: loop exit
PB: predicated region body
PF: predicated region fallthrough
CT: control target
= control target key end

     0   :  { %s15714_s0 = inlined_call_operand.vmem [shape: f32[256,128], index: 0, kind: input, shape index: {}]   ;;  %s15715_s1 = inlined_call_operand.vmem [shape: f32[64,128], index: 1, kind: input, shape index: {}]   ;;  %s15716_s2 = inlined_call_operand.vmem [shape: bf16[128,128], index: 2, kind: input, shape index: {}]   ;;  %s15717_s3 = inlined_call_operand.vmem [shape: f32[1,128], index: 3, kind: input, shape index: {}]   ;;  %s15718_s4 = inlined_call_operand.vmem [shape: bf16[4,128,384], index: 4, kind: input, shape index: {}]   ;;  %s15719_s5 = inlined_call_operand.vmem [shape: f32[4,1,384], index: 5, kind: input, shape index: {}]   ;;  %s15720_s6 = inlined_call_operand.vmem [shape: bf16[4,128,128], index: 6, kind: input, shape index: {}]   ;;  %s15721_s7 = inlined_call_operand.vmem [shape: f32[4,1,128], index: 7, kind: input, shape index: {}]   ;;  %s15722_s8 = inlined_call_operand.vmem [shape: f32[4,1,128], index: 8, kind: input, shape index: {}]   ;;  %s15723_s9 = inlined_call_operand.vmem [shape: f32[4,1,128], index: 9, kind: input, shape index: {}]   ;;  %s15724_s10 = inlined_call_operand.vmem [shape: f32[4,1,128], index: 10, kind: input, shape index: {}]   ;;  %s15725_s11 = inlined_call_operand.vmem [shape: f32[4,1,128], index: 11, kind: input, shape index: {}]   ;;  %s15726_s12 = inlined_call_operand.vmem [shape: bf16[4,128,1024], index: 12, kind: input, shape index: {}]   ;;  %s15727_s13 = inlined_call_operand.vmem [shape: f32[4,1,1024], index: 13, kind: input, shape index: {}]   ;;  %s15728_s14 = inlined_call_operand.vmem [shape: bf16[4,1024,128], index: 14, kind: input, shape index: {}]   ;;  %s15729_s15 = inlined_call_operand.vmem [shape: f32[4,1,128], index: 15, kind: input, shape index: {}]   ;;  %s15730_s16 = inlined_call_operand.hbm [shape: f32[256,128], index: 16, kind: output, shape index: {}]  }
   0x1   :  { %15794 = sst [smem:[#allocation52_spill]] %s15714_s0 }
   0x2   :  { %15795 = sst [smem:[#allocation53_spill]] %s15715_s1 }
   0x3   :  { %15796 = sst [smem:[#allocation54_spill]] %s15716_s2 }
   0x4   :  { %15797 = sst [smem:[#allocation55_spill]] %s15717_s3 }
   0x5   :  { %15798 = sst [smem:[#allocation56_spill]] %s15718_s4 }
   0x6   :  { %15799 = sst [smem:[#allocation57_spill]] %s15719_s5 }
   0x7   :  { %15800 = sst [smem:[#allocation58_spill]] %s15720_s6 }
   0x8   :  { %15801 = sst [smem:[#allocation59_spill]] %s15730_s16 }
   0x9   :  { %21 = vsyncpa [#allocation5], 0 }
   0xa   :  { %23 = vsyncpa [#allocation5 + $0x1], 0  ;;  %s9839_s21 = smov 0   ;;  %s9841_s22 = smov 0  }
   0xb   :  { %s9843_s23 = smov 0   ;;  %s9845_s24 = smov 0  }
   0xc   :  { %s9847_s25 = smov 0   ;;  %s9849_s26 = smov 0  }
   0xd   :  { %s9851_s27 = smov 0   ;;  %s9853_s28 = smov 0  }
   0xe LB: > { %15802 = sst [smem:[#allocation7_spill]] %s9714_s21  ;;  %s8112_s29 = sadd.s32 4294967295, %s9742_s28   ;;  %s9742_s28 = sphi %s9853_s28, %s29_s28   ;;  %s9738_s27 = sphi %s9851_s27, %s16205_s27   ;;  %s9734_s26 = sphi %s9849_s26, %s16204_s26   ;;  %s9730_s25 = sphi %s9847_s25, %s16203_s25   ;;  %s9726_s24 = sphi %s9845_s24, %s16202_s24   ;;  %s9722_s23 = sphi %s9843_s23, %s16201_s23   ;;  %s9718_s22 = sphi %s9841_s22, %s16200_s22   ;;  %s9714_s21 = sphi %s9839_s21, %s16199_s21  }
   0xf   : > { %15803 = sst [smem:[#allocation8_spill]] %s9718_s22  ;;  %s8113_s30 = sadd.s32 4294967294, %s9742_s28  }
  0x10   : > { %15804 = sst [smem:[#allocation9_spill]] %s9722_s23  ;;  %s38_s0 = sadd.s32 1, %s9734_s26 }
  0x11   : > { %15805 = sst [smem:[#allocation10_spill]] %s9726_s24  ;;  %p39_p0 = scmp.ge.s32.totalorder %s38_s0, 4 }
  0x12   : > { %15806 = sst [smem:[#allocation11_spill]] %s9730_s25  ;;  %s41_s17 = sadd.s32 1, %s9738_s27 }
  0x13   : > { %15807 = sst [smem:[#allocation12_spill]] %s9734_s26  ;;  %p459_p1 = scmp.ne.s32.totalorder %s9722_s23, %s9718_s22 }
  0x14   : > { %15808 = sst [smem:[#allocation13_spill]] %s9738_s27  ;;  %p460_p2 = scmp.eq.s32.totalorder %s8112_s29, 15 }
  0x15   : > { %15809 = sst [smem:[#allocation14_spill]] %s9742_s28  ;;  %s16207_s0 = smov (%p39_p0, %s38_s0), 0 }
  0x16   : > { %15810 = sst [smem:[#allocation15_spill]] %s16207_s0  ;;  %s16209_s17 = smov (!%p39_p0, %s41_s17), %s9738_s27 }
  0x17   : > { %p9888_p3 = por %p460_p2, %p459_p1  ;;  %p465_p4 = scmp.ne.s32.totalorder %s9718_s22, %s9714_s21 }
  0x18   : > { %p43_p5 = scmp.ge.s32.totalorder %s16209_s17, 4  ;;  %p466_p6 = scmp.eq.s32.totalorder %s8113_s30, 15 }
  0x19   : > { %s15811_s18 = scalar_select %p9888_p3, 1, 0 }
  0x1a   : > { %p8116_p7 = scmp.ge.s32.totalorder %s9742_s28, 1  ;;  %p584_p8 = scmp.lt.s32.totalorder %s9742_s28, 17 }
  0x1b   : > { %15812 = sst [smem:[#allocation16_spill]] %s15811_s18  ;;  %s16211_s17 = smov (%p43_p5, %s16209_s17), 0 }
  0x1c   : > { %15813 = sst [smem:[#allocation17_spill]] %s16211_s17  ;;  %p9898_p9 = por %p466_p6, %p465_p4 }
  0x1d   : > { %p585_p10 = pnand %p8116_p7, %p584_p8  ;;  %s446_s20 = ssub.s32 %s9738_s27, %s16211_s17 }
  0x1e   : > { %s15814_s19 = scalar_select %p9898_p9, 1, 0 }
  0x1f   : > { %s449_s29 = sadd.s32 1, %s9722_s23  ;;  %p447_p11 = scmp.eq.s32.totalorder %s446_s20, 0 }
  0x20   : > { %15815 = sst [smem:[#allocation18_spill]] %s15814_s19  ;;  %588 = sbr.rel (%p585_p10) target bundleno = 3313 (0xcf1), region = 84 }
  0x21   : > { %s9906_s0 = scalar_select %p447_p11, %s9722_s23, %s449_s29  }
  0x23   : > { %15816 = sst [smem:[#allocation19_spill]] %s9906_s0 }
  0x25   : > { %s15736_s30 = sand.u32 1, %s9718_s22   ;;  %s8118_s26 = sshll.u32 %s9730_s25, 3 }
  0x26   : > { %s8117_s21 = sshll.u32 %s15736_s30, 6  ;;  %p681_p12 = scmp.lt.s32.totalorder %s8118_s26, 31 }
  0x27   : > { %p686_p13 = scmp.lt.s32.totalorder %s9726_s24, 3  ;;  %s15817_s27 = sld [smem:[#allocation52_spill]] }
  0x28   : > { %s16213_s26 = smov (!%p681_p12, %s8118_s26), 31  ;;  %s15819_s4 = sld [smem:[#allocation56_spill]] }
  0x29   : > { %s9914_s19 = scalar_select %p686_p13, %s9726_s24, 3 }
  0x2a   : > { %s8119_s20 = sshll.u32 %s16213_s26, 3  ;;  %s15820_s6 = sld [smem:[#allocation58_spill]] }
  0x2b   : > { %s9131_s0 = smul.u32 192, %s9914_s19  ;;  %s8935_s28 = sshll.u32 %s9914_s19, 6 }
  0x2c   : > { %s9132_s23 = smul.u32 3, %s9914_s19  ;;  %s15821_s5 = sld [smem:[#allocation57_spill]] }
  0x2d   : > { %s9919_s30 = scalar_lea.vmem %s15817_s27, %s8119_s20  ;;  %s8936_s26 = sshll.u32 %s9914_s19, 9 }
  0x2e   : > { %15818 = sst [smem:[#allocation20_spill]] %s9919_s30  ;;  %s9927_s22 = scalar_lea.vmem %s15819_s4, %s9131_s0 }
  0x2f   : > { %s9964_s29 = scalar_lea.vmem %s15726_s12, %s8936_s26  ;;  %s9974_s1 = scalar_lea.vmem %s15728_s14, %s8936_s26 }
  0x30   : > { %s9932_s3 = scalar_lea.vmem %s15820_s6, %s8935_s28  ;;  %s731_s2 = scalar_lea.vmem %s15729_s15, %s9914_s19 }
  0x31   : > { %s15822_s28 = sld [smem:[#allocation10_spill]] }
  0x32   : > { %s9937_s17 = scalar_lea.vmem %s15821_s5, %s9132_s23  ;;  %s8125_s5 = sshll.u32 %s9914_s19, 3 }
  0x33   : > { %s9969_s0 = scalar_lea.vmem %s15727_s13, %s8125_s5  ;;  %s9980_s23 = scalar_lea.vmem [#allocation4], %s8117_s21 }
  0x37   : > { %p8128_p0 = scmp.ne.s32.totalorder %s15822_s28, 0 }
  0x38   : > { %s15823_s16 = sld [smem:[#allocation54_spill]] (!%p8128_p0) }
  0x39   : > { %737 = sbr.rel (%p8128_p0) target bundleno = 241 (0xf1), region = 88  ;;  %s15824_s30 = sld [smem:[#allocation20_spill]] (!%p8128_p0) }
  0x3a   : > { %s15825_s26 = sld [smem:[#allocation55_spill]] (!%p8128_p0) }
  0x3e   : > { %v8945_v0 = vld [vmem:[%s15823_s16 + $0x38] sm:$0xff]  ;;  %v8944_v1 = vld [vmem:[%s15823_s16 + $0x30] sm:$0xff]  ;;  %v8943_v2 = vld [vmem:[%s15823_s16 + $0x28] sm:$0xff] }
  0x3f   : > { %818 = vmatpush.bf16.msra.mxu0 %v8945_v0  ;;  %9107 = vmatpush.bf16.msra.mxu1 %v8945_v0  ;;  %v8942_v3 = vld [vmem:[%s15823_s16 + $0x20] sm:$0xff]  ;;  %v8941_v4 = vld [vmem:[%s15823_s16 + $0x18] sm:$0xff]  ;;  %v8940_v5 = vld [vmem:[%s15823_s16 + $0x10] sm:$0xff] }
  0x40   : > { %9108 = vmatpush.bf16.msra.mxu2 %v8945_v0  ;;  %9109 = vmatpush.bf16.msra.mxu3 %v8945_v0  ;;  %v8939_v6 = vld [vmem:[%s15823_s16 + $0x8] sm:$0xff]  ;;  %v8938_v7 = vld [vmem:[%s15823_s16] sm:$0xff]  ;;  %v740_v10 = vld [vmem:[%s15824_s30 + $0x10] sm:$0xff] }
  0x41   : > { %v738_v8 = vld [vmem:[%s15824_s30] sm:$0xff]  ;;  %v739_v9 = vld [vmem:[%s15824_s30 + $0x8] sm:$0xff]  ;;  %v741_v11 = vld [vmem:[%s15824_s30 + $0x18] sm:$0xff] }
  0x42   : > { %v742_v12 = vld [vmem:[%s15824_s30 + $0x20] sm:$0xff]  ;;  %v743_v13 = vld [vmem:[%s15824_s30 + $0x28] sm:$0xff]  ;;  %v744_v14 = vld [vmem:[%s15824_s30 + $0x30] sm:$0xff]  ;;  %v746_v16 = vpack.c.bf16 %v739_v9, %v738_v8  ;;  %v747_v17 = vpack.c.bf16 %v741_v11, %v740_v10 }
  0x43   : > { %819 = vmatpush.bf16.msra.mxu0 %v8944_v1  ;;  %9110 = vmatpush.bf16.msra.mxu1 %v8944_v1  ;;  %v745_v15 = vld [vmem:[%s15824_s30 + $0x38] sm:$0xff]  ;;  %v748_v18 = vpack.c.bf16 %v743_v13, %v742_v12  ;;  %v9214_v20 = vld [vmem:[%s15825_s26] ss:$0 sm:$0xff]  ;;  %s15826_s30 = sld [smem:[#allocation53_spill]] }
  0x44   : > { %9111 = vmatpush.bf16.msra.mxu2 %v8944_v1  ;;  %9112 = vmatpush.bf16.msra.mxu3 %v8944_v1  ;;  %v749_v19 = vpack.c.bf16 %v745_v15, %v744_v14 }
  0x47   : > { %820 = vmatpush.bf16.msra.mxu0 %v8943_v2  ;;  %9113 = vmatpush.bf16.msra.mxu1 %v8943_v2 }
  0x48   : > { %9114 = vmatpush.bf16.msra.mxu2 %v8943_v2  ;;  %9115 = vmatpush.bf16.msra.mxu3 %v8943_v2 }
  0x49   : > { %v847_v22 = vld [vmem:[%s15826_s30] sm:$0xff]  ;;  %v849_v24 = vld [vmem:[%s15826_s30 + $0x10] sm:$0xff]  ;;  %v848_v36 = vld [vmem:[%s15826_s30 + $0x8] sm:$0xff] }
  0x4a   : > { %v851_v30 = vld [vmem:[%s15826_s30 + $0x20] sm:$0xff]  ;;  %v853_v32 = vld [vmem:[%s15826_s30 + $0x30] sm:$0xff]  ;;  %v850_v38 = vld [vmem:[%s15826_s30 + $0x18] sm:$0xff] }
  0x4b   : > { %821 = vmatpush.bf16.msra.mxu0 %v8942_v3  ;;  %9116 = vmatpush.bf16.msra.mxu1 %v8942_v3  ;;  %v852_v46 = vld [vmem:[%s15826_s30 + $0x28] sm:$0xff]  ;;  %v854_v48 = vld [vmem:[%s15826_s30 + $0x38] sm:$0xff] }
  0x4c   : > { %9117 = vmatpush.bf16.msra.mxu2 %v8942_v3  ;;  %9118 = vmatpush.bf16.msra.mxu3 %v8942_v3 }
  0x4f   : > { %822 = vmatpush.bf16.msra.mxu0 %v8941_v4  ;;  %9119 = vmatpush.bf16.msra.mxu1 %v8941_v4 }
  0x50   : > { %9120 = vmatpush.bf16.msra.mxu2 %v8941_v4  ;;  %9121 = vmatpush.bf16.msra.mxu3 %v8941_v4 }
  0x53   : > { %823 = vmatpush.bf16.msra.mxu0 %v8940_v5  ;;  %9122 = vmatpush.bf16.msra.mxu1 %v8940_v5 }
  0x54   : > { %9123 = vmatpush.bf16.msra.mxu2 %v8940_v5  ;;  %9124 = vmatpush.bf16.msra.mxu3 %v8940_v5 }
  0x57   : > { %824 = vmatpush.bf16.msra.mxu0 %v8939_v6  ;;  %9125 = vmatpush.bf16.msra.mxu1 %v8939_v6 }
  0x58   : > { %9126 = vmatpush.bf16.msra.mxu2 %v8939_v6  ;;  %9127 = vmatpush.bf16.msra.mxu3 %v8939_v6 }
  0x5b   : > { %825 = vmatpush.bf16.msra.mxu0 %v8938_v7  ;;  %9128 = vmatpush.bf16.msra.mxu1 %v8938_v7 }
  0x5c   : > { %9129 = vmatpush.bf16.msra.mxu2 %v8938_v7  ;;  %9130 = vmatpush.bf16.msra.mxu3 %v8938_v7 }
  0x5e   : > { %826 = vmatmul.bf16.vlgmr.msra.gmra.mxu0 %v746_v16  ;;  %831 = vmatmul.bf16.vlgmr.msra.gmra.mxu1 %v747_v17 }
  0x5f   : > { %836 = vmatmul.bf16.vlgmr.msra.gmra.mxu2 %v748_v18  ;;  %841 = vmatmul.bf16.vlgmr.msra.gmra.mxu3 %v749_v19 }
  0xdb   : > { %v827_v21 = vpop.f32.mrf.mxu0  ;;  %v832_v23 = vpop.f32.mrf.mxu1 }
  0xdc   : > { %v828_v25 = vadd.f32 %v9214_v20, %v827_v21  ;;  %v833_v26 = vadd.f32 %v9214_v20, %v832_v23 }
  0xde   : > { %v855_v27 = vadd.f32 %v847_v22, %v828_v25  ;;  %v857_v28 = vadd.f32 %v849_v24, %v833_v26 }
  0xe0   : > { %863 = vst [vmem:[#allocation2 + $0x30] sm:$0xff] %v855_v27 }
  0xe1   : > { %865 = vst [vmem:[#allocation2 + $0x18] sm:$0xff] %v857_v28 }
  0xe2   : > { %v837_v29 = vpop.f32.mrf.mxu2  ;;  %v842_v31 = vpop.f32.mrf.mxu3 }
  0xe3   : > { %v838_v33 = vadd.f32 %v9214_v20, %v837_v29  ;;  %v843_v34 = vadd.f32 %v9214_v20, %v842_v31  ;;  %v829_v35 = vpop.f32.mrf.mxu0  ;;  %v834_v37 = vpop.f32.mrf.mxu1 }
  0xe4   : > { %v830_v39 = vadd.f32 %v9214_v20, %v829_v35  ;;  %v835_v40 = vadd.f32 %v9214_v20, %v834_v37 }
  0xe5   : > { %v859_v41 = vadd.f32 %v851_v30, %v838_v33  ;;  %v861_v42 = vadd.f32 %v853_v32, %v843_v34 }
  0xe6   : > { %v856_v43 = vadd.f32 %v848_v36, %v830_v39  ;;  %v858_v44 = vadd.f32 %v850_v38, %v835_v40 }
  0xe7   : > { %867 = vst [vmem:[#allocation2 + $0x8] sm:$0xff] %v859_v41 }
  0xe8   : > { %869 = vst [vmem:[#allocation2 + $0x28] sm:$0xff] %v861_v42 }
  0xe9   : > { %864 = vst [vmem:[#allocation2] sm:$0xff] %v856_v43 }
  0xea   : > { %866 = vst [vmem:[#allocation2 + $0x10] sm:$0xff] %v858_v44  ;;  %v839_v45 = vpop.f32.mrf.mxu2  ;;  %v844_v47 = vpop.f32.mrf.mxu3 }
  0xeb   : > { %v840_v49 = vadd.f32 %v9214_v20, %v839_v45  ;;  %v845_v50 = vadd.f32 %v9214_v20, %v844_v47 }
  0xed   : > { %v860_v51 = vadd.f32 %v852_v46, %v840_v49  ;;  %v862_v52 = vadd.f32 %v854_v48, %v845_v50 }
  0xef   : > { %868 = vst [vmem:[#allocation2 + $0x20] sm:$0xff] %v860_v51 }
  0xf0   : > { %870 = vst [vmem:[#allocation2 + $0x38] sm:$0xff] %v862_v52 }
  0xf1 PF: > { %v8247_v53 = vld [vmem:[%s9927_s22 + $0xa8] sm:$0xf]  ;;  %v8968_v54 = vld [vmem:[%s9927_s22 + $0xb0] sm:$0xf0]  ;;  %v8967_v55 = vld [vmem:[%s9927_s22 + $0xac] sm:$0xf]  ;;  %s15879_s18 = scalar_lea.vmem %s15721_s7, %s9914_s19  ;;  %s15881_s27 = scalar_lea.vmem %s15722_s8, %s9914_s19 }
  0xf2   : > { %v8248_v56 = vor.u32 %v8968_v54, %v8247_v53  ;;  %v8249_v57 = vld [vmem:[%s9927_s22 + $0xb4] sm:$0xf0]  ;;  %v8255_v58 = vld [vmem:[%s9927_s22 + $0xb0] sm:$0xf]  ;;  %v8969_v59 = vld [vmem:[%s9927_s22 + $0xb8] sm:$0xf0] }
  0xf3   : > { %v8252_v60 = vor.u32 %v8967_v55, %v8249_v57  ;;  %v8256_v61 = vor.u32 %v8969_v59, %v8255_v58  ;;  %v8235_v62 = vld [vmem:[%s9927_s22 + $0x90] sm:$0xf]  ;;  %v8965_v63 = vld [vmem:[%s9927_s22 + $0x98] sm:$0xf0]  ;;  %v8964_v0 = vld [vmem:[%s9927_s22 + $0x94] sm:$0xf] }
  0xf4   : > { %1051 = vmatpush.bf16.msra.mxu0 %v8248_v56  ;;  %v8236_v1 = vor.u32 %v8965_v63, %v8235_v62  ;;  %v8237_v2 = vld [vmem:[%s9927_s22 + $0x9c] sm:$0xf0]  ;;  %v8243_v3 = vld [vmem:[%s9927_s22 + $0x98] sm:$0xf]  ;;  %v8966_v4 = vld [vmem:[%s9927_s22 + $0xa0] sm:$0xf0] }
  0xf5   : > { %1080 = vmatpush.bf16.msra.mxu1 %v8252_v60  ;;  %1109 = vmatpush.bf16.msra.mxu2 %v8256_v61  ;;  %v8240_v5 = vor.u32 %v8964_v0, %v8237_v2  ;;  %v8244_v6 = vor.u32 %v8966_v4, %v8243_v3  ;;  %v8223_v7 = vld [vmem:[%s9927_s22 + $0x78] sm:$0xf]  ;;  %v8962_v8 = vld [vmem:[%s9927_s22 + $0x80] sm:$0xf0]  ;;  %v8961_v9 = vld [vmem:[%s9927_s22 + $0x7c] sm:$0xf] }
  0xf6   : > { %v8225_v10 = vld [vmem:[%s9927_s22 + $0x84] sm:$0xf0]  ;;  %v8231_v11 = vld [vmem:[%s9927_s22 + $0x80] sm:$0xf]  ;;  %v8963_v12 = vld [vmem:[%s9927_s22 + $0x88] sm:$0xf0]  ;;  %v8224_v13 = vor.u32 %v8962_v8, %v8223_v7 }
  0xf7   : > { %v8228_v14 = vor.u32 %v8961_v9, %v8225_v10  ;;  %v8232_v15 = vor.u32 %v8963_v12, %v8231_v11  ;;  %v8211_v16 = vld [vmem:[%s9927_s22 + $0x60] sm:$0xf]  ;;  %v8959_v17 = vld [vmem:[%s9927_s22 + $0x68] sm:$0xf0]  ;;  %v8958_v18 = vld [vmem:[%s9927_s22 + $0x64] sm:$0xf] }
  0xf8   : > { %1052 = vmatpush.bf16.msra.mxu0 %v8236_v1  ;;  %v8213_v19 = vld [vmem:[%s9927_s22 + $0x6c] sm:$0xf0]  ;;  %v8219_v20 = vld [vmem:[%s9927_s22 + $0x68] sm:$0xf]  ;;  %v8960_v21 = vld [vmem:[%s9927_s22 + $0x70] sm:$0xf0]  ;;  %v8212_v22 = vor.u32 %v8959_v17, %v8211_v16 }
  0xf9   : > { %1081 = vmatpush.bf16.msra.mxu1 %v8240_v5  ;;  %1110 = vmatpush.bf16.msra.mxu2 %v8244_v6  ;;  %v8216_v23 = vor.u32 %v8958_v18, %v8213_v19  ;;  %v8220_v24 = vor.u32 %v8960_v21, %v8219_v20  ;;  %v8199_v25 = vld [vmem:[%s9927_s22 + $0x48] sm:$0xf]  ;;  %v8956_v26 = vld [vmem:[%s9927_s22 + $0x50] sm:$0xf0]  ;;  %v8955_v27 = vld [vmem:[%s9927_s22 + $0x4c] sm:$0xf] }
  0xfa   : > { %v8201_v28 = vld [vmem:[%s9927_s22 + $0x54] sm:$0xf0]  ;;  %v8207_v29 = vld [vmem:[%s9927_s22 + $0x50] sm:$0xf]  ;;  %v8957_v30 = vld [vmem:[%s9927_s22 + $0x58] sm:$0xf0]  ;;  %v8200_v31 = vor.u32 %v8956_v26, %v8199_v25 }
  0xfb   : > { %v8187_v32 = vld [vmem:[%s9927_s22 + $0x30] sm:$0xf]  ;;  %v8953_v33 = vld [vmem:[%s9927_s22 + $0x38] sm:$0xf0]  ;;  %v8204_v34 = vor.u32 %v8955_v27, %v8201_v28  ;;  %v8208_v35 = vor.u32 %v8957_v30, %v8207_v29  ;;  %v8952_v36 = vld [vmem:[%s9927_s22 + $0x34] sm:$0xf] }
  0xfc   : > { %1053 = vmatpush.bf16.msra.mxu0 %v8224_v13  ;;  %v8189_v37 = vld [vmem:[%s9927_s22 + $0x3c] sm:$0xf0]  ;;  %v8195_v38 = vld [vmem:[%s9927_s22 + $0x38] sm:$0xf]  ;;  %v8954_v39 = vld [vmem:[%s9927_s22 + $0x40] sm:$0xf0]  ;;  %v8188_v40 = vor.u32 %v8953_v33, %v8187_v32 }
  0xfd   : > { %1082 = vmatpush.bf16.msra.mxu1 %v8228_v14  ;;  %1111 = vmatpush.bf16.msra.mxu2 %v8232_v15  ;;  %v8192_v41 = vor.u32 %v8952_v36, %v8189_v37  ;;  %v8196_v42 = vor.u32 %v8954_v39, %v8195_v38  ;;  %v8175_v43 = vld [vmem:[%s9927_s22 + $0x18] sm:$0xf]  ;;  %v8950_v44 = vld [vmem:[%s9927_s22 + $0x20] sm:$0xf0]  ;;  %v8949_v45 = vld [vmem:[%s9927_s22 + $0x1c] sm:$0xf] }
  0xfe   : > { %v8177_v46 = vld [vmem:[%s9927_s22 + $0x24] sm:$0xf0]  ;;  %v8183_v47 = vld [vmem:[%s9927_s22 + $0x20] sm:$0xf]  ;;  %v8951_v48 = vld [vmem:[%s9927_s22 + $0x28] sm:$0xf0]  ;;  %v8176_v49 = vor.u32 %v8950_v44, %v8175_v43 }
  0xff   : > { %v8180_v50 = vor.u32 %v8949_v45, %v8177_v46  ;;  %v8184_v51 = vor.u32 %v8951_v48, %v8183_v47  ;;  %v8163_v52 = vld [vmem:[%s9927_s22] sm:$0xf]  ;;  %v8947_v53 = vld [vmem:[%s9927_s22 + $0x8] sm:$0xf0]  ;;  %v8946_v54 = vld [vmem:[%s9927_s22 + $0x4] sm:$0xf] }
 0x100   : > { %1054 = vmatpush.bf16.msra.mxu0 %v8212_v22  ;;  %v8165_v55 = vld [vmem:[%s9927_s22 + $0xc] sm:$0xf0]  ;;  %v8171_v56 = vld [vmem:[%s9927_s22 + $0x8] sm:$0xf]  ;;  %v8948_v57 = vld [vmem:[%s9927_s22 + $0x10] sm:$0xf0]  ;;  %v8164_v58 = vor.u32 %v8947_v53, %v8163_v52 }
 0x101   : > { %1083 = vmatpush.bf16.msra.mxu1 %v8216_v23  ;;  %1112 = vmatpush.bf16.msra.mxu2 %v8220_v24  ;;  %v871_v59 = vld [vmem:[#allocation2 + $0x30] sm:$0xff]  ;;  %v872_v60 = vld [vmem:[#allocation2] sm:$0xff]  ;;  %v8168_v61 = vor.u32 %v8946_v54, %v8165_v55  ;;  %v8172_v62 = vor.u32 %v8948_v57, %v8171_v56  ;;  %v873_v0 = vld [vmem:[#allocation2 + $0x18] sm:$0xff]  ;;  %s9744_s22 = smov 112   ;;  %s9746_s5 = smov 96   ;;  %vm1150_vm0 = vcmask 130048  }
 0x102   : > { %v879_v63 = vpack.c.bf16 %v872_v60, %v871_v59  ;;  %v874_v1 = vld [vmem:[#allocation2 + $0x10] sm:$0xff]  ;;  %v875_v3 = vld [vmem:[#allocation2 + $0x8] sm:$0xff]  ;;  %v876_v4 = vld [vmem:[#allocation2 + $0x20] sm:$0xff]  ;;  %s9747_s24 = smov 64   ;;  %s9748_s4 = smov 48   ;;  %vm1204_vm1 = vcmask 523264  }
 0x103   : > { %v880_v2 = vpack.c.bf16 %v874_v1, %v873_v0  ;;  %v881_v5 = vpack.c.bf16 %v876_v4, %v875_v3  ;;  %v877_v6 = vld [vmem:[#allocation2 + $0x28] sm:$0xff]  ;;  %v878_v7 = vld [vmem:[#allocation2 + $0x38] sm:$0xff]  ;;  %v915_v11 = vld [vmem:[%s9937_s17] sm:$0x7]  ;;  %s9745_s17 = smov 80   ;;  %s9749_s21 = smov 16  }
 0x104   : > { %1055 = vmatpush.bf16.msra.mxu0 %v8200_v31  ;;  %v882_v8 = vpack.c.bf16 %v878_v7, %v877_v6  ;;  %v10091_v12 = vperm.slane %v915_v11, 0  ;;  %v918_v13 = vperm.slane %v915_v11, 1  ;;  %v919_v28 = vperm.slane %v915_v11, 2  ;;  %s9750_s28 = smov 32  }
 0x105   : > { %1084 = vmatpush.bf16.msra.mxu1 %v8204_v34  ;;  %1113 = vmatpush.bf16.msra.mxu2 %v8208_v35  ;;  %vm1604_vm2 = vcmask 261248   ;;  %vm1859_vm3 = vcmask 392448   ;;  %vm2114_vm4 = vcmask 523648   ;;  %vm2369_vm5 = vcmask 654848  }
 0x106   : > { %vm2624_vm6 = vcmask 786048   ;;  %vm2879_vm7 = vcmask 917248   ;;  %vm3134_vm8 = vcmask 1048448  }
 0x108   : > { %1056 = vmatpush.bf16.msra.mxu0 %v8188_v40 }
 0x109   : > { %1085 = vmatpush.bf16.msra.mxu1 %v8192_v41  ;;  %1114 = vmatpush.bf16.msra.mxu2 %v8196_v42 }
 0x10c   : > { %1057 = vmatpush.bf16.msra.mxu0 %v8176_v49 }
 0x10d   : > { %1086 = vmatpush.bf16.msra.mxu1 %v8180_v50  ;;  %1115 = vmatpush.bf16.msra.mxu2 %v8184_v51 }
 0x110   : > { %1058 = vmatpush.bf16.msra.mxu0 %v8164_v58 }
 0x111   : > { %1087 = vmatpush.bf16.msra.mxu1 %v8168_v61  ;;  %1116 = vmatpush.bf16.msra.mxu2 %v8172_v62 }
 0x113   : > { %1059 = vmatmul.bf16.vlgmr.msra.gmra.mxu0 %v879_v63 }
 0x114   : > { %1088 = vmatmul.bf16.vlgmr.msra.gmra.mxu1 %v879_v63  ;;  %1117 = vmatmul.bf16.vlgmr.msra.gmra.mxu2 %v879_v63 }
 0x123   : > { %1064 = vmatmul.bf16.gmra.mxu0 %v880_v2 }
 0x124   : > { %1093 = vmatmul.bf16.gmra.mxu1 %v880_v2  ;;  %1122 = vmatmul.bf16.gmra.mxu2 %v880_v2 }
 0x133   : > { %1069 = vmatmul.bf16.gmra.mxu0 %v881_v5 }
 0x134   : > { %1098 = vmatmul.bf16.gmra.mxu1 %v881_v5  ;;  %1127 = vmatmul.bf16.gmra.mxu2 %v881_v5 }
 0x143   : > { %1074 = vmatmul.bf16.gmra.mxu0 %v882_v8 }
 0x144   : > { %1103 = vmatmul.bf16.gmra.mxu1 %v882_v8  ;;  %1132 = vmatmul.bf16.gmra.mxu2 %v882_v8 }
 0x190   : > { %v1060_v9 = vpop.f32.mrf.mxu0 }
 0x191   : > { %v1089_v10 = vpop.f32.mrf.mxu1  ;;  %v1061_v14 = vadd.f32 %v1060_v9, %v10091_v12 }
 0x192   : > { %v1090_v19 = vadd.f32 %v1089_v10, %v918_v13 }
 0x197   : > { %v1118_v15 = vpop.f32.mrf.mxu2 }
 0x198   : > { %v1062_v16 = vpop.f32.mrf.mxu0  ;;  %v1119_v30 = vadd.f32 %v1118_v15, %v919_v28 }
 0x199   : > { %v1063_v17 = vadd.f32 %v1062_v16, %v10091_v12  ;;  %v1091_v18 = vpop.f32.mrf.mxu1 }
 0x19a   : > { %v1092_v20 = vadd.f32 %v1091_v18, %v918_v13 }
 0x19b   : > { %v10095_v21 = vpack.c.bf16 %v1063_v17, %v1061_v14 }
 0x19c   : > { %v10097_v22 = vpack.c.bf16 %v1092_v20, %v1090_v19 }
 0x19d   : > { %1350 = vrot.lane.b32.xlu2 %v10095_v21, %s9744_s22 }
 0x19e   : > { %1876 = vrot.lane.b32.xlu0 %v10097_v22, %s9745_s17  ;;  %1362 = vrot.lane.b32.xlu1 %v10097_v22, %s9744_s22  ;;  %v1164_v6 = vsel %vm1150_vm0, %v10097_v22, 0 }
 0x19f   : > { %v1120_v23 = vpop.f32.mrf.mxu2 }
 0x1a0   : > { %v1065_v27 = vpop.f32.mrf.mxu0  ;;  %v1121_v31 = vadd.f32 %v1120_v23, %v919_v28 }
 0x1a1   : > { %v1094_v24 = vpop.f32.mrf.mxu1  ;;  %v1066_v36 = vadd.f32 %v1065_v27, %v10091_v12 }
 0x1a2   : > { %v10117_v33 = vpack.c.bf16 %v1121_v31, %v1119_v30  ;;  %v1095_v41 = vadd.f32 %v1094_v24, %v918_v13 }
 0x1a4   : > { %15827 = vst [vmem:[#allocation21_spill] sm:$0xff] %v10117_v33 }
 0x1a5   : > { %1621 = vrot.lane.b32.xlu2 %v10097_v22, %s9746_s5 }
 0x1a6   : > { %2131 = vrot.lane.b32.xlu0 %v10097_v22, %s9747_s24  ;;  %1613 = vrot.lane.b32.xlu1 %v10095_v21, %s9746_s5 }
 0x1a7   : > { %v1123_v25 = vpop.f32.mrf.mxu2 }
 0x1a8   : > { %v1067_v34 = vpop.f32.mrf.mxu0  ;;  %v1124_v60 = vadd.f32 %v1123_v25, %v919_v28 }
 0x1a9   : > { %v1096_v26 = vpop.f32.mrf.mxu1  ;;  %v1068_v37 = vadd.f32 %v1067_v34, %v10091_v12 }
 0x1aa   : > { %v1097_v42 = vadd.f32 %v1096_v26, %v918_v13 }
 0x1ab   : > { %v10127_v39 = vpack.c.bf16 %v1068_v37, %v1066_v36 }
 0x1ac   : > { %v1143_v44 = vpack.c.bf16 %v1097_v42, %v1095_v41 }
 0x1ad   : > { %1868 = vrot.lane.b32.xlu2 %v10095_v21, %s9745_s17 }
 0x1ae   : > { %2378 = vrot.lane.b32.xlu0 %v10095_v21, %s9748_s4  ;;  %2386 = vrot.lane.b32.xlu1 %v10097_v22, %s9748_s4  ;;  %v1167_v2 = vsel %vm1150_vm0, %v1143_v44, 0 }
 0x1af   : > { %v1125_v29 = vpop.f32.mrf.mxu2 }
 0x1b0   : > { %v1126_v61 = vadd.f32 %v1125_v29, %v919_v28  ;;  %v1070_v1 = vpop.f32.mrf.mxu0 }
 0x1b1   : > { %v1099_v32 = vpop.f32.mrf.mxu1  ;;  %v1071_v4 = vadd.f32 %v1070_v1, %v10091_v12 }
 0x1b2   : > { %v1100_v49 = vadd.f32 %v1099_v32, %v918_v13  ;;  %v10156_v0 = vpack.c.bf16 %v1126_v61, %v1124_v60 }
 0x1b4   : > { %15830 = vst [vmem:[#allocation24_spill] sm:$0xff] %v10156_v0 }
 0x1b5   : > { %2123 = vrot.lane.b32.xlu2 %v10095_v21, %s9747_s24 }
 0x1b6   : > { %1503 = vrot.lane.b32.xlu0 %v10117_v33, %s9744_s22  ;;  %2896 = vrot.lane.b32.xlu1 %v10097_v22, %s9749_s21 }
 0x1b7   : > { %v1128_v35 = vpop.f32.mrf.mxu2 }
 0x1b8   : > { %v1129_v55 = vadd.f32 %v1128_v35, %v919_v28  ;;  %v1072_v3 = vpop.f32.mrf.mxu0 }
 0x1b9   : > { %v1101_v38 = vpop.f32.mrf.mxu1  ;;  %v1073_v5 = vadd.f32 %v1072_v3, %v10091_v12 }
 0x1ba   : > { %v1102_v50 = vadd.f32 %v1101_v38, %v918_v13 }
 0x1bb   : > { %v1140_v7 = vpack.c.bf16 %v1073_v5, %v1071_v4 }
 0x1bc   : > { %v1144_v56 = vpack.c.bf16 %v1102_v50, %v1100_v49 }
 0x1bd   : > { %2641 = vrot.lane.b32.xlu2 %v10097_v22, %s9750_s28 }
 0x1be   : > { %1615 = vrot.lane.b32.xlu0 %v10127_v39, %s9746_s5  ;;  %2633 = vrot.lane.b32.xlu1 %v10095_v21, %s9750_s28  ;;  %v1170_v63 = vsel %vm1150_vm0, %v1144_v56, 0 }
 0x1bf   : > { %v1130_v40 = vpop.f32.mrf.mxu2 }
 0x1c0   : > { %v1131_v57 = vadd.f32 %v1130_v40, %v919_v28  ;;  %v1075_v9 = vpop.f32.mrf.mxu0 }
 0x1c1   : > { %v1104_v43 = vpop.f32.mrf.mxu1  ;;  %v1076_v16 = vadd.f32 %v1075_v9, %v10091_v12 }
 0x1c2   : > { %v1105_v46 = vadd.f32 %v1104_v43, %v918_v13  ;;  %v10149_v62 = vpack.c.bf16 %v1131_v57, %v1129_v55 }
 0x1c4   : > { %15829 = vst [vmem:[#allocation23_spill] sm:$0xff] %v10149_v62 }
 0x1c5   : > { %1352 = vrot.lane.b32.xlu2 %v10127_v39, %s9744_s22 }
 0x1c6   : > { %2133 = vrot.lane.b32.xlu0 %v1143_v44, %s9747_s24  ;;  %2888 = vrot.lane.b32.xlu1 %v10095_v21, %s9749_s21 }
 0x1c7   : > { %v1133_v45 = vpop.f32.mrf.mxu2 }
 0x1c8   : > { %v1134_v52 = vadd.f32 %v1133_v45, %v919_v28  ;;  %v1077_v14 = vpop.f32.mrf.mxu0 }
 0x1c9   : > { %v1106_v47 = vpop.f32.mrf.mxu1  ;;  %v1078_v17 = vadd.f32 %v1077_v14, %v10091_v12 }
 0x1ca   : > { %v1107_v48 = vadd.f32 %v1106_v47, %v918_v13 }
 0x1cb   : > { %v1141_v20 = vpack.c.bf16 %v1078_v17, %v1076_v16 }
 0x1cc   : > { %v10140_v51 = vpack.c.bf16 %v1107_v48, %v1105_v46 }
 0x1cd   : > { %1623 = vrot.lane.b32.xlu2 %v1143_v44, %s9746_s5 }
 0x1ce   : > { %2643 = vrot.lane.b32.xlu0 %v1143_v44, %s9750_s28  ;;  %1364 = vrot.lane.b32.xlu1 %v1143_v44, %s9744_s22  ;;  %v1173_v53 = vsel %vm1150_vm0, %v10140_v51, 0 }
 0x1cf   : > { %v1135_v54 = vpop.f32.mrf.mxu2  ;;  %1179 = vmatpush.bf16.xpose.msra.mxu3 %v1173_v53 }
 0x1d0   : > { %v1136_v58 = vadd.f32 %v1135_v54, %v919_v28 }
 0x1d2   : > { %v10147_v59 = vpack.c.bf16 %v1136_v58, %v1134_v52 }
 0x1d4   : > { %15828 = vst [vmem:[#allocation22_spill] sm:$0xff] %v10147_v59  ;;  %1297 = vmatpush.bf16.msrb.mxu0 %v10147_v59 }
 0x1d5   : > { %2388 = vrot.lane.b32.xlu2 %v1143_v44, %s9748_s4 }
 0x1d6   : > { %2898 = vrot.lane.b32.xlu0 %v1143_v44, %s9749_s21  ;;  %1878 = vrot.lane.b32.xlu1 %v1143_v44, %s9745_s17 }
 0x1d7   : > { %1180 = vmatpush.bf16.xpose.msra.mxu3 %v1170_v63 }
 0x1d8   : > { %1298 = vmatpush.bf16.msrb.mxu0 %v10149_v62 }
 0x1dc   : > { %1299 = vmatpush.bf16.msrb.mxu0 %v10156_v0 }
 0x1dd   : > { %2380 = vrot.lane.b32.xlu2 %v10127_v39, %s9748_s4 }
 0x1de   : > { %2635 = vrot.lane.b32.xlu0 %v10127_v39, %s9750_s28  ;;  %1870 = vrot.lane.b32.xlu1 %v10127_v39, %s9745_s17 }
 0x1df   : > { %1181 = vmatpush.bf16.xpose.msra.mxu3 %v1167_v2 }
 0x1e0   : > { %1300 = vmatpush.bf16.msrb.mxu0 %v10117_v33 }
 0x1e5   : > { %2890 = vrot.lane.b32.xlu2 %v10127_v39, %s9749_s21 }
 0x1e6   : > { %1505 = vrot.lane.b32.xlu0 %v10156_v0, %s9744_s22  ;;  %2125 = vrot.lane.b32.xlu1 %v10127_v39, %s9747_s24 }
 0x1e7   : > { %1182 = vmatpush.bf16.xpose.msra.mxu3 %v1164_v6 }
 0x1ed   : > { %1617 = vrot.lane.b32.xlu2 %v1140_v7, %s9746_s5 }
 0x1ee   : > { %1366 = vrot.lane.b32.xlu0 %v1144_v56, %s9744_s22  ;;  %2015 = vrot.lane.b32.xlu1 %v10156_v0, %s9745_s17 }
 0x1ef   : > { %8257 = vmatmul.msk.bf16.vlgmr.msra.gmra.mxu3 %vm1150_vm0, %v10095_v21 }
 0x1f5   : > { %2382 = vrot.lane.b32.xlu2 %v1140_v7, %s9748_s4 }
 0x1f6   : > { %1625 = vrot.lane.b32.xlu0 %v1144_v56, %s9746_s5  ;;  %1354 = vrot.lane.b32.xlu1 %v1140_v7, %s9744_s22 }
 0x1f7   : > { %v10192_v8 = vpop.permute.xlu2 %1350 }
 0x1fd   : > { %2900 = vrot.lane.b32.xlu2 %v1144_v56, %s9749_s21 }
 0x1fe   : > { %2135 = vrot.lane.b32.xlu0 %v1144_v56, %s9747_s24  ;;  %1880 = vrot.lane.b32.xlu1 %v1144_v56, %s9745_s17 }
 0x1ff   : > { %8258 = vmatmul.msk.bf16.gmra.mxu3 %vm1150_vm0, %v10127_v39  ;;  %v10198_v10 = vpop.permute.xlu2 %1621 }
 0x205   : > { %2017 = vrot.lane.b32.xlu2 %v10149_v62, %s9745_s17 }
 0x206   : > { %2127 = vrot.lane.b32.xlu0 %v1140_v7, %s9747_s24  ;;  %1872 = vrot.lane.b32.xlu1 %v1140_v7, %s9745_s17 }
 0x207   : > { %v10210_v15 = vpop.permute.xlu2 %1868 }
 0x20d   : > { %1882 = vrot.lane.b32.xlu2 %v10140_v51, %s9745_s17 }
 0x20e   : > { %1507 = vrot.lane.b32.xlu0 %v10149_v62, %s9744_s22  ;;  %2390 = vrot.lane.b32.xlu1 %v1144_v56, %s9748_s4 }
 0x20f   : > { %8259 = vmatmul.msk.bf16.gmra.mxu3 %vm1150_vm0, %v1140_v7  ;;  %v10227_v21 = vpop.permute.xlu2 %2123 }
 0x210   : > { %v10206_v11 = vpop.permute.xlu0 %1876  ;;  %v10208_v13 = vpop.permute.xlu1 %1362 }
 0x215   : > { %2392 = vrot.lane.b32.xlu2 %v10140_v51, %s9748_s4 }
 0x216   : > { %1368 = vrot.lane.b32.xlu0 %v10140_v51, %s9744_s22  ;;  %2645 = vrot.lane.b32.xlu1 %v1144_v56, %s9750_s28 }
 0x217   : > { %v10241_v25 = vpop.permute.xlu2 %2641 }
 0x218   : > { %v10219_v18 = vpop.permute.xlu0 %2131  ;;  %v10221_v19 = vpop.permute.xlu1 %1613 }
 0x21d   : > { %1619 = vrot.lane.b32.xlu2 %v1141_v20, %s9746_s5 }
 0x21e   : > { %1627 = vrot.lane.b32.xlu0 %v10140_v51, %s9746_s5  ;;  %2637 = vrot.lane.b32.xlu1 %v1140_v7, %s9750_s28 }
 0x21f   : > { %8260 = vmatmul.msk.bf16.gmra.mxu3 %vm1150_vm0, %v1141_v20  ;;  %v10253_v28 = vpop.permute.xlu2 %1352 }
 0x220   : > { %v10230_v12 = vpop.permute.xlu0 %2378  ;;  %v10232_v22 = vpop.permute.xlu1 %2386 }
 0x225   : > { %2894 = vrot.lane.b32.xlu2 %v1141_v20, %s9749_s21 }
 0x226   : > { %1356 = vrot.lane.b32.xlu0 %v1141_v20, %s9744_s22  ;;  %2892 = vrot.lane.b32.xlu1 %v1140_v7, %s9749_s21 }
 0x227   : > { %v10264_v31 = vpop.permute.xlu2 %1623 }
 0x228   : > { %v10237_v23 = vpop.permute.xlu0 %1503  ;;  %v10239_v24 = vpop.permute.xlu1 %2896 }
 0x22d   : > { %2019 = vrot.lane.b32.xlu2 %v10147_v59, %s9745_s17 }
 0x22e   : > { %2137 = vrot.lane.b32.xlu0 %v10140_v51, %s9747_s24  ;;  %1762 = vrot.lane.b32.xlu1 %v10149_v62, %s9746_s5 }
 0x22f   : > { %v10280_v35 = vpop.permute.xlu2 %2388 }
 0x230   : > { %v10249_v26 = vpop.permute.xlu0 %1615  ;;  %v10251_v27 = vpop.permute.xlu1 %2633 }
 0x235   : > { %1760 = vrot.lane.b32.xlu2 %v10156_v0, %s9746_s5 }
 0x236   : > { %2902 = vrot.lane.b32.xlu0 %v10140_v51, %s9749_s21  ;;  %1874 = vrot.lane.b32.xlu1 %v1141_v20, %s9745_s17 }
 0x237   : > { %v10293_v40 = vpop.permute.xlu2 %2380 }
 0x238   : > { %v10260_v29 = vpop.permute.xlu0 %2133  ;;  %v10262_v30 = vpop.permute.xlu1 %2888 }
 0x23d   : > { %2527 = vrot.lane.b32.xlu2 %v10149_v62, %s9748_s4 }
 0x23e   : > { %2129 = vrot.lane.b32.xlu0 %v1141_v20, %s9747_s24  ;;  %2647 = vrot.lane.b32.xlu1 %v10140_v51, %s9750_s28 }
 0x23f   : > { %v10303_v43 = vpop.permute.xlu2 %2890 }
 0x240   : > { %v10271_v32 = vpop.permute.xlu0 %2643  ;;  %v10273_v34 = vpop.permute.xlu1 %1364 }
 0x245   : > { %3037 = vrot.lane.b32.xlu2 %v10149_v62, %s9749_s21 }
 0x246   : > { %2384 = vrot.lane.b32.xlu0 %v1141_v20, %s9748_s4  ;;  %1764 = vrot.lane.b32.xlu1 %v10147_v59, %s9746_s5 }
 0x247   : > { %v10311_v46 = vpop.permute.xlu2 %1617 }
 0x248   : > { %v10282_v36 = vpop.permute.xlu0 %2898  ;;  %v10284_v37 = vpop.permute.xlu1 %1878 }
 0x24e   : > { %2639 = vrot.lane.b32.xlu0 %v1141_v20, %s9750_s28  ;;  %2013 = vrot.lane.b32.xlu1 %v10117_v33, %s9745_s17 }
 0x24f   : > { %v10323_v49 = vpop.permute.xlu2 %2382 }
 0x250   : > { %v10289_v38 = vpop.permute.xlu0 %2635  ;;  %v10291_v39 = vpop.permute.xlu1 %1870 }
 0x256   : > { %1509 = vrot.lane.b32.xlu0 %v10147_v59, %s9744_s22  ;;  %2274 = vrot.lane.b32.xlu1 %v10147_v59, %s9747_s24 }
 0x257   : > { %v10337_v56 = vpop.permute.xlu2 %2900 }
 0x258   : > { %v10299_v41 = vpop.permute.xlu0 %1505  ;;  %v10301_v42 = vpop.permute.xlu1 %2125 }
 0x25e   : > { %1758 = vrot.lane.b32.xlu0 %v10117_v33, %s9746_s5  ;;  %2525 = vrot.lane.b32.xlu1 %v10156_v0, %s9748_s4 }
 0x25f   : > { %v10349_v63 = vpop.permute.xlu2 %2017 }
 0x260   : > { %v1367_v44 = vpop.permute.xlu0 %1366  ;;  %v10309_v45 = vpop.permute.xlu1 %2015 }
 0x261   : > { %v1389_v9 = vsel %vm1150_vm0, %v1367_v44, 0 }
 0x266   : > { %2529 = vrot.lane.b32.xlu0 %v10147_v59, %s9748_s4  ;;  %2272 = vrot.lane.b32.xlu1 %v10149_v62, %s9747_s24  ;;  %v1645_v62 = vsel %vm1150_vm0, %v10264_v31, 0 }
 0x267   : > { %v1883_v5 = vpop.permute.xlu2 %1882 }
 0x268   : > { %v1626_v47 = vpop.permute.xlu0 %1625  ;;  %v10317_v48 = vpop.permute.xlu1 %1354 }
 0x269   : > { %v1648_v44 = vsel %vm1150_vm0, %v1626_v47, 0 }
 0x26e   : > { %2270 = vrot.lane.b32.xlu0 %v10156_v0, %s9747_s24  ;;  %2523 = vrot.lane.b32.xlu1 %v10117_v33, %s9748_s4  ;;  %v1906_v0 = vsel %vm1150_vm0, %v1883_v5, 0 }
 0x26f   : > { %v2393_v17 = vpop.permute.xlu2 %2392 }
 0x270   : > { %v10325_v50 = vpop.permute.xlu0 %2135  ;;  %v1881_v51 = vpop.permute.xlu1 %1880 }
 0x272   : > { %v10327_v52 = vpop.f32.mrf.mxu3 }
 0x273   : > { %v1205_v53 = vsel %vm1204_vm1, %v10327_v52, -inf }
 0x274   : > { %1206 = vmax.xlane.f32.xlu2 %v1205_v53 }
 0x276   : > { %2268 = vrot.lane.b32.xlu1 %v10117_v33, %s9747_s24 }
 0x278   : > { %v10333_v54 = vpop.permute.xlu0 %2127  ;;  %v10335_v55 = vpop.permute.xlu1 %1872 }
 0x27a   : > { %v10339_v57 = vpop.f32.mrf.mxu3 }
 0x27e   : > { %3039 = vrot.lane.b32.xlu1 %v10147_v59, %s9749_s21 }
 0x280   : > { %v10343_v58 = vpop.permute.xlu0 %1507  ;;  %v10345_v60 = vpop.permute.xlu1 %2390 }
 0x282   : > { %v10347_v61 = vpop.f32.mrf.mxu3 }
 0x288   : > { %v1369_v1 = vpop.permute.xlu0 %1368  ;;  %v10351_v2 = vpop.permute.xlu1 %2645 }
 0x289   : > { %v1392_v3 = vsel %vm1150_vm0, %v1369_v1, 0 }
 0x28a   : > { %v10354_v4 = vpop.f32.mrf.mxu3  ;;  %1398 = vmatpush.bf16.xpose.msrb.mxu1 %v1392_v3  ;;  %v1386_v3 = vsel %vm1150_vm0, %v10273_v34, 0  ;;  %v1208_v34 = vsel %vm1204_vm1, %v10339_v57, -inf }
 0x28b   : > { %v1214_v20 = vsel %vm1204_vm1, %v10354_v4, -inf }
 0x290   : > { %v1628_v6 = vpop.permute.xlu0 %1627  ;;  %v10356_v7 = vpop.permute.xlu1 %2637 }
 0x291   : > { %v1651_v14 = vsel %vm1150_vm0, %v1628_v6, 0 }
 0x292   : > { %v10360_v16 = vpop.f32.mrf.mxu3  ;;  %1399 = vmatpush.bf16.xpose.msrb.mxu1 %v1389_v9  ;;  %1657 = vmatpush.bf16.xpose.msrb.mxu3 %v1651_v14  ;;  %v1383_v14 = vsel %vm1150_vm0, %v10208_v13, 0  ;;  %v1642_v13 = vsel %vm1150_vm0, %v10198_v10, 0 }
 0x298   : > { %v10364_v53 = vpop.permute.xlu0 %1356  ;;  %v10366_v1 = vpop.permute.xlu1 %2892  ;;  %1215 = vmax.xlane.f32.xlu0 %v1214_v20 }
 0x299   : > { %v10378_v20 = vpop.permute.xlu2 %1619 }
 0x29a   : > { %v10371_v33 = vpop.f32.mrf.mxu3  ;;  %1400 = vmatpush.bf16.xpose.msrb.mxu1 %v1386_v3  ;;  %1658 = vmatpush.bf16.xpose.msrb.mxu3 %v1648_v44 }
 0x2a0   : > { %v2138_v6 = vpop.permute.xlu0 %2137  ;;  %v1763_v9 = vpop.permute.xlu1 %1762 }
 0x2a1   : > { %v2161_v31 = vsel %vm1150_vm0, %v2138_v6, 0  ;;  %v10398_v44 = vpop.permute.xlu2 %2894  ;;  %v2158_v6 = vsel %vm1150_vm0, %v10325_v50, 0  ;;  %v2416_v50 = vsel %vm1150_vm0, %v2393_v17, 0 }
 0x2a2   : > { %v10380_v59 = vpop.f32.mrf.mxu3  ;;  %1401 = vmatpush.bf16.xpose.msrb.mxu1 %v1383_v14  ;;  %1659 = vmatpush.bf16.xpose.msrb.mxu3 %v1645_v62  ;;  %v1903_v62 = vsel %vm1150_vm0, %v1881_v51, 0  ;;  %v1900_v51 = vsel %vm1150_vm0, %v10284_v37, 0  ;;  %v2155_v37 = vsel %vm1150_vm0, %v10260_v29, 0  ;;  %v2413_v29 = vsel %vm1150_vm0, %v10345_v60, 0 }
 0x2a3   : > { %v1223_v17 = vsel %vm1204_vm1, %v10380_v59, -inf }
 0x2a8   : > { %v10384_v47 = vpop.permute.xlu0 %2902  ;;  %v10386_v3 = vpop.permute.xlu1 %1874  ;;  %1209 = vmax.xlane.f32.xlu1 %v1208_v34 }
 0x2a9   : > { %8265 = vmatmul.msk.bf16.vlgmr.msrb.gmra.mxu1 %vm1150_vm0, %v10192_v8  ;;  %v1211_v8 = vsel %vm1204_vm1, %v10347_v61, -inf  ;;  %v2020_v34 = vpop.permute.xlu2 %2019 }
 0x2aa   : > { %1912 = vmatpush.bf16.xpose.msra.mxu1 %v1906_v0  ;;  %v10393_v5 = vpop.f32.mrf.mxu3  ;;  %1660 = vmatpush.bf16.xpose.msrb.mxu3 %v1642_v13  ;;  %v1217_v13 = vsel %vm1204_vm1, %v10360_v16, -inf }
 0x2ab   : > { %v1226_v0 = vsel %vm1204_vm1, %v10393_v5, -inf }
 0x2ac   : > { %1227 = vmax.xlane.f32.xlu0 %v1226_v0  ;;  %v1220_v0 = vsel %vm1204_vm1, %v10371_v33, -inf }
 0x2b0   : > { %v10402_v14 = vpop.permute.xlu0 %2129  ;;  %v2648_v10 = vpop.permute.xlu1 %2647  ;;  %1212 = vmax.xlane.f32.xlu1 %v1211_v8 }
 0x2b1   : > { %8273 = vmatmul.msk.bf16.vlgmr.msrb.gmra.mxu3 %vm1150_vm0, %v10221_v19  ;;  %v1897_v19 = vsel %vm1150_vm0, %v10206_v11, 0  ;;  %v1761_v8 = vpop.permute.xlu2 %1760  ;;  %v2152_v11 = vsel %vm1150_vm0, %v10219_v18, 0  ;;  %v2410_v18 = vsel %vm1150_vm0, %v10280_v35, 0  ;;  %v2665_v35 = vsel %vm1150_vm0, %v10271_v32, 0 }
 0x2b2   : > { %1913 = vmatpush.bf16.xpose.msra.mxu1 %v1903_v62  ;;  %2167 = vmatpush.bf16.xpose.msra.mxu3 %v2161_v31 }
 0x2b8   : > { %v10412_v31 = vpop.permute.xlu0 %2384  ;;  %v1765_v62 = vpop.permute.xlu1 %1764  ;;  %1218 = vmax.xlane.f32.xlu1 %v1217_v13 }
 0x2b9   : > { %8266 = vmatmul.msk.bf16.gmra.mxu1 %vm1150_vm0, %v10253_v28  ;;  %1786 = vmatpush.bf16.msra.mxu0 %v1765_v62  ;;  %v2671_v28 = vsel %vm1150_vm0, %v2648_v10, 0 }
 0x2ba   : > { %1914 = vmatpush.bf16.xpose.msra.mxu1 %v1900_v51  ;;  %2168 = vmatpush.bf16.xpose.msra.mxu3 %v2158_v6 }
 0x2bd   : > { %1787 = vmatpush.bf16.msra.mxu0 %v1763_v9 }
 0x2c0   : > { %v10423_v51 = vpop.permute.xlu0 %2639  ;;  %1221 = vmax.xlane.f32.xlu1 %v1220_v0 }
 0x2c1   : > { %8274 = vmatmul.msk.bf16.gmra.mxu3 %vm1150_vm0, %v10249_v26  ;;  %1788 = vmatpush.bf16.msra.mxu0 %v1761_v8  ;;  %v2668_v26 = vsel %vm1150_vm0, %v10351_v2, 0  ;;  %v2014_v2 = vpop.permute.xlu1 %2013 }
 0x2c2   : > { %1915 = vmatpush.bf16.xpose.msra.mxu1 %v1897_v19  ;;  %2169 = vmatpush.bf16.xpose.msra.mxu3 %v2155_v37 }
 0x2c8   : > { %v1510_v9 = vpop.permute.xlu0 %1509  ;;  %1224 = vmax.xlane.f32.xlu1 %v1223_v17 }
 0x2c9   : > { %8267 = vmatmul.msk.bf16.gmra.mxu1 %vm1150_vm0, %v10317_v48  ;;  %1531 = vmatpush.bf16.msrb.mxu2 %v1510_v9  ;;  %v2407_v48 = vsel %vm1150_vm0, %v10232_v22, 0  ;;  %v2275_v22 = vpop.permute.xlu1 %2274 }
 0x2ca   : > { %2422 = vmatpush.bf16.xpose.msrb.mxu1 %v2416_v50  ;;  %2170 = vmatpush.bf16.xpose.msra.mxu3 %v2152_v11 }
 0x2cd   : > { %1532 = vmatpush.bf16.msrb.mxu2 %v10343_v58 }
 0x2d0   : > { %v1759_v60 = vpop.permute.xlu0 %1758 }
 0x2d1   : > { %1533 = vmatpush.bf16.msrb.mxu2 %v10299_v41  ;;  %8275 = vmatmul.msk.bf16.gmra.mxu3 %vm1150_vm0, %v10311_v46  ;;  %v2662_v41 = vsel %vm1150_vm0, %v10241_v25, 0  ;;  %v10461_v32 = vpop.permute.xlu1 %2525  ;;  %v2923_v25 = vsel %vm1150_vm0, %v10337_v56, 0  ;;  %v2920_v46 = vsel %vm1150_vm0, %v10282_v36, 0 }
 0x2d2   : > { %2423 = vmatpush.bf16.xpose.msrb.mxu1 %v2413_v29  ;;  %2677 = vmatpush.bf16.xpose.msrb.mxu3 %v2671_v28 }
 0x2d3   : > { %1789 = vmatpush.bf16.msra.mxu0 %v1759_v60 }
 0x2d5   : > { %1534 = vmatpush.bf16.msrb.mxu2 %v10237_v23  ;;  %v2926_v23 = vsel %vm1150_vm0, %v10384_v47, 0 }
 0x2d9   : > { %2041 = vmatpush.bf16.msra.mxu2 %v2020_v34  ;;  %8268 = vmatmul.msk.bf16.gmra.mxu1 %vm1150_vm0, %v10364_v53 }
 0x2da   : > { %2424 = vmatpush.bf16.xpose.msrb.mxu1 %v2410_v18  ;;  %2678 = vmatpush.bf16.xpose.msrb.mxu3 %v2668_v26 }
 0x2dd   : > { %2042 = vmatpush.bf16.msra.mxu2 %v10349_v63  ;;  %v10487_v63 = vpop.permute.xlu0 %2529 }
 0x2e1   : > { %2043 = vmatpush.bf16.msra.mxu2 %v10309_v45  ;;  %8276 = vmatmul.msk.bf16.gmra.mxu3 %vm1150_vm0, %v10378_v20  ;;  %v2273_v45 = vpop.permute.xlu1 %2272 }
 0x2e2   : > { %2425 = vmatpush.bf16.xpose.msrb.mxu1 %v2407_v48  ;;  %2679 = vmatpush.bf16.xpose.msrb.mxu3 %v2665_v35 }
 0x2e5   : > { %2044 = vmatpush.bf16.msra.mxu2 %v2014_v2 }
 0x2e9   : > { %8281 = vmatmul.msk.bf16.vlgmr.msra.gmra.mxu1 %vm1150_vm0, %v10210_v15  ;;  %v10471_v58 = vpop.permute.xlu1 %2523  ;;  %v2917_v15 = vsel %vm1150_vm0, %v10239_v24, 0 }
 0x2ea   : > { %2680 = vmatpush.bf16.xpose.msrb.mxu3 %v2662_v41  ;;  %2932 = vmatpush.bf16.xpose.msra.mxu1 %v2926_v23 }
 0x2f1   : > { %8289 = vmatmul.msk.bf16.vlgmr.msra.gmra.mxu3 %vm1150_vm0, %v10227_v21  ;;  %v10477_v21 = vpop.permute.xlu2 %2527  ;;  %v2269_v56 = vpop.permute.xlu1 %2268 }
 0x2f2   : > { %2933 = vmatpush.bf16.xpose.msra.mxu1 %v2923_v25 }
 0x2f9   : > { %8282 = vmatmul.msk.bf16.gmra.mxu1 %vm1150_vm0, %v10291_v39  ;;  %v10481_v39 = vpop.permute.xlu2 %3037  ;;  %v10485_v36 = vpop.permute.xlu1 %3039 }
 0x2fa   : > { %2934 = vmatpush.bf16.xpose.msra.mxu1 %v2920_v46 }
 0x301   : > { %8290 = vmatmul.msk.bf16.gmra.mxu3 %vm1150_vm0, %v10301_v42  ;;  %v1207_v42 = vpop.xlane.xlu2 %1206 }
 0x302   : > { %2935 = vmatpush.bf16.xpose.msra.mxu1 %v2917_v15  ;;  %v1229_v53 = vsub.f32 %v10327_v52, %v1207_v42 }
 0x304   : > { %v1237_v24 = vmul.f32 1.442695, %v1229_v53 }
 0x306   : > { %9221 = vpow2.f32 %v1237_v24 }
 0x309   : > { %8283 = vmatmul.msk.bf16.gmra.mxu1 %vm1150_vm0, %v10335_v55  ;;  %v2271_v55 = vpop.permute.xlu0 %2270 }
 0x30c   : > { %v10495_v6 = vpop.eup %9221 }
 0x311   : > { %8291 = vmatmul.msk.bf16.gmra.mxu3 %vm1150_vm0, %v10333_v54  ;;  %v1216_v34 = vpop.xlane.xlu0 %1215 }
 0x312   : > { %v1232_v19 = vsub.f32 %v10354_v4, %v1216_v34 }
 0x319   : > { %8284 = vmatmul.msk.bf16.gmra.mxu1 %vm1150_vm0, %v10386_v3 }
 0x31b   : > { %v1210_v20 = vpop.xlane.xlu1 %1209 }
 0x31c   : > { %v1230_v47 = vsub.f32 %v10339_v57, %v1210_v20 }
 0x31e   : > { %v1239_v10 = vmul.f32 1.442695, %v1230_v47 }
 0x31f   : > { %v1228_v2 = vpop.xlane.xlu0 %1227 }
 0x320   : > { %9223 = vpow2.f32 %v1239_v10  ;;  %v1236_v46 = vsub.f32 %v10393_v5, %v1228_v2 }
 0x321   : > { %8292 = vmatmul.msk.bf16.gmra.mxu3 %vm1150_vm0, %v10402_v14 }
 0x323   : > { %v1213_v54 = vpop.xlane.xlu1 %1212 }
 0x324   : > { %v1231_v52 = vsub.f32 %v10347_v61, %v1213_v54  ;;  %v1243_v61 = vmul.f32 1.442695, %v1232_v19 }
 0x326   : > { %v10497_v13 = vpop.eup %9223  ;;  %v10500_v3 = vpop.f32.mrf.mxu1  ;;  %v1241_v14 = vmul.f32 1.442695, %v1231_v52 }
 0x327   : > { %v1423_v57 = vsel %vm1204_vm1, %v10500_v3, -inf  ;;  %v1277_v62 = vpack.c.bf16 %v10497_v13, %v10495_v6 }
 0x328   : > { %1424 = vmax.xlane.f32.xlu1 %v1423_v57  ;;  %9225 = vpow2.f32 %v1241_v14 }
 0x329   : > { %8261 = vmatmul.msk.bf16.vlgmr.msrb.gmra.mxu0 %vm1204_vm1, %v1277_v62  ;;  %8297 = vmatmul.msk.bf16.vlgmr.msrb.gmra.mxu1 %vm1150_vm0, %v10230_v12  ;;  %9227 = vpow2.f32 %v1243_v61 }
 0x32a   : > { %2296 = vmatpush.bf16.msrb.mxu0 %v2275_v22 }
 0x32b   : > { %v1219_v37 = vpop.xlane.xlu1 %1218 }
 0x32c   : > { %v1233_v17 = vsub.f32 %v10360_v16, %v1219_v37 }
 0x32e   : > { %2297 = vmatpush.bf16.msrb.mxu0 %v2273_v45  ;;  %v10510_v50 = vpop.f32.mrf.mxu1  ;;  %v10514_v0 = vpop.eup %9225  ;;  %v1245_v18 = vmul.f32 1.442695, %v1233_v17 }
 0x32f   : > { %15831 = vst [vmem:[#allocation25_spill] sm:$0xff] %v10514_v0  ;;  %v10520_v11 = vpop.eup %9227 }
 0x330   : > { %15832 = vst [vmem:[#allocation26_spill] sm:$0xff] %v10520_v11 }
 0x331   : > { %8305 = vmatmul.msk.bf16.vlgmr.msrb.gmra.mxu3 %vm1150_vm0, %v10251_v27  ;;  %v1278_v27 = vpack.c.bf16 %v10520_v11, %v10514_v0 }
 0x332   : > { %2298 = vmatpush.bf16.msrb.mxu0 %v2271_v55 }
 0x333   : > { %v1222_v4 = vpop.xlane.xlu1 %1221 }
 0x334   : > { %v10516_v8 = vpop.f32.mrf.mxu3  ;;  %v1234_v28 = vsub.f32 %v10371_v33, %v1222_v4  ;;  %v1426_v33 = vsel %vm1204_vm1, %v10510_v50, -inf }
 0x335   : > { %v1682_v12 = vsel %vm1204_vm1, %v10516_v8, -inf }
 0x336   : > { %2299 = vmatpush.bf16.msrb.mxu0 %v2269_v56  ;;  %v10523_v29 = vpop.f32.mrf.mxu1  ;;  %1683 = vmax.xlane.f32.xlu2 %v1682_v12  ;;  %v1247_v9 = vmul.f32 1.442695, %v1234_v28  ;;  %v1251_v56 = vmul.f32 1.442695, %v1236_v46 }
 0x337   : > { %v1429_v22 = vsel %vm1204_vm1, %v10523_v29, -inf }
 0x338   : > { %9229 = vpow2.f32 %v1247_v9 }
 0x339   : > { %8262 = vmatmul.msk.bf16.gmra.mxu0 %vm1204_vm1, %v1278_v27  ;;  %8298 = vmatmul.msk.bf16.gmra.mxu1 %vm1150_vm0, %v10293_v40  ;;  %9231 = vpow2.f32 %v1245_v18 }
 0x33b   : > { %v1225_v40 = vpop.xlane.xlu1 %1224 }
 0x33c   : > { %v10531_v26 = vpop.f32.mrf.mxu3  ;;  %v1235_v25 = vsub.f32 %v10380_v59, %v1225_v40 }
 0x33d   : > { %v1685_v60 = vsel %vm1204_vm1, %v10531_v26, -inf }
 0x33e   : > { %v10537_v48 = vpop.f32.mrf.mxu1  ;;  %1427 = vmax.xlane.f32.xlu2 %v1426_v33  ;;  %1686 = vmax.xlane.f32.xlu0 %v1685_v60  ;;  %v10541_v16 = vpop.eup %9229  ;;  %v1249_v15 = vmul.f32 1.442695, %v1235_v25 }
 0x33f   : > { %15833 = vst [vmem:[#allocation27_spill] sm:$0xff] %v10541_v16  ;;  %v10549_v23 = vpop.eup %9231  ;;  %v1432_v59 = vsel %vm1204_vm1, %v10537_v48, -inf }
 0x340   : > { %15834 = vst [vmem:[#allocation28_spill] sm:$0xff] %v10549_v23  ;;  %9233 = vpow2.f32 %v1249_v15 }
 0x341   : > { %8306 = vmatmul.msk.bf16.gmra.mxu3 %vm1150_vm0, %v10289_v38  ;;  %v1279_v38 = vpack.c.bf16 %v10541_v16, %v10549_v23  ;;  %9235 = vpow2.f32 %v1251_v56 }
 0x344   : > { %v10543_v35 = vpop.f32.mrf.mxu3 }
 0x345   : > { %v1688_v41 = vsel %vm1204_vm1, %v10543_v35, -inf }
 0x346   : > { %v10552_v45 = vpop.f32.mrf.mxu1  ;;  %1689 = vmax.xlane.f32.xlu2 %v1688_v41  ;;  %1430 = vmax.xlane.f32.xlu0 %v1429_v22 }
 0x347   : > { %v1435_v5 = vsel %vm1204_vm1, %v10552_v45, -inf }
 0x349   : > { %8263 = vmatmul.msk.bf16.gmra.mxu0 %vm1204_vm1, %v1279_v38  ;;  %8299 = vmatmul.msk.bf16.gmra.mxu1 %vm1150_vm0, %v10323_v49  ;;  %v10572_v49 = vpop.eup %9233 }
 0x34a   : > { %15835 = vst [vmem:[#allocation29_spill] sm:$0xff] %v10572_v49  ;;  %v10580_v10 = vpop.eup %9235 }
 0x34b   : > { %15836 = vst [vmem:[#allocation30_spill] sm:$0xff] %v10580_v10  ;;  %v1280_v34 = vpack.c.bf16 %v10580_v10, %v10572_v49 }
 0x34c   : > { %v10560_v42 = vpop.f32.mrf.mxu3 }
 0x34d   : > { %v1691_v53 = vsel %vm1204_vm1, %v10560_v42, -inf }
 0x34e   : > { %v10566_v24 = vpop.f32.mrf.mxu1  ;;  %1433 = vmax.xlane.f32.xlu2 %v1432_v59  ;;  %1692 = vmax.xlane.f32.xlu1 %v1691_v53 }
 0x34f   : > { %1436 = vmax.xlane.f32.xlu0 %v1435_v5  ;;  %v1438_v47 = vsel %vm1204_vm1, %v10566_v24, -inf }
 0x351   : > { %8307 = vmatmul.msk.bf16.gmra.mxu3 %vm1150_vm0, %v10356_v7 }
 0x354   : > { %v10574_v20 = vpop.f32.mrf.mxu3 }
 0x355   : > { %v1694_v55 = vsel %vm1204_vm1, %v10574_v20, -inf }
 0x356   : > { %v10582_v54 = vpop.f32.mrf.mxu1  ;;  %1439 = vmax.xlane.f32.xlu2 %v1438_v47 }
 0x357   : > { %1695 = vmax.xlane.f32.xlu0 %v1694_v55  ;;  %v1441_v62 = vsel %vm1204_vm1, %v10582_v54, -inf  ;;  %v15837_v55 = vld [vmem:[#allocation22_spill] sm:$0xff] }
 0x359   : > { %8264 = vmatmul.msk.bf16.gmra.mxu0 %vm1204_vm1, %v1280_v34  ;;  %8300 = vmatmul.msk.bf16.gmra.mxu1 %vm1150_vm0, %v10412_v31 }
 0x35c   : > { %v10589_v7 = vpop.f32.mrf.mxu3 }
 0x35d   : > { %v1697_v52 = vsel %vm1204_vm1, %v10589_v7, -inf }
 0x35e   : > { %v10593_v57 = vpop.f32.mrf.mxu1  ;;  %1698 = vmax.xlane.f32.xlu2 %v1697_v52 }
 0x35f   : > { %1442 = vmax.xlane.f32.xlu0 %v1441_v62 }
 0x361   : > { %8308 = vmatmul.msk.bf16.gmra.mxu3 %vm1150_vm0, %v10423_v51  ;;  %v1444_v51 = vsel %vm1204_vm1, %v10593_v57, -inf }
 0x364   : > { %v10599_v19 = vpop.f32.mrf.mxu3 }
 0x365   : > { %v1700_v31 = vsel %vm1204_vm1, %v10599_v19, -inf }
 0x366   : > { %v10603_v14 = vpop.f32.mrf.mxu1  ;;  %1701 = vmax.xlane.f32.xlu2 %v1700_v31 }
 0x367   : > { %v1937_v37 = vsel %vm1204_vm1, %v10603_v14, -inf }
 0x368   : > { %1938 = vmax.xlane.f32.xlu0 %v1937_v37 }
 0x369   : > { %8313 = vmatmul.msk.bf16.vlgmr.msra.gmra.mxu1 %vm1150_vm0, %v10262_v30 }
 0x36c   : > { %v10609_v61 = vpop.f32.mrf.mxu3 }
 0x36d   : > { %v1703_v4 = vsel %vm1204_vm1, %v10609_v61, -inf }
 0x36e   : > { %v10615_v12 = vpop.f32.mrf.mxu1  ;;  %1445 = vmax.xlane.f32.xlu2 %v1444_v51  ;;  %1704 = vmax.xlane.f32.xlu1 %v1703_v4 }
 0x36f   : > { %v1940_v33 = vsel %vm1204_vm1, %v10615_v12, -inf }
 0x374   : > { %v10617_v28 = vpop.f32.mrf.mxu3 }
 0x375   : > { %v2192_v27 = vsel %vm1204_vm1, %v10617_v28, -inf }
 0x376   : > { %v10621_v17 = vpop.f32.mrf.mxu1  ;;  %2193 = vmax.xlane.f32.xlu0 %v2192_v27 }
 0x377   : > { %v1943_v30 = vsel %vm1204_vm1, %v10621_v17, -inf }
 0x378   : > { %1944 = vmax.xlane.f32.xlu1 %v1943_v30 }
 0x379   : > { %8314 = vmatmul.msk.bf16.gmra.mxu1 %vm1150_vm0, %v10303_v43 }
 0x37c   : > { %v10627_v9 = vpop.f32.mrf.mxu3 }
 0x37d   : > { %v2195_v18 = vsel %vm1204_vm1, %v10627_v9, -inf }
 0x37e   : > { %v10633_v60 = vpop.f32.mrf.mxu1  ;;  %2196 = vmax.xlane.f32.xlu2 %v2195_v18  ;;  %1941 = vmax.xlane.f32.xlu0 %v1940_v33 }
 0x37f   : > { %v1946_v38 = vsel %vm1204_vm1, %v10633_v60, -inf }
 0x384   : > { %v10635_v40 = vpop.f32.mrf.mxu3 }
 0x385   : > { %v2198_v2 = vsel %vm1204_vm1, %v10635_v40, -inf }
 0x386   : > { %v10639_v41 = vpop.f32.mrf.mxu1  ;;  %2199 = vmax.xlane.f32.xlu0 %v2198_v2 }
 0x387   : > { %v1949_v43 = vsel %vm1204_vm1, %v10639_v41, -inf }
 0x388   : > { %1950 = vmax.xlane.f32.xlu1 %v1949_v43 }
 0x389   : > { %8315 = vmatmul.msk.bf16.gmra.mxu1 %vm1150_vm0, %v10366_v1 }
 0x38c   : > { %v10645_v22 = vpop.f32.mrf.mxu3 }
 0x38d   : > { %v2201_v25 = vsel %vm1204_vm1, %v10645_v22, -inf }
 0x38e   : > { %v10651_v46 = vpop.f32.mrf.mxu1  ;;  %2202 = vmax.xlane.f32.xlu2 %v2201_v25  ;;  %1947 = vmax.xlane.f32.xlu0 %v1946_v38 }
 0x38f   : > { %v1952_v15 = vsel %vm1204_vm1, %v10651_v46, -inf }
 0x390   : > { %1953 = vmax.xlane.f32.xlu1 %v1952_v15 }
 0x394   : > { %v10655_v56 = vpop.f32.mrf.mxu3 }
 0x395   : > { %v2204_v1 = vsel %vm1204_vm1, %v10655_v56, -inf }
 0x396   : > { %v10659_v59 = vpop.f32.mrf.mxu1  ;;  %2205 = vmax.xlane.f32.xlu2 %v2204_v1 }
 0x397   : > { %v1955_v62 = vsel %vm1204_vm1, %v10659_v59, -inf }
 0x399   : > { %8316 = vmatmul.msk.bf16.gmra.mxu1 %vm1150_vm0, %v10398_v44 }
 0x39b   : > { %v1425_v31 = vpop.xlane.xlu1 %1424 }
 0x39c   : > { %v10663_v53 = vpop.f32.mrf.mxu3  ;;  %v1447_v51 = vsub.f32 %v10500_v3, %v1425_v31 }
 0x39d   : > { %v2207_v5 = vsel %vm1204_vm1, %v10663_v53, -inf }
 0x39e   : > { %v10667_v47 = vpop.f32.mrf.mxu1  ;;  %2208 = vmax.xlane.f32.xlu1 %v2207_v5  ;;  %v1455_v2 = vmul.f32 1.442695, %v1447_v51 }
 0x3a0   : > { %9237 = vpow2.f32 %v1455_v2 }
 0x3a2   : > { %2784 = vrot.lane.b32.xlu0 %v15837_v55, %s9750_s28 }
 0x3a4   : > { %v10671_v34 = vpop.f32.mrf.mxu3 }
 0x3a5   : > { %v2210_v52 = vsel %vm1204_vm1, %v10671_v34, -inf }
 0x3a6   : > { %v10677_v44 = vpop.f32.mrf.mxu1  ;;  %2211 = vmax.xlane.f32.xlu2 %v2210_v52  ;;  %1956 = vmax.xlane.f32.xlu1 %v1955_v62 }
 0x3a7   : > { %v2447_v30 = vsel %vm1204_vm1, %v10677_v44, -inf }
 0x3a9   : > { %v1684_v37 = vpop.xlane.xlu2 %1683 }
 0x3aa   : > { %v1706_v27 = vsub.f32 %v10516_v8, %v1684_v37  ;;  %v10697_v37 = vpop.eup %9237 }
 0x3ac   : > { %v10680_v4 = vpop.f32.mrf.mxu3  ;;  %v1714_v43 = vmul.f32 1.442695, %v1706_v27 }
 0x3ae   : > { %v10685_v18 = vpop.f32.mrf.mxu1  ;;  %2448 = vmax.xlane.f32.xlu2 %v2447_v30  ;;  %9239 = vpow2.f32 %v1714_v43 }
 0x3af   : > { %v2450_v33 = vsel %vm1204_vm1, %v10685_v18, -inf }
 0x3b0   : > { %2451 = vmax.xlane.f32.xlu1 %v2450_v33 }
 0x3b1   : > { %v1428_v25 = vpop.xlane.xlu2 %1427  ;;  %v1687_v38 = vpop.xlane.xlu0 %1686 }
 0x3b2   : > { %v1448_v3 = vsub.f32 %v10510_v50, %v1428_v25  ;;  %v1707_v15 = vsub.f32 %v10531_v26, %v1687_v38 }
 0x3b4   : > { %v1457_v8 = vmul.f32 1.442695, %v1448_v3  ;;  %v1716_v1 = vmul.f32 1.442695, %v1707_v15  ;;  %v10691_v5 = vpop.f32.mrf.mxu3  ;;  %v10699_v50 = vpop.eup %9239 }
 0x3b6   : > { %9241 = vpow2.f32 %v1457_v8  ;;  %v10693_v55 = vpop.f32.mrf.mxu1 }
 0x3b7   : > { %9243 = vpow2.f32 %v1716_v1  ;;  %v2453_v52 = vsel %vm1204_vm1, %v10693_v55, -inf }
 0x3b8   : > { %2454 = vmax.xlane.f32.xlu1 %v2453_v52 }
 0x3b9   : > { %v1690_v62 = vpop.xlane.xlu2 %1689  ;;  %v1431_v31 = vpop.xlane.xlu0 %1430 }
 0x3ba   : > { %v1708_v51 = vsub.f32 %v10543_v35, %v1690_v62  ;;  %v1449_v33 = vsub.f32 %v10523_v29, %v1431_v31  ;;  %v2702_v35 = vsel %vm1204_vm1, %v10691_v5, -inf }
 0x3bc   : > { %v10701_v26 = vpop.eup %9241  ;;  %v10704_v27 = vpop.f32.mrf.mxu3  ;;  %v1718_v38 = vmul.f32 1.442695, %v1708_v51  ;;  %v1459_v3 = vmul.f32 1.442695, %v1449_v33  ;;  %v15838_v33 = vld [vmem:[#allocation24_spill] sm:$0xff] }
 0x3bd   : > { %v10706_v30 = vpop.eup %9243  ;;  %v1495_v2 = vpack.c.bf16 %v10701_v26, %v10697_v37 }
 0x3be   : > { %v1754_v43 = vpack.c.bf16 %v10706_v30, %v10699_v50  ;;  %v10713_v25 = vpop.f32.mrf.mxu1  ;;  %9245 = vpow2.f32 %v1718_v38  ;;  %v1958_v38 = vsel %vm1204_vm1, %v10667_v47, -inf }
 0x3bf   : > { %8269 = vmatmul.msk.bf16.vlgmr.msrb.gmra.mxu2 %vm1204_vm1, %v1495_v2  ;;  %9247 = vpow2.f32 %v1459_v3 }
 0x3c0   : > { %8277 = vmatmul.msk.bf16.vlgmr.msra.gmra.mxu0 %vm1204_vm1, %v1754_v43  ;;  %2551 = vmatpush.bf16.msrb.mxu2 %v10487_v63 }
 0x3c1   : > { %2703 = vmax.xlane.f32.xlu1 %v2702_v35  ;;  %v1434_v29 = vpop.xlane.xlu2 %1433  ;;  %v1693_v15 = vpop.xlane.xlu1 %1692 }
 0x3c2   : > { %v1450_v8 = vsub.f32 %v10537_v48, %v1434_v29  ;;  %v1709_v1 = vsub.f32 %v10560_v42, %v1693_v15  ;;  %v1437_v52 = vpop.xlane.xlu0 %1436 }
 0x3c4   : > { %v1461_v62 = vmul.f32 1.442695, %v1450_v8  ;;  %v1720_v31 = vmul.f32 1.442695, %v1709_v1  ;;  %2552 = vmatpush.bf16.msrb.mxu2 %v10477_v21  ;;  %v10723_v51 = vpop.f32.mrf.mxu3  ;;  %v10730_v42 = vpop.eup %9245  ;;  %v1451_v21 = vsub.f32 %v10552_v45, %v1437_v52  ;;  %v15839_v1 = vld [vmem:[#allocation23_spill] sm:$0xff] }
 0x3c5   : > { %v10732_v43 = vpop.eup %9247 }
 0x3c6   : > { %9249 = vpow2.f32 %v1461_v62  ;;  %v10725_v63 = vpop.f32.mrf.mxu1  ;;  %3035 = vrot.lane.b32.xlu2 %v15838_v33, %s9749_s21  ;;  %v1463_v52 = vmul.f32 1.442695, %v1451_v21 }
 0x3c7   : > { %9251 = vpow2.f32 %v1720_v31 }
 0x3c8   : > { %2553 = vmatpush.bf16.msrb.mxu2 %v10461_v32  ;;  %9253 = vpow2.f32 %v1463_v52  ;;  %v2705_v52 = vsel %vm1204_vm1, %v10704_v27, -inf }
 0x3c9   : > { %v1440_v48 = vpop.xlane.xlu2 %1439 }
 0x3ca   : > { %v1696_v2 = vpop.xlane.xlu0 %1695  ;;  %v1452_v3 = vsub.f32 %v10566_v24, %v1440_v48  ;;  %v2213_v48 = vsel %vm1204_vm1, %v10680_v4, -inf }
 0x3cb   : > { %v1710_v15 = vsub.f32 %v10574_v20, %v1696_v2 }
 0x3cc   : > { %v10737_v35 = vpop.eup %9249  ;;  %2554 = vmatpush.bf16.msrb.mxu2 %v10471_v58  ;;  %v10741_v29 = vpop.f32.mrf.mxu3  ;;  %1959 = vmax.xlane.f32.xlu0 %v1958_v38  ;;  %v1465_v58 = vmul.f32 1.442695, %v1452_v3  ;;  %v15840_v3 = vld [vmem:[#allocation21_spill] sm:$0xff] }
 0x3cd   : > { %v10743_v32 = vpop.eup %9251  ;;  %v1496_v8 = vpack.c.bf16 %v10737_v35, %v10732_v43  ;;  %v1722_v62 = vmul.f32 1.442695, %v1710_v15 }
 0x3ce   : > { %v10748_v45 = vpop.f32.mrf.mxu1  ;;  %2782 = vrot.lane.b32.xlu2 %v15839_v1, %s9750_s28  ;;  %v1755_v24 = vpack.c.bf16 %v10743_v32, %v10730_v42  ;;  %9255 = vpow2.f32 %v1465_v58 }
 0x3cf   : > { %8270 = vmatmul.msk.bf16.gmra.mxu2 %vm1204_vm1, %v1496_v8  ;;  %9257 = vpow2.f32 %v1722_v62  ;;  %v10765_v8 = vpop.eup %9253 }
 0x3d0   : > { %8278 = vmatmul.msk.bf16.gmra.mxu0 %vm1204_vm1, %v1755_v24 }
 0x3d1   : > { %v1699_v31 = vpop.xlane.xlu2 %1698 }
 0x3d2   : > { %v1711_v20 = vsub.f32 %v10589_v7, %v1699_v31  ;;  %v1443_v15 = vpop.xlane.xlu0 %1442 }
 0x3d3   : > { %v1453_v62 = vsub.f32 %v10582_v54, %v1443_v15 }
 0x3d4   : > { %v1724_v2 = vmul.f32 1.442695, %v1711_v20  ;;  %v10759_v38 = vpop.f32.mrf.mxu3  ;;  %2214 = vmax.xlane.f32.xlu0 %v2213_v48  ;;  %v10767_v1 = vpop.eup %9255 }
 0x3d5   : > { %v10769_v24 = vpop.eup %9257  ;;  %v1497_v20 = vpack.c.bf16 %v10767_v1, %v10765_v8  ;;  %v1467_v15 = vmul.f32 1.442695, %v1453_v62  ;;  %v2711_v62 = vsel %vm1204_vm1, %v10741_v29, -inf }
 0x3d6   : > { %9259 = vpow2.f32 %v1724_v2  ;;  %v10761_v21 = vpop.f32.mrf.mxu1  ;;  %3033 = vrot.lane.b32.xlu2 %v15840_v3, %s9749_s21 }
 0x3d7   : > { %9261 = vpow2.f32 %v1467_v15 }
 0x3d9   : > { %v1702_v7 = vpop.xlane.xlu2 %1701 }
 0x3da   : > { %v1712_v31 = vsub.f32 %v10599_v19, %v1702_v7 }
 0x3db   : > { %v1939_v19 = vpop.xlane.xlu0 %1938 }
 0x3dc   : > { %v10773_v58 = vpop.eup %9259  ;;  %2706 = vmax.xlane.f32.xlu0 %v2705_v52  ;;  %v10781_v2 = vpop.f32.mrf.mxu3  ;;  %v1726_v7 = vmul.f32 1.442695, %v1712_v31 }
 0x3dd   : > { %v1756_v48 = vpack.c.bf16 %v10773_v58, %v10769_v24 }
 0x3de   : > { %v10783_v10 = vpop.f32.mrf.mxu1  ;;  %2780 = vrot.lane.b32.xlu2 %v15838_v33, %s9750_s28  ;;  %v2714_v33 = vsel %vm1204_vm1, %v10759_v38, -inf  ;;  %9263 = vpow2.f32 %v1726_v7 }
 0x3df   : > { %8271 = vmatmul.msk.bf16.gmra.mxu2 %vm1204_vm1, %v1497_v20  ;;  %v2468_v54 = vsel %vm1204_vm1, %v10783_v10, -inf }
 0x3e0   : > { %8279 = vmatmul.msk.bf16.gmra.mxu0 %vm1204_vm1, %v1756_v48  ;;  %2469 = vmax.xlane.f32.xlu1 %v2468_v54  ;;  %v1961_v48 = vsub.f32 %v10603_v14, %v1939_v19 }
 0x3e1   : > { %v1446_v52 = vpop.xlane.xlu2 %1445  ;;  %v1705_v49 = vpop.xlane.xlu1 %1704 }
 0x3e2   : > { %v1454_v16 = vsub.f32 %v10593_v57, %v1446_v52  ;;  %v1713_v23 = vsub.f32 %v10609_v61, %v1705_v49  ;;  %v10801_v57 = vpop.eup %9261  ;;  %v2717_v52 = vsel %vm1204_vm1, %v10781_v2, -inf }
 0x3e4   : > { %v1469_v20 = vmul.f32 1.442695, %v1454_v16  ;;  %v1728_v11 = vmul.f32 1.442695, %v1713_v23  ;;  %2715 = vmax.xlane.f32.xlu0 %v2714_v33  ;;  %v10799_v31 = vpop.f32.mrf.mxu3  ;;  %v10803_v61 = vpop.eup %9263  ;;  %v1969_v33 = vmul.f32 1.442695, %v1961_v48 }
 0x3e5   : > { %v2720_v16 = vsel %vm1204_vm1, %v10799_v31, -inf }
 0x3e6   : > { %9265 = vpow2.f32 %v1469_v20  ;;  %2778 = vrot.lane.b32.xlu2 %v15840_v3, %s9750_s28  ;;  %v10817_v7 = vpop.f32.mrf.mxu1 }
 0x3e7   : > { %9267 = vpow2.f32 %v1728_v11 }
 0x3e8   : > { %2712 = vmax.xlane.f32.xlu1 %v2711_v62  ;;  %9269 = vpow2.f32 %v1969_v33  ;;  %v1733_v33 = vsel %vm1204_vm1, %v10706_v30, 0.0  ;;  %v1730_v30 = vsel %vm1204_vm1, %v10699_v50, 0.0 }
 0x3e9   : > { %v2194_v49 = vpop.xlane.xlu0 %2193 }
 0x3ea   : > { %v2216_v3 = vsub.f32 %v10617_v28, %v2194_v49  ;;  %v1471_v49 = vsel %vm1204_vm1, %v10697_v37, 0.0 }
 0x3eb   : > { %v1945_v48 = vpop.xlane.xlu1 %1944 }
 0x3ec   : > { %v10807_v23 = vpop.eup %9265  ;;  %2721 = vmax.xlane.f32.xlu0 %v2720_v16  ;;  %v2224_v14 = vmul.f32 1.442695, %v2216_v3  ;;  %v10827_v16 = vpop.f32.mrf.mxu3 }
 0x3ed   : > { %v10810_v11 = vpop.eup %9267  ;;  %v1498_v54 = vpack.c.bf16 %v10807_v23, %v10801_v57  ;;  %v2723_v3 = vsel %vm1204_vm1, %v10827_v16, -inf }
 0x3ee   : > { %v1757_v15 = vpack.c.bf16 %v10810_v11, %v10803_v61  ;;  %9271 = vpow2.f32 %v2224_v14  ;;  %v10835_v37 = vpop.eup %9269  ;;  %v1963_v14 = vsub.f32 %v10621_v17, %v1945_v48 }
 0x3ef   : > { %8272 = vmatmul.msk.bf16.gmra.mxu2 %vm1204_vm1, %v1498_v54 }
 0x3f0   : > { %8280 = vmatmul.msk.bf16.gmra.mxu0 %vm1204_vm1, %v1757_v15  ;;  %2718 = vmax.xlane.f32.xlu1 %v2717_v52  ;;  %v10831_v15 = vpop.f32.mrf.mxu0 }
 0x3f1   : > { %v2197_v19 = vpop.xlane.xlu2 %2196  ;;  %v1942_v28 = vpop.xlane.xlu0 %1941  ;;  %15841 = vst [vmem:[#allocation22_spill] sm:$0xff] %v10831_v15 }
 0x3f2   : > { %v2217_v20 = vsub.f32 %v10627_v9, %v2197_v19  ;;  %v1962_v62 = vsub.f32 %v10615_v12, %v1942_v28  ;;  %v10833_v12 = vpop.f32.mrf.mxu1 }
 0x3f4   : > { %v2226_v54 = vmul.f32 1.442695, %v2217_v20  ;;  %v1971_v0 = vmul.f32 1.442695, %v1962_v62  ;;  %1472 = vadd.xlane.f32.xlu0 %v1471_v49  ;;  %v9272_v52 = vpop.eup %9271 }
 0x3f6   : > { %9273 = vpow2.f32 %v2226_v54  ;;  %v1973_v54 = vmul.f32 1.442695, %v1963_v14 }
 0x3f7   : > { %9275 = vpow2.f32 %v1971_v0 }
 0x3f8   : > { %2724 = vmax.xlane.f32.xlu1 %v2723_v3  ;;  %9277 = vpow2.f32 %v1973_v54 }
 0x3f9   : > { %v2200_v9 = vpop.xlane.xlu0 %2199 }
 0x3fa   : > { %v2218_v20 = vsub.f32 %v10635_v40, %v2200_v9  ;;  %v10854_v14 = vpop.f32.mrf.mxu1 }
 0x3fb   : > { %v1951_v49 = vpop.xlane.xlu1 %1950 }
 0x3fc   : > { %v10839_v19 = vpop.eup %9273  ;;  %1734 = vadd.xlane.f32.xlu0 %v1733_v33  ;;  %v2228_v3 = vmul.f32 1.442695, %v2218_v20  ;;  %v10850_v33 = vpop.f32.mrf.mxu0 }
 0x3fd   : > { %v9276_v0 = vpop.eup %9275  ;;  %v2264_v28 = vpack.c.bf16 %v10839_v19, %v9272_v52 }
 0x3fe   : > { %v2009_v62 = vpack.c.bf16 %v9276_v0, %v10835_v37  ;;  %9279 = vpow2.f32 %v2228_v3 }
 0x400   : > { %8285 = vmatmul.msk.bf16.vlgmr.msra.gmra.mxu2 %vm1204_vm1, %v2009_v62  ;;  %8293 = vmatmul.msk.bf16.vlgmr.msrb.gmra.mxu0 %vm1204_vm1, %v2264_v28  ;;  %v2240_v62 = vsel %vm1204_vm1, %v9272_v52, 0.0  ;;  %v2960_v52 = vsel %vm1204_vm1, %v10833_v12, -inf }
 0x401   : > { %3061 = vmatpush.bf16.msra.mxu2 %v10485_v36  ;;  %1731 = vadd.xlane.f32.xlu1 %v1730_v30  ;;  %v2203_v17 = vpop.xlane.xlu2 %2202  ;;  %v1948_v48 = vpop.xlane.xlu0 %1947  ;;  %v1988_v36 = vsel %vm1204_vm1, %v9276_v0, 0.0 }
 0x402   : > { %v2219_v40 = vsub.f32 %v10645_v22, %v2203_v17  ;;  %v1964_v9 = vsub.f32 %v10633_v60, %v1948_v48  ;;  %v10859_v22 = vpop.eup %9277  ;;  %v10872_v0 = vpop.f32.mrf.mxu1  ;;  %v2456_v48 = vsel %vm1204_vm1, %v10713_v25, -inf }
 0x403   : > { %v1954_v50 = vpop.xlane.xlu1 %1953 }
 0x404   : > { %v2230_v28 = vmul.f32 1.442695, %v2219_v40  ;;  %v1975_v15 = vmul.f32 1.442695, %v1964_v9  ;;  %2241 = vadd.xlane.f32.xlu0 %v2240_v62  ;;  %v10861_v20 = vpop.eup %9279  ;;  %v10867_v30 = vpop.f32.mrf.mxu0  ;;  %v1965_v9 = vsub.f32 %v10639_v41, %v1951_v49 }
 0x405   : > { %3062 = vmatpush.bf16.msra.mxu2 %v10481_v39  ;;  %15842 = vst [vmem:[#allocation24_spill] sm:$0xff] %v10867_v30  ;;  %v1966_v39 = vsub.f32 %v10651_v46, %v1954_v50 }
 0x406   : > { %9281 = vpow2.f32 %v2230_v28  ;;  %v1977_v50 = vmul.f32 1.442695, %v1965_v9 }
 0x407   : > { %9283 = vpow2.f32 %v1975_v15  ;;  %v1979_v46 = vmul.f32 1.442695, %v1966_v39  ;;  %v2459_v39 = vsel %vm1204_vm1, %v10725_v63, -inf }
 0x409   : > { %1989 = vadd.xlane.f32.xlu1 %v1988_v36  ;;  %v2206_v60 = vpop.xlane.xlu2 %2205  ;;  %9285 = vpow2.f32 %v1979_v46 }
 0x40a   : > { %v2220_v3 = vsub.f32 %v10655_v56, %v2206_v60  ;;  %v2963_v56 = vsel %vm1204_vm1, %v10854_v14, -inf  ;;  %v1480_v60 = vsel %vm1204_vm1, %v10737_v35, 0.0 }
 0x40c   : > { %v10865_v54 = vpop.eup %9281  ;;  %2961 = vmax.xlane.f32.xlu0 %v2960_v52  ;;  %v2232_v62 = vmul.f32 1.442695, %v2220_v3  ;;  %v10889_v52 = vpop.f32.mrf.mxu0 }
 0x40d   : > { %v10870_v15 = vpop.eup %9283  ;;  %v2265_v17 = vpack.c.bf16 %v10865_v54, %v10861_v20  ;;  %15843 = vst [vmem:[#allocation23_spill] sm:$0xff] %v10889_v52  ;;  %v10893_v3 = vpop.f32.mrf.mxu1 }
 0x40e   : > { %v2010_v40 = vpack.c.bf16 %v10870_v15, %v10859_v22  ;;  %9287 = vpow2.f32 %v2232_v62 }
 0x40f   : > { %2457 = vmax.xlane.f32.xlu2 %v2456_v48 }
 0x410   : > { %8286 = vmatmul.msk.bf16.gmra.mxu2 %vm1204_vm1, %v2010_v40  ;;  %8294 = vmatmul.msk.bf16.gmra.mxu0 %vm1204_vm1, %v2265_v17  ;;  %v10899_v17 = vpop.eup %9285  ;;  %v2966_v40 = vsel %vm1204_vm1, %v10872_v0, -inf }
 0x411   : > { %2964 = vmax.xlane.f32.xlu1 %v2963_v56  ;;  %v2209_v28 = vpop.xlane.xlu1 %2208 }
 0x412   : > { %v2221_v36 = vsub.f32 %v10663_v53, %v2209_v28  ;;  %v1477_v53 = vsel %vm1204_vm1, %v10732_v43, 0.0  ;;  %v2462_v43 = vsel %vm1204_vm1, %v10748_v45, -inf }
 0x414   : > { %v2234_v41 = vmul.f32 1.442695, %v2221_v36  ;;  %1481 = vadd.xlane.f32.xlu0 %v1480_v60  ;;  %v2785_v49 = vpop.permute.xlu0 %2784  ;;  %v10901_v48 = vpop.eup %9287  ;;  %v1739_v36 = vsel %vm1204_vm1, %v10743_v32, 0.0 }
 0x415   : > { %2806 = vmatpush.bf16.msra.mxu0 %v2785_v49  ;;  %v10915_v28 = vpop.f32.mrf.mxu0  ;;  %v2465_v49 = vsel %vm1204_vm1, %v10761_v21, -inf }
 0x416   : > { %9289 = vpow2.f32 %v2234_v41  ;;  %15844 = vst [vmem:[#allocation21_spill] sm:$0xff] %v10915_v28  ;;  %v2969_v41 = vsel %vm1204_vm1, %v10893_v3, -inf }
 0x417   : > { %9291 = vpow2.f32 %v1977_v50  ;;  %2460 = vmax.xlane.f32.xlu2 %v2459_v39  ;;  %v10921_v50 = vpop.f32.mrf.mxu1 }
 0x418   : > { %v2972_v39 = vsel %vm1204_vm1, %v10921_v50, -inf }
 0x419   : > { %1478 = vadd.xlane.f32.xlu1 %v1477_v53  ;;  %v10897_v35 = vpop.xlane.xlu2 %2211 }
 0x41c   : > { %v10905_v9 = vpop.eup %9289  ;;  %2967 = vmax.xlane.f32.xlu0 %v2966_v40 }
 0x41d   : > { %v10907_v46 = vpop.eup %9291  ;;  %v2266_v56 = vpack.c.bf16 %v10905_v9, %v10901_v48  ;;  %v10929_v40 = vpop.f32.mrf.mxu0 }
 0x41e   : > { %v2011_v62 = vpack.c.bf16 %v10899_v17, %v10907_v46  ;;  %15845 = vst [vmem:[#allocation31_spill] sm:$0xff] %v10929_v40  ;;  %v2708_v40 = vsel %vm1204_vm1, %v10723_v51, -inf }
 0x41f   : > { %2463 = vmax.xlane.f32.xlu2 %v2462_v43  ;;  %v10931_v32 = vpop.f32.mrf.mxu1  ;;  %v2957_v43 = vsel %vm1204_vm1, %v10817_v7, -inf }
 0x420   : > { %8287 = vmatmul.msk.bf16.gmra.mxu2 %vm1204_vm1, %v2011_v62  ;;  %8295 = vmatmul.msk.bf16.gmra.mxu0 %vm1204_vm1, %v2266_v56  ;;  %v1991_v56 = vsel %vm1204_vm1, %v10859_v22, 0.0  ;;  %v1957_v62 = vpop.xlane.xlu1 %1956 }
 0x421   : > { %1740 = vadd.xlane.f32.xlu1 %v1739_v36  ;;  %v2449_v60 = vpop.xlane.xlu2 %2448 }
 0x422   : > { %v2471_v36 = vsub.f32 %v10677_v44, %v2449_v60 }
 0x424   : > { %2970 = vmax.xlane.f32.xlu0 %v2969_v41  ;;  %v2246_v41 = vsel %vm1204_vm1, %v10861_v20, 0.0 }
 0x425   : > { %v10942_v22 = vpop.f32.mrf.mxu0 }
 0x426   : > { %15846 = vst [vmem:[#allocation32_spill] sm:$0xff] %v10942_v22 }
 0x427   : > { %2466 = vmax.xlane.f32.xlu2 %v2465_v49 }
 0x428   : > { %v2452_v44 = vpop.xlane.xlu1 %2451 }
 0x429   : > { %2973 = vmax.xlane.f32.xlu1 %v2972_v39  ;;  %v3036_v53 = vpop.permute.xlu2 %3035  ;;  %v2479_v39 = vmul.f32 1.442695, %v2471_v36  ;;  %v1967_v36 = vsub.f32 %v10659_v59, %v1957_v62 }
 0x42a   : > { %3063 = vmatpush.bf16.msra.mxu2 %v3036_v53  ;;  %v2975_v53 = vsel %vm1204_vm1, %v10931_v32, -inf }
 0x42b   : > { %9293 = vpow2.f32 %v2479_v39  ;;  %v1981_v22 = vmul.f32 1.442695, %v1967_v36 }
 0x42c   : > { %1992 = vadd.xlane.f32.xlu0 %v1991_v56  ;;  %v10944_v56 = vpop.f32.mrf.mxu1 }
 0x42d   : > { %v2978_v20 = vsel %vm1204_vm1, %v10944_v56, -inf  ;;  %v10958_v39 = vpop.f32.mrf.mxu0 }
 0x42e   : > { %15847 = vst [vmem:[#allocation33_spill] sm:$0xff] %v10958_v39 }
 0x42f   : > { %2958 = vmax.xlane.f32.xlu2 %v2957_v43  ;;  %v2472_v43 = vsub.f32 %v10685_v18, %v2452_v44 }
 0x430   : > { %v10963_v62 = vpop.xlane.xlu1 %2454 }
 0x431   : > { %2247 = vadd.xlane.f32.xlu1 %v2246_v41  ;;  %v2783_v49 = vpop.permute.xlu2 %2782  ;;  %v2249_v41 = vsel %vm1204_vm1, %v10865_v54, 0.0 }
 0x432   : > { %2807 = vmatpush.bf16.msra.mxu0 %v2783_v49  ;;  %v10954_v49 = vpop.eup %9293 }
 0x433   : > { %v2495_v59 = vsel %vm1204_vm1, %v10954_v49, 0.0 }
 0x434   : > { %2976 = vmax.xlane.f32.xlu0 %v2975_v53  ;;  %v2481_v53 = vmul.f32 1.442695, %v2472_v43 }
 0x436   : > { %9295 = vpow2.f32 %v2481_v53 }
 0x437   : > { %2709 = vmax.xlane.f32.xlu2 %v2708_v40  ;;  %v1474_v40 = vsel %vm1204_vm1, %v10701_v26, 0.0  ;;  %v2222_v26 = vsub.f32 %v10671_v34, %v10897_v35  ;;  %9297 = vpow2.f32 %v1981_v22  ;;  %v1486_v34 = vsel %vm1204_vm1, %v10767_v1, 0.0 }
 0x439   : > { %2979 = vmax.xlane.f32.xlu1 %v2978_v20  ;;  %v3034_v60 = vpop.permute.xlu2 %3033  ;;  %v2236_v43 = vmul.f32 1.442695, %v2222_v26 }
 0x43a   : > { %3064 = vmatpush.bf16.msra.mxu2 %v3034_v60  ;;  %v1742_v60 = vsel %vm1204_vm1, %v10769_v24, 0.0 }
 0x43c   : > { %2250 = vadd.xlane.f32.xlu0 %v2249_v41  ;;  %v9296_v53 = vpop.eup %9295 }
 0x43d   : > { %v10971_v36 = vpop.f32.mrf.mxu0  ;;  %v10976_v35 = vpop.eup %9297 }
 0x43f   : > { %1475 = vadd.xlane.f32.xlu2 %v1474_v40  ;;  %v1960_v20 = vpop.xlane.xlu0 %1959 }
 0x440   : > { %v1968_v18 = vsub.f32 %v10667_v47, %v1960_v20  ;;  %v1985_v47 = vsel %vm1204_vm1, %v10835_v37, 0.0  ;;  %v2704_v37 = vpop.xlane.xlu1 %2703 }
 0x441   : > { %2496 = vadd.xlane.f32.xlu1 %v2495_v59  ;;  %v2781_v54 = vpop.permute.xlu2 %2780 }
 0x442   : > { %v1983_v44 = vmul.f32 1.442695, %v1968_v18  ;;  %2808 = vmatpush.bf16.msra.mxu0 %v2781_v54  ;;  %v2498_v18 = vsel %vm1204_vm1, %v9296_v53, 0.0 }
 0x444   : > { %9299 = vpow2.f32 %v1983_v44  ;;  %1743 = vadd.xlane.f32.xlu0 %v1742_v60 }
 0x445   : > { %9301 = vpow2.f32 %v2236_v43  ;;  %v10989_v26 = vpop.f32.mrf.mxu0 }
 0x447   : > { %1986 = vadd.xlane.f32.xlu2 %v1985_v47  ;;  %v2215_v41 = vpop.xlane.xlu0 %2214 }
 0x448   : > { %v2223_v40 = vsub.f32 %v10680_v4, %v2215_v41  ;;  %v2243_v4 = vsel %vm1204_vm1, %v10839_v19, 0.0 }
 0x449   : > { %1487 = vadd.xlane.f32.xlu1 %v1486_v34  ;;  %v2779_v24 = vpop.permute.xlu2 %2778 }
 0x44a   : > { %v10978_v22 = vpop.eup %9299  ;;  %v2238_v20 = vmul.f32 1.442695, %v2223_v40  ;;  %2809 = vmatpush.bf16.msra.mxu0 %v2779_v24  ;;  %v2726_v40 = vsub.f32 %v10691_v5, %v2704_v37  ;;  %v2519_v24 = vpack.c.bf16 %v9296_v53, %v10954_v49  ;;  %v1994_v5 = vsel %vm1204_vm1, %v10870_v15, 0.0 }
 0x44b   : > { %v2012_v59 = vpack.c.bf16 %v10978_v22, %v10976_v35  ;;  %v10987_v44 = vpop.eup %9301  ;;  %v2473_v49 = vsub.f32 %v10693_v55, %v10963_v62 }
 0x44c   : > { %9303 = vpow2.f32 %v2238_v20  ;;  %2499 = vadd.xlane.f32.xlu0 %v2498_v18  ;;  %v2734_v19 = vmul.f32 1.442695, %v2726_v40 }
 0x44d   : > { %8288 = vmatmul.msk.bf16.gmra.mxu2 %vm1204_vm1, %v2012_v59  ;;  %v11002_v20 = vpop.f32.mrf.mxu0  ;;  %v2483_v15 = vmul.f32 1.442695, %v2473_v49 }
 0x44e   : > { %15848 = vst [vmem:[#allocation34_spill] sm:$0xff] %v11002_v20 }
 0x44f   : > { %2244 = vadd.xlane.f32.xlu2 %v2243_v4  ;;  %v2707_v1 = vpop.xlane.xlu0 %2706 }
 0x450   : > { %v2727_v54 = vsub.f32 %v10704_v27, %v2707_v1  ;;  %v1736_v27 = vsel %vm1204_vm1, %v10730_v42, 0.0  ;;  %v11008_v42 = vpop.f32.mrf.mxu2 }
 0x452   : > { %v10991_v60 = vpop.eup %9303  ;;  %v2736_v47 = vmul.f32 1.442695, %v2727_v54 }
 0x453   : > { %v10993_v43 = vpop.xlane.xlu1 %2469  ;;  %v2267_v41 = vpack.c.bf16 %v10991_v60, %v10987_v44 }
 0x454   : > { %9305 = vpow2.f32 %v2736_v47  ;;  %v1483_v47 = vsel %vm1204_vm1, %v10765_v8, 0.0 }
 0x455   : > { %8296 = vmatmul.msk.bf16.gmra.mxu0 %vm1204_vm1, %v2267_v41  ;;  %9307 = vpow2.f32 %v2734_v19  ;;  %v11014_v53 = vpop.f32.mrf.mxu0 }
 0x456   : > { %9309 = vpow2.f32 %v2483_v15 }
 0x457   : > { %1737 = vadd.xlane.f32.xlu2 %v1736_v27  ;;  %v11017_v54 = vpop.xlane.xlu0 %2715 }
 0x458   : > { %v11023_v40 = vpop.f32.mrf.mxu2 }
 0x45a   : > { %v9306_v34 = vpop.eup %9305 }
 0x45b   : > { %v2713_v18 = vpop.xlane.xlu1 %2712  ;;  %v2753_v59 = vsel %vm1204_vm1, %v9306_v34, 0.0  ;;  %v9308_v37 = vpop.eup %9307 }
 0x45c   : > { %2754 = vadd.xlane.f32.xlu1 %v2753_v59  ;;  %v2774_v4 = vpack.c.bf16 %v9306_v34, %v9308_v37  ;;  %v2750_v27 = vsel %vm1204_vm1, %v9308_v37, 0.0  ;;  %v9310_v62 = vpop.eup %9309 }
 0x45d   : > { %8301 = vmatmul.msk.bf16.vlgmr.msrb.gmra.mxu2 %vm1204_vm1, %v2519_v24  ;;  %v11026_v19 = vpop.f32.mrf.mxu0  ;;  %v2729_v24 = vsub.f32 %v10741_v29, %v2713_v18  ;;  %v2501_v8 = vsel %vm1204_vm1, %v9310_v62, 0.0 }
 0x45e   : > { %15849 = vst [vmem:[#allocation35_spill] sm:$0xff] %v11026_v19 }
 0x45f   : > { %1995 = vadd.xlane.f32.xlu2 %v1994_v5  ;;  %v11028_v55 = vpop.xlane.xlu0 %2721  ;;  %v2740_v5 = vmul.f32 1.442695, %v2729_v24 }
 0x460   : > { %v1541_v59 = vpop.f32.mrf.mxu2 }
 0x461   : > { %9311 = vpow2.f32 %v2740_v5 }
 0x463   : > { %v11010_v1 = vpop.xlane.xlu1 %2718 }
 0x465   : > { %8309 = vmatmul.msk.bf16.vlgmr.msra.gmra.mxu0 %vm1204_vm1, %v2774_v4  ;;  %v11034_v4 = vpop.f32.mrf.mxu0 }
 0x466   : > { %15850 = vst [vmem:[#allocation36_spill] sm:$0xff] %v11034_v4 }
 0x467   : > { %1484 = vadd.xlane.f32.xlu2 %v1483_v47  ;;  %v11036_v49 = vpop.xlane.xlu0 %1472  ;;  %v1745_v47 = vsel %vm1204_vm1, %v10773_v58, 0.0  ;;  %v11044_v29 = vpop.eup %9311 }
 0x468   : > { %v11042_v15 = vpop.f32.mrf.mxu2  ;;  %v2759_v5 = vsel %vm1204_vm1, %v11044_v29, 0.0 }
 0x46b   : > { %v11021_v41 = vpop.xlane.xlu1 %2724 }
 0x46d   : > { %v11046_v18 = vpop.f32.mrf.mxu0 }
 0x46e   : > { %15851 = vst [vmem:[#allocation37_spill] sm:$0xff] %v11046_v18 }
 0x46f   : > { %2751 = vadd.xlane.f32.xlu2 %v2750_v27 }
 0x474   : > { %v11030_v34 = vpop.xlane.xlu1 %1731 }
 0x475   : > { %v11057_v52 = vpop.f32.mrf.mxu0 }
 0x476   : > { %15853 = vst [vmem:[#allocation39_spill] sm:$0xff] %v11057_v52 }
 0x477   : > { %2502 = vadd.xlane.f32.xlu2 %v2501_v8  ;;  %v11049_v8 = vpop.xlane.xlu0 %1734 }
 0x47c   : > { %v11038_v37 = vpop.xlane.xlu1 %1989 }
 0x47f   : > { %1746 = vadd.xlane.f32.xlu2 %v1745_v47  ;;  %v11055_v47 = vpop.f32.mrf.mxu2  ;;  %v11059_v18 = vpop.xlane.xlu0 %2241 }
 0x480   : > { %15852 = vst [vmem:[#allocation38_spill] sm:$0xff] %v11055_v47 }
 0x482   : > { %v2458_v27 = vpop.xlane.xlu2 %2457 }
 0x483   : > { %v2474_v24 = vsub.f32 %v10713_v25, %v2458_v27  ;;  %v2252_v27 = vsel %vm1204_vm1, %v10901_v48, 0.0 }
 0x484   : > { %v11051_v39 = vpop.xlane.xlu1 %2964 }
 0x485   : > { %v2485_v28 = vmul.f32 1.442695, %v2474_v24 }
 0x487   : > { %9313 = vpow2.f32 %v2485_v28  ;;  %2760 = vadd.xlane.f32.xlu2 %v2759_v5  ;;  %v11073_v48 = vpop.f32.mrf.mxu2 }
 0x48a   : > { %v2461_v58 = vpop.xlane.xlu2 %2460 }
 0x48b   : > { %v2475_v25 = vsub.f32 %v10725_v63, %v2461_v58  ;;  %v2730_v63 = vsub.f32 %v10759_v38, %v11017_v54 }
 0x48c   : > { %v1479_v4 = vpop.xlane.xlu1 %1478 }
 0x48d   : > { %v9314_v19 = vpop.eup %9313  ;;  %9315 = vrcp.f32 %v1479_v4  ;;  %v2487_v28 = vmul.f32 1.442695, %v2475_v25 }
 0x48e   : > { %v2504_v24 = vsel %vm1204_vm1, %v9314_v19, 0.0  ;;  %v2520_v30 = vpack.c.bf16 %v9314_v19, %v9310_v62  ;;  %v1997_v19 = vsel %vm1204_vm1, %v10907_v46, 0.0  ;;  %v2962_v62 = vpop.xlane.xlu0 %2961  ;;  %v2255_v46 = vsel %vm1204_vm1, %v10905_v9, 0.0 }
 0x48f   : > { %2253 = vadd.xlane.f32.xlu2 %v2252_v27  ;;  %2505 = vadd.xlane.f32.xlu1 %v2504_v24  ;;  %9317 = vpow2.f32 %v2487_v28  ;;  %v2478_v28 = vsub.f32 %v10783_v10, %v10993_v43  ;;  %v1253_v10 = vsel %vm1204_vm1, %v10495_v6, 0.0 }
 0x490   : > { %8302 = vmatmul.msk.bf16.gmra.mxu2 %vm1204_vm1, %v2520_v30  ;;  %v11077_v30 = vpop.f32.mrf.mxu0 }
 0x492   : > { %v2464_v5 = vpop.xlane.xlu2 %2463 }
 0x493   : > { %v9316_v47 = vpop.eup %9315  ;;  %v2476_v52 = vsub.f32 %v10748_v45, %v2464_v5  ;;  %v2742_v45 = vmul.f32 1.442695, %v2730_v63  ;;  %v11091_v5 = vpop.f32.mrf.mxu2 }
 0x494   : > { %v11067_v4 = vpop.xlane.xlu1 %1740  ;;  %v11069_v20 = vmul.f32 %v9316_v47, %v1541_v59  ;;  %v2982_v59 = vsub.f32 %v10833_v12, %v2962_v62  ;;  %v2493_v62 = vmul.f32 1.442695, %v2478_v28 }
 0x495   : > { %v2489_v58 = vmul.f32 1.442695, %v2476_v52  ;;  %v11080_v47 = vpop.eup %9317 }
 0x496   : > { %v2991_v12 = vmul.f32 1.442695, %v2982_v59 }
 0x497   : > { %9319 = vpow2.f32 %v2489_v58  ;;  %1998 = vadd.xlane.f32.xlu1 %v1997_v19 }
 0x498   : > { %9321 = vpow2.f32 %v2742_v45  ;;  %v11094_v63 = vpop.f32.mrf.mxu0 }
 0x499   : > { %9323 = vpow2.f32 %v2991_v12 }
 0x49a   : > { %v2467_v25 = vpop.xlane.xlu2 %2466 }
 0x49b   : > { %v2477_v38 = vsub.f32 %v10761_v21, %v2467_v25  ;;  %v11102_v25 = vpop.f32.mrf.mxu2 }
 0x49c   : > { %v11083_v54 = vpop.xlane.xlu1 %2973 }
 0x49d   : > { %v9320_v52 = vpop.eup %9319  ;;  %v2491_v21 = vmul.f32 1.442695, %v2477_v38 }
 0x49e   : > { %v2510_v27 = vsel %vm1204_vm1, %v9320_v52, 0.0  ;;  %v2521_v24 = vpack.c.bf16 %v9320_v52, %v11080_v47  ;;  %v11096_v19 = vpop.eup %9321 }
 0x49f   : > { %2511 = vadd.xlane.f32.xlu2 %v2510_v27  ;;  %2256 = vadd.xlane.f32.xlu1 %v2255_v46  ;;  %9325 = vpow2.f32 %v2491_v21  ;;  %v2762_v43 = vsel %vm1204_vm1, %v11096_v19, 0.0  ;;  %v9324_v45 = vpop.eup %9323 }
 0x4a0   : > { %8303 = vmatmul.msk.bf16.gmra.mxu2 %vm1204_vm1, %v2521_v24  ;;  %v2306_v27 = vpop.f32.mrf.mxu0  ;;  %v2983_v24 = vsub.f32 %v10854_v14, %v11051_v39  ;;  %v11119_v14 = vpop.xlane.xlu0 %1481 }
 0x4a2   : > { %v2959_v58 = vpop.xlane.xlu2 %2958 }
 0x4a3   : > { %v2981_v12 = vsub.f32 %v10817_v7, %v2959_v58  ;;  %v11122_v7 = vpop.f32.mrf.mxu2 }
 0x4a4   : > { %v2248_v9 = vpop.xlane.xlu1 %2247 }
 0x4a5   : > { %9327 = vrcp.f32 %v2248_v9  ;;  %v11104_v59 = vpop.eup %9325  ;;  %v3008_v9 = vsel %vm1204_vm1, %v9324_v45, 0.0  ;;  %v2989_v39 = vmul.f32 1.442695, %v2981_v12 }
 0x4a6   : > { %9329 = vpow2.f32 %v2493_v62  ;;  %v1256_v62 = vsel %vm1204_vm1, %v10497_v13, 0.0  ;;  %v2731_v13 = vsub.f32 %v10781_v2, %v11010_v1 }
 0x4a7   : > { %1254 = vadd.xlane.f32.xlu2 %v1253_v10  ;;  %2763 = vadd.xlane.f32.xlu1 %v2762_v43 }
 0x4a8   : > { %v2968_v12 = vpop.xlane.xlu0 %2967 }
 0x4aa   : > { %v2710_v38 = vpop.xlane.xlu2 %2709 }
 0x4ab   : > { %v9328_v52 = vpop.eup %9327  ;;  %v2728_v46 = vsub.f32 %v10723_v51, %v2710_v38  ;;  %v2993_v51 = vmul.f32 1.442695, %v2983_v24  ;;  %v11136_v2 = vpop.f32.mrf.mxu2 }
 0x4ac   : > { %v11109_v6 = vmul.f32 %v9328_v52, %v2306_v27  ;;  %v11111_v28 = vpop.eup %9329  ;;  %v1489_v52 = vsel %vm1204_vm1, %v10801_v57, 0.0  ;;  %v2984_v57 = vsub.f32 %v10872_v0, %v2968_v12 }
 0x4ad   : > { %v2738_v21 = vmul.f32 1.442695, %v2728_v46  ;;  %v2522_v10 = vpack.c.bf16 %v11111_v28, %v11104_v59  ;;  %v2744_v46 = vmul.f32 1.442695, %v2731_v13  ;;  %v2732_v13 = vsub.f32 %v10799_v31, %v11028_v55 }
 0x4af   : > { %9331 = vpow2.f32 %v2738_v21  ;;  %1257 = vadd.xlane.f32.xlu1 %v1256_v62  ;;  %3009 = vadd.xlane.f32.xlu2 %v3008_v9 }
 0x4b0   : > { %8304 = vmatmul.msk.bf16.gmra.mxu2 %vm1204_vm1, %v2522_v10  ;;  %9333 = vpow2.f32 %v2993_v51  ;;  %v2995_v10 = vmul.f32 1.442695, %v2984_v57 }
 0x4b1   : > { %9335 = vpow2.f32 %v2989_v39 }
 0x4b2   : > { %v1476_v43 = vpop.xlane.xlu2 %1475  ;;  %9337 = vrcp.f32 %v11036_v49 }
 0x4b3   : > { %9339 = vpow2.f32 %v2744_v46 }
 0x4b4   : > { %9341 = vrcp.f32 %v11049_v8 }
 0x4b5   : > { %v9332_v58 = vpop.eup %9331  ;;  %9343 = vpow2.f32 %v2995_v10  ;;  %v2980_v10 = vpop.xlane.xlu1 %2979 }
 0x4b6   : > { %v2756_v38 = vsel %vm1204_vm1, %v9332_v58, 0.0  ;;  %v2775_v27 = vpack.c.bf16 %v11044_v29, %v9332_v58  ;;  %v9334_v24 = vpop.eup %9333  ;;  %v2000_v29 = vsel %vm1204_vm1, %v10899_v17, 0.0  ;;  %v2733_v58 = vsub.f32 %v10827_v16, %v11021_v41  ;;  %v2971_v16 = vpop.xlane.xlu0 %2970 }
 0x4b7   : > { %2757 = vadd.xlane.f32.xlu0 %v2756_v38  ;;  %1490 = vadd.xlane.f32.xlu1 %v1489_v52  ;;  %v11133_v62 = vpop.eup %9335  ;;  %v3011_v9 = vsel %vm1204_vm1, %v9334_v24, 0.0  ;;  %v2507_v17 = vsel %vm1204_vm1, %v11080_v47, 0.0  ;;  %v11155_v38 = vpop.f32.mrf.mxu2  ;;  %v2986_v47 = vsub.f32 %v10921_v50, %v11083_v54  ;;  %v2985_v46 = vsub.f32 %v10893_v3, %v2971_v16 }
 0x4b8   : > { %8310 = vmatmul.msk.bf16.gmra.mxu0 %vm1204_vm1, %v2775_v27  ;;  %v3029_v1 = vpack.c.bf16 %v9324_v45, %v11133_v62  ;;  %v9338_v51 = vpop.eup %9337  ;;  %v2748_v52 = vmul.f32 1.442695, %v2733_v58  ;;  %v2746_v27 = vmul.f32 1.442695, %v2732_v13  ;;  %v1492_v3 = vsel %vm1204_vm1, %v10807_v23, 0.0 }
 0x4b9   : > { %v9340_v49 = vpop.eup %9339  ;;  %v1564_v0 = vmul.f32 %v9338_v51, %v11008_v42  ;;  %v2999_v57 = vmul.f32 1.442695, %v2986_v47  ;;  %v2988_v23 = vsub.f32 %v10944_v56, %v2980_v10  ;;  %v1748_v47 = vsel %vm1204_vm1, %v10803_v61, 0.0 }
 0x4ba   : > { %v11131_v21 = vpop.xlane.xlu2 %1986  ;;  %v2776_v45 = vpack.c.bf16 %v9340_v49, %v11096_v19  ;;  %v9342_v41 = vpop.eup %9341  ;;  %9345 = vpow2.f32 %v2748_v52  ;;  %v2765_v55 = vsel %vm1204_vm1, %v9340_v49, 0.0 }
 0x4bb   : > { %v9344_v42 = vpop.eup %9343  ;;  %9347 = vrcp.f32 %v1476_v43  ;;  %v1820_v31 = vmul.f32 %v9342_v41, %v10989_v26  ;;  %v2997_v43 = vmul.f32 1.442695, %v2985_v46  ;;  %v3003_v52 = vmul.f32 1.442695, %v2988_v23 }
 0x4bc   : > { %v3030_v19 = vpack.c.bf16 %v9344_v42, %v9334_v24  ;;  %9349 = vpow2.f32 %v2746_v27 }
 0x4bd   : > { %9351 = vpow2.f32 %v2999_v57  ;;  %v2497_v56 = vpop.xlane.xlu1 %2496 }
 0x4be   : > { %v11172_v50 = vpop.xlane.xlu0 %1992  ;;  %9353 = vpow2.f32 %v2997_v43 }
 0x4bf   : > { %2001 = vadd.xlane.f32.xlu0 %v2000_v29  ;;  %3012 = vadd.xlane.f32.xlu1 %v3011_v9  ;;  %v11168_v12 = vpop.f32.mrf.mxu2  ;;  %9355 = vpow2.f32 %v3003_v52 }
 0x4c0   : > { %8317 = vmatmul.msk.bf16.vlgmr.msra.gmra.mxu2 %vm1204_vm1, %v3029_v1  ;;  %v11170_v1 = vpop.eup %9345 }
 0x4c1   : > { %v9348_v26 = vpop.eup %9347 }
 0x4c2   : > { %v11144_v39 = vpop.xlane.xlu2 %2244  ;;  %v11176_v24 = vpop.eup %9349  ;;  %v1565_v29 = vmul.f32 %v9348_v26, %v11023_v40  ;;  %v3005_v40 = vsel %vm1204_vm1, %v11133_v62, 0.0  ;;  %v3014_v26 = vsel %vm1204_vm1, %v9344_v42, 0.0  ;;  %v2003_v42 = vsel %vm1204_vm1, %v10976_v35, 0.0 }
 0x4c3   : > { %v2777_v9 = vpack.c.bf16 %v11170_v1, %v11176_v24  ;;  %v9352_v49 = vpop.eup %9351 }
 0x4c5   : > { %v11211_v61 = vpop.xlane.xlu1 %1487 }
 0x4c7   : > { %2508 = vadd.xlane.f32.xlu0 %v2507_v17  ;;  %1580 = vrot.lane.b32.xlu2 %v1564_v0, %s9749_s21  ;;  %v11187_v58 = vpop.f32.mrf.mxu2  ;;  %v2977_v0 = vpop.xlane.xlu0 %2976 }
 0x4c8   : > { %8311 = vmatmul.msk.bf16.gmra.mxu0 %vm1204_vm1, %v2776_v45  ;;  %v9354_v17 = vpop.eup %9353  ;;  %v2987_v13 = vsub.f32 %v10931_v32, %v2977_v0 }
 0x4c9   : > { %v3031_v45 = vpack.c.bf16 %v9352_v49, %v9354_v17  ;;  %v11200_v62 = vpop.eup %9355 }
 0x4ca   : > { %v11159_v8 = vpop.xlane.xlu2 %1737  ;;  %v3001_v41 = vmul.f32 1.442695, %v2987_v13 }
 0x4cc   : > { %9357 = vpow2.f32 %v3001_v41 }
 0x4cd   : > { %9359 = vrcp.f32 %v11030_v34 }
 0x4ce   : > { %9361 = vrcp.f32 %v11059_v18 }
 0x4cf   : > { %2766 = vadd.xlane.f32.xlu0 %v2765_v55  ;;  %1837 = vrot.lane.b32.xlu2 %v1820_v31, %s9750_s28  ;;  %v11196_v27 = vpop.f32.mrf.mxu2  ;;  %v11240_v35 = vpop.xlane.xlu0 %2250 }
 0x4d0   : > { %8318 = vmatmul.msk.bf16.gmra.mxu2 %vm1204_vm1, %v3030_v19  ;;  %v1751_v19 = vsel %vm1204_vm1, %v10810_v11, 0.0  ;;  %v3017_v11 = vsel %vm1204_vm1, %v9354_v17, 0.0 }
 0x4d2   : > { %v11174_v54 = vpop.xlane.xlu2 %1995  ;;  %v11202_v32 = vpop.eup %9357 }
 0x4d3   : > { %v3032_v46 = vpack.c.bf16 %v11200_v62, %v11202_v32 }
 0x4d7   : > { %1493 = vadd.xlane.f32.xlu0 %v1492_v3  ;;  %v11204_v55 = vpop.f32.mrf.mxu2  ;;  %v3020_v3 = vsel %vm1204_vm1, %v9352_v49, 0.0  ;;  %v2261_v49 = vsel %vm1204_vm1, %v10991_v60, 0.0 }
 0x4d8   : > { %1582 = vrot.lane.b32.xlu1 %v1565_v29, %s9749_s21  ;;  %8312 = vmatmul.msk.bf16.gmra.mxu0 %vm1204_vm1, %v2777_v9  ;;  %15854 = vst [vmem:[#allocation40_spill] sm:$0xff] %v11204_v55  ;;  %v11219_v29 = vpop.xlane.xlu1 %2754  ;;  %v2006_v9 = vsel %vm1204_vm1, %v10978_v22, 0.0 }
 0x4da   : > { %v11185_v51 = vpop.xlane.xlu2 %1484 }
 0x4df   : > { %3006 = vadd.xlane.f32.xlu0 %v3005_v40  ;;  %v11216_v43 = vpop.f32.mrf.mxu2 }
 0x4e0   : > { %8319 = vmatmul.msk.bf16.gmra.mxu2 %vm1204_vm1, %v3031_v45  ;;  %15855 = vst [vmem:[#allocation41_spill] sm:$0xff] %v11216_v43  ;;  %v9360_v45 = vpop.eup %9359 }
 0x4e1   : > { %v1819_v34 = vmul.f32 %v9360_v45, %v10971_v36  ;;  %v9362_v13 = vpop.eup %9361 }
 0x4e2   : > { %v11194_v16 = vpop.xlane.xlu2 %2751 }
 0x4e7   : > { %1749 = vadd.xlane.f32.xlu0 %v1748_v47  ;;  %v2556_v0 = vpop.f32.mrf.mxu2 }
 0x4ea   : > { %v2503_v31 = vpop.xlane.xlu2 %2502 }
 0x4eb   : > { %9363 = vrcp.f32 %v2503_v31  ;;  %v2329_v31 = vmul.f32 %v9362_v13, %v11077_v30 }
 0x4ec   : > { %9365 = vrcp.f32 %v11131_v21  ;;  %v11254_v21 = vpop.xlane.xlu0 %1743 }
 0x4ed   : > { %9367 = vrcp.f32 %v11144_v39 }
 0x4ee   : > { %9369 = vrcp.f32 %v11038_v37 }
 0x4ef   : > { %1752 = vadd.xlane.f32.xlu0 %v1751_v19  ;;  %v11237_v22 = vpop.f32.mrf.mxu2 }
 0x4f0   : > { %8320 = vmatmul.msk.bf16.gmra.mxu2 %vm1204_vm1, %v3032_v46 }
 0x4f1   : > { %v9364_v41 = vpop.eup %9363 }
 0x4f2   : > { %v11213_v57 = vpop.xlane.xlu2 %1746  ;;  %v9366_v18 = vpop.eup %9365 }
 0x4f3   : > { %v2074_v36 = vmul.f32 %v9366_v18, %v11122_v7  ;;  %v15856_v7 = vld [vmem:[#allocation22_spill] sm:$0xff] }
 0x4f4   : > { %v2500_v37 = vpop.xlane.xlu0 %2499 }
 0x4f7   : > { %3015 = vadd.xlane.f32.xlu0 %v3014_v26 }
 0x4f8   : > { %3021 = vadd.xlane.f32.xlu2 %v3020_v3  ;;  %v9368_v3 = vpop.eup %9367 }
 0x4f9   : > { %v2330_v39 = vmul.f32 %v9368_v3, %v11094_v63 }
 0x4fa   : > { %v11224_v10 = vpop.xlane.xlu2 %2760 }
 0x4ff   : > { %3018 = vadd.xlane.f32.xlu0 %v3017_v11  ;;  %v9370_v11 = vpop.eup %9369 }
 0x500   : > { %2007 = vadd.xlane.f32.xlu2 %v2006_v9  ;;  %v2075_v30 = vmul.f32 %v9370_v11, %v11136_v2 }
 0x502   : > { %v11228_v23 = vpop.xlane.xlu1 %2505  ;;  %2004 = vadd.xlane.f32.xlu1 %v2003_v42  ;;  %v11233_v17 = vpop.xlane.xlu2 %2253 }
 0x50a   : > { %v11235_v40 = vpop.xlane.xlu1 %1998  ;;  %2262 = vadd.xlane.f32.xlu1 %v2261_v49 }
 0x512   : > { %v11244_v52 = vpop.xlane.xlu2 %2511  ;;  %v11246_v60 = vpop.xlane.xlu1 %2256 }
 0x513   : > { %v2561_v47 = vpop.f32.mrf.mxu2  ;;  %1835 = vrot.lane.b32.xlu0 %v1819_v34, %s9750_s28 }
 0x514   : > { %v11249_v19 = vmul.f32 %v9364_v41, %v2561_v47  ;;  %v11269_v41 = vpop.f32.mrf.mxu0 }
 0x518   : > { %2345 = vrot.lane.b32.xlu2 %v2329_v31, %s9747_s24 }
 0x51a   : > { %v1255_v46 = vpop.xlane.xlu2 %1254  ;;  %v11258_v26 = vpop.xlane.xlu1 %2763 }
 0x51b   : > { %9371 = vrcp.f32 %v1255_v46  ;;  %2090 = vrot.lane.b32.xlu0 %v2074_v36, %s9748_s4  ;;  %v11281_v36 = vpop.f32.mrf.mxu2 }
 0x51c   : > { %9373 = vrcp.f32 %v2497_v56  ;;  %v11279_v31 = vpop.f32.mrf.mxu0 }
 0x521   : > { %v9372_v9 = vpop.eup %9371 }
 0x522   : > { %v1258_v42 = vpop.xlane.xlu1 %1257  ;;  %v11263_v49 = vpop.xlane.xlu2 %3009  ;;  %v1330_v45 = vmul.f32 %v9372_v9, %v15856_v7 }
 0x523   : > { %9375 = vrcp.f32 %v1258_v42  ;;  %2347 = vrot.lane.b32.xlu1 %v2330_v39, %s9747_s24  ;;  %2092 = vrot.lane.b32.xlu0 %v2075_v30, %s9748_s4  ;;  %v9374_v34 = vpop.eup %9373  ;;  %v2566_v9 = vpop.f32.mrf.mxu2 }
 0x524   : > { %1338 = vst.msk [vmem:[#allocation3] sm:$0xff] %vm1150_vm0, %v1330_v45  ;;  %v2584_v2 = vmul.f32 %v9374_v34, %v2556_v0  ;;  %v11285_v3 = vpop.f32.mrf.mxu0  ;;  %v15857_v45 = vld [vmem:[#allocation25_spill] sm:$0xff] }
 0x525   : > { %v1259_v34 = vsel %vm1204_vm1, %v15857_v45, 0.0  ;;  %v2516_v45 = vsel %vm1204_vm1, %v11111_v28, 0.0 }
 0x529   : > { %v9376_v13 = vpop.eup %9375 }
 0x52a   : > { %v1581_v63 = vpop.permute.xlu2 %1580  ;;  %v1331_v56 = vmul.f32 %v9376_v13, %v10850_v33  ;;  %v11273_v47 = vpop.xlane.xlu0 %2757  ;;  %v2513_v33 = vsel %vm1204_vm1, %v11104_v59, 0.0 }
 0x52b   : > { %1605 = vst.msk [vmem:[#allocation3] sm:$0xff] %vm1604_vm2, %v1581_v63  ;;  %2600 = vrot.lane.b32.xlu1 %v2584_v2, %s9745_s17  ;;  %v11283_v0 = vpop.xlane.xlu1 %1490  ;;  %v2258_v63 = vsel %vm1204_vm1, %v10987_v44, 0.0 }
 0x52c   : > { %1339 = vst.msk [vmem:[#allocation3 + $0x8] sm:$0xff] %vm1150_vm0, %v1331_v56  ;;  %v11295_v7 = vpop.f32.mrf.mxu0 }
 0x532   : > { %v11277_v18 = vpop.xlane.xlu0 %2001  ;;  %v1838_v2 = vpop.permute.xlu2 %1837 }
 0x533   : > { %v11289_v30 = vpop.xlane.xlu1 %3012 }
 0x534   : > { %v11305_v56 = vpop.f32.mrf.mxu0 }
 0x535   : > { %15858 = vst [vmem:[#allocation22_spill] sm:$0xff] %v11305_v56 }
 0x53a   : > { %v2509_v46 = vpop.xlane.xlu0 %2508 }
 0x53b   : > { %9377 = vrcp.f32 %v2509_v46  ;;  %v11307_v46 = vpop.f32.mrf.mxu2 }
 0x53c   : > { %v2811_v44 = vpop.f32.mrf.mxu0  ;;  %9379 = vrcp.f32 %v2500_v37 }
 0x53d   : > { %9381 = vrcp.f32 %v11219_v29 }
 0x53e   : > { %9383 = vrcp.f32 %v11194_v16 }
 0x541   : > { %2514 = vadd.xlane.f32.xlu2 %v2513_v33  ;;  %v9378_v11 = vpop.eup %9377  ;;  %v15859_v33 = vld [vmem:[#allocation26_spill] sm:$0xff] }
 0x542   : > { %v11291_v39 = vpop.xlane.xlu0 %2766  ;;  %v11293_v42 = vmul.f32 %v9378_v11, %v2566_v9  ;;  %v1262_v11 = vsel %vm1204_vm1, %v15859_v33, 0.0  ;;  %v2768_v9 = vsel %vm1204_vm1, %v11176_v24, 0.0  ;;  %v9380_v24 = vpop.eup %9379 }
 0x543   : > { %v2585_v28 = vmul.f32 %v9380_v24, %v11237_v22 }
 0x549   : > { %1260 = vadd.xlane.f32.xlu2 %v1259_v34 }
 0x54a   : > { %v1583_v13 = vpop.permute.xlu1 %1582  ;;  %v11300_v59 = vpop.xlane.xlu0 %1493 }
 0x54b   : > { %1606 = vst.msk [vmem:[#allocation3 + $0x8] sm:$0xff] %vm1604_vm2, %v1583_v13  ;;  %v11315_v13 = vpop.f32.mrf.mxu2 }
 0x54c   : > { %1861 = vst.msk [vmem:[#allocation3 + $0x8] sm:$0xff] %vm1859_vm3, %v1838_v2 }
 0x54d   : > { %2259 = vadd.xlane.f32.xlu0 %v2258_v63  ;;  %v2813_v63 = vpop.f32.mrf.mxu0 }
 0x551   : > { %1263 = vadd.xlane.f32.xlu2 %v1262_v11  ;;  %v9382_v11 = vpop.eup %9381 }
 0x552   : > { %v3007_v34 = vpop.xlane.xlu0 %3006 }
 0x553   : > { %v11321_v33 = vpop.f32.mrf.mxu2  ;;  %9385 = vrcp.f32 %v3007_v34 }
 0x554   : > { %9387 = vrcp.f32 %v11119_v14 }
 0x555   : > { %2769 = vadd.xlane.f32.xlu1 %v2768_v9  ;;  %2517 = vadd.xlane.f32.xlu0 %v2516_v45  ;;  %v2840_v9 = vmul.f32 %v9382_v11, %v2813_v63  ;;  %v9384_v45 = vpop.eup %9383  ;;  %9389 = vrcp.f32 %v11067_v4 }
 0x556   : > { %v2839_v29 = vmul.f32 %v9384_v45, %v2811_v44  ;;  %9391 = vrcp.f32 %v11174_v54 }
 0x557   : > { %9393 = vrcp.f32 %v11240_v35  ;;  %v3026_v35 = vsel %vm1204_vm1, %v11200_v62, 0.0 }
 0x558   : > { %9395 = vrcp.f32 %v11263_v49 }
 0x559   : > { %v9386_v37 = vpop.eup %9385  ;;  %9397 = vrcp.f32 %v11159_v8 }
 0x55a   : > { %v11317_v2 = vpop.xlane.xlu0 %1749  ;;  %v9388_v34 = vpop.eup %9387  ;;  %9399 = vrcp.f32 %v11273_v47 }
 0x55b   : > { %v3066_v43 = vpop.f32.mrf.mxu2  ;;  %v1567_v44 = vmul.f32 %v9388_v34, %v11042_v15  ;;  %v9390_v24 = vpop.eup %9389  ;;  %9401 = vrcp.f32 %v11172_v50 }
 0x55c   : > { %v3094_v16 = vmul.f32 %v9386_v37, %v3066_v43  ;;  %v9392_v4 = vpop.eup %9391  ;;  %9403 = vrcp.f32 %v11224_v10 }
 0x55d   : > { %v2077_v45 = vmul.f32 %v9392_v4, %v11168_v12  ;;  %v9394_v54 = vpop.eup %9393  ;;  %v3023_v12 = vsel %vm1204_vm1, %v11202_v32, 0.0 }
 0x562   : > { %v11324_v56 = vpop.xlane.xlu0 %1752 }
 0x563   : > { %v3068_v34 = vpop.f32.mrf.mxu2 }
 0x569   : > { %2857 = vrot.lane.b32.xlu2 %v2840_v9, %s9746_s5  ;;  %2602 = vrot.lane.b32.xlu0 %v2585_v28, %s9745_s17 }
 0x56a   : > { %v11330_v55 = vpop.xlane.xlu0 %3015 }
 0x56b   : > { %v11335_v22 = vpop.xlane.xlu2 %3021 }
 0x56e   : > { %2855 = vrot.lane.b32.xlu1 %v2839_v29, %s9746_s5 }
 0x571   : > { %3110 = vrot.lane.b32.xlu2 %v3094_v16, %s9744_s22  ;;  %v2332_v16 = vmul.f32 %v9394_v54, %v11269_v41  ;;  %v2816_v41 = vpop.f32.mrf.mxu0  ;;  %v3071_v54 = vpop.f32.mrf.mxu2 }
 0x572   : > { %v11337_v63 = vpop.xlane.xlu0 %3018 }
 0x573   : > { %v11344_v11 = vpop.xlane.xlu2 %2007 }
 0x575   : > { %v11342_v43 = vpop.xlane.xlu1 %2004 }
 0x579   : > { %1584 = vrot.lane.b32.xlu2 %v11069_v20, %s9749_s21  ;;  %v1822_v20 = vmul.f32 %v9390_v24, %v11014_v53  ;;  %v2771_v53 = vsel %vm1204_vm1, %v11170_v1, 0.0  ;;  %v2818_v47 = vpop.f32.mrf.mxu0 }
 0x57b   : > { %v2346_v9 = vpop.permute.xlu2 %2345 }
 0x57d   : > { %v11350_v15 = vpop.xlane.xlu1 %2262 }
 0x581   : > { %1586 = vrot.lane.b32.xlu2 %v1567_v44, %s9749_s21  ;;  %v9396_v44 = vpop.eup %9395 }
 0x582   : > { %v3095_v62 = vmul.f32 %v9396_v44, %v3068_v34  ;;  %v9398_v32 = vpop.eup %9397  ;;  %v15863_v44 = vld [vmem:[#allocation23_spill] sm:$0xff] }
 0x585   : > { %v1836_v14 = vpop.permute.xlu0 %1835 }
 0x586   : > { %1860 = vst.msk [vmem:[#allocation3] sm:$0xff] %vm1859_vm3, %v1836_v14  ;;  %v15860_v14 = vld [vmem:[#allocation34_spill] sm:$0xff] }
 0x587   : > { %v1821_v49 = vmul.f32 %v9398_v32, %v15860_v14 }
 0x589   : > { %1841 = vrot.lane.b32.xlu2 %v1822_v20, %s9750_s28  ;;  %v9400_v20 = vpop.eup %9399 }
 0x58a   : > { %v2841_v4 = vmul.f32 %v9400_v20, %v2816_v41  ;;  %v9402_v8 = vpop.eup %9401 }
 0x58d   : > { %v2091_v28 = vpop.permute.xlu0 %2090 }
 0x58e   : > { %2115 = vst.msk [vmem:[#allocation3] sm:$0xff] %vm2114_vm4, %v2091_v28 }
 0x58f   : > { %2370 = vst.msk [vmem:[#allocation3] sm:$0xff] %vm2369_vm5, %v2346_v9  ;;  %v9404_v9 = vpop.eup %9403 }
 0x590   : > { %v2842_v50 = vmul.f32 %v9404_v9, %v2818_v47 }
 0x591   : > { %2096 = vrot.lane.b32.xlu2 %v2077_v45, %s9748_s4  ;;  %v15861_v45 = vld [vmem:[#allocation28_spill] sm:$0xff] }
 0x593   : > { %2772 = vadd.xlane.f32.xlu0 %v2771_v53  ;;  %v1265_v53 = vsel %vm1204_vm1, %v15861_v45, 0.0 }
 0x595   : > { %v2348_v37 = vpop.permute.xlu1 %2347  ;;  %v2093_v29 = vpop.permute.xlu0 %2092 }
 0x596   : > { %2116 = vst.msk [vmem:[#allocation3 + $0x8] sm:$0xff] %vm2114_vm4, %v2093_v29  ;;  %v15862_v29 = vld [vmem:[#allocation24_spill] sm:$0xff] }
 0x597   : > { %2371 = vst.msk [vmem:[#allocation3 + $0x8] sm:$0xff] %vm2369_vm5, %v2348_v37 }
 0x598   : > { %3027 = vadd.xlane.f32.xlu1 %v3026_v35 }
 0x599   : > { %2351 = vrot.lane.b32.xlu2 %v2332_v16, %s9747_s24 }
 0x59b   : > { %3024 = vadd.xlane.f32.xlu0 %v3023_v12 }
 0x59d   : > { %v2601_v1 = vpop.permute.xlu1 %2600 }
 0x59e   : > { %2625 = vst.msk [vmem:[#allocation3] sm:$0xff] %vm2624_vm6, %v2601_v1 }
 0x5af   : > { %3112 = vrot.lane.b32.xlu0 %v3095_v62, %s9744_s22 }
 0x5b1   : > { %2604 = vrot.lane.b32.xlu1 %v11249_v19, %s9745_s17  ;;  %v2076_v19 = vmul.f32 %v9402_v8, %v11155_v38 }
 0x5b4   : > { %v11375_v24 = vpop.xlane.xlu2 %2514 }
 0x5b7   : > { %1839 = vrot.lane.b32.xlu0 %v1821_v49, %s9750_s28 }
 0x5b9   : > { %2859 = vrot.lane.b32.xlu1 %v2841_v4, %s9746_s5 }
 0x5bc   : > { %v1261_v28 = vpop.xlane.xlu2 %1260 }
 0x5bd   : > { %9405 = vrcp.f32 %v1261_v28 }
 0x5be   : > { %9407 = vrcp.f32 %v11289_v30 }
 0x5bf   : > { %2094 = vrot.lane.b32.xlu0 %v2076_v19, %s9748_s4  ;;  %9409 = vrcp.f32 %v11185_v51 }
 0x5c0   : > { %v11393_v16 = vpop.xlane.xlu0 %2259 }
 0x5c1   : > { %2861 = vrot.lane.b32.xlu1 %v2842_v50, %s9746_s5 }
 0x5c2   : > { %1266 = vadd.xlane.f32.xlu2 %v1265_v53 }
 0x5c3   : > { %v9406_v10 = vpop.eup %9405 }
 0x5c4   : > { %v1264_v37 = vpop.xlane.xlu2 %1263  ;;  %v1332_v35 = vmul.f32 %v9406_v10, %v15862_v29  ;;  %v9408_v38 = vpop.eup %9407  ;;  %v8976_v29 = vld [vmem:[%s9932_s3 + $0x30] sm:$0xff] }
 0x5c5   : > { %9411 = vrcp.f32 %v1264_v37  ;;  %v3096_v30 = vmul.f32 %v9408_v38, %v3071_v54  ;;  %v9410_v12 = vpop.eup %9409  ;;  %v8977_v37 = vld [vmem:[%s9932_s3 + $0x38] sm:$0xff]  ;;  %v15867_v38 = vld [vmem:[#allocation27_spill] sm:$0xff] }
 0x5c6   : > { %9413 = vrcp.f32 %v11228_v23  ;;  %1340 = vst.msk [vmem:[#allocation3 + $0x10] sm:$0xff] %vm1150_vm0, %v1332_v35  ;;  %3223 = vmatpush.bf16.msra.mxu3 %v8977_v37 }
 0x5c7   : > { %2349 = vrot.lane.b32.xlu0 %v11109_v6, %s9747_s24  ;;  %9415 = vrcp.f32 %v11254_v21  ;;  %v15864_v6 = vld [vmem:[#allocation38_spill] sm:$0xff]  ;;  %v3073_v21 = vpop.f32.mrf.mxu2 }
 0x5c8   : > { %9417 = vrcp.f32 %v11330_v55  ;;  %v1568_v23 = vmul.f32 %v9410_v12, %v15864_v6  ;;  %v11404_v41 = vpop.xlane.xlu0 %2517  ;;  %v11409_v8 = vpop.xlane.xlu1 %2769  ;;  %v8973_v12 = vld [vmem:[%s9932_s3 + $0x18] sm:$0xff] }
 0x5c9   : > { %3114 = vrot.lane.b32.xlu1 %v3096_v30, %s9744_s22  ;;  %9419 = vrcp.f32 %v11213_v57  ;;  %v15866_v57 = vld [vmem:[#allocation36_spill] sm:$0xff]  ;;  %v1268_v30 = vsel %vm1204_vm1, %v15867_v38, 0.0 }
 0x5ca   : > { %9421 = vrcp.f32 %v11235_v40  ;;  %3224 = vmatpush.bf16.msra.mxu3 %v8976_v29 }
 0x5cb   : > { %v9412_v51 = vpop.eup %9411  ;;  %9423 = vrcp.f32 %v11277_v18 }
 0x5cc   : > { %v9414_v1 = vpop.eup %9413  ;;  %v2858_v34 = vpop.permute.xlu2 %2857  ;;  %v1333_v62 = vmul.f32 %v9412_v51, %v15863_v44  ;;  %9425 = vrcp.f32 %v11246_v60 }
 0x5cd   : > { %v2587_v32 = vmul.f32 %v9414_v1, %v11281_v36  ;;  %v9416_v14 = vpop.eup %9415  ;;  %v15865_v36 = vld [vmem:[#allocation35_spill] sm:$0xff]  ;;  %9427 = vrcp.f32 %v11211_v61  ;;  %v8971_v1 = vld [vmem:[%s9932_s3 + $0x8] sm:$0xff] }
 0x5ce   : > { %1341 = vst.msk [vmem:[#allocation3 + $0x18] sm:$0xff] %vm1150_vm0, %v1333_v62  ;;  %v9418_v20 = vpop.eup %9417  ;;  %v1823_v4 = vmul.f32 %v9416_v14, %v15865_v36  ;;  %9429 = vrcp.f32 %v11233_v17 }
 0x5cf   : > { %2606 = vrot.lane.b32.xlu0 %v2587_v32, %s9745_s17  ;;  %v3097_v55 = vmul.f32 %v9418_v20, %v3073_v21  ;;  %v9420_v28 = vpop.eup %9419  ;;  %9431 = vrcp.f32 %v11244_v52  ;;  %v15869_v20 = vld [vmem:[#allocation30_spill] sm:$0xff] }
 0x5d0   : > { %v9422_v9 = vpop.eup %9421  ;;  %v1824_v40 = vmul.f32 %v9420_v28, %v15866_v57  ;;  %9433 = vrcp.f32 %v11258_v26 }
 0x5d1   : > { %1588 = vrot.lane.b32.xlu1 %v1568_v23, %s9749_s21  ;;  %v2078_v45 = vmul.f32 %v9422_v9, %v11187_v58  ;;  %v9424_v18 = vpop.eup %9423  ;;  %v15868_v23 = vld [vmem:[#allocation29_spill] sm:$0xff]  ;;  %9435 = vrcp.f32 %v11300_v59 }
 0x5d2   : > { %v9426_v60 = vpop.eup %9425  ;;  %v2079_v10 = vmul.f32 %v9424_v18, %v11196_v27  ;;  %v8975_v27 = vld [vmem:[%s9932_s3 + $0x28] sm:$0xff]  ;;  %v1271_v14 = vsel %vm1204_vm1, %v15868_v23, 0.0  ;;  %9437 = vrcp.f32 %v11291_v39 }
 0x5d3   : > { %v2334_v58 = vmul.f32 %v9426_v60, %v11285_v3  ;;  %3225 = vmatpush.bf16.msra.mxu3 %v8975_v27  ;;  %v8974_v3 = vld [vmem:[%s9932_s3 + $0x20] sm:$0xff]  ;;  %v9428_v44 = vpop.eup %9427  ;;  %9439 = vrcp.f32 %v11393_v16 }
 0x5d4   : > { %v3111_v49 = vpop.permute.xlu2 %3110  ;;  %v1569_v62 = vmul.f32 %v9428_v44, %v11073_v48  ;;  %v9430_v6 = vpop.eup %9429  ;;  %v1274_v48 = vsel %vm1204_vm1, %v15869_v20, 0.0  ;;  %9441 = vrcp.f32 %v11324_v56 }
 0x5d5   : > { %v2333_v61 = vmul.f32 %v9430_v6, %v11279_v31  ;;  %v9432_v17 = vpop.eup %9431  ;;  %9443 = vrcp.f32 %v11337_v63 }
 0x5d6   : > { %v2589_v21 = vmul.f32 %v9432_v17, %v11307_v46  ;;  %v9434_v31 = vpop.eup %9433  ;;  %9445 = vrcp.f32 %v11404_v41 }
 0x5d7   : > { %3226 = vmatpush.bf16.msra.mxu3 %v8974_v3  ;;  %v9436_v46 = vpop.eup %9435  ;;  %9447 = vrcp.f32 %v11375_v24 }
 0x5d8   : > { %v9438_v57 = vpop.eup %9437  ;;  %9449 = vrcp.f32 %v11335_v22 }
 0x5d9   : > { %1843 = vrot.lane.b32.xlu1 %v1823_v4, %s9750_s28  ;;  %v2821_v4 = vpop.f32.mrf.mxu0  ;;  %v9440_v56 = vpop.eup %9439 }
 0x5da   : > { %3116 = vrot.lane.b32.xlu2 %v3097_v55, %s9744_s22  ;;  %v2843_v55 = vmul.f32 %v9434_v31, %v2821_v4  ;;  %v9442_v16 = vpop.eup %9441  ;;  %v2335_v63 = vmul.f32 %v9440_v56, %v11295_v7  ;;  %v15873_v4 = vld [vmem:[#allocation40_spill] sm:$0xff]  ;;  %v15874_v31 = vld [vmem:[#allocation41_spill] sm:$0xff] }
 0x5db   : > { %v2603_v47 = vpop.permute.xlu0 %2602  ;;  %3227 = vmatpush.bf16.msra.mxu3 %v8973_v12  ;;  %v9444_v18 = vpop.eup %9443 }
 0x5dc   : > { %2626 = vst.msk [vmem:[#allocation3 + $0x8] sm:$0xff] %vm2624_vm6, %v2603_v47  ;;  %v1585_v19 = vpop.permute.xlu2 %1584  ;;  %v9446_v41 = vpop.eup %9445 }
 0x5dd   : > { %1607 = vst.msk [vmem:[#allocation3 + $0x10] sm:$0xff] %vm1604_vm2, %v1585_v19  ;;  %v1571_v19 = vmul.f32 %v9436_v46, %v11102_v25  ;;  %v9448_v37 = vpop.eup %9447  ;;  %v2591_v27 = vmul.f32 %v9446_v41, %v11321_v33  ;;  %v15875_v46 = vld [vmem:[#allocation22_spill] sm:$0xff] }
 0x5de   : > { %2881 = vst.msk [vmem:[#allocation3 + $0x8] sm:$0xff] %vm2879_vm7, %v2858_v34  ;;  %v8970_v34 = vld [vmem:[%s9932_s3] sm:$0xff]  ;;  %v9450_v22 = vpop.eup %9449 }
 0x5e0   : > { %v2856_v50 = vpop.permute.xlu1 %2855 }
 0x5e1   : > { %2880 = vst.msk [vmem:[#allocation3] sm:$0xff] %vm2879_vm7, %v2856_v50  ;;  %1845 = vrot.lane.b32.xlu1 %v1824_v40, %s9750_s28  ;;  %v2823_v28 = vpop.f32.mrf.mxu0 }
 0x5e2   : > { %3135 = vst.msk [vmem:[#allocation3] sm:$0xff] %vm3134_vm8, %v3111_v49  ;;  %2098 = vrot.lane.b32.xlu2 %v2078_v45, %s9748_s4  ;;  %v2844_v39 = vmul.f32 %v9438_v57, %v2823_v28  ;;  %v3076_v45 = vpop.f32.mrf.mxu2 }
 0x5e4   : > { %v1587_v53 = vpop.permute.xlu2 %1586 }
 0x5e5   : > { %1608 = vst.msk [vmem:[#allocation3 + $0x18] sm:$0xff] %vm1604_vm2, %v1587_v53  ;;  %v15870_v53 = vld [vmem:[#allocation39_spill] sm:$0xff] }
 0x5e6   : > { %v1826_v60 = vmul.f32 %v9442_v16, %v15870_v53  ;;  %v15877_v53 = vld [vmem:[#allocation32_spill] sm:$0xff] }
 0x5e9   : > { %2100 = vrot.lane.b32.xlu1 %v2079_v10, %s9748_s4  ;;  %v3143_v59 = vld [vmem:[#allocation3] sm:$0xff]  ;;  %v11482_v7 = vpop.f32.mrf.mxu0 }
 0x5ea   : > { %2355 = vrot.lane.b32.xlu2 %v2334_v58, %s9747_s24  ;;  %v3098_v58 = vmul.f32 %v9444_v18, %v3076_v45  ;;  %v3078_v24 = vpop.f32.mrf.mxu2 }
 0x5eb   : > { %v3099_v3 = vmul.f32 %v9450_v22, %v3078_v24 }
 0x5ec   : > { %v1842_v54 = vpop.permute.xlu2 %1841 }
 0x5ed   : > { %1863 = vst.msk [vmem:[#allocation3 + $0x18] sm:$0xff] %vm1859_vm3, %v1842_v54 }
 0x5f1   : > { %2608 = vrot.lane.b32.xlu1 %v11293_v42, %s9745_s17  ;;  %v8972_v42 = vld [vmem:[%s9932_s3 + $0x10] sm:$0xff] }
 0x5f2   : > { %3228 = vmatpush.bf16.msra.mxu3 %v8972_v42  ;;  %v3081_v42 = vpop.f32.mrf.mxu2 }
 0x5f4   : > { %v2097_v35 = vpop.permute.xlu2 %2096 }
 0x5f5   : > { %2118 = vst.msk [vmem:[#allocation3 + $0x18] sm:$0xff] %vm2114_vm4, %v2097_v35  ;;  %v2590_v35 = vmul.f32 %v9448_v37, %v11315_v13 }
 0x5f6   : > { %3229 = vmatpush.bf16.msra.mxu3 %v8971_v1  ;;  %v2828_v1 = vpop.f32.mrf.mxu0 }
 0x5f9   : > { %1269 = vadd.xlane.f32.xlu0 %v1268_v30 }
 0x5fa   : > { %3230 = vmatpush.bf16.msra.mxu3 %v8970_v34 }
 0x5fc   : > { %v2352_v51 = vpop.permute.xlu2 %2351 }
 0x5fd   : > { %2373 = vst.msk [vmem:[#allocation3 + $0x18] sm:$0xff] %vm2369_vm5, %v2352_v51 }
 0x606   : > { %v11448_v32 = vpop.xlane.xlu0 %2772 }
 0x60b   : > { %v11458_v36 = vpop.xlane.xlu1 %3027 }
 0x60d   : > { %1590 = vrot.lane.b32.xlu0 %v1569_v62, %s9749_s21 }
 0x60e   : > { %v3025_v49 = vpop.xlane.xlu0 %3024 }
 0x613   : > { %1272 = vadd.xlane.f32.xlu2 %v1271_v14 }
 0x615   : > { %2353 = vrot.lane.b32.xlu0 %v2333_v61, %s9747_s24  ;;  %v15872_v61 = vld [vmem:[#allocation37_spill] sm:$0xff] }
 0x61b   : > { %1275 = vadd.xlane.f32.xlu1 %v1274_v48 }
 0x61d   : > { %2610 = vrot.lane.b32.xlu0 %v2589_v21, %s9745_s17 }
 0x621   : > { %v3113_v52 = vpop.permute.xlu0 %3112 }
 0x622   : > { %3136 = vst.msk [vmem:[#allocation3 + $0x8] sm:$0xff] %vm3134_vm8, %v3113_v52 }
 0x623   : > { %v2605_v47 = vpop.permute.xlu1 %2604 }
 0x625   : > { %2863 = vrot.lane.b32.xlu0 %v2843_v55, %s9746_s5 }
 0x629   : > { %v1840_v26 = vpop.permute.xlu0 %1839  ;;  %v3144_v9 = vld [vmem:[#allocation3 + $0x8] sm:$0xff] }
 0x62a   : > { %1862 = vst.msk [vmem:[#allocation3 + $0x10] sm:$0xff] %vm1859_vm3, %v1840_v26  ;;  %v3151_v40 = vpack.c.bf16 %v3144_v9, %v3143_v59  ;;  %v3083_v59 = vpop.f32.mrf.mxu2 }
 0x62b   : > { %v2860_v50 = vpop.permute.xlu1 %2859  ;;  %1594 = vrot.lane.b32.xlu2 %v1571_v19, %s9749_s21 }
 0x62c   : > { %3231 = vmatmul.bf16.vlgmr.msra.gmra.mxu3 %v3151_v40 }
 0x62d   : > { %2865 = vrot.lane.b32.xlu0 %v2844_v39, %s9746_s5  ;;  %v15876_v39 = vld [vmem:[#allocation31_spill] sm:$0xff] }
 0x631   : > { %v2095_v25 = vpop.permute.xlu0 %2094 }
 0x632   : > { %2117 = vst.msk [vmem:[#allocation3 + $0x10] sm:$0xff] %vm2114_vm4, %v2095_v25 }
 0x633   : > { %v2862_v10 = vpop.permute.xlu1 %2861  ;;  %2357 = vrot.lane.b32.xlu2 %v2335_v63, %s9747_s24 }
 0x634   : > { %1849 = vrot.lane.b32.xlu1 %v1826_v60, %s9750_s28 }
 0x635   : > { %v1267_v54 = vpop.xlane.xlu2 %1266  ;;  %3118 = vrot.lane.b32.xlu0 %v3098_v58, %s9744_s22 }
 0x636   : > { %9451 = vrcp.f32 %v1267_v54  ;;  %v15878_v54 = vld [vmem:[#allocation33_spill] sm:$0xff] }
 0x637   : > { %9453 = vrcp.f32 %v3025_v49 }
 0x638   : > { %9455 = vrcp.f32 %v11448_v32 }
 0x639   : > { %v2350_v29 = vpop.permute.xlu0 %2349  ;;  %9457 = vrcp.f32 %v11283_v0  ;;  %v15871_v0 = vld [vmem:[#allocation21_spill] sm:$0xff] }
 0x63a   : > { %2372 = vst.msk [vmem:[#allocation3 + $0x10] sm:$0xff] %vm2369_vm5, %v2350_v29  ;;  %9459 = vrcp.f32 %v11317_v2 }
 0x63b   : > { %2627 = vst.msk [vmem:[#allocation3 + $0x10] sm:$0xff] %vm2624_vm6, %v2605_v47  ;;  %v3115_v38 = vpop.permute.xlu1 %3114  ;;  %2614 = vrot.lane.b32.xlu2 %v2591_v27, %s9745_s17  ;;  %9461 = vrcp.f32 %v11342_v43  ;;  %v11547_v27 = vld [vmem:[%s15879_s18] ss:$0 sm:$0xff] }
 0x63c   : > { %v9452_v30 = vpop.eup %9451  ;;  %2882 = vst.msk [vmem:[#allocation3 + $0x10] sm:$0xff] %vm2879_vm7, %v2860_v50  ;;  %2612 = vrot.lane.b32.xlu1 %v2590_v35, %s9745_s17  ;;  %9463 = vrcp.f32 %v11344_v11  ;;  %s15882_s17 = scalar_lea.vmem %s15723_s9, %s9914_s19 }
 0x63d   : > { %3137 = vst.msk [vmem:[#allocation3 + $0x10] sm:$0xff] %vm3134_vm8, %v3115_v38  ;;  %3120 = vrot.lane.b32.xlu0 %v3099_v3, %s9744_s22  ;;  %v1334_v33 = vmul.f32 %v9452_v30, %v15871_v0  ;;  %v9454_v12 = vpop.eup %9453  ;;  %v3117_v62 = vpop.permute.xlu2 %3116  ;;  %9465 = vrcp.f32 %v11350_v15  ;;  %v9639_v30 = vld [vmem:[#allocation2 + $0x30] sm:$0xff] }
 0x63e   : > { %v9456_v51 = vpop.eup %9455  ;;  %v3100_v44 = vmul.f32 %v9454_v12, %v3081_v42  ;;  %9467 = vrcp.f32 %v11409_v8 }
 0x63f   : > { %1342 = vst.msk [vmem:[#allocation3 + $0x20] sm:$0xff] %vm1150_vm0, %v1334_v33  ;;  %v9458_v13 = vpop.eup %9457  ;;  %v2846_v32 = vmul.f32 %v9456_v51, %v2828_v1  ;;  %9469 = vrcp.f32 %v11458_v36 }
 0x640   : > { %v1570_v23 = vmul.f32 %v9458_v13, %v11091_v5  ;;  %v9460_v2 = vpop.eup %9459 }
 0x641   : > { %v2607_v34 = vpop.permute.xlu0 %2606  ;;  %v1825_v49 = vmul.f32 %v9460_v2, %v15872_v61  ;;  %v9462_v21 = vpop.eup %9461 }
 0x642   : > { %2628 = vst.msk [vmem:[#allocation3 + $0x18] sm:$0xff] %vm2624_vm6, %v2607_v34  ;;  %v2080_v52 = vmul.f32 %v9462_v21, %v15873_v4  ;;  %v9464_v43 = vpop.eup %9463  ;;  %v9640_v34 = vld [vmem:[#allocation2] sm:$0xff] }
 0x643   : > { %2883 = vst.msk [vmem:[#allocation3 + $0x18] sm:$0xff] %vm2879_vm7, %v2862_v10  ;;  %v1589_v6 = vpop.permute.xlu1 %1588  ;;  %3122 = vrot.lane.b32.xlu2 %v3100_v44, %s9744_s22  ;;  %v2081_v55 = vmul.f32 %v9464_v43, %v15874_v31  ;;  %v9466_v47 = vpop.eup %9465 }
 0x644   : > { %3138 = vst.msk [vmem:[#allocation3 + $0x18] sm:$0xff] %vm3134_vm8, %v3117_v62  ;;  %2869 = vrot.lane.b32.xlu1 %v2846_v32, %s9746_s5  ;;  %v3145_v17 = vld [vmem:[#allocation3 + $0x10] sm:$0xff]  ;;  %v2336_v28 = vmul.f32 %v9466_v47, %v15875_v46  ;;  %v9468_v26 = vpop.eup %9467 }
 0x645   : > { %1609 = vst.msk [vmem:[#allocation3 + $0x20] sm:$0xff] %vm1604_vm2, %v1589_v6  ;;  %1592 = vrot.lane.b32.xlu0 %v1570_v23, %s9749_s21  ;;  %v2099_v48 = vpop.permute.xlu2 %2098  ;;  %v2845_v11 = vmul.f32 %v9468_v26, %v11482_v7  ;;  %v9470_v15 = vpop.eup %9469  ;;  %s16188_s21 = scalar_lea.vmem %s15725_s11, %s9914_s19 }
 0x646   : > { %v3101_v40 = vmul.f32 %v9470_v15, %v3083_v59 }
 0x64b   : > { %v1844_v14 = vpop.permute.xlu1 %1843  ;;  %v3146_v20 = vld [vmem:[#allocation3 + $0x18] sm:$0xff] }
 0x64c   : > { %1864 = vst.msk [vmem:[#allocation3 + $0x20] sm:$0xff] %vm1859_vm3, %v1844_v14  ;;  %v3152_v5 = vpack.c.bf16 %v3146_v20, %v3145_v17 }
 0x64d   : > { %2119 = vst.msk [vmem:[#allocation3 + $0x20] sm:$0xff] %vm2114_vm4, %v2099_v48  ;;  %1847 = vrot.lane.b32.xlu0 %v1825_v49, %s9750_s28  ;;  %v2356_v45 = vpop.permute.xlu2 %2355  ;;  %v9641_v49 = vld [vmem:[#allocation2 + $0x18] sm:$0xff] }
 0x64e   : > { %3236 = vmatmul.bf16.gmra.mxu3 %v3152_v5 }
 0x653   : > { %v1846_v9 = vpop.permute.xlu1 %1845 }
 0x655   : > { %2102 = vrot.lane.b32.xlu0 %v2080_v52, %s9748_s4  ;;  %v9642_v52 = vld [vmem:[#allocation2 + $0x10] sm:$0xff] }
 0x65b   : > { %v2101_v50 = vpop.permute.xlu1 %2100 }
 0x65d   : > { %2104 = vrot.lane.b32.xlu0 %v2081_v55, %s9748_s4 }
 0x663   : > { %v2609_v56 = vpop.permute.xlu1 %2608 }
 0x665   : > { %2359 = vrot.lane.b32.xlu0 %v2336_v28, %s9747_s24 }
 0x66c   : > { %v1270_v19 = vpop.xlane.xlu0 %1269 }
 0x66d   : > { %9471 = vrcp.f32 %v1270_v19  ;;  %2867 = vrot.lane.b32.xlu0 %v2845_v11, %s9746_s5  ;;  %v9751_v11 = vmov 128.0   ;;  %s16187_s5 = scalar_lea.vmem %s15724_s10, %s9914_s19  ;;  %s16189_s19 = sld [smem:[#allocation10_spill]] }
 0x673   : > { %v9472_v57 = vpop.eup %9471  ;;  %p8929_p1 = scmp.ne.s32.totalorder %s16189_s19, 3 }
 0x674   : > { %v1335_v8 = vmul.f32 %v9472_v57, %v15876_v39 }
 0x675   : > { %3124 = vrot.lane.b32.xlu0 %v3101_v40, %s9744_s22 }
 0x676   : > { %1343 = vst.msk [vmem:[#allocation3 + $0x28] sm:$0xff] %vm1150_vm0, %v1335_v8 }
 0x67f   : > { %v1591_v36 = vpop.permute.xlu0 %1590 }
 0x680   : > { %1610 = vst.msk [vmem:[#allocation3 + $0x28] sm:$0xff] %vm1604_vm2, %v1591_v36 }
 0x681   : > { %1865 = vst.msk [vmem:[#allocation3 + $0x28] sm:$0xff] %vm1859_vm3, %v1846_v9 }
 0x682   : > { %2120 = vst.msk [vmem:[#allocation3 + $0x28] sm:$0xff] %vm2114_vm4, %v2101_v50 }
 0x683   : > { %2375 = vst.msk [vmem:[#allocation3 + $0x28] sm:$0xff] %vm2369_vm5, %v2356_v45 }
 0x686   : > { %v1273_v16 = vpop.xlane.xlu2 %1272 }
 0x687   : > { %9473 = vrcp.f32 %v1273_v16  ;;  %v2354_v18 = vpop.permute.xlu0 %2353 }
 0x688   : > { %2374 = vst.msk [vmem:[#allocation3 + $0x20] sm:$0xff] %vm2369_vm5, %v2354_v18 }
 0x689   : > { %2629 = vst.msk [vmem:[#allocation3 + $0x20] sm:$0xff] %vm2624_vm6, %v2609_v56 }
 0x68d   : > { %v9474_v25 = vpop.eup %9473 }
 0x68e   : > { %v1276_v63 = vpop.xlane.xlu1 %1275  ;;  %v1336_v60 = vmul.f32 %v9474_v25, %v15877_v53  ;;  %v1595_v37 = vpop.permute.xlu2 %1594  ;;  %v9643_v25 = vld [vmem:[#allocation2 + $0x8] sm:$0xff] }
 0x68f   : > { %9475 = vrcp.f32 %v1276_v63  ;;  %v2611_v10 = vpop.permute.xlu0 %2610 }
 0x690   : > { %2630 = vst.msk [vmem:[#allocation3 + $0x28] sm:$0xff] %vm2624_vm6, %v2611_v10  ;;  %9477 = vrcp.f32 %v9751_v11  ;;  %v8515_v11 = vld [vmem:[%s9964_s29 + $0x140] sm:$0xf] }
 0x691   : > { %1344 = vst.msk [vmem:[#allocation3 + $0x30] sm:$0xff] %vm1150_vm0, %v1336_v60 }
 0x695   : > { %v9476_v58 = vpop.eup %9475 }
 0x696   : > { %v1337_v41 = vmul.f32 %v9476_v58, %v15878_v54  ;;  %v2358_v6 = vpop.permute.xlu2 %2357  ;;  %v9478_v19 = vpop.eup %9477  ;;  %v9644_v58 = vld [vmem:[#allocation2 + $0x20] sm:$0xff] }
 0x697   : > { %v2864_v24 = vpop.permute.xlu0 %2863  ;;  %v3279_v15 = vmul.f32 128.0, %v9478_v19  ;;  %vm3283_vm9 = vweird.f32 %v9478_v19 }
 0x698   : > { %1345 = vst.msk [vmem:[#allocation3 + $0x38] sm:$0xff] %vm1150_vm0, %v1337_v41 }
 0x699   : > { %1612 = vst.msk [vmem:[#allocation3 + $0x38] sm:$0xff] %vm1604_vm2, %v1595_v37  ;;  %v3280_v59 = vsub.f32 1.0, %v3279_v15 }
 0x69a   : > { %2884 = vst.msk [vmem:[#allocation3 + $0x20] sm:$0xff] %vm2879_vm7, %v2864_v24 }
 0x69b   : > { %v3281_v9 = vmul.f32 %v9478_v19, %v3280_v59  ;;  %v9018_v59 = vld [vmem:[%s9964_s29 + $0x144] sm:$0xf] }
 0x69d   : > { %v3282_v57 = vadd.f32 %v9478_v19, %v3281_v9  ;;  %v8517_v9 = vld [vmem:[%s9964_s29 + $0x160] sm:$0xf0] }
 0x69e   : > { %v2615_v20 = vpop.permute.xlu2 %2614 }
 0x69f   : > { %v2866_v7 = vpop.permute.xlu0 %2865  ;;  %v11566_v40 = vsel %vm3283_vm9, %v9478_v19, %v3282_v57  ;;  %v9022_v19 = vld [vmem:[%s9964_s29 + $0x15c] sm:$0xf0]  ;;  %v8523_v57 = vld [vmem:[%s9964_s29 + $0x148] sm:$0xf] }
 0x6a0   : > { %2885 = vst.msk [vmem:[#allocation3 + $0x28] sm:$0xff] %vm2879_vm7, %v2866_v7  ;;  %v8516_v15 = vor.u32 %v9022_v19, %v8515_v11  ;;  %v8389_v11 = vld [vmem:[%s9964_s29 + $0x60] sm:$0xf0]  ;;  %v8395_v19 = vld [vmem:[%s9964_s29 + $0x48] sm:$0xf] }
 0x6a1   : > { %15880 = vst [vmem:[#allocation25_spill] sm:$0xff] %v11566_v40 }
 0x6a6   : > { %v1850_v22 = vpop.permute.xlu1 %1849  ;;  %v3123_v55 = vpop.permute.xlu2 %3122 }
 0x6a7   : > { %1867 = vst.msk [vmem:[#allocation3 + $0x38] sm:$0xff] %vm1859_vm3, %v1850_v22  ;;  %v3119_v29 = vpop.permute.xlu0 %3118 }
 0x6a8   : > { %3139 = vst.msk [vmem:[#allocation3 + $0x20] sm:$0xff] %vm3134_vm8, %v3119_v29 }
 0x6ae   : > { %v2613_v23 = vpop.permute.xlu1 %2612 }
 0x6af   : > { %v3232_v35 = vpop.f32.mrf.mxu3  ;;  %v3121_v3 = vpop.permute.xlu0 %3120  ;;  %v3147_v51 = vld [vmem:[#allocation3 + $0x20] sm:$0xff] }
 0x6b0   : > { %v3233_v38 = vadd.f32 %v11547_v27, %v3232_v35  ;;  %3140 = vst.msk [vmem:[#allocation3 + $0x28] sm:$0xff] %vm3134_vm8, %v3121_v3 }
 0x6b2   : > { %v3252_v0 = vadd.f32 %v9639_v30, %v3233_v38  ;;  %v9645_v30 = vld [vmem:[#allocation2 + $0x28] sm:$0xff] }
 0x6b4   : > { %3262 = vadd.xlane.f32.xlu1 %v3252_v0 }
 0x6b6   : > { %v2870_v5 = vpop.permute.xlu1 %2869 }
 0x6b7   : > { %v3234_v33 = vpop.f32.mrf.mxu3  ;;  %v1593_v12 = vpop.permute.xlu0 %1592  ;;  %v3148_v13 = vld [vmem:[#allocation3 + $0x28] sm:$0xff] }
 0x6b8   : > { %v3235_v42 = vadd.f32 %v11547_v27, %v3234_v33  ;;  %1611 = vst.msk [vmem:[#allocation3 + $0x30] sm:$0xff] %vm1604_vm2, %v1593_v12  ;;  %v3153_v1 = vpack.c.bf16 %v3148_v13, %v3147_v51  ;;  %v9646_v13 = vld [vmem:[#allocation2 + $0x38] sm:$0xff] }
 0x6ba   : > { %v3253_v44 = vadd.f32 %v9640_v34, %v3235_v42  ;;  %3241 = vmatmul.bf16.gmra.mxu3 %v3153_v1  ;;  %v8579_v34 = vld [vmem:[%s9964_s29 + $0x1c0] sm:$0xf] }
 0x6bc   : > { %3264 = vadd.xlane.f32.xlu2 %v3253_v44 }
 0x6bf   : > { %v1848_v62 = vpop.permute.xlu0 %1847 }
 0x6c0   : > { %1866 = vst.msk [vmem:[#allocation3 + $0x30] sm:$0xff] %vm1859_vm3, %v1848_v62  ;;  %v9034_v62 = vld [vmem:[%s9964_s29 + $0x1c4] sm:$0xf] }
 0x6c7   : > { %v2103_v32 = vpop.permute.xlu0 %2102 }
 0x6c8   : > { %2121 = vst.msk [vmem:[#allocation3 + $0x30] sm:$0xff] %vm2114_vm4, %v2103_v32 }
 0x6c9   : > { %2376 = vst.msk [vmem:[#allocation3 + $0x30] sm:$0xff] %vm2369_vm5, %v2358_v6  ;;  %v8581_v6 = vld [vmem:[%s9964_s29 + $0x1e0] sm:$0xf0] }
 0x6ca   : > { %2631 = vst.msk [vmem:[#allocation3 + $0x30] sm:$0xff] %vm2624_vm6, %v2613_v23  ;;  %v9039_v23 = vld [vmem:[%s9964_s29 + $0x1e4] sm:$0xf0] }
 0x6cf   : > { %v2105_v2 = vpop.permute.xlu0 %2104 }
 0x6d0   : > { %2122 = vst.msk [vmem:[#allocation3 + $0x38] sm:$0xff] %vm2114_vm4, %v2105_v2  ;;  %v8584_v2 = vor.u32 %v9034_v62, %v8581_v6  ;;  %v9007_v62 = vld [vmem:[%s9964_s29 + $0xe4] sm:$0xf0] }
 0x6d1   : > { %v3237_v14 = vpop.f32.mrf.mxu3 }
 0x6d2   : > { %v3238_v61 = vadd.f32 %v11547_v27, %v3237_v14  ;;  %3886 = vmatpush.bf16.msrb.mxu1 %v8584_v2 }
 0x6d4   : > { %v3254_v17 = vadd.f32 %v9641_v49, %v3238_v61  ;;  %v9035_v61 = vld [vmem:[%s9964_s29 + $0x1cc] sm:$0xf] }
 0x6d5   : > { %v8589_v49 = vld [vmem:[%s9964_s29 + $0x1e8] sm:$0xf0] }
 0x6d6   : > { %3266 = vadd.xlane.f32.xlu0 %v3254_v17 }
 0x6d7   : > { %v2360_v48 = vpop.permute.xlu0 %2359 }
 0x6d8   : > { %2377 = vst.msk [vmem:[#allocation3 + $0x38] sm:$0xff] %vm2369_vm5, %v2360_v48  ;;  %v9030_v48 = vld [vmem:[%s9964_s29 + $0x19c] sm:$0xf0] }
 0x6d9   : > { %2632 = vst.msk [vmem:[#allocation3 + $0x38] sm:$0xff] %vm2624_vm6, %v2615_v20  ;;  %v3239_v21 = vpop.f32.mrf.mxu3  ;;  %v8547_v20 = vld [vmem:[%s9964_s29 + $0x180] sm:$0xf] }
 0x6da   : > { %2887 = vst.msk [vmem:[#allocation3 + $0x38] sm:$0xff] %vm2879_vm7, %v2870_v5  ;;  %v3240_v4 = vadd.f32 %v11547_v27, %v3239_v21  ;;  %v9026_v5 = vld [vmem:[%s9964_s29 + $0x184] sm:$0xf]  ;;  %v8548_v21 = vor.u32 %v9030_v48, %v8547_v20  ;;  %v8427_v48 = vld [vmem:[%s9964_s29 + $0x88] sm:$0xf] }
 0x6db   : > { %v8421_v20 = vld [vmem:[%s9964_s29 + $0xa0] sm:$0xf0] }
 0x6dc   : > { %v3255_v43 = vadd.f32 %v9642_v52, %v3240_v4  ;;  %v8549_v4 = vld [vmem:[%s9964_s29 + $0x1a0] sm:$0xf0]  ;;  %v8555_v52 = vld [vmem:[%s9964_s29 + $0x188] sm:$0xf] }
 0x6de   : > { %3268 = vadd.xlane.f32.xlu1 %v3255_v43 }
 0x6df   : > { %v2868_v31 = vpop.permute.xlu0 %2867 }
 0x6e0   : > { %2886 = vst.msk [vmem:[#allocation3 + $0x30] sm:$0xff] %vm2879_vm7, %v2868_v31  ;;  %v8552_v31 = vor.u32 %v9026_v5, %v8549_v4  ;;  %v8995_v4 = vld [vmem:[%s9964_s29 + $0x8c] sm:$0xf] }
 0x6e1   : > { %3141 = vst.msk [vmem:[#allocation3 + $0x30] sm:$0xff] %vm3134_vm8, %v3123_v55 }
 0x6e2   : > { %3887 = vmatpush.bf16.msrb.mxu1 %v8552_v31 }
 0x6e7   : > { %v3125_v47 = vpop.permute.xlu0 %3124 }
 0x6e8   : > { %3142 = vst.msk [vmem:[#allocation3 + $0x38] sm:$0xff] %vm3134_vm8, %v3125_v47  ;;  %v3149_v46 = vld [vmem:[#allocation3 + $0x30] sm:$0xff]  ;;  %v9027_v47 = vld [vmem:[%s9964_s29 + $0x18c] sm:$0xf] }
 0x6ef   : > { %v3150_v28 = vld [vmem:[#allocation3 + $0x38] sm:$0xff] }
 0x6f0   : > { %v3154_v26 = vpack.c.bf16 %v3150_v28, %v3149_v46  ;;  %v8557_v46 = vld [vmem:[%s9964_s29 + $0x1a8] sm:$0xf0] }
 0x6f1   : > { %v8560_v28 = vor.u32 %v9027_v47, %v8557_v46  ;;  %v8990_v47 = vld [vmem:[%s9964_s29 + $0x5c] sm:$0xf0]  ;;  %v8986_v46 = vld [vmem:[%s9964_s29 + $0x44] sm:$0xf] }
 0x6f2   : > { %3246 = vmatmul.bf16.gmra.mxu3 %v3154_v26 }
 0x727   : > { %v3263_v39 = vpop.xlane.xlu1 %3262 }
 0x728   : > { %v3285_v8 = vmul.f32 %v11566_v40, %v3263_v39  ;;  %v8520_v39 = vor.u32 %v9018_v59, %v8517_v9 }
 0x72a   : > { %v11569_v50 = vsub.f32 %v3252_v0, %v3285_v8  ;;  %v9023_v8 = vld [vmem:[%s9964_s29 + $0x164] sm:$0xf0]  ;;  %3888 = vmatpush.bf16.msrb.mxu1 %v8520_v39 }
 0x72c   : > { %v3301_v45 = vmul.f32 %v11569_v50, %v11569_v50 }
 0x72e   : > { %3309 = vadd.xlane.f32.xlu1 %v3301_v45  ;;  %v9019_v45 = vld [vmem:[%s9964_s29 + $0x14c] sm:$0xf] }
 0x72f   : > { %v3265_v36 = vpop.xlane.xlu2 %3264 }
 0x730   : > { %v3286_v18 = vmul.f32 %v11566_v40, %v3265_v36  ;;  %v8525_v36 = vld [vmem:[%s9964_s29 + $0x168] sm:$0xf0] }
 0x732   : > { %v11578_v53 = vsub.f32 %v3253_v44, %v3286_v18  ;;  %v9038_v44 = vld [vmem:[%s9964_s29 + $0x1dc] sm:$0xf0]  ;;  %v8528_v18 = vor.u32 %v9019_v45, %v8525_v36  ;;  %v8397_v45 = vld [vmem:[%s9964_s29 + $0x68] sm:$0xf0] }
 0x733   : > { %v8580_v32 = vor.u32 %v9038_v44, %v8579_v34  ;;  %v8453_v34 = vld [vmem:[%s9964_s29 + $0xe0] sm:$0xf0]  ;;  %v8459_v44 = vld [vmem:[%s9964_s29 + $0xc8] sm:$0xf] }
 0x734   : > { %v3302_v41 = vmul.f32 %v11578_v53, %v11578_v53  ;;  %v8460_v6 = vor.u32 %v9007_v62, %v8459_v44 }
 0x735   : > { %3857 = vmatpush.bf16.msrb.mxu0 %v8580_v32 }
 0x739   : > { %3858 = vmatpush.bf16.msrb.mxu0 %v8548_v21  ;;  %v8999_v21 = vld [vmem:[%s9964_s29 + $0xa4] sm:$0xf0] }
 0x73d   : > { %v3242_v56 = vpop.f32.mrf.mxu3  ;;  %3859 = vmatpush.bf16.msrb.mxu0 %v8516_v15  ;;  %v8991_v15 = vld [vmem:[%s9964_s29 + $0x64] sm:$0xf0] }
 0x73e   : > { %v3243_v16 = vadd.f32 %v11547_v27, %v3242_v56  ;;  %v8396_v39 = vor.u32 %v8991_v15, %v8395_v19 }
 0x740   : > { %v11575_v63 = vadd.f32 %v9643_v25, %v3243_v16  ;;  %v8524_v16 = vor.u32 %v9023_v8, %v8523_v57  ;;  %v8483_v25 = vld [vmem:[%s9964_s29 + $0x100] sm:$0xf]  ;;  %v8392_v57 = vor.u32 %v8986_v46, %v8389_v11  ;;  %v8987_v8 = vld [vmem:[%s9964_s29 + $0x4c] sm:$0xf] }
 0x741   : > { %v8400_v36 = vor.u32 %v8987_v8, %v8397_v45 }
 0x742   : > { %3270 = vadd.xlane.f32.xlu2 %v11575_v63 }
 0x745   : > { %v3244_v60 = vpop.f32.mrf.mxu3 }
 0x746   : > { %v3245_v10 = vadd.f32 %v11547_v27, %v3244_v60  ;;  %v9014_v60 = vld [vmem:[%s9964_s29 + $0x11c] sm:$0xf0] }
 0x748   : > { %v11581_v54 = vadd.f32 %v9644_v58, %v3245_v10  ;;  %v9010_v10 = vld [vmem:[%s9964_s29 + $0x104] sm:$0xf]  ;;  %v8484_v58 = vor.u32 %v9014_v60, %v8483_v25 }
 0x749   : > { %v3267_v24 = vpop.xlane.xlu0 %3266  ;;  %v8978_v25 = vld [vmem:[%s9964_s29 + $0x4] sm:$0xf] }
 0x74a   : > { %v3287_v37 = vmul.f32 %v11566_v40, %v3267_v24  ;;  %3272 = vadd.xlane.f32.xlu0 %v11581_v54  ;;  %3311 = vadd.xlane.f32.xlu2 %v3302_v41  ;;  %v8485_v41 = vld [vmem:[%s9964_s29 + $0x120] sm:$0xf0]  ;;  %v8491_v24 = vld [vmem:[%s9964_s29 + $0x108] sm:$0xf] }
 0x74b   : > { %3860 = vmatpush.bf16.msrb.mxu0 %v8484_v58  ;;  %v8357_v58 = vld [vmem:[%s9964_s29 + $0x20] sm:$0xf0] }
 0x74c   : > { %v11587_v7 = vsub.f32 %v3254_v17, %v3287_v37  ;;  %v8592_v17 = vor.u32 %v9035_v61, %v8589_v49  ;;  %v9015_v37 = vld [vmem:[%s9964_s29 + $0x124] sm:$0xf0]  ;;  %v8998_v61 = vld [vmem:[%s9964_s29 + $0x9c] sm:$0xf0]  ;;  %v8994_v49 = vld [vmem:[%s9964_s29 + $0x84] sm:$0xf] }
 0x74d   : > { %v8424_v5 = vor.u32 %v8994_v49, %v8421_v20 }
 0x74e   : > { %v3303_v22 = vmul.f32 %v11587_v7, %v11587_v7  ;;  %3944 = vmatpush.bf16.msrb.mxu3 %v8592_v17 }
 0x751   : > { %v3269_v29 = vpop.xlane.xlu1 %3268 }
 0x752   : > { %3313 = vadd.xlane.f32.xlu2 %v3303_v22  ;;  %v3288_v38 = vmul.f32 %v11566_v40, %v3269_v29  ;;  %3945 = vmatpush.bf16.msrb.mxu3 %v8560_v28  ;;  %v8488_v22 = vor.u32 %v9010_v10, %v8485_v41  ;;  %v8492_v29 = vor.u32 %v9015_v37, %v8491_v24  ;;  %v8363_v41 = vld [vmem:[%s9964_s29 + $0x8] sm:$0xf] }
 0x753   : > { %v8983_v24 = vld [vmem:[%s9964_s29 + $0x24] sm:$0xf0] }
 0x754   : > { %v11596_v33 = vsub.f32 %v3255_v43, %v3288_v38  ;;  %v9031_v43 = vld [vmem:[%s9964_s29 + $0x1a4] sm:$0xf0]  ;;  %3889 = vmatpush.bf16.msrb.mxu1 %v8488_v22  ;;  %v8360_v22 = vor.u32 %v8978_v25, %v8357_v58 }
 0x755   : > { %v8556_v55 = vor.u32 %v9031_v43, %v8555_v52  ;;  %v8429_v52 = vld [vmem:[%s9964_s29 + $0xa8] sm:$0xf0]  ;;  %v8428_v43 = vor.u32 %v8999_v21, %v8427_v48 }
 0x756   : > { %v3304_v1 = vmul.f32 %v11596_v33, %v11596_v33  ;;  %3946 = vmatpush.bf16.msrb.mxu3 %v8528_v18  ;;  %v8432_v31 = vor.u32 %v8995_v4, %v8429_v52  ;;  %v8982_v18 = vld [vmem:[%s9964_s29 + $0x1c] sm:$0xf0] }
 0x775   : > { %v3247_v35 = vpop.f32.mrf.mxu3 }
 0x776   : > { %v3248_v3 = vadd.f32 %v11547_v27, %v3247_v35  ;;  %v9011_v35 = vld [vmem:[%s9964_s29 + $0x10c] sm:$0xf] }
 0x778   : > { %v11593_v0 = vadd.f32 %v9645_v30, %v3248_v3  ;;  %v8493_v3 = vld [vmem:[%s9964_s29 + $0x128] sm:$0xf0] }
 0x779   : > { %v8496_v30 = vor.u32 %v9011_v35, %v8493_v3  ;;  %v8365_v35 = vld [vmem:[%s9964_s29 + $0x28] sm:$0xf0] }
 0x77a   : > { %3274 = vadd.xlane.f32.xlu0 %v11593_v0 }
 0x77b   : > { %3947 = vmatpush.bf16.msrb.mxu3 %v8496_v30 }
 0x77d   : > { %v3249_v12 = vpop.f32.mrf.mxu3 }
 0x77e   : > { %v3250_v51 = vadd.f32 %v11547_v27, %v3249_v12  ;;  %v8587_v27 = vld [vmem:[%s9964_s29 + $0x1c8] sm:$0xf]  ;;  %v8451_v12 = vld [vmem:[%s9964_s29 + $0xc0] sm:$0xf] }
 0x77f   : > { %v8588_v14 = vor.u32 %v9039_v23, %v8587_v27  ;;  %v9003_v27 = vld [vmem:[%s9964_s29 + $0xcc] sm:$0xf] }
 0x780   : > { %v11599_v42 = vadd.f32 %v9646_v13, %v3250_v51  ;;  %v9006_v51 = vld [vmem:[%s9964_s29 + $0xdc] sm:$0xf0]  ;;  %v9002_v13 = vld [vmem:[%s9964_s29 + $0xc4] sm:$0xf]  ;;  %v8461_v23 = vld [vmem:[%s9964_s29 + $0xe8] sm:$0xf0] }
 0x781   : > { %3915 = vmatpush.bf16.msrb.mxu2 %v8588_v14  ;;  %v8456_v32 = vor.u32 %v9002_v13, %v8453_v34  ;;  %v8464_v2 = vor.u32 %v9003_v27, %v8461_v23  ;;  %v8419_v14 = vld [vmem:[%s9964_s29 + $0x80] sm:$0xf] }
 0x782   : > { %3276 = vadd.xlane.f32.xlu1 %v11599_v42  ;;  %3315 = vadd.xlane.f32.xlu0 %v3304_v1  ;;  %v8452_v1 = vor.u32 %v9006_v51, %v8451_v12  ;;  %v8420_v17 = vor.u32 %v8998_v61, %v8419_v14 }
 0x783   : > { %3890 = vmatpush.bf16.msrb.mxu1 %v8456_v32  ;;  %3948 = vmatpush.bf16.msrb.mxu3 %v8464_v2 }
 0x784   : > { %3861 = vmatpush.bf16.msrb.mxu0 %v8452_v1 }
 0x785   : > { %3916 = vmatpush.bf16.msrb.mxu2 %v8556_v55  ;;  %v8387_v55 = vld [vmem:[%s9964_s29 + $0x40] sm:$0xf] }
 0x787   : > { %3891 = vmatpush.bf16.msrb.mxu1 %v8424_v5  ;;  %3949 = vmatpush.bf16.msrb.mxu3 %v8432_v31 }
 0x788   : > { %3862 = vmatpush.bf16.msrb.mxu0 %v8420_v17  ;;  %v11692_v17 = vld [vmem:[%s15881_s27] ss:$0 sm:$0xff] }
 0x789   : > { %3917 = vmatpush.bf16.msrb.mxu2 %v8524_v16  ;;  %v8355_v16 = vld [vmem:[%s9964_s29] sm:$0xf] }
 0x78a   : > { %v8356_v10 = vor.u32 %v8982_v18, %v8355_v16 }
 0x78b   : > { %3892 = vmatpush.bf16.msrb.mxu1 %v8392_v57  ;;  %3950 = vmatpush.bf16.msrb.mxu3 %v8400_v36 }
 0x78d   : > { %3918 = vmatpush.bf16.msrb.mxu2 %v8492_v29  ;;  %v8364_v29 = vor.u32 %v8983_v24, %v8363_v41 }
 0x78f   : > { %3893 = vmatpush.bf16.msrb.mxu1 %v8360_v22 }
 0x791   : > { %3919 = vmatpush.bf16.msrb.mxu2 %v8460_v6 }
 0x795   : > { %3920 = vmatpush.bf16.msrb.mxu2 %v8428_v43 }
 0x799   : > { %3921 = vmatpush.bf16.msrb.mxu2 %v8396_v39 }
 0x79d   : > { %3922 = vmatpush.bf16.msrb.mxu2 %v8364_v29 }
 0x7a1   : > { %v3310_v26 = vpop.xlane.xlu1 %3309 }
 0x7a2   : > { %v3325_v56 = vmul.f32 %v3310_v26, %v11566_v40  ;;  %v8388_v26 = vor.u32 %v8990_v47, %v8387_v55 }
 0x7a4   : > { %v11637_v38 = vadd.f32 1e-05, %v3325_v56  ;;  %3863 = vmatpush.bf16.msrb.mxu0 %v8388_v26 }
 0x7a6   : > { %9479 = vrsqrt.f32 %v11637_v38  ;;  %vm3347_vm11 = vweird.f32 %v11637_v38 }
 0x7a8   : > { %3864 = vmatpush.bf16.msrb.mxu0 %v8356_v10 }
 0x7ac   : > { %v9480_v59 = vpop.eup %9479 }
 0x7ad   : > { %v3342_v60 = vmul.f32 %v9480_v59, %v11637_v38  ;;  %vm3348_vm10 = vweird.f32 %v9480_v59  ;;  %v11700_v38 = vld [vmem:[%s15882_s17] ss:$0 sm:$0xff] }
 0x7ae   : > { %vm3349_vm12 = vmor %vm3347_vm11, %vm3348_vm10 }
 0x7af   : > { %v3343_v30 = vmul.f32 %v9480_v59, %v3342_v60 }
 0x7b1   : > { %v3344_v62 = vmul.f32 0.5, %v3343_v30 }
 0x7b3   : > { %v3345_v6 = vsub.f32 1.5, %v3344_v62 }
 0x7b5   : > { %v3271_v28 = vpop.xlane.xlu2 %3270  ;;  %v3346_v23 = vmul.f32 %v9480_v59, %v3345_v6 }
 0x7b6   : > { %v3289_v9 = vmul.f32 %v11566_v40, %v3271_v28 }
 0x7b7   : > { %v3350_v61 = vsel %vm3349_vm12, %v9480_v59, %v3346_v23 }
 0x7b8   : > { %v11666_v56 = vsub.f32 %v11575_v63, %v3289_v9  ;;  %v8979_v63 = vld [vmem:[%s9964_s29 + $0xc] sm:$0xf]  ;;  %v3421_v20 = vmul.f32 %v3350_v61, %v11569_v50 }
 0x7b9   : > { %v8368_v3 = vor.u32 %v8979_v63, %v8365_v35 }
 0x7ba   : > { %v3305_v37 = vmul.f32 %v11666_v56, %v11666_v56  ;;  %v3432_v21 = vmul.f32 %v11692_v17, %v3421_v20 }
 0x7bb   : > { %3951 = vmatpush.bf16.msrb.mxu3 %v8368_v3 }
 0x7bc   : > { %3317 = vadd.xlane.f32.xlu1 %v3305_v37  ;;  %v11706_v43 = vadd.f32 %v11700_v38, %v3432_v21 }
 0x7bd   : > { %v3312_v12 = vpop.xlane.xlu2 %3311  ;;  %v3273_v51 = vpop.xlane.xlu0 %3272 }
 0x7be   : > { %v3326_v13 = vmul.f32 %v3312_v12, %v11566_v40  ;;  %v3290_v1 = vmul.f32 %v11566_v40, %v3273_v51  ;;  %15883 = vst [vmem:[#allocation26_spill] sm:$0xff] %v11706_v43 }
 0x7c0   : > { %v3334_v34 = vadd.f32 1e-05, %v3326_v13  ;;  %v11682_v44 = vsub.f32 %v11581_v54, %v3290_v1 }
 0x7c2   : > { %9481 = vrsqrt.f32 %v3334_v34  ;;  %v3306_v32 = vmul.f32 %v11682_v44, %v11682_v44  ;;  %vm3357_vm14 = vweird.f32 %v3334_v34 }
 0x7c4   : > { %3319 = vadd.xlane.f32.xlu2 %v3306_v32 }
 0x7c5   : > { %v3314_v55 = vpop.xlane.xlu2 %3313 }
 0x7c8   : > { %v9482_v27 = vpop.eup %9481 }
 0x7c9   : > { %v3352_v2 = vmul.f32 %v9482_v27, %v3334_v34  ;;  %vm3358_vm13 = vweird.f32 %v9482_v27 }
 0x7ca   : > { %vm3359_vm15 = vmor %vm3357_vm14, %vm3358_vm13 }
 0x7cb   : > { %v3353_v14 = vmul.f32 %v9482_v27, %v3352_v2 }
 0x7cd   : > { %v3354_v54 = vmul.f32 0.5, %v3353_v14 }
 0x7cf   : > { %v3355_v49 = vsub.f32 1.5, %v3354_v54 }
 0x7d1   : > { %v3356_v48 = vmul.f32 %v9482_v27, %v3355_v49 }
 0x7d3   : > { %v3360_v5 = vsel %vm3359_vm15, %v9482_v27, %v3356_v48 }
 0x7d4   : > { %v3422_v4 = vmul.f32 %v3360_v5, %v11578_v53  ;;  %v3327_v53 = vmul.f32 %v3314_v55, %v11566_v40 }
 0x7d6   : > { %v3433_v52 = vmul.f32 %v11692_v17, %v3422_v4  ;;  %v3335_v47 = vadd.f32 1e-05, %v3327_v53 }
 0x7d8   : > { %v11709_v50 = vadd.f32 %v11700_v38, %v3433_v52  ;;  %9483 = vrsqrt.f32 %v3335_v47  ;;  %vm3367_vm1 = vweird.f32 %v3335_v47 }
 0x7da   : > { %15884 = vst [vmem:[#allocation34_spill] sm:$0xff] %v11709_v50  ;;  %v11713_v31 = vpack.c.bf16 %v11709_v50, %v11706_v43 }
 0x7dc   : > { %15885 = vst [vmem:[#allocation28_spill] sm:$0xff] %v11713_v31  ;;  %3865 = vmatmul.bf16.vlgmr.msrb.gmra.mxu0 %v11713_v31  ;;  %3894 = vmatmul.bf16.vlgmr.msrb.gmra.mxu1 %v11713_v31 }
 0x7dd   : > { %3923 = vmatmul.bf16.vlgmr.msrb.gmra.mxu2 %v11713_v31  ;;  %3952 = vmatmul.bf16.vlgmr.msrb.gmra.mxu3 %v11713_v31  ;;  %v8501_v31 = vld [vmem:[%s9964_s29 + $0x130] sm:$0xf0] }
 0x7de   : > { %v9484_v28 = vpop.eup %9483 }
 0x7df   : > { %v3362_v19 = vmul.f32 %v9484_v28, %v3335_v47  ;;  %vm3368_vm0 = vweird.f32 %v9484_v28 }
 0x7e0   : > { %vm3369_vm2 = vmor %vm3367_vm1, %vm3368_vm0 }
 0x7e1   : > { %v3363_v59 = vmul.f32 %v9484_v28, %v3362_v19 }
 0x7e3   : > { %v3364_v16 = vmul.f32 0.5, %v3363_v59 }
 0x7e5   : > { %v3365_v18 = vsub.f32 1.5, %v3364_v16 }
 0x7e7   : > { %v3366_v60 = vmul.f32 %v9484_v28, %v3365_v18 }
 0x7e9   : > { %v3370_v41 = vsel %vm3369_vm2, %v9484_v28, %v3366_v60 }
 0x7ed   : > { %v3275_v46 = vpop.xlane.xlu0 %3274 }
 0x7ee   : > { %v3291_v26 = vmul.f32 %v11566_v40, %v3275_v46 }
 0x7f0   : > { %v11722_v11 = vsub.f32 %v11593_v0, %v3291_v26  ;;  %v3519_v26 = vld [vmem:[%s9969_s0] sm:$0xff] }
 0x7f1   : > { %v11770_v19 = vperm.slane %v3519_v26, 0 }
 0x7f2   : > { %v3307_v15 = vmul.f32 %v11722_v11, %v11722_v11 }
 0x7f4   : > { %3321 = vadd.xlane.f32.xlu0 %v3307_v15 }
 0x7f5   : > { %v3277_v9 = vpop.xlane.xlu1 %3276  ;;  %v3316_v57 = vpop.xlane.xlu0 %3315 }
 0x7f6   : > { %v3292_v39 = vmul.f32 %v11566_v40, %v3277_v9  ;;  %v3328_v8 = vmul.f32 %v3316_v57, %v11566_v40 }
 0x7f8   : > { %v11729_v45 = vsub.f32 %v11599_v42, %v3292_v39  ;;  %v3336_v36 = vadd.f32 1e-05, %v3328_v8  ;;  %v3423_v42 = vmul.f32 %v3370_v41, %v11587_v7 }
 0x7fa   : > { %9485 = vrsqrt.f32 %v3336_v36  ;;  %v3308_v0 = vmul.f32 %v11729_v45, %v11729_v45  ;;  %vm3377_vm4 = vweird.f32 %v3336_v36  ;;  %v3434_v63 = vmul.f32 %v11692_v17, %v3423_v42 }
 0x7fc   : > { %3323 = vadd.xlane.f32.xlu1 %v3308_v0  ;;  %v11738_v30 = vadd.f32 %v11700_v38, %v3434_v63  ;;  %v11792_v0 = vperm.slane %v3519_v26, 2 }
 0x7fe   : > { %15886 = vst [vmem:[#allocation24_spill] sm:$0xff] %v11738_v30 }
 0x800   : > { %v9486_v25 = vpop.eup %9485 }
 0x801   : > { %v3372_v10 = vmul.f32 %v9486_v25, %v3336_v36  ;;  %vm3378_vm3 = vweird.f32 %v9486_v25 }
 0x802   : > { %vm3379_vm5 = vmor %vm3377_vm4, %vm3378_vm3 }
 0x803   : > { %v3373_v58 = vmul.f32 %v9486_v25, %v3372_v10 }
 0x805   : > { %v3374_v24 = vmul.f32 0.5, %v3373_v58 }
 0x807   : > { %v3375_v37 = vsub.f32 1.5, %v3374_v24 }
 0x809   : > { %v3376_v22 = vmul.f32 %v9486_v25, %v3375_v37 }
 0x80b   : > { %v3380_v29 = vsel %vm3379_vm5, %v9486_v25, %v3376_v22 }
 0x80c   : > { %v3424_v35 = vmul.f32 %v3380_v29, %v11596_v33 }
 0x80e   : > { %v3435_v3 = vmul.f32 %v11692_v17, %v3424_v35 }
 0x810   : > { %v11741_v12 = vadd.f32 %v11700_v38, %v3435_v3 }
 0x812   : > { %15887 = vst [vmem:[#allocation23_spill] sm:$0xff] %v11741_v12  ;;  %v11745_v51 = vpack.c.bf16 %v11741_v12, %v11738_v30 }
 0x814   : > { %15888 = vst [vmem:[#allocation38_spill] sm:$0xff] %v11745_v51  ;;  %3870 = vmatmul.bf16.gmra.mxu0 %v11745_v51  ;;  %3899 = vmatmul.bf16.gmra.mxu1 %v11745_v51 }
 0x815   : > { %3928 = vmatmul.bf16.gmra.mxu2 %v11745_v51  ;;  %3957 = vmatmul.bf16.gmra.mxu3 %v11745_v51  ;;  %v8499_v51 = vld [vmem:[%s9964_s29 + $0x110] sm:$0xf] }
 0x82f   : > { %v3318_v7 = vpop.xlane.xlu1 %3317 }
 0x830   : > { %v3329_v33 = vmul.f32 %v3318_v7, %v11566_v40  ;;  %v11810_v7 = vperm.slane %v3519_v26, 3 }
 0x832   : > { %v3337_v13 = vadd.f32 1e-05, %v3329_v33  ;;  %15892 = vst [vmem:[#allocation29_spill] sm:$0xff] %v11810_v7 }
 0x834   : > { %9487 = vrsqrt.f32 %v3337_v13  ;;  %vm3387_vm7 = vweird.f32 %v3337_v13 }
 0x837   : > { %v3320_v1 = vpop.xlane.xlu2 %3319 }
 0x838   : > { %v3330_v34 = vmul.f32 %v3320_v1, %v11566_v40 }
 0x83a   : > { %v9488_v62 = vpop.eup %9487  ;;  %v3338_v32 = vadd.f32 1e-05, %v3330_v34 }
 0x83b   : > { %v3382_v6 = vmul.f32 %v9488_v62, %v3337_v13  ;;  %vm3388_vm6 = vweird.f32 %v9488_v62 }
 0x83c   : > { %9489 = vrsqrt.f32 %v3338_v32  ;;  %vm3389_vm8 = vmor %vm3387_vm7, %vm3388_vm6  ;;  %vm3397_vm10 = vweird.f32 %v3338_v32 }
 0x83d   : > { %v3383_v27 = vmul.f32 %v9488_v62, %v3382_v6 }
 0x83f   : > { %v3384_v23 = vmul.f32 0.5, %v3383_v27 }
 0x841   : > { %v3385_v2 = vsub.f32 1.5, %v3384_v23 }
 0x842   : > { %v9490_v14 = vpop.eup %9489 }
 0x843   : > { %v3386_v61 = vmul.f32 %v9488_v62, %v3385_v2  ;;  %v3392_v54 = vmul.f32 %v9490_v14, %v3338_v32  ;;  %vm3398_vm9 = vweird.f32 %v9490_v14 }
 0x844   : > { %vm3399_vm11 = vmor %vm3397_vm10, %vm3398_vm9 }
 0x845   : > { %v3393_v49 = vmul.f32 %v9490_v14, %v3392_v54  ;;  %v3390_v20 = vsel %vm3389_vm8, %v9488_v62, %v3386_v61 }
 0x846   : > { %v3425_v21 = vmul.f32 %v3390_v20, %v11666_v56 }
 0x847   : > { %v3394_v48 = vmul.f32 0.5, %v3393_v49 }
 0x848   : > { %v3436_v55 = vmul.f32 %v11692_v17, %v3425_v21 }
 0x849   : > { %v3395_v5 = vsub.f32 1.5, %v3394_v48 }
 0x84a   : > { %v11758_v46 = vadd.f32 %v11700_v38, %v3436_v55 }
 0x84b   : > { %v3396_v4 = vmul.f32 %v9490_v14, %v3395_v5 }
 0x84c   : > { %15889 = vst [vmem:[#allocation35_spill] sm:$0xff] %v11758_v46 }
 0x84d   : > { %v3400_v52 = vsel %vm3399_vm11, %v9490_v14, %v3396_v4 }
 0x84e   : > { %v3426_v53 = vmul.f32 %v3400_v52, %v11682_v44  ;;  %v11772_v44 = vperm.slane %v3519_v26, 1 }
 0x850   : > { %v3437_v47 = vmul.f32 %v11692_v17, %v3426_v53 }
 0x852   : > { %v11761_v28 = vadd.f32 %v11700_v38, %v3437_v47 }
 0x854   : > { %15890 = vst [vmem:[#allocation36_spill] sm:$0xff] %v11761_v28  ;;  %v11766_v56 = vpack.c.bf16 %v11761_v28, %v11758_v46 }
 0x856   : > { %15891 = vst [vmem:[#allocation27_spill] sm:$0xff] %v11766_v56  ;;  %3875 = vmatmul.bf16.gmra.mxu0 %v11766_v56  ;;  %3904 = vmatmul.bf16.gmra.mxu1 %v11766_v56 }
 0x857   : > { %3933 = vmatmul.bf16.gmra.mxu2 %v11766_v56  ;;  %3962 = vmatmul.bf16.gmra.mxu3 %v11766_v56 }
 0x859   : > { %v3866_v15 = vpop.f32.mrf.mxu0  ;;  %v3895_v59 = vpop.f32.mrf.mxu1 }
 0x85a   : > { %v11777_v9 = vadd.f32 %v3866_v15, %v11770_v19  ;;  %v11780_v57 = vadd.f32 %v3895_v59, %v11772_v44 }
 0x85c   : > { %v11783_v39 = vmul.f32 0.70710677, %v11777_v9  ;;  %v11786_v8 = vmul.f32 0.70710677, %v11780_v57 }
 0x85e   : > { %v4217_v36 = vmul.f32 %v11783_v39, %v11783_v39  ;;  %v4257_v16 = vmul.f32 %v11786_v8, %v11786_v8 }
 0x860   : > { %v11794_v18 = vmin.f32 %v4217_v36, 16.0  ;;  %v11796_v25 = vmin.f32 %v4257_v16, 16.0  ;;  %v3924_v60 = vpop.f32.mrf.mxu2  ;;  %v3953_v13 = vpop.f32.mrf.mxu3 }
 0x861   : > { %v11801_v41 = vadd.f32 %v3924_v60, %v11792_v0  ;;  %v11818_v32 = vadd.f32 %v3953_v13, %v11810_v7  ;;  %v3868_v4 = vpop.f32.mrf.mxu0 }
 0x862   : > { %v4230_v10 = vmul.f32 3.8918573e-05, %v11794_v18  ;;  %v4270_v58 = vmul.f32 3.8918573e-05, %v11796_v25  ;;  %v4219_v34 = vmul.f32 2.1237322e-06, %v11794_v18  ;;  %v11833_v26 = vadd.f32 %v3868_v4, %v11770_v19 }
 0x863   : > { %v11805_v22 = vmul.f32 0.70710677, %v11801_v41  ;;  %v4259_v27 = vmul.f32 2.1237322e-06, %v11796_v25  ;;  %v11823_v61 = vmul.f32 0.70710677, %v11818_v32 }
 0x864   : > { %v4231_v24 = vadd.f32 0.001143296, %v4230_v10  ;;  %v4271_v37 = vadd.f32 0.001143296, %v4270_v58  ;;  %v4220_v2 = vadd.f32 0.00028619796, %v4219_v34 }
 0x865   : > { %v4297_v35 = vmul.f32 %v11805_v22, %v11805_v22  ;;  %v4260_v49 = vadd.f32 0.00028619796, %v4259_v27  ;;  %v4337_v21 = vmul.f32 %v11823_v61, %v11823_v61 }
 0x866   : > { %v4232_v42 = vmul.f32 %v4231_v24, %v11794_v18  ;;  %v4272_v29 = vmul.f32 %v4271_v37, %v11796_v25  ;;  %v4221_v48 = vmul.f32 %v4220_v2, %v11794_v18  ;;  %v11841_v24 = vmul.f32 0.70710677, %v11833_v26 }
 0x867   : > { %v11813_v1 = vmin.f32 %v4297_v35, 16.0  ;;  %v4261_v55 = vmul.f32 %v4260_v49, %v11796_v25  ;;  %v11836_v36 = vmin.f32 %v4337_v21, 16.0 }
 0x868   : > { %v4233_v63 = vadd.f32 0.014752088, %v4232_v42  ;;  %v4273_v3 = vadd.f32 0.014752088, %v4272_v29  ;;  %v4222_v47 = vadd.f32 0.0036580483, %v4221_v48  ;;  %v4537_v34 = vmul.f32 %v11841_v24, %v11841_v24 }
 0x869   : > { %v4310_v23 = vmul.f32 3.8918573e-05, %v11813_v1  ;;  %v4299_v59 = vmul.f32 2.1237322e-06, %v11813_v1  ;;  %v4262_v60 = vadd.f32 0.0036580483, %v4261_v55 }
 0x86a   : > { %v4234_v33 = vmul.f32 %v4233_v63, %v11794_v18  ;;  %v4274_v62 = vmul.f32 %v4273_v3, %v11796_v25  ;;  %v4223_v58 = vmul.f32 %v4222_v47, %v11794_v18  ;;  %v4339_v29 = vmul.f32 2.1237322e-06, %v11836_v36 }
 0x86b   : > { %v4311_v20 = vadd.f32 0.001143296, %v4310_v23  ;;  %v4300_v42 = vadd.f32 0.00028619796, %v4299_v59  ;;  %v4263_v35 = vmul.f32 %v4262_v60, %v11796_v25  ;;  %v4350_v3 = vmul.f32 3.8918573e-05, %v11836_v36 }
 0x86c   : > { %v4235_v6 = vadd.f32 0.112945676, %v4234_v33  ;;  %v4275_v14 = vadd.f32 0.112945676, %v4274_v62  ;;  %v4224_v13 = vadd.f32 0.05243302, %v4223_v58  ;;  %v3897_v62 = vpop.f32.mrf.mxu1 }
 0x86d   : > { %v4312_v53 = vmul.f32 %v4311_v20, %v11813_v1  ;;  %v4301_v27 = vmul.f32 %v4300_v42, %v11813_v1  ;;  %v4340_v23 = vadd.f32 0.00028619796, %v4339_v29  ;;  %v4264_v2 = vadd.f32 0.05243302, %v4263_v35 }
 0x86e   : > { %v4236_v54 = vmul.f32 %v4235_v6, %v11794_v18  ;;  %v4276_v5 = vmul.f32 %v4275_v14, %v11796_v25  ;;  %v4351_v14 = vadd.f32 0.001143296, %v4350_v3  ;;  %v3898_v49 = vadd.f32 %v3897_v62, %v11772_v44 }
 0x86f   : > { %v4313_v10 = vadd.f32 0.014752088, %v4312_v53  ;;  %v4225_v20 = vmul.f32 %v4224_v13, %v11794_v18  ;;  %v11858_v48 = vmin.f32 %v4537_v34, 16.0  ;;  %v4341_v21 = vmul.f32 %v4340_v23, %v11836_v36 }
 0x870   : > { %v4237_v52 = vadd.f32 0.4994258, %v4236_v54  ;;  %v4277_v15 = vadd.f32 0.4994258, %v4276_v5  ;;  %v4302_v5 = vadd.f32 0.0036580483, %v4301_v27  ;;  %v4265_v4 = vmul.f32 %v4264_v2, %v11796_v25 }
 0x871   : > { %v4314_v33 = vmul.f32 %v4313_v10, %v11813_v1  ;;  %v11865_v53 = vmul.f32 0.70710677, %v3898_v49  ;;  %v4550_v59 = vmul.f32 3.8918573e-05, %v11858_v48  ;;  %v4342_v10 = vadd.f32 0.0036580483, %v4341_v21 }
 0x872   : > { %v4238_v16 = vmul.f32 %v4237_v52, %v11794_v18  ;;  %v4278_v37 = vmul.f32 %v4277_v15, %v11796_v25  ;;  %v4352_v52 = vmul.f32 %v4351_v14, %v11836_v36  ;;  %v4226_v15 = vadd.f32 0.18741608, %v4225_v20 }
 0x873   : > { %v4315_v54 = vadd.f32 0.112945676, %v4314_v33  ;;  %v4303_v60 = vmul.f32 %v4302_v5, %v11813_v1  ;;  %v4266_v58 = vadd.f32 0.18741608, %v4265_v4  ;;  %v4577_v3 = vmul.f32 %v11865_v53, %v11865_v53 }
 0x874   : > { %v11845_v63 = vadd.f32 1.0, %v4238_v16  ;;  %v11852_v6 = vadd.f32 1.0, %v4278_v37  ;;  %v3926_v16 = vpop.f32.mrf.mxu2  ;;  %v4353_v37 = vadd.f32 0.014752088, %v4352_v52  ;;  %v11879_v13 = vmul.f32 0.5, %v11777_v9 }
 0x875   : > { %v4316_v55 = vmul.f32 %v4315_v54, %v11813_v1  ;;  %v3927_v33 = vadd.f32 %v3926_v16, %v11792_v0  ;;  %v4227_v34 = vmul.f32 %v4226_v15, %v11794_v18  ;;  %v4551_v62 = vadd.f32 0.001143296, %v4550_v59 }
 0x876   : > { %9491 = vrcp.f32 %v11845_v63  ;;  %v11883_v27 = vmul.f32 0.5, %v11780_v57  ;;  %v11886_v23 = vmul.f32 0.5, %v11801_v41  ;;  %v4304_v2 = vadd.f32 0.05243302, %v4303_v60 }
 0x877   : > { %9493 = vrcp.f32 %v11852_v6  ;;  %v4317_v35 = vadd.f32 0.4994258, %v4316_v55  ;;  %v4343_v14 = vmul.f32 %v4342_v10, %v11836_v36  ;;  %v4267_v54 = vmul.f32 %v4266_v58, %v11796_v25 }
 0x878   : > { %v11893_v9 = vmul.f32 0.5, %v11818_v32  ;;  %v4354_v18 = vmul.f32 %v4353_v37, %v11836_v36  ;;  %v11897_v21 = vmin.f32 %v4577_v3, 16.0  ;;  %v11899_v41 = vmul.f32 0.70710677, %v3927_v33  ;;  %v3322_v3 = vpop.xlane.xlu0 %3321 }
 0x879   : > { %v4318_v57 = vmul.f32 %v4317_v35, %v11813_v1  ;;  %v11901_v4 = vadd.f32 1.1283791, %v4227_v34  ;;  %v11904_v52 = vmul.f32 0.5, %v11833_v26  ;;  %v4552_v25 = vmul.f32 %v4551_v62, %v11858_v48  ;;  %v3955_v35 = vpop.f32.mrf.mxu3 }
 0x87a   : > { %15893 = vst [vmem:[#allocation30_spill] sm:$0xff] %v11893_v9  ;;  %v11907_v55 = vmul.f32 0.5, %v3898_v49  ;;  %v4249_v32 = vand.u32 2147483647, %v11845_v63  ;;  %v4305_v15 = vmul.f32 %v4304_v2, %v11813_v1  ;;  %v4344_v59 = vadd.f32 0.05243302, %v4343_v14 }
 0x87b   : > { %15894 = vst [vmem:[#allocation39_spill] sm:$0xff] %v11904_v52  ;;  %v4539_v16 = vmul.f32 2.1237322e-06, %v11858_v48  ;;  %vm4245_vm12 = vweird.f32 %v11845_v63  ;;  %v11913_v60 = vadd.f32 1.1283791, %v4267_v54  ;;  %v11916_v37 = vadd.f32 1.0, %v4318_v57 }
 0x87c   : > { %v11867_v47 = vpop.eup %9491  ;;  %15895 = vst [vmem:[#allocation21_spill] sm:$0xff] %v11907_v55  ;;  %v4355_v58 = vadd.f32 0.112945676, %v4354_v18  ;;  %v4590_v49 = vmul.f32 3.8918573e-05, %v11897_v21  ;;  %v4251_v34 = vand.u32 2147483648, %v11845_v63  ;;  %vm4285_vm13 = vweird.f32 %v11852_v6 }
 0x87d   : > { %v11871_v42 = vpop.eup %9493  ;;  %v4241_v29 = vmul.f32 %v11867_v47, %v11845_v63  ;;  %v4289_v62 = vand.u32 2147483647, %v11852_v6  ;;  %v4553_v2 = vadd.f32 0.014752088, %v4552_v25  ;;  %vm4246_vm14 = vweird.f32 %v11867_v47  ;;  %v9020_v9 = vld [vmem:[%s9964_s29 + $0x154] sm:$0xf] }
 0x87e   : > { %v4281_v20 = vmul.f32 %v11871_v42, %v11852_v6  ;;  %vm11925_vm15 = vcmp.eq.f32.partialorder %v4249_v32, 8.507059e+37  ;;  %v4306_v54 = vadd.f32 0.18741608, %v4305_v15  ;;  %v4540_v18 = vadd.f32 0.00028619796, %v4539_v16  ;;  %vm11951_vm1 = vmor %vm4245_vm12, %vm4246_vm14 }
 0x87f   : > { %v4242_v5 = vsub.f32 1.0, %v4241_v29  ;;  %v4617_v29 = vmul.f32 %v11899_v41, %v11899_v41  ;;  %v4356_v57 = vmul.f32 %v4355_v58, %v11836_v36  ;;  %v11933_v28 = vadd.f32 %v3955_v35, %v11810_v7  ;;  %v3324_v58 = vpop.xlane.xlu1 %3323  ;;  %v9012_v52 = vld [vmem:[%s9964_s29 + $0x114] sm:$0xf] }
 0x880   : > { %v4282_v10 = vsub.f32 1.0, %v4281_v20  ;;  %v4345_v20 = vmul.f32 %v4344_v59, %v11836_v36  ;;  %v3331_v46 = vmul.f32 %v3322_v3, %v11566_v40  ;;  %9495 = vrcp.f32 %v11916_v37 }
 0x881   : > { %v4243_v26 = vmul.f32 %v11867_v47, %v4242_v5  ;;  %15898 = vst [vmem:[#allocation37_spill] sm:$0xff] %v11933_v28  ;;  %v4591_v32 = vadd.f32 0.001143296, %v4590_v49  ;;  %v11938_v12 = vmin.f32 %v4617_v29, 16.0  ;;  %v4252_v15 = vor.u32 1.1754944e-38, %v4251_v34 }
 0x882   : > { %v4283_v5 = vmul.f32 %v11871_v42, %v4282_v10  ;;  %v4291_v59 = vand.u32 2147483648, %v11852_v6  ;;  %v4554_v16 = vmul.f32 %v4553_v2, %v11858_v48  ;;  %v11942_v10 = vmul.f32 0.5, %v3927_v33 }
 0x883   : > { %v4244_v25 = vadd.f32 %v11867_v47, %v4243_v26  ;;  %vm4286_vm0 = vweird.f32 %v11871_v42  ;;  %v4307_v35 = vmul.f32 %v4306_v54, %v11813_v1  ;;  %v4346_v3 = vadd.f32 0.18741608, %v4345_v20 }
 0x884   : > { %15899 = vst [vmem:[#allocation40_spill] sm:$0xff] %v11942_v10  ;;  %v4541_v26 = vmul.f32 %v4540_v18, %v11858_v48  ;;  %v4284_v29 = vadd.f32 %v11871_v42, %v4283_v5  ;;  %v4357_v33 = vadd.f32 0.4994258, %v4356_v57  ;;  %v11957_v34 = vmul.f32 0.70710677, %v11933_v28  ;;  %vm11979_vm3 = vmor %vm4285_vm13, %vm4286_vm0 }
 0x885   : > { %v11959_v2 = vadd.f32 1e-05, %v3331_v46  ;;  %v4248_v1 = vsel %vm11951_vm1, %v11867_v47, %v4244_v25  ;;  %v4592_v54 = vmul.f32 %v4591_v32, %v11897_v21  ;;  %v4630_v63 = vmul.f32 3.8918573e-05, %v11938_v12  ;;  %v8533_v28 = vld [vmem:[%s9964_s29 + $0x170] sm:$0xf0] }
 0x886   : > { %15902 = vst [vmem:[#allocation41_spill] sm:$0xff] %v11957_v34  ;;  %v3332_v20 = vmul.f32 %v3324_v58, %v11566_v40  ;;  %vm11967_vm2 = vcmp.eq.f32.partialorder %v4289_v62, 8.507059e+37  ;;  %v4331_v5 = vand.u32 2147483648, %v11916_v37  ;;  %v4555_v57 = vadd.f32 0.112945676, %v4554_v16  ;;  %v11973_v46 = vpop.eup %9495 }
 0x887   : > { %9497 = vrsqrt.f32 %v11959_v2  ;;  %v4292_v25 = vor.u32 1.1754944e-38, %v4291_v59  ;;  %v11983_v62 = vadd.f32 1.1283791, %v4307_v35  ;;  %v4347_v32 = vmul.f32 %v4346_v3, %v11836_v36 }
 0x888   : > { %v4542_v58 = vadd.f32 0.0036580483, %v4541_v26  ;;  %v4253_v16 = vsel %vm11925_vm15, %v4252_v15, %v4248_v1  ;;  %v4288_v49 = vsel %vm11979_vm3, %v11871_v42, %v4284_v29  ;;  %v4358_v40 = vmul.f32 %v4357_v33, %v11836_v36 }
 0x889   : > { %v4657_v6 = vmul.f32 %v11957_v34, %v11957_v34  ;;  %v4229_v59 = vmul.f32 %v11901_v4, %v11783_v39  ;;  %v4593_v35 = vadd.f32 0.014752088, %v4592_v54  ;;  %v4631_v3 = vadd.f32 0.001143296, %v4630_v63 }
 0x88a   : > { %v11996_v26 = vadd.f32 1e-05, %v3332_v20  ;;  %v4321_v14 = vmul.f32 %v11973_v46, %v11916_v37  ;;  %v12001_v42 = vor.u32 1.1754944e-38, %v4331_v5  ;;  %v4556_v36 = vmul.f32 %v4555_v57, %v11858_v48  ;;  %v8595_v5 = vld [vmem:[%s9964_s29 + $0x1d0] sm:$0xf] }
 0x88b   : > { %v4254_v29 = vmul.f32 %v4253_v16, %v4229_v59  ;;  %v4293_v33 = vsel %vm11967_vm2, %v4292_v25, %v4288_v49  ;;  %v12006_v39 = vadd.f32 1.1283791, %v4347_v32  ;;  %v4543_v4 = vmul.f32 %v4542_v58, %v11858_v48  ;;  %v9040_v57 = vld [vmem:[%s9964_s29 + $0x1ec] sm:$0xf0] }
 0x88c   : > { %v4269_v54 = vmul.f32 %v11913_v60, %v11786_v8  ;;  %v12013_v63 = vadd.f32 1.0, %v4358_v40  ;;  %v12015_v20 = vmin.f32 %v4657_v6, 16.0  ;;  %v4594_v18 = vmul.f32 %v4593_v35, %v11897_v21  ;;  %v9036_v35 = vld [vmem:[%s9964_s29 + $0x1d4] sm:$0xf] }
 0x88d   : > { %v12009_v1 = vpop.eup %9497  ;;  %v4632_v47 = vmul.f32 %v4631_v3, %v11938_v12  ;;  %9499 = vrsqrt.f32 %v11996_v26  ;;  %v4322_v58 = vsub.f32 1.0, %v4321_v14  ;;  %v4557_v8 = vadd.f32 0.4994258, %v4556_v36  ;;  %v8597_v3 = vld [vmem:[%s9964_s29 + $0x1f0] sm:$0xf0] }
 0x88e   : > { %v3402_v25 = vmul.f32 %v12009_v1, %v11959_v2  ;;  %v4294_v32 = vmul.f32 %v4293_v33, %v4269_v54  ;;  %v4579_v40 = vmul.f32 2.1237322e-06, %v11897_v21  ;;  %v8609_v60 = vclamps-f32 %v4254_v29, 1.0  ;;  %v8603_v54 = vld [vmem:[%s9964_s29 + $0x1d8] sm:$0xf] }
 0x88f   : > { %v4544_v16 = vadd.f32 0.05243302, %v4543_v4  ;;  %v8596_v6 = vor.u32 %v9040_v57, %v8595_v5  ;;  %v4670_v59 = vmul.f32 3.8918573e-05, %v12015_v20  ;;  %v4595_v33 = vadd.f32 0.112945676, %v4594_v18 }
 0x890   : > { %v3403_v49 = vmul.f32 %v12009_v1, %v3402_v25  ;;  %v4633_v14 = vadd.f32 0.014752088, %v4632_v47  ;;  %v8610_v36 = vclamps-f32 %v4294_v32, 1.0  ;;  %9501 = vrcp.f32 %v12013_v63  ;;  %v9041_v25 = vld [vmem:[%s9964_s29 + $0x1f4] sm:$0xf0] }
 0x891   : > { %3973 = vmatpush.bf16.msra.mxu0 %v8596_v6  ;;  %v4558_v29 = vmul.f32 %v4557_v8, %v11858_v48  ;;  %v4323_v57 = vmul.f32 %v11973_v46, %v4322_v58  ;;  %v4371_v15 = vand.u32 2147483648, %v12013_v63  ;;  %v4545_v18 = vmul.f32 %v4544_v16, %v11858_v48  ;;  %v9037_v6 = vld [vmem:[%s9964_s29 + $0x1dc] sm:$0xf] }
 0x892   : > { %v3404_v4 = vmul.f32 0.5, %v3403_v49  ;;  %v8600_v47 = vor.u32 %v9036_v35, %v8597_v3  ;;  %v8605_v32 = vld [vmem:[%s9964_s29 + $0x1f8] sm:$0xf0]  ;;  %v12041_v30 = vadd.f32 1.0, %v8609_v60  ;;  %v4619_v8 = vmul.f32 2.1237322e-06, %v11938_v12 }
 0x893   : > { %v12034_v5 = vpop.eup %9499  ;;  %v4671_v49 = vadd.f32 0.001143296, %v4670_v59  ;;  %v4596_v43 = vmul.f32 %v4595_v33, %v11897_v21  ;;  %v4634_v56 = vmul.f32 %v4633_v14, %v11938_v12  ;;  %v8604_v16 = vor.u32 %v9041_v25, %v8603_v54  ;;  %v8563_v35 = vld [vmem:[%s9964_s29 + $0x190] sm:$0xf]  ;;  %v9028_v54 = vld [vmem:[%s9964_s29 + $0x194] sm:$0xf] }
 0x894   : > { %v3405_v50 = vsub.f32 1.5, %v3404_v4  ;;  %v3412_v58 = vmul.f32 %v12034_v5, %v11996_v26  ;;  %4002 = vmatpush.bf16.msra.mxu1 %v8600_v47  ;;  %v9032_v3 = vld [vmem:[%s9964_s29 + $0x1ac] sm:$0xf0]  ;;  %v12050_v10 = vadd.f32 1.0, %v8610_v36  ;;  %v12052_v60 = vadd.f32 1.0, %v4558_v29 }
 0x895   : > { %v4580_v59 = vadd.f32 0.00028619796, %v4579_v40  ;;  %v8608_v4 = vor.u32 %v9037_v6, %v8605_v32  ;;  %v12054_v33 = vadd.f32 0.18741608, %v4545_v18  ;;  %vm3408_vm4 = vweird.f32 %v12009_v1  ;;  %4031 = vmatpush.bf16.msra.mxu2 %v8604_v16  ;;  %v8565_v25 = vld [vmem:[%s9964_s29 + $0x1b0] sm:$0xf0] }
 0x896   : > { %v3406_v14 = vmul.f32 %v12009_v1, %v3405_v50  ;;  %v3413_v55 = vmul.f32 %v12034_v5, %v3412_v58  ;;  %v12061_v36 = vpop.eup %9501  ;;  %v15907_v29 = vand.u32 2147483647, %v11916_v37  ;;  %v12069_v18 = vadd.f32 0.00028619796, %v4619_v8  ;;  %v8571_v6 = vld [vmem:[%s9964_s29 + $0x198] sm:$0xf] }
 0x897   : > { %v4672_v50 = vmul.f32 %v4671_v49, %v12015_v20  ;;  %4060 = vmatpush.bf16.msra.mxu3 %v8608_v4  ;;  %v8564_v47 = vor.u32 %v9032_v3, %v8563_v35  ;;  %v9033_v32 = vld [vmem:[%s9964_s29 + $0x1b4] sm:$0xf0]  ;;  %vm4326_vm6 = vweird.f32 %v11973_v46  ;;  %v12075_v58 = vadd.f32 0.4994258, %v4596_v43  ;;  %v9029_v8 = vld [vmem:[%s9964_s29 + $0x19c] sm:$0xf] }
 0x898   : > { %vm12065_vm5 = vcmp.eq.f32.partialorder %v15907_v29, 8.507059e+37  ;;  %v12077_v16 = vadd.f32 0.112945676, %v4634_v56  ;;  %vm3407_vm7 = vweird.f32 %v11959_v2  ;;  %v4324_v49 = vadd.f32 %v11973_v46, %v4323_v57  ;;  %v8573_v56 = vld [vmem:[%s9964_s29 + $0x1b8] sm:$0xf0] }
 0x899   : > { %9503 = vrcp.f32 %v12052_v60  ;;  %vm12085_vm8 = vmor %vm3407_vm7, %vm3408_vm4  ;;  %v3414_v3 = vmul.f32 0.5, %v3413_v55  ;;  %3974 = vmatpush.bf16.msra.mxu0 %v8564_v47  ;;  %v8568_v43 = vor.u32 %v9028_v54, %v8565_v25  ;;  %v8531_v4 = vld [vmem:[%s9964_s29 + $0x150] sm:$0xf]  ;;  %v8572_v57 = vor.u32 %v9033_v32, %v8571_v6  ;;  %v8539_v47 = vld [vmem:[%s9964_s29 + $0x158] sm:$0xf] }
 0x89a   : > { %v3410_v2 = vsel %vm12085_vm8, %v12009_v1, %v3406_v14  ;;  %v9024_v29 = vld [vmem:[%s9964_s29 + $0x16c] sm:$0xf0]  ;;  %vm4325_vm9 = vweird.f32 %v11916_v37  ;;  %v12100_v55 = vmul.f32 %v12061_v36, %v12013_v63  ;;  %v4581_v54 = vmul.f32 %v4580_v59, %v11897_v21  ;;  %v9025_v1 = vld [vmem:[%s9964_s29 + $0x174] sm:$0xf0]  ;;  %v9021_v59 = vld [vmem:[%s9964_s29 + $0x15c] sm:$0xf] }
 0x89b   : > { %v4673_v25 = vadd.f32 0.014752088, %v4672_v50  ;;  %4003 = vmatpush.bf16.msra.mxu1 %v8568_v43  ;;  %v4309_v14 = vmul.f32 %v11983_v62, %v11805_v22  ;;  %vm12109_vm10 = vmor %vm4325_vm9, %vm4326_vm6  ;;  %v12113_v6 = vor.u32 1.1754944e-38, %v4371_v15  ;;  %v3415_v32 = vsub.f32 1.5, %v3414_v3  ;;  %4032 = vmatpush.bf16.msra.mxu2 %v8572_v57  ;;  %v8541_v50 = vld [vmem:[%s9964_s29 + $0x178] sm:$0xf0] }
 0x89c   : > { %vm3418_vm11 = vweird.f32 %v12034_v5  ;;  %v4328_v22 = vsel %vm12109_vm10, %v11973_v46, %v4324_v49  ;;  %v3427_v62 = vmul.f32 %v3410_v2, %v11722_v11  ;;  %v8576_v35 = vor.u32 %v9029_v8, %v8573_v56  ;;  %v9016_v15 = vld [vmem:[%s9964_s29 + $0x12c] sm:$0xf0]  ;;  %v8507_v37 = vld [vmem:[%s9964_s29 + $0x118] sm:$0xf]  ;;  %v8509_v2 = vld [vmem:[%s9964_s29 + $0x138] sm:$0xf0] }
 0x89d   : > { %v8532_v43 = vor.u32 %v9024_v29, %v8531_v4  ;;  %v12127_v3 = vmul.f32 %v12006_v39, %v11823_v61  ;;  %v3416_v57 = vmul.f32 %v12034_v5, %v3415_v32  ;;  %vm3417_vm12 = vweird.f32 %v11996_v26  ;;  %v9017_v46 = vld [vmem:[%s9964_s29 + $0x134] sm:$0xf0]  ;;  %v8467_v29 = vld [vmem:[%s9964_s29 + $0xd0] sm:$0xf]  ;;  %v9004_v32 = vld [vmem:[%s9964_s29 + $0xd4] sm:$0xf] }
 0x89e   : > { %v8536_v34 = vor.u32 %v9020_v9, %v8533_v28  ;;  %v4362_v8 = vsub.f32 1.0, %v12100_v55  ;;  %v12137_v49 = vadd.f32 0.0036580483, %v4581_v54  ;;  %v4674_v61 = vmul.f32 %v4673_v25, %v12015_v20  ;;  %vm3419_vm13 = vmor %vm3417_vm12, %vm3418_vm11  ;;  %4061 = vmatpush.bf16.msra.mxu3 %v8576_v35  ;;  %v9013_v9 = vld [vmem:[%s9964_s29 + $0x11c] sm:$0xf] }
 0x89f   : > { %v12134_v11 = vpop.eup %9503  ;;  %3975 = vmatpush.bf16.msra.mxu0 %v8532_v43  ;;  %v8540_v28 = vor.u32 %v9025_v1, %v8539_v47  ;;  %v4333_v26 = vsel %vm12065_vm5, %v12001_v42, %v4328_v22  ;;  %v3420_v39 = vsel %vm3419_vm13, %v12034_v5, %v3416_v57  ;;  %v8544_v56 = vor.u32 %v9021_v59, %v8541_v50  ;;  %v9008_v55 = vld [vmem:[%s9964_s29 + $0xec] sm:$0xf0]  ;;  %v8469_v40 = vld [vmem:[%s9964_s29 + $0xf0] sm:$0xf0]  ;;  %v3871_v5 = vpop.f32.mrf.mxu0  ;;  %v9005_v43 = vld [vmem:[%s9964_s29 + $0xdc] sm:$0xf] }
 0x8a0   : > { %4004 = vmatpush.bf16.msra.mxu1 %v8536_v34  ;;  %v8500_v4 = vor.u32 %v9016_v15, %v8499_v51  ;;  %v3438_v54 = vmul.f32 %v11692_v17, %v3427_v62  ;;  %v3428_v25 = vmul.f32 %v3420_v39, %v11729_v45  ;;  %v8504_v47 = vor.u32 %v9012_v52, %v8501_v31  ;;  %v3900_v31 = vpop.f32.mrf.mxu1  ;;  %v8475_v62 = vld [vmem:[%s9964_s29 + $0xd8] sm:$0xf]  ;;  %v8477_v15 = vld [vmem:[%s9964_s29 + $0xf8] sm:$0xf0]  ;;  %v8435_v57 = vld [vmem:[%s9964_s29 + $0x90] sm:$0xf] }
 0x8a1   : > { %4033 = vmatpush.bf16.msra.mxu2 %v8540_v28  ;;  %v8508_v1 = vor.u32 %v9017_v46, %v8507_v37  ;;  %v12156_v42 = vmul.f32 %v12134_v11, %v12052_v60  ;;  %v4598_v51 = vmul.f32 %v12075_v58, %v11897_v21  ;;  %v4621_v34 = vmul.f32 %v12069_v18, %v11938_v12  ;;  %v9009_v58 = vld [vmem:[%s9964_s29 + $0xf4] sm:$0xf0] }
 0x8a2   : > { %v4636_v45 = vmul.f32 %v12077_v16, %v11938_v12  ;;  %v4675_v52 = vadd.f32 0.112945676, %v4674_v61  ;;  %v3439_v59 = vmul.f32 %v11692_v17, %v3428_v25  ;;  %4062 = vmatpush.bf16.msra.mxu3 %v8544_v56  ;;  %v8512_v50 = vor.u32 %v9013_v9, %v8509_v2  ;;  %v8437_v61 = vld [vmem:[%s9964_s29 + $0xb0] sm:$0xf0] }
 0x8a3   : > { %3976 = vmatpush.bf16.msra.mxu0 %v8500_v4  ;;  %v8468_v22 = vor.u32 %v9008_v55, %v8467_v29  ;;  %v12167_v18 = vmul.f32 %v4333_v26, %v4309_v14  ;;  %v4363_v16 = vmul.f32 %v12061_v36, %v4362_v8  ;;  %vm4365_vm14 = vweird.f32 %v12013_v63  ;;  %v8443_v55 = vld [vmem:[%s9964_s29 + $0x98] sm:$0xf] }
 0x8a4   : > { %v12173_v35 = vmul.f32 %v12054_v33, %v11858_v48  ;;  %4005 = vmatpush.bf16.msra.mxu1 %v8504_v47  ;;  %v8472_v17 = vor.u32 %v9004_v32, %v8469_v40  ;;  %v12179_v37 = vadd.f32 %v11700_v38, %v3438_v54  ;;  %v12182_v14 = vadd.f32 %v11700_v38, %v3439_v59  ;;  %v9000_v48 = vld [vmem:[%s9964_s29 + $0xac] sm:$0xf0]  ;;  %v8996_v33 = vld [vmem:[%s9964_s29 + $0x94] sm:$0xf]  ;;  %v3929_v38 = vpop.f32.mrf.mxu2  ;;  %v9001_v54 = vld [vmem:[%s9964_s29 + $0xb4] sm:$0xf0] }
 0x8a5   : > { %4034 = vmatpush.bf16.msra.mxu2 %v8508_v1  ;;  %v12185_v46 = vadd.f32 %v3871_v5, %v11770_v19  ;;  %v12188_v8 = vadd.f32 %v3900_v31, %v11772_v44  ;;  %v4562_v28 = vsub.f32 1.0, %v12156_v42  ;;  %v12194_v9 = vadd.f32 1.0, %v4598_v51  ;;  %v8997_v51 = vld [vmem:[%s9964_s29 + $0x9c] sm:$0xf]  ;;  %v8403_v59 = vld [vmem:[%s9964_s29 + $0x50] sm:$0xf] }
 0x8a6   : > { %15914 = vst [vmem:[#allocation22_spill] sm:$0xff] %v12179_v37  ;;  %v4622_v26 = vadd.f32 0.0036580483, %v4621_v34  ;;  %v4637_v39 = vadd.f32 0.4994258, %v4636_v45  ;;  %v12198_v56 = vpack.c.bf16 %v12182_v14, %v12179_v37  ;;  %4063 = vmatpush.bf16.msra.mxu3 %v8512_v50  ;;  %v8476_v4 = vor.u32 %v9009_v58, %v8475_v62  ;;  %v3958_v58 = vpop.f32.mrf.mxu3 }
 0x8a7   : > { %15915 = vst [vmem:[#allocation31_spill] sm:$0xff] %v12182_v14  ;;  %3977 = vmatpush.bf16.msra.mxu0 %v8468_v22  ;;  %v8480_v2 = vor.u32 %v9005_v43, %v8477_v15  ;;  %v12201_v29 = vmul.f32 0.70710677, %v12185_v46  ;;  %v15916_v25 = vand.u32 2147483647, %v12013_v63  ;;  %v4583_v1 = vmul.f32 %v12137_v49, %v11897_v21 }
 0x8a8   : > { %4006 = vmatpush.bf16.msra.mxu1 %v8472_v17  ;;  %v12214_v32 = vmul.f32 0.70710677, %v12188_v8  ;;  %v8436_v40 = vor.u32 %v9000_v48, %v8435_v57  ;;  %v8440_v42 = vor.u32 %v8996_v33, %v8437_v61  ;;  %v8445_v34 = vld [vmem:[%s9964_s29 + $0xb8] sm:$0xf0]  ;;  %v4364_v45 = vadd.f32 %v12061_v36, %v4363_v16  ;;  %3880 = vmatmul.bf16.gmra.mxu0 %v12198_v56  ;;  %v8992_v50 = vld [vmem:[%s9964_s29 + $0x6c] sm:$0xf0] }
 0x8a9   : > { %vm12207_vm15 = vcmp.eq.f32.partialorder %v15916_v25, 8.507059e+37  ;;  %v4659_v5 = vmul.f32 2.1237322e-06, %v12015_v20  ;;  %v4676_v31 = vmul.f32 %v4675_v52, %v12015_v20  ;;  %3909 = vmatmul.bf16.gmra.mxu1 %v12198_v56  ;;  %v12224_v49 = vadd.f32 %v3929_v38, %v11792_v0  ;;  %3938 = vmatmul.bf16.gmra.mxu2 %v12198_v56  ;;  %v8988_v16 = vld [vmem:[%s9964_s29 + $0x54] sm:$0xf] }
 0x8aa   : > { %vm4366_vm0 = vweird.f32 %v12061_v36  ;;  %v4623_v22 = vmul.f32 %v4622_v26, %v11938_v12  ;;  %v4638_v62 = vmul.f32 %v4637_v39, %v11938_v12  ;;  %3967 = vmatmul.bf16.gmra.mxu3 %v12198_v56  ;;  %v4857_v52 = vmul.f32 %v12201_v29, %v12201_v29  ;;  %v8405_v17 = vld [vmem:[%s9964_s29 + $0x70] sm:$0xf0]  ;;  %4035 = vmatpush.bf16.msra.mxu2 %v8476_v4  ;;  %v8411_v39 = vld [vmem:[%s9964_s29 + $0x58] sm:$0xf] }
 0x8ab   : > { %4064 = vmatpush.bf16.msra.mxu3 %v8480_v2  ;;  %v4897_v43 = vmul.f32 %v12214_v32, %v12214_v32  ;;  %v8444_v15 = vor.u32 %v9001_v54, %v8443_v55  ;;  %v8448_v57 = vor.u32 %v8997_v51, %v8445_v34  ;;  %v12240_v48 = vmul.f32 0.70710677, %v12224_v49  ;;  %3978 = vmatpush.bf16.msra.mxu0 %v8436_v40  ;;  %v8993_v38 = vld [vmem:[%s9964_s29 + $0x74] sm:$0xf0]  ;;  %vm12250_vm1 = vmor %vm4365_vm14, %vm4366_vm0 }
 0x8ac   : > { %v4563_v33 = vmul.f32 %v12134_v11, %v4562_v28  ;;  %v4584_v61 = vadd.f32 0.05243302, %v4583_v1  ;;  %9505 = vrcp.f32 %v12194_v9  ;;  %4007 = vmatpush.bf16.msra.mxu1 %v8440_v42  ;;  %v8404_v26 = vor.u32 %v8992_v50, %v8403_v59  ;;  %v8989_v59 = vld [vmem:[%s9964_s29 + $0x5c] sm:$0xf] }
 0x8ad   : > { %v4660_v2 = vadd.f32 0.00028619796, %v4659_v5  ;;  %v4677_v55 = vadd.f32 0.4994258, %v4676_v31  ;;  %v12255_v28 = vadd.f32 %v3958_v58, %v11810_v7  ;;  %v8408_v54 = vor.u32 %v8988_v16, %v8405_v17  ;;  %v8413_v50 = vld [vmem:[%s9964_s29 + $0x78] sm:$0xf0] }
 0x8ae   : > { %v4368_v25 = vsel %vm12250_vm1, %v12061_v36, %v4364_v45  ;;  %v4624_v1 = vadd.f32 0.05243302, %v4623_v22  ;;  %v12260_v40 = vmin.f32 %v4857_v52, 16.0  ;;  %v4937_v63 = vmul.f32 %v12240_v48, %v12240_v48  ;;  %4036 = vmatpush.bf16.msra.mxu2 %v8444_v15 }
 0x8af   : > { %v4548_v42 = vadd.f32 1.1283791, %v12173_v35  ;;  %v12265_v51 = vadd.f32 1.0, %v4638_v62  ;;  %v12267_v34 = vmin.f32 %v4897_v43, 16.0  ;;  %4065 = vmatpush.bf16.msra.mxu3 %v8448_v57  ;;  %v8412_v5 = vor.u32 %v8993_v38, %v8411_v39  ;;  %3979 = vmatpush.bf16.msra.mxu0 %v8404_v26 }
 0x8b0   : > { %v4564_v31 = vadd.f32 %v12134_v11, %v4563_v33  ;;  %vm4566_vm2 = vweird.f32 %v12134_v11  ;;  %v4571_v36 = vand.u32 2147483648, %v12052_v60  ;;  %v4585_v45 = vmul.f32 %v4584_v61, %v11897_v21  ;;  %4008 = vmatpush.bf16.msra.mxu1 %v8408_v54 }
 0x8b1   : > { %v4373_v35 = vsel %vm12207_vm15, %v12113_v6, %v4368_v25  ;;  %v4661_v22 = vmul.f32 %v4660_v2, %v12015_v20  ;;  %v4678_v62 = vmul.f32 %v4677_v55, %v12015_v20  ;;  %v12281_v52 = vmul.f32 0.70710677, %v12255_v28 }
 0x8b2   : > { %v12283_v58 = vpop.eup %9505  ;;  %vm4565_vm3 = vweird.f32 %v12052_v60  ;;  %v4625_v16 = vmul.f32 %v4624_v1, %v11938_v12  ;;  %v4870_v17 = vmul.f32 3.8918573e-05, %v12260_v40  ;;  %v12288_v43 = vmin.f32 %v4937_v63, 16.0  ;;  %4037 = vmatpush.bf16.msra.mxu2 %v8412_v5 }
 0x8b3   : > { %vm12292_vm4 = vmor %vm4565_vm3, %vm4566_vm2  ;;  %v4569_v47 = vand.u32 2147483647, %v12052_v60  ;;  %9507 = vrcp.f32 %v12265_v51  ;;  %v4910_v15 = vmul.f32 3.8918573e-05, %v12267_v34  ;;  %v8416_v57 = vor.u32 %v8989_v59, %v8413_v50 }
 0x8b4   : > { %v4374_v33 = vmul.f32 %v4373_v35, %v12127_v3  ;;  %v4568_v61 = vsel %vm12292_vm4, %v12134_v11, %v4564_v31  ;;  %v4572_v26 = vor.u32 1.1754944e-38, %v4571_v36  ;;  %v4586_v39 = vadd.f32 0.18741608, %v4585_v45 }
 0x8b5   : > { %v4601_v38 = vmul.f32 %v12283_v58, %v12194_v9  ;;  %v4662_v4 = vadd.f32 0.0036580483, %v4661_v22  ;;  %v12305_v2 = vadd.f32 1.0, %v4678_v62  ;;  %v4977_v60 = vmul.f32 %v12281_v52, %v12281_v52  ;;  %4066 = vmatpush.bf16.msra.mxu3 %v8416_v57 }
 0x8b6   : > { %v4626_v55 = vadd.f32 0.18741608, %v4625_v16  ;;  %v4871_v54 = vadd.f32 0.001143296, %v4870_v17  ;;  %v4950_v3 = vmul.f32 3.8918573e-05, %v12288_v43  ;;  %v12312_v25 = vmul.f32 %v12041_v30, %v11879_v13 }
 0x8b7   : > { %v8611_v11 = vclamps-f32 %v12167_v18, 1.0  ;;  %vm4570_vm5 = vcmp.eq.f32.partialorder %v4569_v47, 8.507059e+37  ;;  %v4911_v1 = vadd.f32 0.001143296, %v4910_v15  ;;  %v8612_v63 = vclamps-f32 %v4374_v33, 1.0 }
 0x8b8   : > { %v4549_v5 = vmul.f32 %v4548_v42, %v11841_v24  ;;  %v4573_v31 = vsel %vm4570_vm5, %v4572_v26, %v4568_v61  ;;  %v4587_v36 = vmul.f32 %v4586_v39, %v11897_v21  ;;  %v4602_v59 = vsub.f32 1.0, %v4601_v38 }
 0x8b9   : > { %v12317_v45 = vpop.eup %9507  ;;  %v4663_v50 = vmul.f32 %v4662_v4, %v12015_v20  ;;  %9509 = vrcp.f32 %v12305_v2  ;;  %v12321_v35 = vmin.f32 %v4977_v60, 16.0  ;;  %v12325_v30 = vmul.f32 %v12050_v10, %v11883_v27 }
 0x8ba   : > { %v4627_v13 = vmul.f32 %v4626_v55, %v11938_v12  ;;  %v4872_v24 = vmul.f32 %v4871_v54, %v12260_v40  ;;  %v4951_v18 = vadd.f32 0.001143296, %v4950_v3  ;;  %v6779_v42 = vadd.f32 1.0, %v8611_v11  ;;  %v3873_v55 = vpop.f32.mrf.mxu0  ;;  %v8381_v54 = vld [vmem:[%s9964_s29 + $0x38] sm:$0xf0] }
 0x8bb   : > { %v12329_v21 = vmul.f32 %v4573_v31, %v4549_v5  ;;  %v4611_v22 = vand.u32 2147483648, %v12194_v9  ;;  %v4912_v62 = vmul.f32 %v4911_v1, %v12267_v34  ;;  %v4588_v16 = vadd.f32 1.1283791, %v4587_v36 }
 0x8bc   : > { %v4609_v17 = vand.u32 2147483647, %v12194_v9  ;;  %v4641_v6 = vmul.f32 %v12317_v45, %v12265_v51  ;;  %v4859_v27 = vmul.f32 2.1237322e-06, %v12260_v40  ;;  %v12337_v10 = vadd.f32 1.0, %v8612_v63 }
 0x8bd   : > { %v4603_v12 = vmul.f32 %v12283_v58, %v4602_v59  ;;  %v4664_v47 = vadd.f32 0.05243302, %v4663_v50  ;;  %v4990_v15 = vmul.f32 3.8918573e-05, %v12321_v35  ;;  %vm4605_vm6 = vweird.f32 %v12194_v9 }
 0x8be   : > { %v4628_v57 = vadd.f32 1.1283791, %v4627_v13  ;;  %v4873_v33 = vadd.f32 0.014752088, %v4872_v24  ;;  %v4952_v61 = vmul.f32 %v4951_v18, %v12288_v43  ;;  %v4612_v38 = vor.u32 1.1754944e-38, %v4611_v22 }
 0x8bf   : > { %v12343_v26 = vpop.eup %9509  ;;  %v4899_v4 = vmul.f32 2.1237322e-06, %v12267_v34  ;;  %v4913_v60 = vadd.f32 0.014752088, %v4912_v62  ;;  %vm4606_vm7 = vweird.f32 %v12283_v58  ;;  %vm12348_vm8 = vcmp.eq.f32.partialorder %v4609_v17, 8.507059e+37 }
 0x8c0   : > { %v4642_v3 = vsub.f32 1.0, %v4641_v6  ;;  %v4649_v11 = vand.u32 2147483647, %v12265_v51  ;;  %v4860_v1 = vadd.f32 0.00028619796, %v4859_v27  ;;  %v4604_v63 = vadd.f32 %v12283_v58, %v4603_v12  ;;  %vm12367_vm9 = vmor %vm4605_vm6, %vm4606_vm7 }
 0x8c1   : > { %v4651_v5 = vand.u32 2147483648, %v12265_v51  ;;  %v4665_v31 = vmul.f32 %v4664_v47, %v12015_v20  ;;  %v4991_v36 = vadd.f32 0.001143296, %v4990_v15  ;;  %v4681_v59 = vmul.f32 %v12343_v26, %v12305_v2  ;;  %v8371_v27 = vld [vmem:[%s9964_s29 + $0x10] sm:$0xf] }
 0x8c2   : > { %v4874_v50 = vmul.f32 %v4873_v33, %v12260_v40  ;;  %v4953_v13 = vadd.f32 0.014752088, %v4952_v61  ;;  %v12360_v24 = vadd.f32 %v3873_v55, %v11770_v19  ;;  %v12363_v18 = vmul.f32 %v6779_v42, %v11886_v23  ;;  %v8984_v42 = vld [vmem:[%s9964_s29 + $0x2c] sm:$0xf0]  ;;  %v8980_v15 = vld [vmem:[%s9964_s29 + $0x14] sm:$0xf] }
 0x8c3   : > { %v4900_v62 = vadd.f32 0.00028619796, %v4899_v4  ;;  %v4914_v17 = vmul.f32 %v4913_v60, %v12267_v34  ;;  %v4939_v6 = vmul.f32 2.1237322e-06, %v12288_v43  ;;  %v12375_v12 = vmul.f32 %v4588_v16, %v11865_v53  ;;  %v8373_v33 = vld [vmem:[%s9964_s29 + $0x30] sm:$0xf0] }
 0x8c4   : > { %15925 = vst [vmem:[#allocation32_spill] sm:$0xff] %v12363_v18  ;;  %v12378_v47 = vmul.f32 %v4628_v57, %v11899_v41  ;;  %v4643_v23 = vmul.f32 %v12317_v45, %v4642_v3  ;;  %v4861_v9 = vmul.f32 %v4860_v1, %v12260_v40  ;;  %v4608_v61 = vsel %vm12367_vm9, %v12283_v58, %v4604_v63  ;;  %v8379_v22 = vld [vmem:[%s9964_s29 + $0x18] sm:$0xf]  ;;  %v15948_v18 = vld [vmem:[#allocation27_spill] sm:$0xff] }
 0x8c5   : > { %v4652_v4 = vor.u32 1.1754944e-38, %v4651_v5  ;;  %v4666_v60 = vadd.f32 0.18741608, %v4665_v31  ;;  %v4992_v55 = vmul.f32 %v4991_v36, %v12321_v35  ;;  %v4682_v53 = vsub.f32 1.0, %v4681_v59  ;;  %v3902_v36 = vpop.f32.mrf.mxu1 }
 0x8c6   : > { %v4875_v16 = vadd.f32 0.112945676, %v4874_v50  ;;  %v4954_v41 = vmul.f32 %v4953_v13, %v12288_v43  ;;  %v12391_v57 = vmul.f32 0.70710677, %v12360_v24  ;;  %v4901_v3 = vmul.f32 %v4900_v62, %v12267_v34 }
 0x8c7   : > { %v4915_v1 = vadd.f32 0.112945676, %v4914_v17  ;;  %v8372_v39 = vor.u32 %v8984_v42, %v8371_v27  ;;  %v8376_v14 = vor.u32 %v8980_v15, %v8373_v33  ;;  %v4644_v58 = vadd.f32 %v12317_v45, %v4643_v23  ;;  %v8981_v23 = vld [vmem:[%s9964_s29 + $0x1c] sm:$0xf] }
 0x8c8   : > { %15928 = vst [vmem:[#allocation33_spill] sm:$0xff] %v12391_v57  ;;  %vm4646_vm10 = vweird.f32 %v12317_v45  ;;  %vm12396_vm11 = vcmp.eq.f32.partialorder %v4649_v11, 8.507059e+37  ;;  %v4862_v5 = vadd.f32 0.0036580483, %v4861_v9  ;;  %v4940_v31 = vadd.f32 0.00028619796, %v4939_v6 }
 0x8c9   : > { %v4613_v59 = vsel %vm12348_vm8, %v4612_v38, %v4608_v61  ;;  %vm4645_vm12 = vweird.f32 %v12265_v51  ;;  %v4667_v50 = vmul.f32 %v4666_v60, %v12015_v20  ;;  %v4993_v13 = vadd.f32 0.014752088, %v4992_v55  ;;  %3980 = vmatpush.bf16.msra.mxu0 %v8372_v39  ;;  %4009 = vmatpush.bf16.msra.mxu1 %v8376_v14  ;;  %v8985_v11 = vld [vmem:[%s9964_s29 + $0x34] sm:$0xf0] }
 0x8ca   : > { %v4683_v62 = vmul.f32 %v12343_v26, %v4682_v53  ;;  %v4876_v17 = vmul.f32 %v4875_v16, %v12260_v40  ;;  %v4955_v27 = vadd.f32 0.112945676, %v4954_v41  ;;  %v5177_v6 = vmul.f32 %v12391_v57, %v12391_v57  ;;  %vm12414_vm13 = vmor %vm4645_vm12, %vm4646_vm10  ;;  %v15933_v33 = vld [vmem:[#allocation28_spill] sm:$0xff]  ;;  %v9070_v57 = vld [vmem:[%s9974_s1 + $0xe0] sm:$0xff] }
 0x8cb   : > { %v4902_v20 = vadd.f32 0.0036580483, %v4901_v3  ;;  %v4916_v14 = vmul.f32 %v4915_v1, %v12267_v34  ;;  %v4979_v39 = vmul.f32 2.1237322e-06, %v12321_v35  ;;  %v12421_v38 = vadd.f32 %v3902_v36, %v11772_v44 }
 0x8cc   : > { %v4648_v9 = vsel %vm12414_vm13, %v12317_v45, %v4644_v58  ;;  %vm4686_vm14 = vweird.f32 %v12343_v26  ;;  %v4691_v42 = vand.u32 2147483648, %v12305_v2  ;;  %v4941_v15 = vmul.f32 %v4940_v31, %v12288_v43  ;;  %3981 = vmatmul.bf16.vlgmr.msra.gmra.mxu0 %v15933_v33  ;;  %4010 = vmatmul.bf16.vlgmr.msra.gmra.mxu1 %v15933_v33 }
 0x8cd   : > { %v4994_v61 = vmul.f32 %v4993_v13, %v12321_v35  ;;  %v12432_v60 = vmin.f32 %v5177_v6, 16.0  ;;  %v8380_v55 = vor.u32 %v8985_v11, %v8379_v22  ;;  %v8384_v53 = vor.u32 %v8981_v23, %v8381_v54 }
 0x8ce   : > { %v4684_v16 = vadd.f32 %v12343_v26, %v4683_v62  ;;  %v4863_v45 = vmul.f32 %v4862_v5, %v12260_v40  ;;  %v4877_v41 = vadd.f32 0.4994258, %v4876_v17  ;;  %v4956_v3 = vmul.f32 %v4955_v27, %v12288_v43 }
 0x8cf   : > { %v4903_v1 = vmul.f32 %v4902_v20, %v12267_v34  ;;  %v4917_v58 = vadd.f32 0.4994258, %v4916_v14  ;;  %v4980_v31 = vadd.f32 0.00028619796, %v4979_v39  ;;  %v12439_v36 = vmul.f32 0.70710677, %v12421_v38  ;;  %4038 = vmatpush.bf16.msra.mxu2 %v8380_v55  ;;  %4067 = vmatpush.bf16.msra.mxu3 %v8384_v53  ;;  %v3931_v14 = vpop.f32.mrf.mxu2 }
 0x8d0   : > { %v4668_v13 = vadd.f32 1.1283791, %v4667_v50  ;;  %vm4685_vm15 = vweird.f32 %v12305_v2  ;;  %v4689_v22 = vand.u32 2147483647, %v12305_v2  ;;  %v4942_v11 = vadd.f32 0.0036580483, %v4941_v15 }
 0x8d1   : > { %15934 = vst [vmem:[#allocation28_spill] sm:$0xff] %v12439_v36  ;;  %v4653_v5 = vsel %vm12396_vm11, %v4652_v4, %v4648_v9  ;;  %vm12447_vm0 = vmor %vm4685_vm15, %vm4686_vm14  ;;  %v4692_v17 = vor.u32 1.1754944e-38, %v4691_v42  ;;  %v4995_v27 = vadd.f32 0.112945676, %v4994_v61  ;;  %v5190_v6 = vmul.f32 3.8918573e-05, %v12432_v60 }
 0x8d2   : > { %v4688_v50 = vsel %vm12447_vm0, %v12343_v26, %v4684_v16  ;;  %v4864_v23 = vadd.f32 0.05243302, %v4863_v45  ;;  %v4878_v2 = vmul.f32 %v4877_v41, %v12260_v40  ;;  %v4957_v54 = vadd.f32 0.4994258, %v4956_v3  ;;  %4039 = vmatmul.bf16.vlgmr.msra.gmra.mxu2 %v15933_v33  ;;  %4068 = vmatmul.bf16.vlgmr.msra.gmra.mxu3 %v15933_v33  ;;  %v15937_v42 = vld [vmem:[#allocation41_spill] sm:$0xff] }
 0x8d3   : > { %v4904_v4 = vadd.f32 0.05243302, %v4903_v1  ;;  %v4918_v63 = vmul.f32 %v4917_v58, %v12267_v34  ;;  %v4981_v51 = vmul.f32 %v4980_v31, %v12321_v35  ;;  %v5217_v20 = vmul.f32 %v12439_v36, %v12439_v36 }
 0x8d4   : > { %v4614_v39 = vmul.f32 %v4613_v59, %v12375_v12  ;;  %v4654_v26 = vmul.f32 %v4653_v5, %v12378_v47  ;;  %vm4690_vm1 = vcmp.eq.f32.partialorder %v4689_v22, 8.507059e+37  ;;  %v4943_v9 = vmul.f32 %v4942_v11, %v12288_v43  ;;  %v3960_v12 = vpop.f32.mrf.mxu3 }
 0x8d5   : > { %v4669_v15 = vmul.f32 %v4668_v13, %v15937_v42  ;;  %v4693_v61 = vsel %vm4690_vm1, %v4692_v17, %v4688_v50  ;;  %v4996_v33 = vmul.f32 %v4995_v27, %v12321_v35  ;;  %v5191_v55 = vadd.f32 0.001143296, %v5190_v6 }
 0x8d6   : > { %v4865_v53 = vmul.f32 %v4864_v23, %v12260_v40  ;;  %v12468_v16 = vadd.f32 1.0, %v4878_v2  ;;  %v4958_v45 = vmul.f32 %v4957_v54, %v12288_v43  ;;  %v12472_v41 = vadd.f32 %v3931_v14, %v11792_v0 }
 0x8d7   : > { %v4905_v47 = vmul.f32 %v4904_v4, %v12267_v34  ;;  %v12475_v59 = vadd.f32 1.0, %v4918_v63  ;;  %v4982_v3 = vadd.f32 0.0036580483, %v4981_v51  ;;  %v12477_v1 = vmin.f32 %v5217_v20, 16.0  ;;  %v15940_v4 = vld [vmem:[#allocation39_spill] sm:$0xff] }
 0x8d8   : > { %v15938_v58 = vclamps-f32 %v12329_v21, 1.0  ;;  %v8618_v13 = vclamps-f32 %v4614_v39, 1.0  ;;  %v8619_v22 = vclamps-f32 %v4654_v26, 1.0  ;;  %v4944_v11 = vadd.f32 0.05243302, %v4943_v9  ;;  %v15941_v39 = vld [vmem:[#allocation38_spill] sm:$0xff] }
 0x8d9   : > { %v4694_v5 = vmul.f32 %v4693_v61, %v4669_v15  ;;  %v4997_v62 = vadd.f32 0.4994258, %v4996_v33  ;;  %v5192_v17 = vmul.f32 %v5191_v55, %v12432_v60  ;;  %v12483_v27 = vadd.f32 %v3960_v12, %v11810_v7 }
 0x8da   : > { %v6785_v31 = vadd.f32 1.0, %v15938_v58  ;;  %v4866_v6 = vadd.f32 0.18741608, %v4865_v53  ;;  %9511 = vrcp.f32 %v12468_v16  ;;  %v12486_v50 = vadd.f32 1.0, %v4958_v45  ;;  %v15943_v53 = vld [vmem:[#allocation37_spill] sm:$0xff] }
 0x8db   : > { %v12489_v23 = vmul.f32 0.70710677, %v12472_v41  ;;  %v4906_v21 = vadd.f32 0.18741608, %v4905_v47  ;;  %9513 = vrcp.f32 %v12475_v59  ;;  %v4983_v2 = vmul.f32 %v4982_v3, %v12321_v35 }
 0x8dc   : > { %v5230_v54 = vmul.f32 3.8918573e-05, %v12477_v1  ;;  %v12495_v63 = vmul.f32 %v6785_v31, %v15940_v4  ;;  %v6786_v51 = vadd.f32 1.0, %v8618_v13  ;;  %v4945_v20 = vmul.f32 %v4944_v11, %v12288_v43  ;;  %3986 = vmatmul.bf16.gmra.mxu0 %v15941_v39  ;;  %4015 = vmatmul.bf16.gmra.mxu1 %v15941_v39  ;;  %v15944_v31 = vld [vmem:[#allocation30_spill] sm:$0xff] }
 0x8dd   : > { %15939 = vst [vmem:[#allocation41_spill] sm:$0xff] %v12489_v23  ;;  %v5257_v14 = vmul.f32 %v12489_v23, %v12489_v23  ;;  %v6787_v26 = vadd.f32 1.0, %v8619_v22  ;;  %v4998_v9 = vmul.f32 %v4997_v62, %v12321_v35  ;;  %v5193_v42 = vadd.f32 0.014752088, %v5192_v17 }
 0x8de   : > { %v12504_v15 = vmul.f32 0.70710677, %v12483_v27  ;;  %v8620_v61 = vclamps-f32 %v4694_v5, 1.0  ;;  %v4867_v33 = vmul.f32 %v4866_v6, %v12260_v40  ;;  %9515 = vrcp.f32 %v12486_v50  ;;  %v15945_v6 = vld [vmem:[#allocation21_spill] sm:$0xff] }
 0x8df   : > { %v12508_v55 = vmin.f32 %v5257_v14, 16.0  ;;  %v4100_v45 = vmul.f32 0.5, %v15943_v53  ;;  %v4907_v12 = vmul.f32 %v4906_v21, %v12267_v34  ;;  %v4984_v47 = vadd.f32 0.05243302, %v4983_v2  ;;  %v15946_v2 = vld [vmem:[#allocation40_spill] sm:$0xff] }
 0x8e0   : > { %15942 = vst [vmem:[#allocation39_spill] sm:$0xff] %v12504_v15  ;;  %v5231_v3 = vadd.f32 0.001143296, %v5230_v54  ;;  %v12512_v58 = vpop.eup %9511  ;;  %v12516_v13 = vmul.f32 %v12337_v10, %v15944_v31  ;;  %v12521_v22 = vmul.f32 0.5, %v12185_v46  ;;  %v4946_v11 = vadd.f32 0.18741608, %v4945_v20 }
 0x8e1   : > { %v12523_v5 = vpop.eup %9513  ;;  %v12525_v34 = vadd.f32 1.0, %v4998_v9  ;;  %v5194_v62 = vmul.f32 %v5193_v42, %v12432_v60  ;;  %v5270_v17 = vmul.f32 3.8918573e-05, %v12508_v55  ;;  %v5297_v10 = vmul.f32 %v12504_v15, %v12504_v15  ;;  %v9049_v20 = vld [vmem:[%s9974_s1 + $0x38] sm:$0xff] }
 0x8e2   : > { %v12532_v21 = vmul.f32 %v6786_v51, %v15945_v6  ;;  %v12535_v54 = vmul.f32 %v6787_v26, %v15946_v2  ;;  %v6788_v46 = vadd.f32 1.0, %v8620_v61  ;;  %v4868_v4 = vadd.f32 1.1283791, %v4867_v33  ;;  %4044 = vmatmul.bf16.gmra.mxu2 %v15941_v39  ;;  %4073 = vmatmul.bf16.gmra.mxu3 %v15941_v39  ;;  %v9057_v14 = vld [vmem:[%s9974_s1 + $0x78] sm:$0xff] }
 0x8e3   : > { %v9065_v9 = vld [vmem:[%s9974_s1 + $0xb8] sm:$0xff]  ;;  %v4908_v42 = vadd.f32 1.1283791, %v4907_v12  ;;  %v4985_v53 = vmul.f32 %v4984_v47, %v12321_v35  ;;  %v5232_v31 = vmul.f32 %v5231_v3, %v12477_v1  ;;  %v5271_v40 = vadd.f32 0.001143296, %v5270_v17  ;;  %7453 = vmatpush.bf16.msrb.mxu0 %v9049_v20  ;;  %7482 = vmatpush.bf16.msrb.mxu1 %v9057_v14  ;;  %v9048_v20 = vld [vmem:[%s9974_s1 + $0x30] sm:$0xff] }
 0x8e4   : > { %15947 = vst [vmem:[#allocation38_spill] sm:$0xff] %v12535_v54  ;;  %v9073_v51 = vld [vmem:[%s9974_s1 + $0xf8] sm:$0xff]  ;;  %v12545_v6 = vpop.eup %9515  ;;  %v4881_v26 = vmul.f32 %v12512_v58, %v12468_v16  ;;  %v4889_v61 = vand.u32 2147483647, %v12468_v16  ;;  %v4921_v39 = vmul.f32 %v12523_v5, %v12475_v59  ;;  %v4947_v33 = vmul.f32 %v4946_v11, %v12288_v43  ;;  %7511 = vmatpush.bf16.msrb.mxu2 %v9065_v9  ;;  %v9064_v14 = vld [vmem:[%s9974_s1 + $0xb0] sm:$0xff]  ;;  %v9062_v54 = vld [vmem:[%s9974_s1 + $0xa0] sm:$0xff] }
 0x8e5   : > { %9517 = vrcp.f32 %v12525_v34  ;;  %v5195_v12 = vadd.f32 0.112945676, %v5194_v62  ;;  %v5272_v47 = vmul.f32 %v5271_v40, %v12508_v55  ;;  %v12555_v3 = vmin.f32 %v5297_v10, 16.0  ;;  %7540 = vmatpush.bf16.msrb.mxu3 %v9073_v51  ;;  %v9056_v62 = vld [vmem:[%s9974_s1 + $0x70] sm:$0xff] }
 0x8e6   : > { %v12562_v43 = vmul.f32 0.5, %v12188_v8  ;;  %v5179_v11 = vmul.f32 2.1237322e-06, %v12432_v60  ;;  %v12568_v37 = vmul.f32 %v6788_v46, %v4100_v45  ;;  %v4929_v40 = vand.u32 2147483647, %v12475_v59  ;;  %v9072_v51 = vld [vmem:[%s9974_s1 + $0xf0] sm:$0xff] }
 0x8e7   : > { %v4961_v10 = vmul.f32 %v12545_v6, %v12486_v50  ;;  %v5233_v9 = vadd.f32 0.014752088, %v5232_v31  ;;  %v4882_v17 = vsub.f32 1.0, %v4881_v26  ;;  %v4891_v2 = vand.u32 2147483648, %v12468_v16  ;;  %7454 = vmatpush.bf16.msrb.mxu0 %v9048_v20  ;;  %7483 = vmatpush.bf16.msrb.mxu1 %v9056_v62  ;;  %v9055_v20 = vld [vmem:[%s9974_s1 + $0x68] sm:$0xff] }
 0x8e8   : > { %v4986_v8 = vadd.f32 0.18741608, %v4985_v53  ;;  %v5273_v15 = vadd.f32 0.014752088, %v5272_v47  ;;  %v4922_v23 = vsub.f32 1.0, %v4921_v39  ;;  %v5196_v46 = vmul.f32 %v5195_v12, %v12432_v60  ;;  %7512 = vmatpush.bf16.msrb.mxu2 %v9064_v14  ;;  %v9047_v47 = vld [vmem:[%s9974_s1 + $0x28] sm:$0xff] }
 0x8e9   : > { %v4948_v45 = vadd.f32 1.1283791, %v4947_v33  ;;  %v5310_v7 = vmul.f32 3.8918573e-05, %v12555_v3  ;;  %7541 = vmatpush.bf16.msrb.mxu3 %v9072_v51  ;;  %v12578_v31 = vmul.f32 %v4868_v4, %v12201_v29  ;;  %vm4885_vm2 = vweird.f32 %v12468_v16  ;;  %v9063_v62 = vld [vmem:[%s9974_s1 + $0xa8] sm:$0xff] }
 0x8ea   : > { %v4931_v53 = vand.u32 2147483648, %v12475_v59  ;;  %v5180_v26 = vadd.f32 0.00028619796, %v5179_v11  ;;  %v4962_v33 = vsub.f32 1.0, %v4961_v10  ;;  %v5219_v12 = vmul.f32 2.1237322e-06, %v12477_v1 }
 0x8eb   : > { %v12585_v39 = vpop.eup %9517  ;;  %v5234_v36 = vmul.f32 %v5233_v9, %v12477_v1  ;;  %v5311_v14 = vadd.f32 0.001143296, %v5310_v7  ;;  %v9071_v51 = vld [vmem:[%s9974_s1 + $0xe8] sm:$0xff]  ;;  %v4883_v29 = vmul.f32 %v12512_v58, %v4882_v17  ;;  %v12592_v4 = vmul.f32 %v4908_v42, %v12214_v32  ;;  %7455 = vmatpush.bf16.msrb.mxu0 %v9047_v47  ;;  %7484 = vmatpush.bf16.msrb.mxu1 %v9055_v20 }
 0x8ec   : > { %vm4925_vm3 = vweird.f32 %v12475_v59  ;;  %v5274_v11 = vmul.f32 %v5273_v15, %v12508_v55  ;;  %3991 = vmatmul.bf16.gmra.mxu0 %v15948_v18  ;;  %4020 = vmatmul.bf16.gmra.mxu1 %v15948_v18  ;;  %v12598_v10 = vor.u32 1.1754944e-38, %v4891_v2  ;;  %v4923_v7 = vmul.f32 %v12523_v5, %v4922_v23 }
 0x8ed   : > { %v4987_v9 = vmul.f32 %v4986_v8, %v12321_v35  ;;  %v5197_v17 = vadd.f32 0.4994258, %v5196_v46  ;;  %vm12602_vm4 = vcmp.eq.f32.partialorder %v4889_v61, 8.507059e+37  ;;  %v12606_v15 = vor.u32 1.1754944e-38, %v4931_v53  ;;  %7513 = vmatpush.bf16.msrb.mxu2 %v9063_v62  ;;  %7542 = vmatpush.bf16.msrb.mxu3 %v9071_v51  ;;  %v9046_v35 = vld [vmem:[%s9974_s1 + $0x20] sm:$0xff]  ;;  %v9045_v51 = vld [vmem:[%s9974_s1 + $0x18] sm:$0xff] }
 0x8ee   : > { %v5001_v42 = vmul.f32 %v12585_v39, %v12525_v34  ;;  %v5181_v2 = vmul.f32 %v5180_v26, %v12432_v60  ;;  %v5312_v23 = vmul.f32 %v5311_v14, %v12555_v3  ;;  %v9054_v8 = vld [vmem:[%s9974_s1 + $0x60] sm:$0xff]  ;;  %vm12614_vm5 = vcmp.eq.f32.partialorder %v4929_v40, 8.507059e+37 }
 0x8ef   : > { %v12619_v61 = vmul.f32 %v4948_v45, %v12240_v48  ;;  %v4963_v53 = vmul.f32 %v12545_v6, %v4962_v33  ;;  %v5220_v47 = vadd.f32 0.00028619796, %v5219_v12  ;;  %v5235_v20 = vadd.f32 0.112945676, %v5234_v36  ;;  %7456 = vmatpush.bf16.msrb.mxu0 %v9046_v35  ;;  %7485 = vmatpush.bf16.msrb.mxu1 %v9054_v8  ;;  %v9051_v35 = vld [vmem:[%s9974_s1 + $0x48] sm:$0xff] }
 0x8f0   : > { %v4884_v26 = vadd.f32 %v12512_v58, %v4883_v29  ;;  %vm4886_vm6 = vweird.f32 %v12512_v58  ;;  %v4969_v40 = vand.u32 2147483647, %v12486_v50  ;;  %v5275_v62 = vadd.f32 0.112945676, %v5274_v11  ;;  %v9053_v29 = vld [vmem:[%s9974_s1 + $0x58] sm:$0xff] }
 0x8f1   : > { %v4924_v14 = vadd.f32 %v12523_v5, %v4923_v7  ;;  %vm4926_vm7 = vweird.f32 %v12523_v5  ;;  %v5198_v48 = vmul.f32 %v5197_v17, %v12432_v60  ;;  %v5313_v45 = vadd.f32 0.014752088, %v5312_v23  ;;  %vm12640_vm9 = vmor %vm4885_vm2, %vm4886_vm6  ;;  %7514 = vmatpush.bf16.msrb.mxu2 %v9062_v54  ;;  %7543 = vmatpush.bf16.msrb.mxu3 %v9070_v57 }
 0x8f2   : > { %vm4965_vm8 = vweird.f32 %v12486_v50  ;;  %v4971_v36 = vand.u32 2147483648, %v12486_v50  ;;  %v5002_v33 = vsub.f32 1.0, %v5001_v42  ;;  %v5182_v12 = vadd.f32 0.0036580483, %v5181_v2  ;;  %4049 = vmatmul.bf16.gmra.mxu2 %v15948_v18  ;;  %4078 = vmatmul.bf16.gmra.mxu3 %v15948_v18  ;;  %v9061_v18 = vld [vmem:[%s9974_s1 + $0x98] sm:$0xff]  ;;  %vm12657_vm11 = vmor %vm4925_vm3, %vm4926_vm7 }
 0x8f3   : > { %v4964_v7 = vadd.f32 %v12545_v6, %v4963_v53  ;;  %vm4966_vm10 = vweird.f32 %v12545_v6  ;;  %v5221_v17 = vmul.f32 %v5220_v47, %v12477_v1  ;;  %v5236_v42 = vmul.f32 %v5235_v20, %v12477_v1  ;;  %v9069_v2 = vld [vmem:[%s9974_s1 + $0xd8] sm:$0xff]  ;;  %7457 = vmatpush.bf16.msrb.mxu0 %v9045_v51  ;;  %7486 = vmatpush.bf16.msrb.mxu1 %v9053_v29  ;;  %v3905_v51 = vpop.f32.mrf.mxu1 }
 0x8f4   : > { %v4888_v16 = vsel %vm12640_vm9, %v12512_v58, %v4884_v26  ;;  %vm12661_vm12 = vcmp.eq.f32.partialorder %v4969_v40, 8.507059e+37  ;;  %v12665_v57 = vadd.f32 1.1283791, %v4987_v9  ;;  %v5276_v54 = vmul.f32 %v5275_v62, %v12508_v55  ;;  %vm12679_vm13 = vmor %vm4965_vm8, %vm4966_vm10  ;;  %v9044_v26 = vld [vmem:[%s9974_s1 + $0x10] sm:$0xff]  ;;  %v9059_v9 = vld [vmem:[%s9974_s1 + $0x88] sm:$0xff] }
 0x8f5   : > { %v4928_v58 = vsel %vm12657_vm11, %v12523_v5, %v4924_v14  ;;  %v12671_v8 = vadd.f32 1.0, %v5198_v48  ;;  %v5259_v59 = vmul.f32 2.1237322e-06, %v12508_v55  ;;  %v5314_v53 = vmul.f32 %v5313_v45, %v12555_v3  ;;  %v9052_v40 = vld [vmem:[%s9974_s1 + $0x50] sm:$0xff]  ;;  %7515 = vmatpush.bf16.msrb.mxu2 %v9061_v18  ;;  %7544 = vmatpush.bf16.msrb.mxu3 %v9069_v2  ;;  %v3876_v45 = vpop.f32.mrf.mxu0 }
 0x8f6   : > { %v4972_v47 = vor.u32 1.1754944e-38, %v4971_v36  ;;  %v5003_v5 = vmul.f32 %v12585_v39, %v5002_v33  ;;  %vm5005_vm14 = vweird.f32 %v12525_v34  ;;  %v5183_v20 = vmul.f32 %v5182_v12, %v12432_v60  ;;  %v9060_v36 = vld [vmem:[%s9974_s1 + $0x90] sm:$0xff] }
 0x8f7   : > { %v4893_v62 = vsel %vm12602_vm4, %v12598_v10, %v4888_v16  ;;  %v4968_v50 = vsel %vm12679_vm13, %v12545_v6, %v4964_v7  ;;  %v5222_v14 = vadd.f32 0.0036580483, %v5221_v17  ;;  %v5237_v48 = vadd.f32 0.4994258, %v5236_v42  ;;  %v9068_v33 = vld [vmem:[%s9974_s1 + $0xd0] sm:$0xff]  ;;  %7458 = vmatpush.bf16.msrb.mxu0 %v9044_v26  ;;  %7487 = vmatpush.bf16.msrb.mxu1 %v9052_v40  ;;  %v9043_v42 = vld [vmem:[%s9974_s1 + $0x8] sm:$0xff] }
 0x8f8   : > { %v4933_v12 = vsel %vm12614_vm5, %v12606_v15, %v4928_v58  ;;  %vm5006_vm15 = vweird.f32 %v12585_v39  ;;  %v5011_v10 = vand.u32 2147483648, %v12525_v34  ;;  %v5277_v32 = vadd.f32 0.4994258, %v5276_v54 }
 0x8f9   : > { %9519 = vrcp.f32 %v12671_v8  ;;  %v5260_v6 = vadd.f32 0.00028619796, %v5259_v59  ;;  %v5315_v29 = vadd.f32 0.112945676, %v5314_v53  ;;  %v12703_v11 = vadd.f32 %v3876_v45, %v11770_v19  ;;  %7516 = vmatpush.bf16.msrb.mxu2 %v9060_v36  ;;  %7545 = vmatpush.bf16.msrb.mxu3 %v9068_v33  ;;  %vm12734_vm0 = vmor %vm5005_vm14, %vm5006_vm15 }
 0x8fa   : > { %v4973_v46 = vsel %vm12661_vm12, %v4972_v47, %v4968_v50  ;;  %v5004_v15 = vadd.f32 %v12585_v39, %v5003_v5  ;;  %v5184_v7 = vadd.f32 0.05243302, %v5183_v20  ;;  %v5299_v17 = vmul.f32 2.1237322e-06, %v12555_v3  ;;  %v9067_v47 = vld [vmem:[%s9974_s1 + $0xc8] sm:$0xff] }
 0x8fb   : > { %v5223_v18 = vmul.f32 %v5222_v14, %v12477_v1  ;;  %v5238_v2 = vmul.f32 %v5237_v48, %v12477_v1  ;;  %v12713_v16 = vmul.f32 0.70710677, %v12703_v11  ;;  %v12716_v23 = vadd.f32 %v3905_v51, %v11772_v44  ;;  %7459 = vmatpush.bf16.msrb.mxu0 %v9043_v42  ;;  %7488 = vmatpush.bf16.msrb.mxu1 %v9051_v35 }
 0x8fc   : > { %v4894_v54 = vmul.f32 %v4893_v62, %v12578_v31  ;;  %v4934_v58 = vmul.f32 %v4933_v12, %v12592_v4  ;;  %v5009_v59 = vand.u32 2147483647, %v12525_v34  ;;  %v5278_v53 = vmul.f32 %v5277_v32, %v12508_v55  ;;  %3996 = vmatmul.bf16.gmra.mxu0 %v12198_v56  ;;  %4025 = vmatmul.bf16.gmra.mxu1 %v12198_v56 }
 0x8fd   : > { %v12728_v5 = vmul.f32 0.5, %v12224_v49  ;;  %v5261_v4 = vmul.f32 %v5260_v6, %v12508_v55  ;;  %v5316_v20 = vmul.f32 %v5315_v29, %v12555_v3  ;;  %v5497_v26 = vmul.f32 %v12713_v16, %v12713_v16  ;;  %7517 = vmatpush.bf16.msrb.mxu2 %v9059_v9  ;;  %7546 = vmatpush.bf16.msrb.mxu3 %v9067_v47  ;;  %v3934_v9 = vpop.f32.mrf.mxu2 }
 0x8fe   : > { %v4974_v49 = vmul.f32 %v4973_v46, %v12619_v61  ;;  %v5008_v40 = vsel %vm12734_vm0, %v12585_v39, %v5004_v15  ;;  %v5012_v34 = vor.u32 1.1754944e-38, %v5011_v10  ;;  %v5300_v62 = vadd.f32 0.00028619796, %v5299_v17 }
 0x8ff   : > { %v12746_v50 = vpop.eup %9519  ;;  %v5185_v14 = vmul.f32 %v5184_v7, %v12432_v60  ;;  %v5224_v48 = vadd.f32 0.05243302, %v5223_v18  ;;  %v12749_v45 = vadd.f32 1.0, %v5238_v2  ;;  %v12752_v36 = vmul.f32 0.70710677, %v12716_v23 }
 0x900   : > { %v4989_v61 = vmul.f32 %v12665_v57, %v12281_v52  ;;  %vm5010_vm1 = vcmp.eq.f32.partialorder %v5009_v59, 8.507059e+37  ;;  %v12756_v33 = vadd.f32 1.0, %v5278_v53  ;;  %v12758_v39 = vmin.f32 %v5497_v26, 16.0 }
 0x901   : > { %v8625_v12 = vclamps-f32 %v4894_v54, 1.0  ;;  %v5013_v10 = vsel %vm5010_vm1, %v5012_v34, %v5008_v40  ;;  %v5262_v32 = vadd.f32 0.0036580483, %v5261_v4  ;;  %v5317_v51 = vadd.f32 0.4994258, %v5316_v20 }
 0x902   : > { %v8626_v6 = vclamps-f32 %v4934_v58, 1.0  ;;  %v8627_v29 = vclamps-f32 %v4974_v49, 1.0  ;;  %v5201_v46 = vmul.f32 %v12746_v50, %v12671_v8  ;;  %v5301_v15 = vmul.f32 %v5300_v62, %v12555_v3  ;;  %4054 = vmatmul.bf16.gmra.mxu2 %v12198_v56  ;;  %4083 = vmatmul.bf16.gmra.mxu3 %v12198_v56 }
 0x903   : > { %v5186_v52 = vadd.f32 0.18741608, %v5185_v14  ;;  %v5225_v57 = vmul.f32 %v5224_v48, %v12477_v1  ;;  %9521 = vrcp.f32 %v12749_v45  ;;  %v5537_v7 = vmul.f32 %v12752_v36, %v12752_v36 }
 0x904   : > { %v12770_v17 = vmul.f32 0.5, %v12255_v28  ;;  %v5014_v42 = vmul.f32 %v5013_v10, %v4989_v61  ;;  %9523 = vrcp.f32 %v12756_v33  ;;  %v5510_v18 = vmul.f32 3.8918573e-05, %v12758_v39  ;;  %v9042_v61 = vld [vmem:[%s9974_s1] sm:$0xff] }
 0x905   : > { %v6908_v2 = vpack.c.bf16 %v12568_v37, %v12516_v13  ;;  %v6793_v56 = vadd.f32 1.0, %v8625_v12  ;;  %v5263_v35 = vmul.f32 %v5262_v32, %v12508_v55  ;;  %v5318_v54 = vmul.f32 %v5317_v51, %v12555_v3  ;;  %v9050_v12 = vld [vmem:[%s9974_s1 + $0x40] sm:$0xff]  ;;  %7460 = vmatpush.bf16.msrb.mxu0 %v9042_v61  ;;  %v3878_v37 = vpop.f32.mrf.mxu0 }
 0x906   : > { %v6794_v58 = vadd.f32 1.0, %v8626_v6  ;;  %v12779_v59 = vmul.f32 0.5, %v12360_v24  ;;  %v5202_v53 = vsub.f32 1.0, %v5201_v46  ;;  %v5302_v28 = vadd.f32 0.0036580483, %v5301_v15  ;;  %v9066_v6 = vld [vmem:[%s9974_s1 + $0xc0] sm:$0xff]  ;;  %7489 = vmatpush.bf16.msrb.mxu1 %v9050_v12 }
 0x907   : > { %v6795_v47 = vadd.f32 1.0, %v8627_v29  ;;  %v5187_v31 = vmul.f32 %v5186_v52, %v12432_v60  ;;  %v5226_v4 = vadd.f32 0.18741608, %v5225_v57  ;;  %v12782_v20 = vmin.f32 %v5537_v7, 16.0  ;;  %7547 = vmatpush.bf16.msrb.mxu3 %v9066_v6 }
 0x908   : > { %v8628_v26 = vclamps-f32 %v5014_v42, 1.0  ;;  %v12785_v49 = vmul.f32 0.5, %v12421_v38  ;;  %v12788_v24 = vmul.f32 0.5, %v12472_v41  ;;  %v5511_v40 = vadd.f32 0.001143296, %v5510_v18  ;;  %v9058_v38 = vld [vmem:[%s9974_s1 + $0x80] sm:$0xff] }
 0x909   : > { %v12790_v34 = vpop.eup %9521  ;;  %v12793_v62 = vmul.f32 %v6793_v56, %v12521_v22  ;;  %v5264_v14 = vadd.f32 0.05243302, %v5263_v35  ;;  %v12795_v48 = vadd.f32 1.0, %v5318_v54  ;;  %v12798_v60 = vadd.f32 %v3934_v9, %v11792_v0  ;;  %7518 = vmatpush.bf16.msrb.mxu2 %v9058_v38  ;;  %v15969_v38 = vld [vmem:[#allocation32_spill] sm:$0xff] }
 0x90a   : > { %v12803_v10 = vpop.eup %9523  ;;  %v12806_v41 = vmul.f32 %v6794_v58, %v12562_v43  ;;  %v5203_v32 = vmul.f32 %v12746_v50, %v5202_v53  ;;  %v12810_v51 = vmul.f32 0.5, %v12483_v27  ;;  %v5303_v22 = vmul.f32 %v5302_v28, %v12555_v3  ;;  %v15965_v53 = vld [vmem:[#allocation33_spill] sm:$0xff] }
 0x90b   : > { %v12815_v29 = vmul.f32 %v6795_v47, %v12728_v5  ;;  %v5188_v46 = vadd.f32 1.1283791, %v5187_v31  ;;  %v5227_v15 = vmul.f32 %v5226_v4, %v12477_v1  ;;  %v5550_v52 = vmul.f32 3.8918573e-05, %v12782_v20 }
 0x90c   : > { %v6796_v43 = vadd.f32 1.0, %v8628_v26  ;;  %v5241_v57 = vmul.f32 %v12790_v34, %v12749_v45  ;;  %v5499_v27 = vmul.f32 2.1237322e-06, %v12758_v39  ;;  %v5512_v7 = vmul.f32 %v5511_v40, %v12758_v39 }
 0x90d   : > { %v5265_v5 = vmul.f32 %v5264_v14, %v12508_v55  ;;  %v5281_v42 = vmul.f32 %v12803_v10, %v12756_v33  ;;  %9525 = vrcp.f32 %v12795_v48  ;;  %v12828_v1 = vmul.f32 0.70710677, %v12798_v60 }
 0x90e   : > { %v5204_v18 = vadd.f32 %v12746_v50, %v5203_v32  ;;  %vm5206_vm2 = vweird.f32 %v12746_v50  ;;  %v5209_v56 = vand.u32 2147483647, %v12671_v8  ;;  %v5304_v35 = vadd.f32 0.05243302, %v5303_v22 }
 0x90f   : > { %v15963_v54 = vpack.c.bf16 %v12495_v63, %v12312_v25  ;;  %v15964_v58 = vpack.c.bf16 %v12532_v21, %v12325_v30  ;;  %v5189_v28 = vmul.f32 %v5188_v46, %v15965_v53  ;;  %v5211_v9 = vand.u32 2147483648, %v12671_v8  ;;  %v15971_v46 = vld [vmem:[#allocation28_spill] sm:$0xff] }
 0x910   : > { %v5228_v47 = vadd.f32 1.1283791, %v5227_v15  ;;  %v5551_v31 = vadd.f32 0.001143296, %v5550_v52  ;;  %vm5205_vm3 = vweird.f32 %v12671_v8  ;;  %v5242_v4 = vsub.f32 1.0, %v5241_v57 }
 0x911   : > { %7461 = vmatmul.bf16.vlgmr.msrb.gmra.mxu0 %v15963_v54  ;;  %7490 = vmatmul.bf16.vlgmr.msrb.gmra.mxu1 %v15964_v58  ;;  %v5500_v26 = vadd.f32 0.00028619796, %v5499_v27  ;;  %v5513_v40 = vadd.f32 0.014752088, %v5512_v7  ;;  %v12843_v14 = vmul.f32 %v6796_v43, %v12770_v17  ;;  %vm12845_vm4 = vmor %vm5205_vm3, %vm5206_vm2  ;;  %v5266_v30 = vadd.f32 0.18741608, %v5265_v5 }
 0x912   : > { %v5282_v63 = vsub.f32 1.0, %v5281_v42  ;;  %v5577_v21 = vmul.f32 %v12828_v1, %v12828_v1  ;;  %v5208_v61 = vsel %vm12845_vm4, %v12746_v50, %v5204_v18  ;;  %vm5210_vm5 = vcmp.eq.f32.partialorder %v5209_v56, 8.507059e+37  ;;  %v15968_v17 = vld [vmem:[#allocation38_spill] sm:$0xff]  ;;  %7548 = vmatmul.bf16.vlgmr.msrb.gmra.mxu3 %v6908_v2 }
 0x913   : > { %v5251_v8 = vand.u32 2147483648, %v12749_v45  ;;  %v5305_v12 = vmul.f32 %v5304_v35, %v12555_v3  ;;  %v15970_v32 = vpack.c.bf16 %v15968_v17, %v15969_v38  ;;  %v12862_v22 = vpop.eup %9525  ;;  %v5212_v6 = vor.u32 1.1754944e-38, %v5211_v9 }
 0x914   : > { %v12865_v15 = vmul.f32 %v5228_v47, %v15971_v46  ;;  %v5539_v50 = vmul.f32 2.1237322e-06, %v12782_v20  ;;  %v5552_v52 = vmul.f32 %v5551_v31, %v12782_v20  ;;  %v5243_v43 = vmul.f32 %v12790_v34, %v5242_v4 }
 0x915   : > { %7519 = vmatmul.bf16.vlgmr.msrb.gmra.mxu2 %v15970_v32  ;;  %vm5245_vm6 = vweird.f32 %v12749_v45  ;;  %v5501_v57 = vmul.f32 %v5500_v26, %v12758_v39  ;;  %v5514_v27 = vmul.f32 %v5513_v40, %v12758_v39  ;;  %v5213_v13 = vsel %vm5210_vm5, %v5212_v6, %v5208_v61 }
 0x916   : > { %v5267_v2 = vmul.f32 %v5266_v30, %v12508_v55  ;;  %v5283_v7 = vmul.f32 %v12803_v10, %v5282_v63  ;;  %v12875_v5 = vmin.f32 %v5577_v21, 16.0  ;;  %v5249_v42 = vand.u32 2147483647, %v12749_v45  ;;  %v3963_v21 = vpop.f32.mrf.mxu3 }
 0x917   : > { %v5252_v18 = vor.u32 1.1754944e-38, %v5251_v8  ;;  %v5306_v56 = vadd.f32 0.18741608, %v5305_v12  ;;  %v5321_v35 = vmul.f32 %v12862_v22, %v12795_v48  ;;  %vm5246_vm7 = vweird.f32 %v12790_v34 }
 0x918   : > { %v5540_v54 = vadd.f32 0.00028619796, %v5539_v50  ;;  %v5553_v58 = vadd.f32 0.014752088, %v5552_v52  ;;  %v12882_v53 = vadd.f32 %v3878_v37, %v11770_v19  ;;  %v5214_v9 = vmul.f32 %v5213_v13, %v5189_v28  ;;  %vm12895_vm10 = vmor %vm5245_vm6, %vm5246_vm7  ;;  %v15976_v50 = vld [vmem:[#allocation29_spill] sm:$0xff] }
 0x919   : > { %v5244_v55 = vadd.f32 %v12790_v34, %v5243_v43  ;;  %v5502_v47 = vadd.f32 0.0036580483, %v5501_v57  ;;  %v5515_v31 = vadd.f32 0.112945676, %v5514_v27  ;;  %v5268_v4 = vadd.f32 1.1283791, %v5267_v2 }
 0x91a   : > { %v5284_v26 = vadd.f32 %v12803_v10, %v5283_v7  ;;  %vm5286_vm8 = vweird.f32 %v12803_v10  ;;  %v5590_v40 = vmul.f32 3.8918573e-05, %v12875_v5  ;;  %vm5285_vm9 = vweird.f32 %v12756_v33 }
 0x91b   : > { %v5289_v25 = vand.u32 2147483647, %v12756_v33  ;;  %v5291_v30 = vand.u32 2147483648, %v12756_v33  ;;  %v5322_v63 = vsub.f32 1.0, %v5321_v35  ;;  %v5307_v61 = vmul.f32 %v5306_v56, %v12555_v3  ;;  %vm12908_vm11 = vmor %vm5285_vm9, %vm5286_vm8 }
 0x91c   : > { %v5541_v8 = vmul.f32 %v5540_v54, %v12782_v20  ;;  %v5554_v12 = vmul.f32 %v5553_v58, %v12782_v20  ;;  %v12903_v17 = vmul.f32 0.70710677, %v12882_v53  ;;  %v8633_v33 = vclamps-f32 %v5214_v9, 1.0 }
 0x91d   : > { %v5248_v38 = vsel %vm12895_vm10, %v12790_v34, %v5244_v55  ;;  %v5503_v32 = vmul.f32 %v5502_v47, %v12758_v39  ;;  %v5516_v3 = vmul.f32 %v5515_v31, %v12758_v39  ;;  %v5288_v6 = vsel %vm12908_vm11, %v12803_v10, %v5284_v26  ;;  %v15977_v34 = vld [vmem:[#allocation41_spill] sm:$0xff] }
 0x91e   : > { %v5591_v46 = vadd.f32 0.001143296, %v5590_v40  ;;  %v12918_v52 = vadd.f32 %v3963_v21, %v15976_v50  ;;  %v5817_v43 = vmul.f32 %v12903_v17, %v12903_v17  ;;  %vm5250_vm12 = vcmp.eq.f32.partialorder %v5249_v42, 8.507059e+37 }
 0x91f   : > { %v5269_v57 = vmul.f32 %v5268_v4, %v15977_v34  ;;  %v5292_v27 = vor.u32 1.1754944e-38, %v5291_v30  ;;  %v5323_v37 = vmul.f32 %v12862_v22, %v5322_v63  ;;  %v5253_v13 = vsel %vm5250_vm12, %v5252_v18, %v5248_v38 }
 0x920   : > { %vm5290_vm13 = vcmp.eq.f32.partialorder %v5289_v25, 8.507059e+37  ;;  %v5542_v2 = vadd.f32 0.0036580483, %v5541_v8  ;;  %v5555_v7 = vadd.f32 0.112945676, %v5554_v12  ;;  %v12924_v54 = vmin.f32 %v5817_v43, 16.0  ;;  %v3907_v25 = vpop.f32.mrf.mxu1 }
 0x921   : > { %v5293_v56 = vsel %vm5290_vm13, %v5292_v27, %v5288_v6  ;;  %v5504_v35 = vadd.f32 0.05243302, %v5503_v32  ;;  %v5517_v10 = vadd.f32 0.4994258, %v5516_v3  ;;  %v6801_v58 = vadd.f32 1.0, %v8633_v33  ;;  %v3936_v27 = vpop.f32.mrf.mxu2 }
 0x922   : > { %v5308_v9 = vadd.f32 1.1283791, %v5307_v61  ;;  %v5592_v55 = vmul.f32 %v5591_v46, %v12875_v5  ;;  %v12928_v42 = vmul.f32 0.70710677, %v12918_v52  ;;  %v5254_v47 = vmul.f32 %v5253_v13, %v12865_v15 }
 0x923   : > { %v5324_v31 = vadd.f32 %v12862_v22, %v5323_v37  ;;  %vm5325_vm14 = vweird.f32 %v12795_v48  ;;  %vm5326_vm15 = vweird.f32 %v12862_v22  ;;  %v5294_v18 = vmul.f32 %v5293_v56, %v5269_v57 }
 0x924   : > { %v5331_v4 = vand.u32 2147483648, %v12795_v48  ;;  %v5543_v26 = vmul.f32 %v5542_v2, %v12782_v20  ;;  %v5556_v40 = vmul.f32 %v5555_v7, %v12782_v20  ;;  %v5329_v30 = vand.u32 2147483647, %v12795_v48  ;;  %vm12941_vm0 = vmor %vm5325_vm14, %vm5326_vm15  ;;  %v15980_v7 = vld [vmem:[#allocation39_spill] sm:$0xff] }
 0x925   : > { %v5505_v63 = vmul.f32 %v5504_v35, %v12758_v39  ;;  %v5518_v15 = vmul.f32 %v5517_v10, %v12758_v39  ;;  %v5830_v21 = vmul.f32 3.8918573e-05, %v12924_v54  ;;  %v12946_v61 = vmul.f32 0.5, %v12703_v11 }
 0x926   : > { %v5579_v8 = vmul.f32 2.1237322e-06, %v12875_v5  ;;  %v5593_v12 = vadd.f32 0.014752088, %v5592_v55  ;;  %v5617_v33 = vmul.f32 %v12928_v42, %v12928_v42  ;;  %v8634_v48 = vclamps-f32 %v5254_v47, 1.0 }
 0x927   : > { %v5328_v38 = vsel %vm12941_vm0, %v12862_v22, %v5324_v31  ;;  %v12955_v45 = vmul.f32 0.5, %v12716_v23  ;;  %v12958_v32 = vadd.f32 %v3907_v25, %v11772_v44  ;;  %v8635_v3 = vclamps-f32 %v5294_v18, 1.0 }
 0x928   : > { %v5332_v11 = vor.u32 1.1754944e-38, %v5331_v4  ;;  %v5544_v6 = vadd.f32 0.05243302, %v5543_v26  ;;  %v5557_v46 = vadd.f32 0.4994258, %v5556_v40  ;;  %vm5330_vm1 = vcmp.eq.f32.partialorder %v5329_v30, 8.507059e+37 }
 0x929   : > { %v5506_v43 = vadd.f32 0.18741608, %v5505_v63  ;;  %v12960_v34 = vadd.f32 1.0, %v5518_v15  ;;  %v5831_v57 = vadd.f32 0.001143296, %v5830_v21  ;;  %v5594_v22 = vmul.f32 %v5593_v12, %v12875_v5 }
 0x92a   : > { %v5333_v37 = vsel %vm5330_vm1, %v5332_v11, %v5328_v38  ;;  %v5580_v13 = vadd.f32 0.00028619796, %v5579_v8  ;;  %v12963_v2 = vmin.f32 %v5617_v33, 16.0  ;;  %v6802_v23 = vadd.f32 1.0, %v8634_v48 }
 0x92b   : > { %v5309_v56 = vmul.f32 %v5308_v9, %v15980_v7  ;;  %v5832_v35 = vmul.f32 %v5831_v57, %v12924_v54  ;;  %v12968_v10 = vmul.f32 0.70710677, %v12958_v32  ;;  %v6803_v55 = vadd.f32 1.0, %v8635_v3 }
 0x92c   : > { %v5545_v47 = vmul.f32 %v5544_v6, %v12782_v20  ;;  %v5558_v31 = vmul.f32 %v5557_v46, %v12782_v20  ;;  %v12973_v18 = vadd.f32 %v3936_v27, %v11792_v0  ;;  %v5507_v26 = vmul.f32 %v5506_v43, %v12758_v39 }
 0x92d   : > { %v5334_v4 = vmul.f32 %v5333_v37, %v5309_v56  ;;  %9527 = vrcp.f32 %v12960_v34  ;;  %v5833_v40 = vadd.f32 0.014752088, %v5832_v35  ;;  %v5581_v9 = vmul.f32 %v5580_v13, %v12875_v5 }
 0x92e   : > { %v5595_v25 = vadd.f32 0.112945676, %v5594_v22  ;;  %v5630_v30 = vmul.f32 3.8918573e-05, %v12963_v2  ;;  %v5857_v63 = vmul.f32 %v12968_v10, %v12968_v10  ;;  %v12982_v15 = vmul.f32 %v6801_v58, %v12779_v59 }
 0x92f   : > { %v12985_v21 = vmul.f32 0.5, %v12798_v60  ;;  %v5819_v28 = vmul.f32 2.1237322e-06, %v12924_v54  ;;  %v5834_v39 = vmul.f32 %v5833_v40, %v12924_v54  ;;  %v5546_v8 = vadd.f32 0.18741608, %v5545_v47 }
 0x930   : > { %v12989_v12 = vadd.f32 1.0, %v5558_v31  ;;  %v12991_v33 = vmin.f32 %v5857_v63, 16.0  ;;  %v12994_v48 = vmul.f32 0.70710677, %v12973_v18  ;;  %v12997_v38 = vmul.f32 %v6802_v23, %v12785_v49 }
 0x931   : > { %v13000_v59 = vmul.f32 %v6803_v55, %v12788_v24  ;;  %v8636_v60 = vclamps-f32 %v5334_v4, 1.0  ;;  %v5508_v58 = vadd.f32 1.1283791, %v5507_v26  ;;  %v5582_v3 = vadd.f32 0.0036580483, %v5581_v9  ;;  %v3965_v55 = vpop.f32.mrf.mxu3 }
 0x932   : > { %v5596_v11 = vmul.f32 %v5595_v25, %v12875_v5  ;;  %v5631_v6 = vadd.f32 0.001143296, %v5630_v30  ;;  %v5835_v46 = vadd.f32 0.112945676, %v5834_v39  ;;  %v5820_v57 = vadd.f32 0.00028619796, %v5819_v28 }
 0x933   : > { %v13003_v43 = vpop.eup %9527  ;;  %v5859_v27 = vmul.f32 2.1237322e-06, %v12991_v33  ;;  %v5870_v37 = vmul.f32 3.8918573e-05, %v12991_v33  ;;  %v5897_v49 = vmul.f32 %v12994_v48, %v12994_v48  ;;  %v5547_v24 = vmul.f32 %v5546_v8, %v12782_v20 }
 0x934   : > { %9529 = vrcp.f32 %v12989_v12  ;;  %v5619_v13 = vmul.f32 2.1237322e-06, %v12963_v2  ;;  %v5836_v22 = vmul.f32 %v5835_v46, %v12924_v54  ;;  %v6804_v23 = vadd.f32 1.0, %v8636_v60 }
 0x935   : > { %v5860_v7 = vadd.f32 0.00028619796, %v5859_v27  ;;  %v5871_v56 = vadd.f32 0.001143296, %v5870_v37  ;;  %v13013_v35 = vmin.f32 %v5897_v49, 16.0  ;;  %v13016_v47 = vmul.f32 %v5508_v58, %v12713_v16 }
 0x936   : > { %v5521_v31 = vmul.f32 %v13003_v43, %v12960_v34  ;;  %v5632_v20 = vmul.f32 %v5631_v6, %v12963_v2  ;;  %v5837_v4 = vadd.f32 0.4994258, %v5836_v22  ;;  %v5597_v26 = vadd.f32 0.4994258, %v5596_v11 }
 0x937   : > { %v5821_v40 = vmul.f32 %v5820_v57, %v12924_v54  ;;  %v5872_v9 = vmul.f32 %v5871_v56, %v12991_v33  ;;  %v5910_v25 = vmul.f32 3.8918573e-05, %v13013_v35  ;;  %v5529_v30 = vand.u32 2147483647, %v12960_v34 }
 0x938   : > { %v5583_v63 = vmul.f32 %v5582_v3, %v12875_v5  ;;  %v5861_v16 = vmul.f32 %v5860_v7, %v12991_v33  ;;  %v13028_v28 = vadd.f32 %v3965_v55, %v15976_v50  ;;  %v5531_v39 = vand.u32 2147483648, %v12960_v34 }
 0x939   : > { %v5620_v8 = vadd.f32 0.00028619796, %v5619_v13  ;;  %v5838_v60 = vmul.f32 %v5837_v4, %v12924_v54  ;;  %v5873_v58 = vadd.f32 0.014752088, %v5872_v9  ;;  %v13035_v6 = vmul.f32 %v6804_v23, %v12810_v51 }
 0x93a   : > { %v13032_v11 = vpop.eup %9529  ;;  %v5522_v46 = vsub.f32 1.0, %v5521_v31  ;;  %v5633_v57 = vadd.f32 0.014752088, %v5632_v20  ;;  %v5911_v27 = vadd.f32 0.001143296, %v5910_v25  ;;  %v5598_v3 = vmul.f32 %v5597_v26, %v12875_v5 }
 0x93b   : > { %v5822_v37 = vadd.f32 0.0036580483, %v5821_v40  ;;  %v13038_v49 = vadd.f32 1.0, %v5838_v60  ;;  %v5874_v22 = vmul.f32 %v5873_v58, %v12991_v33  ;;  %v5584_v7 = vadd.f32 0.05243302, %v5583_v63 }
 0x93c   : > { %v5862_v13 = vadd.f32 0.0036580483, %v5861_v16  ;;  %v5912_v56 = vmul.f32 %v5911_v27, %v13013_v35  ;;  %v13043_v55 = vmul.f32 0.70710677, %v13028_v28  ;;  %vm5525_vm2 = vweird.f32 %v12960_v34 }
 0x93d   : > { %v5548_v51 = vadd.f32 1.1283791, %v5547_v24  ;;  %v5561_v23 = vmul.f32 %v13032_v11, %v12989_v12  ;;  %v5621_v31 = vmul.f32 %v5620_v8, %v12963_v2  ;;  %9531 = vrcp.f32 %v13038_v49 }
 0x93e   : > { %v5523_v20 = vmul.f32 %v13003_v43, %v5522_v46  ;;  %v5532_v4 = vor.u32 1.1754944e-38, %v5531_v39  ;;  %v5634_v26 = vmul.f32 %v5633_v57, %v12963_v2  ;;  %v5875_v40 = vadd.f32 0.112945676, %v5874_v22 }
 0x93f   : > { %v13052_v9 = vadd.f32 1.0, %v5598_v3  ;;  %v5823_v25 = vmul.f32 %v5822_v37, %v12924_v54  ;;  %v5913_v63 = vadd.f32 0.014752088, %v5912_v56  ;;  %v5937_v24 = vmul.f32 %v13043_v55, %v13043_v55 }
 0x940   : > { %vm5526_vm3 = vweird.f32 %v13003_v43  ;;  %v5585_v16 = vmul.f32 %v5584_v7, %v12875_v5  ;;  %v5863_v8 = vmul.f32 %v5862_v13, %v12991_v33  ;;  %v5876_v60 = vmul.f32 %v5875_v40, %v12991_v33 }
 0x941   : > { %vm13061_vm4 = vcmp.eq.f32.partialorder %v5529_v30, 8.507059e+37  ;;  %v5562_v58 = vsub.f32 1.0, %v5561_v23  ;;  %v5622_v46 = vadd.f32 0.0036580483, %v5621_v31  ;;  %v13065_v57 = vmin.f32 %v5937_v24, 16.0  ;;  %vm13090_vm6 = vmor %vm5525_vm2, %vm5526_vm3 }
 0x942   : > { %v6913_v27 = vpack.c.bf16 %v12982_v15, %v12793_v62  ;;  %v5524_v3 = vadd.f32 %v13003_v43, %v5523_v20  ;;  %v5635_v37 = vadd.f32 0.112945676, %v5634_v26  ;;  %v5877_v22 = vadd.f32 0.4994258, %v5876_v60 }
 0x943   : > { %v5914_v7 = vmul.f32 %v5913_v63, %v13013_v35  ;;  %v13071_v13 = vpop.eup %9531  ;;  %9533 = vrcp.f32 %v13052_v9  ;;  %v5824_v30 = vadd.f32 0.05243302, %v5823_v25  ;;  %v5950_v56 = vmul.f32 3.8918573e-05, %v13065_v57 }
 0x944   : > { %7466 = vmatmul.bf16.gmra.mxu0 %v6913_v27  ;;  %v6914_v23 = vpack.c.bf16 %v12997_v38, %v12806_v41  ;;  %v13078_v31 = vmul.f32 %v5548_v51, %v12752_v36  ;;  %v5586_v62 = vadd.f32 0.18741608, %v5585_v16  ;;  %v5841_v15 = vmul.f32 %v13071_v13, %v13038_v49 }
 0x945   : > { %v5864_v20 = vadd.f32 0.05243302, %v5863_v8  ;;  %v5563_v26 = vmul.f32 %v13032_v11, %v5562_v58  ;;  %vm5565_vm5 = vweird.f32 %v12989_v12  ;;  %v5569_v40 = vand.u32 2147483647, %v12989_v12 }
 0x946   : > { %v5878_v25 = vmul.f32 %v5877_v22, %v12991_v33  ;;  %7495 = vmatmul.bf16.gmra.mxu1 %v6914_v23  ;;  %v5623_v41 = vmul.f32 %v5622_v46, %v12963_v2  ;;  %v5636_v38 = vmul.f32 %v5635_v37, %v12963_v2  ;;  %v5915_v51 = vadd.f32 0.112945676, %v5914_v7 }
 0x947   : > { %v5951_v63 = vadd.f32 0.001143296, %v5950_v56  ;;  %v5528_v24 = vsel %vm13090_vm6, %v13003_v43, %v5524_v3  ;;  %v5825_v16 = vmul.f32 %v5824_v30, %v12924_v54  ;;  %v5842_v8 = vsub.f32 1.0, %v5841_v15 }
 0x948   : > { %v13100_v60 = vadd.f32 1.0, %v5878_v25  ;;  %v5571_v34 = vand.u32 2147483648, %v12989_v12  ;;  %v5587_v58 = vmul.f32 %v5586_v62, %v12875_v5  ;;  %v5865_v27 = vmul.f32 %v5864_v20, %v12991_v33 }
 0x949   : > { %v5952_v46 = vmul.f32 %v5951_v63, %v13065_v57  ;;  %v13106_v37 = vpop.eup %9533  ;;  %v5564_v22 = vadd.f32 %v13032_v11, %v5563_v26  ;;  %vm5566_vm7 = vweird.f32 %v13032_v11  ;;  %vm13110_vm8 = vcmp.eq.f32.partialorder %v5569_v40, 8.507059e+37 }
 0x94a   : > { %9535 = vrcp.f32 %v13100_v60  ;;  %v5533_v3 = vsel %vm13061_vm4, %v5532_v4, %v5528_v24  ;;  %v5624_v5 = vadd.f32 0.05243302, %v5623_v41  ;;  %v5637_v7 = vadd.f32 0.4994258, %v5636_v38  ;;  %vm13123_vm9 = vmor %vm5565_vm5, %vm5566_vm7 }
 0x94b   : > { %v5916_v30 = vmul.f32 %v5915_v51, %v13013_v35  ;;  %v5826_v56 = vadd.f32 0.18741608, %v5825_v16  ;;  %v5843_v23 = vmul.f32 %v13071_v13, %v5842_v8  ;;  %v5953_v62 = vadd.f32 0.014752088, %v5952_v46 }
 0x94c   : > { %v6915_v15 = vpack.c.bf16 %v13000_v59, %v12815_v29  ;;  %v5572_v26 = vor.u32 1.1754944e-38, %v5571_v34  ;;  %v13127_v39 = vadd.f32 1.1283791, %v5587_v58  ;;  %v13131_v4 = vmul.f32 %v13106_v37, %v13052_v9 }
 0x94d   : > { %v5866_v40 = vadd.f32 0.18741608, %v5865_v27  ;;  %v5568_v25 = vsel %vm13123_vm9, %v13032_v11, %v5564_v22  ;;  %v5899_v29 = vmul.f32 2.1237322e-06, %v13013_v35  ;;  %v5954_v12 = vmul.f32 %v5953_v62, %v13065_v57  ;;  %v3881_v27 = vpop.f32.mrf.mxu0 }
 0x94e   : > { %7524 = vmatmul.bf16.gmra.mxu2 %v6915_v15  ;;  %v6916_v59 = vpack.c.bf16 %v13035_v6, %v12843_v14  ;;  %v13141_v36 = vmul.f32 %v5533_v3, %v13016_v47  ;;  %v5625_v41 = vmul.f32 %v5624_v5, %v12963_v2  ;;  %v5638_v38 = vmul.f32 %v5637_v7, %v12963_v2 }
 0x94f   : > { %v5917_v51 = vadd.f32 0.4994258, %v5916_v30  ;;  %v5827_v24 = vmul.f32 %v5826_v56, %v12924_v54  ;;  %v5844_v11 = vadd.f32 %v13071_v13, %v5843_v23  ;;  %vm5846_vm10 = vweird.f32 %v13071_v13 }
 0x950   : > { %v9536_v63 = vpop.eup %9535  ;;  %v5851_v16 = vand.u32 2147483648, %v13038_v49  ;;  %7553 = vmatmul.bf16.gmra.mxu3 %v6916_v59  ;;  %v5573_v14 = vsel %vm13110_vm8, %v5572_v26, %v5568_v25  ;;  %v5602_v47 = vsub.f32 1.0, %v13131_v4  ;;  %v5867_v6 = vmul.f32 %v5866_v40, %v12991_v33 }
 0x951   : > { %v5881_v8 = vmul.f32 %v9536_v63, %v13100_v60  ;;  %vm5845_vm11 = vweird.f32 %v13038_v49  ;;  %v5849_v54 = vand.u32 2147483647, %v13038_v49  ;;  %v5900_v34 = vadd.f32 0.00028619796, %v5899_v29 }
 0x952   : > { %v5955_v58 = vadd.f32 0.112945676, %v5954_v12  ;;  %v13156_v46 = vadd.f32 1.0, %v5638_v38  ;;  %vm13158_vm12 = vmor %vm5845_vm11, %vm5846_vm10  ;;  %v5918_v3 = vmul.f32 %v5917_v51, %v13013_v35  ;;  %v13164_v33 = vadd.f32 %v3881_v27, %v11770_v19 }
 0x953   : > { %v5882_v43 = vsub.f32 1.0, %v5881_v8  ;;  %v5828_v5 = vadd.f32 1.1283791, %v5827_v24  ;;  %v5848_v49 = vsel %vm13158_vm12, %v13071_v13, %v5844_v11  ;;  %v5852_v7 = vor.u32 1.1754944e-38, %v5851_v16 }
 0x954   : > { %v5891_v30 = vand.u32 2147483648, %v13100_v60  ;;  %v5868_v56 = vadd.f32 1.1283791, %v5867_v6  ;;  %vm5886_vm13 = vweird.f32 %v9536_v63  ;;  %v5889_v62 = vand.u32 2147483647, %v13100_v60 }
 0x955   : > { %v5883_v23 = vmul.f32 %v9536_v63, %v5882_v43  ;;  %vm5850_vm14 = vcmp.eq.f32.partialorder %v5849_v54, 8.507059e+37  ;;  %v5901_v15 = vmul.f32 %v5900_v34, %v13013_v35  ;;  %v5956_v20 = vmul.f32 %v5955_v58, %v13065_v57 }
 0x956   : > { %v13174_v26 = vmul.f32 0.70710677, %v13164_v33  ;;  %v5853_v4 = vsel %vm5850_vm14, %v5852_v7, %v5848_v49  ;;  %vm5885_vm15 = vweird.f32 %v13100_v60  ;;  %v13177_v13 = vadd.f32 1.0, %v5918_v3 }
 0x957   : > { %v5884_v40 = vadd.f32 %v9536_v63, %v5883_v23  ;;  %9537 = vrcp.f32 %v13156_v46  ;;  %v5829_v25 = vmul.f32 %v5828_v5, %v12903_v17  ;;  %vm5887_vm0 = vmor %vm5885_vm15, %vm5886_vm13  ;;  %v5892_v29 = vor.u32 1.1754944e-38, %v5891_v30 }
 0x958   : > { %v6137_v12 = vmul.f32 %v13174_v26, %v13174_v26  ;;  %v5869_v59 = vmul.f32 %v5868_v56, %v12968_v10  ;;  %vm5890_vm1 = vcmp.eq.f32.partialorder %v5889_v62, 8.507059e+37  ;;  %v5939_v51 = vmul.f32 2.1237322e-06, %v13065_v57 }
 0x959   : > { %v5888_v38 = vsel %vm5887_vm0, %v9536_v63, %v5884_v40  ;;  %v5854_v24 = vmul.f32 %v5853_v4, %v5829_v25  ;;  %v5957_v60 = vadd.f32 0.4994258, %v5956_v20  ;;  %v5626_v6 = vadd.f32 0.18741608, %v5625_v41 }
 0x95a   : > { %v5893_v11 = vsel %vm5890_vm1, %v5892_v29, %v5888_v38  ;;  %v13185_v16 = vmin.f32 %v6137_v12, 16.0  ;;  %v5902_v54 = vadd.f32 0.0036580483, %v5901_v15  ;;  %9539 = vrcp.f32 %v13177_v13 }
 0x95b   : > { %v5894_v8 = vmul.f32 %v5893_v11, %v5869_v59  ;;  %v5574_v17 = vmul.f32 %v5573_v14, %v13078_v31  ;;  %v5603_v34 = vmul.f32 %v13106_v37, %v5602_v47  ;;  %v13191_v10 = vmul.f32 0.5, %v12918_v52 }
 0x95c   : > { %v6150_v63 = vmul.f32 3.8918573e-05, %v13185_v16  ;;  %v5609_v58 = vand.u32 2147483647, %v13052_v9  ;;  %v5611_v27 = vand.u32 2147483648, %v13052_v9  ;;  %v4129_v22 = vmul.f32 0.5, %v12882_v53 }
 0x95d   : > { %v5940_v41 = vadd.f32 0.00028619796, %v5939_v51  ;;  %v13197_v43 = vpop.eup %9537  ;;  %v8649_v3 = vclamps-f32 %v5854_v24, 1.0  ;;  %v8650_v5 = vclamps-f32 %v5894_v8, 1.0  ;;  %v5958_v31 = vmul.f32 %v5957_v60, %v13065_v57  ;;  %v3910_v24 = vpop.f32.mrf.mxu1 }
 0x95e   : > { %v6151_v14 = vadd.f32 0.001143296, %v6150_v63  ;;  %v8641_v47 = vclamps-f32 %v13141_v36, 1.0  ;;  %v13203_v52 = vmul.f32 %v13127_v39, %v12828_v1  ;;  %v5627_v49 = vmul.f32 %v5626_v6, %v12963_v2 }
 0x95f   : > { %v5903_v7 = vmul.f32 %v5902_v54, %v13013_v35  ;;  %v8642_v30 = vclamps-f32 %v5574_v17, 1.0  ;;  %v5604_v53 = vadd.f32 %v13106_v37, %v5603_v34  ;;  %vm5606_vm2 = vweird.f32 %v13106_v37 }
 0x960   : > { %v6152_v56 = vmul.f32 %v6151_v14, %v13185_v16  ;;  %v13210_v23 = vpop.eup %9539  ;;  %vm5605_vm3 = vweird.f32 %v13052_v9  ;;  %vm13213_vm4 = vcmp.eq.f32.partialorder %v5609_v58, 8.507059e+37  ;;  %v5641_v1 = vmul.f32 %v13197_v43, %v13156_v46 }
 0x961   : > { %v5941_v2 = vmul.f32 %v5940_v41, %v13065_v57  ;;  %v5612_v39 = vor.u32 1.1754944e-38, %v5611_v27  ;;  %v6817_v62 = vadd.f32 1.0, %v8649_v3  ;;  %v6818_v15 = vadd.f32 1.0, %v8650_v5  ;;  %vm13222_vm5 = vmor %vm5605_vm3, %vm5606_vm2 }
 0x962   : > { %v13220_v20 = vadd.f32 1.0, %v5958_v31  ;;  %v6809_v4 = vadd.f32 1.0, %v8641_v47  ;;  %v4130_v9 = vmul.f32 0.5, %v12958_v32  ;;  %v5904_v25 = vadd.f32 0.05243302, %v5903_v7  ;;  %v3939_v7 = vpop.f32.mrf.mxu2 }
 0x963   : > { %v6153_v29 = vadd.f32 0.014752088, %v6152_v56  ;;  %v6810_v12 = vadd.f32 1.0, %v8642_v30  ;;  %v5608_v59 = vsel %vm13222_vm5, %v13106_v37, %v5604_v53  ;;  %v5628_v38 = vadd.f32 1.1283791, %v5627_v49 }
 0x964   : > { %v5921_v51 = vmul.f32 %v13210_v23, %v13177_v13  ;;  %v5642_v11 = vsub.f32 1.0, %v5641_v1  ;;  %v5942_v60 = vadd.f32 0.0036580483, %v5941_v2  ;;  %v13234_v8 = vadd.f32 %v3910_v24, %v11772_v44 }
 0x965   : > { %v6154_v6 = vmul.f32 %v6153_v29, %v13185_v16  ;;  %v6881_v32 = vmul.f32 %v6817_v62, %v4129_v22  ;;  %v6882_v54 = vmul.f32 %v6818_v15, %v4130_v9  ;;  %9541 = vrcp.f32 %v13220_v20 }
 0x966   : > { %v6139_v17 = vmul.f32 2.1237322e-06, %v13185_v16  ;;  %v6873_v37 = vmul.f32 %v6809_v4, %v12946_v61  ;;  %v5905_v34 = vmul.f32 %v5904_v25, %v13013_v35  ;;  %v13241_v58 = vmul.f32 0.70710677, %v13234_v8 }
 0x967   : > { %v6155_v63 = vadd.f32 0.112945676, %v6154_v6  ;;  %v6874_v27 = vmul.f32 %v6810_v12, %v12955_v45  ;;  %v5649_v41 = vand.u32 2147483647, %v13156_v46  ;;  %v5651_v3 = vand.u32 2147483648, %v13156_v46  ;;  %v3968_v45 = vpop.f32.mrf.mxu3 }
 0x968   : > { %v5922_v22 = vsub.f32 1.0, %v5921_v51  ;;  %v5613_v5 = vsel %vm13213_vm4, %v5612_v39, %v5608_v59  ;;  %v5643_v31 = vmul.f32 %v13197_v43, %v5642_v11  ;;  %v6177_v14 = vmul.f32 %v13241_v58, %v13241_v58 }
 0x969   : > { %v6156_v61 = vmul.f32 %v6155_v63, %v13185_v16  ;;  %v5943_v47 = vmul.f32 %v5942_v60, %v13065_v57  ;;  %v6140_v49 = vadd.f32 0.00028619796, %v6139_v17  ;;  %v6921_v30 = vpack.c.bf16 %v6881_v32, %v6873_v37 }
 0x96a   : > { %v6922_v53 = vpack.c.bf16 %v6882_v54, %v6874_v27  ;;  %v5906_v56 = vadd.f32 0.18741608, %v5905_v34  ;;  %v13253_v2 = vmin.f32 %v6177_v14, 16.0  ;;  %v13256_v36 = vadd.f32 %v3939_v7, %v11792_v0 }
 0x96b   : > { %v6157_v1 = vadd.f32 0.4994258, %v6156_v61  ;;  %v13258_v39 = vpop.eup %9541  ;;  %v13261_v62 = vmul.f32 %v5628_v38, %v12928_v42  ;;  %vm5645_vm6 = vweird.f32 %v13156_v46  ;;  %v5923_v15 = vmul.f32 %v13210_v23, %v5922_v22  ;;  %7471 = vmatmul.bf16.gmra.mxu0 %v6921_v30 }
 0x96c   : > { %v13266_v4 = vadd.f32 %v3968_v45, %v15976_v50  ;;  %7500 = vmatmul.bf16.gmra.mxu1 %v6922_v53  ;;  %v13269_v40 = vmul.f32 %v5613_v5, %v13203_v52  ;;  %v5652_v9 = vor.u32 1.1754944e-38, %v5651_v3  ;;  %v6190_v29 = vmul.f32 3.8918573e-05, %v13253_v2  ;;  %v3883_v45 = vpop.f32.mrf.mxu0 }
 0x96d   : > { %v6158_v25 = vmul.f32 %v6157_v1, %v13185_v16  ;;  %vm5646_vm7 = vweird.f32 %v13197_v43  ;;  %v5944_v42 = vadd.f32 0.05243302, %v5943_v47  ;;  %v6141_v12 = vmul.f32 %v6140_v49, %v13185_v16 }
 0x96e   : > { %v13276_v59 = vmul.f32 0.70710677, %v13256_v36  ;;  %v5644_v38 = vadd.f32 %v13197_v43, %v5643_v31  ;;  %vm13279_vm8 = vcmp.eq.f32.partialorder %v5649_v41, 8.507059e+37  ;;  %v5907_v52 = vmul.f32 %v5906_v56, %v13013_v35  ;;  %vm13302_vm11 = vmor %vm5645_vm6, %vm5646_vm7 }
 0x96f   : > { %v5961_v24 = vmul.f32 %v13258_v39, %v13220_v20  ;;  %v6191_v11 = vadd.f32 0.001143296, %v6190_v29  ;;  %v5924_v60 = vadd.f32 %v13210_v23, %v5923_v15  ;;  %vm5926_vm9 = vweird.f32 %v13210_v23 }
 0x970   : > { %v6217_v6 = vmul.f32 %v13276_v59, %v13276_v59  ;;  %v13291_v32 = vmul.f32 0.70710677, %v13266_v4  ;;  %vm5925_vm10 = vweird.f32 %v13177_v13  ;;  %v5929_v54 = vand.u32 2147483647, %v13177_v13 }
 0x971   : > { %v5931_v35 = vand.u32 2147483648, %v13177_v13  ;;  %v13296_v17 = vadd.f32 1.0, %v6158_v25  ;;  %v5945_v34 = vmul.f32 %v5944_v42, %v13065_v57  ;;  %v6142_v63 = vadd.f32 0.0036580483, %v6141_v12  ;;  %vm13314_vm12 = vmor %vm5925_vm10, %vm5926_vm9 }
 0x972   : > { %v6192_v27 = vmul.f32 %v6191_v11, %v13253_v2  ;;  %v13308_v41 = vmin.f32 %v6217_v6, 16.0  ;;  %v8643_v3 = vclamps-f32 %v13269_v40, 1.0  ;;  %v5648_v13 = vsel %vm13302_vm11, %v13197_v43, %v5644_v38 }
 0x973   : > { %v5962_v46 = vsub.f32 1.0, %v5961_v24  ;;  %v6257_v5 = vmul.f32 %v13291_v32, %v13291_v32  ;;  %v5908_v31 = vadd.f32 1.1283791, %v5907_v52  ;;  %v5928_v61 = vsel %vm13314_vm12, %v13210_v23, %v5924_v60 }
 0x974   : > { %v6179_v14 = vmul.f32 2.1237322e-06, %v13253_v2  ;;  %v6193_v47 = vadd.f32 0.014752088, %v6192_v27  ;;  %v5932_v49 = vor.u32 1.1754944e-38, %v5931_v35  ;;  %9543 = vrcp.f32 %v13296_v17 }
 0x975   : > { %v6230_v43 = vmul.f32 3.8918573e-05, %v13308_v41  ;;  %v13326_v7 = vmin.f32 %v6257_v5, 16.0  ;;  %vm5930_vm13 = vcmp.eq.f32.partialorder %v5929_v54, 8.507059e+37  ;;  %v5946_v30 = vadd.f32 0.18741608, %v5945_v34 }
 0x976   : > { %v6143_v53 = vmul.f32 %v6142_v63, %v13185_v16  ;;  %v6194_v56 = vmul.f32 %v6193_v47, %v13253_v2  ;;  %v5933_v1 = vsel %vm5930_vm13, %v5932_v49, %v5928_v61  ;;  %v5963_v23 = vmul.f32 %v13258_v39, %v5962_v46 }
 0x977   : > { %v6231_v15 = vadd.f32 0.001143296, %v6230_v43  ;;  %v6270_v40 = vmul.f32 3.8918573e-05, %v13326_v7  ;;  %v5653_v25 = vsel %vm13279_vm8, %v5652_v9, %v5648_v13  ;;  %v5909_v29 = vmul.f32 %v5908_v31, %v12994_v48 }
 0x978   : > { %v6180_v42 = vadd.f32 0.00028619796, %v6179_v14  ;;  %v13336_v12 = vadd.f32 %v3883_v45, %v11770_v19  ;;  %v6195_v38 = vadd.f32 0.112945676, %v6194_v56  ;;  %v6219_v52 = vmul.f32 2.1237322e-06, %v13308_v41  ;;  %v3912_v56 = vpop.f32.mrf.mxu1 }
 0x979   : > { %v6232_v24 = vmul.f32 %v6231_v15, %v13308_v41  ;;  %v6271_v11 = vadd.f32 0.001143296, %v6270_v40  ;;  %v5934_v60 = vmul.f32 %v5933_v1, %v5909_v29  ;;  %v5947_v6 = vmul.f32 %v5946_v30, %v13065_v57 }
 0x97a   : > { %v5971_v54 = vand.u32 2147483648, %v13220_v20  ;;  %v6144_v35 = vadd.f32 0.05243302, %v6143_v53  ;;  %v13342_v51 = vpop.eup %9543  ;;  %v5964_v48 = vadd.f32 %v13258_v39, %v5963_v23  ;;  %vm5966_vm14 = vweird.f32 %v13258_v39 }
 0x97b   : > { %v6233_v19 = vadd.f32 0.014752088, %v6232_v24  ;;  %v6272_v9 = vmul.f32 %v6271_v11, %v13326_v7  ;;  %vm5965_vm15 = vweird.f32 %v13220_v20  ;;  %v5969_v37 = vand.u32 2147483647, %v13220_v20 }
 0x97c   : > { %v6181_v34 = vmul.f32 %v6180_v42, %v13253_v2  ;;  %v13351_v57 = vmul.f32 0.70710677, %v13336_v12  ;;  %v6196_v63 = vmul.f32 %v6195_v38, %v13253_v2  ;;  %v6220_v27 = vadd.f32 0.00028619796, %v6219_v52  ;;  %vm13356_vm0 = vmor %vm5965_vm15, %vm5966_vm14 }
 0x97d   : > { %v6234_v13 = vmul.f32 %v6233_v19, %v13308_v41  ;;  %v6273_v22 = vadd.f32 0.014752088, %v6272_v9  ;;  %v5654_v46 = vmul.f32 %v5653_v25, %v13261_v62  ;;  %v5948_v5 = vadd.f32 1.1283791, %v5947_v6 }
 0x97e   : > { %v6145_v20 = vmul.f32 %v6144_v35, %v13185_v16  ;;  %v6161_v61 = vmul.f32 %v13342_v51, %v13296_v17  ;;  %v8651_v14 = vclamps-f32 %v5934_v60, 1.0  ;;  %v5968_v47 = vsel %vm13356_vm0, %v13258_v39, %v5964_v48 }
 0x97f   : > { %v5972_v49 = vor.u32 1.1754944e-38, %v5971_v54  ;;  %v6235_v43 = vadd.f32 0.112945676, %v6234_v13  ;;  %v6182_v45 = vadd.f32 0.0036580483, %v6181_v34  ;;  %v6274_v30 = vmul.f32 %v6273_v22, %v13326_v7 }
 0x980   : > { %v6259_v62 = vmul.f32 2.1237322e-06, %v13326_v7  ;;  %v6457_v53 = vmul.f32 %v13351_v57, %v13351_v57  ;;  %v6811_v1 = vadd.f32 1.0, %v8643_v3  ;;  %vm5970_vm1 = vcmp.eq.f32.partialorder %v5969_v37, 8.507059e+37 }
 0x981   : > { %v6197_v23 = vadd.f32 0.4994258, %v6196_v63  ;;  %v6221_v15 = vmul.f32 %v6220_v27, %v13308_v41  ;;  %v8644_v40 = vclamps-f32 %v5654_v46, 1.0  ;;  %v5973_v25 = vsel %vm5970_vm1, %v5972_v49, %v5968_v47 }
 0x982   : > { %v6146_v29 = vadd.f32 0.18741608, %v6145_v20  ;;  %v6162_v39 = vsub.f32 1.0, %v6161_v61  ;;  %v6819_v42 = vadd.f32 1.0, %v8651_v14  ;;  %v5949_v38 = vmul.f32 %v5948_v5, %v13043_v55  ;;  %v3941_v14 = vpop.f32.mrf.mxu2 }
 0x983   : > { %v6236_v52 = vmul.f32 %v6235_v43, %v13308_v41  ;;  %v13374_v24 = vadd.f32 %v3912_v56, %v11772_v44  ;;  %v6183_v11 = vmul.f32 %v6182_v45, %v13253_v2  ;;  %v6260_v60 = vadd.f32 0.00028619796, %v6259_v62 }
 0x984   : > { %v6275_v3 = vadd.f32 0.112945676, %v6274_v30  ;;  %v13377_v6 = vmin.f32 %v6457_v53, 16.0  ;;  %v4131_v54 = vmul.f32 0.5, %v12973_v18  ;;  %v5974_v35 = vmul.f32 %v5973_v25, %v5949_v38 }
 0x985   : > { %v6198_v48 = vmul.f32 %v6197_v23, %v13253_v2  ;;  %v6222_v19 = vadd.f32 0.0036580483, %v6221_v15  ;;  %v4132_v9 = vmul.f32 0.5, %v13028_v28  ;;  %v6147_v55 = vmul.f32 %v6146_v29, %v13185_v16 }
 0x986   : > { %v6163_v37 = vmul.f32 %v13342_v51, %v6162_v39  ;;  %v6276_v44 = vmul.f32 %v6275_v3, %v13326_v7  ;;  %v6875_v34 = vmul.f32 %v6811_v1, %v12985_v21  ;;  %v6812_v63 = vadd.f32 1.0, %v8644_v40 }
 0x987   : > { %v6883_v27 = vmul.f32 %v6819_v42, %v4131_v54  ;;  %v6237_v13 = vadd.f32 0.4994258, %v6236_v52  ;;  %v6184_v22 = vadd.f32 0.05243302, %v6183_v11  ;;  %v6261_v18 = vmul.f32 %v6260_v60, %v13326_v7 }
 0x988   : > { %v6470_v46 = vmul.f32 3.8918573e-05, %v13377_v6  ;;  %v13389_v5 = vmul.f32 0.70710677, %v13374_v24  ;;  %v8652_v28 = vclamps-f32 %v5974_v35, 1.0  ;;  %v13391_v31 = vadd.f32 1.0, %v6198_v48 }
 0x989   : > { %v6223_v16 = vmul.f32 %v6222_v19, %v13308_v41  ;;  %v6277_v20 = vadd.f32 0.4994258, %v6276_v44  ;;  %v6148_v61 = vadd.f32 1.1283791, %v6147_v55  ;;  %v6164_v21 = vadd.f32 %v13342_v51, %v6163_v37 }
 0x98a   : > { %vm6165_vm2 = vweird.f32 %v13296_v17  ;;  %vm6166_vm3 = vweird.f32 %v13342_v51  ;;  %v6169_v47 = vand.u32 2147483647, %v13296_v17  ;;  %v6171_v49 = vand.u32 2147483648, %v13296_v17 }
 0x98b   : > { %v6238_v43 = vmul.f32 %v6237_v13, %v13308_v41  ;;  %v6459_v45 = vmul.f32 2.1237322e-06, %v13377_v6  ;;  %v6185_v62 = vmul.f32 %v6184_v22, %v13253_v2  ;;  %v6262_v30 = vadd.f32 0.0036580483, %v6261_v18  ;;  %vm13404_vm4 = vmor %vm6165_vm2, %vm6166_vm3 }
 0x98c   : > { %v6471_v53 = vadd.f32 0.001143296, %v6470_v46  ;;  %v6497_v56 = vmul.f32 %v13389_v5, %v13389_v5  ;;  %9545 = vrcp.f32 %v13391_v31  ;;  %v6224_v23 = vadd.f32 0.05243302, %v6223_v16 }
 0x98d   : > { %v6278_v17 = vmul.f32 %v6277_v20, %v13326_v7  ;;  %v13411_v15 = vadd.f32 %v3941_v14, %v11792_v0  ;;  %v6820_v40 = vadd.f32 1.0, %v8652_v28  ;;  %v6168_v25 = vsel %vm13404_vm4, %v13342_v51, %v6164_v21 }
 0x98e   : > { %v6472_v29 = vmul.f32 %v6471_v53, %v13377_v6  ;;  %v6923_v39 = vpack.c.bf16 %v6883_v27, %v6875_v34  ;;  %v6172_v42 = vor.u32 1.1754944e-38, %v6171_v49  ;;  %v13417_v38 = vadd.f32 1.0, %v6238_v43  ;;  %v3970_v49 = vpop.f32.mrf.mxu3 }
 0x98f   : > { %v6460_v52 = vadd.f32 0.00028619796, %v6459_v45  ;;  %v13419_v11 = vmin.f32 %v6497_v56, 16.0  ;;  %vm6170_vm5 = vcmp.eq.f32.partialorder %v6169_v47, 8.507059e+37  ;;  %v6186_v60 = vadd.f32 0.18741608, %v6185_v62 }
 0x990   : > { %v6263_v3 = vmul.f32 %v6262_v30, %v13326_v7  ;;  %v6473_v0 = vadd.f32 0.014752088, %v6472_v29  ;;  %7529 = vmatmul.bf16.gmra.mxu2 %v6923_v39  ;;  %v6173_v54 = vsel %vm6170_vm5, %v6172_v42, %v6168_v25  ;;  %v6225_v35 = vmul.f32 %v6224_v23, %v13308_v41 }
 0x991   : > { %v13423_v48 = vadd.f32 1.0, %v6278_v17  ;;  %v13426_v51 = vmul.f32 0.70710677, %v13411_v15  ;;  %v6876_v19 = vmul.f32 %v6812_v63, %v13191_v10  ;;  %v4137_v55 = vmul.f32 0.5, %v13164_v33 }
 0x992   : > { %v6149_v37 = vmul.f32 %v6148_v61, %v13174_v26  ;;  %v6474_v44 = vmul.f32 %v6473_v0, %v13377_v6  ;;  %v13432_v34 = vpop.eup %9545  ;;  %v6884_v27 = vmul.f32 %v6820_v40, %v4132_v9  ;;  %9547 = vrcp.f32 %v13417_v38 }
 0x993   : > { %v6461_v13 = vmul.f32 %v6460_v52, %v13377_v6  ;;  %v6510_v22 = vmul.f32 3.8918573e-05, %v13419_v11  ;;  %v6187_v46 = vmul.f32 %v6186_v60, %v13253_v2  ;;  %v6264_v28 = vadd.f32 0.05243302, %v6263_v3 }
 0x994   : > { %v6174_v18 = vmul.f32 %v6173_v54, %v6149_v37  ;;  %v6475_v10 = vadd.f32 0.112945676, %v6474_v44  ;;  %v6226_v63 = vadd.f32 0.18741608, %v6225_v35  ;;  %9549 = vrcp.f32 %v13423_v48 }
 0x995   : > { %v6511_v33 = vadd.f32 0.001143296, %v6510_v22  ;;  %v6537_v26 = vmul.f32 %v13426_v51, %v13426_v51  ;;  %v13442_v9 = vmul.f32 0.5, %v13234_v8  ;;  %v6201_v16 = vmul.f32 %v13432_v34, %v13391_v31 }
 0x996   : > { %v13447_v20 = vmul.f32 0.5, %v13256_v36  ;;  %v6476_v2 = vmul.f32 %v6475_v10, %v13377_v6  ;;  %v13451_v61 = vmul.f32 0.5, %v13266_v4  ;;  %v13454_v21 = vmul.f32 0.5, %v13336_v12 }
 0x997   : > { %v6462_v14 = vadd.f32 0.0036580483, %v6461_v13  ;;  %v6512_v47 = vmul.f32 %v6511_v33, %v13419_v11  ;;  %v8657_v8 = vclamps-f32 %v6174_v18, 1.0  ;;  %v6265_v43 = vmul.f32 %v6264_v28, %v13326_v7 }
 0x998   : > { %v6477_v45 = vadd.f32 0.4994258, %v6476_v2  ;;  %v6924_v62 = vpack.c.bf16 %v6884_v27, %v6876_v19  ;;  %v13458_v30 = vpop.eup %9547  ;;  %v6188_v36 = vadd.f32 1.1283791, %v6187_v46  ;;  %v6227_v53 = vmul.f32 %v6226_v63, %v13308_v41 }
 0x999   : > { %v6513_v56 = vadd.f32 0.014752088, %v6512_v47  ;;  %v13461_v4 = vmin.f32 %v6537_v26, 16.0  ;;  %v6202_v1 = vsub.f32 1.0, %v6201_v16  ;;  %v6211_v12 = vand.u32 2147483648, %v13391_v31 }
 0x99a   : > { %v13465_v23 = vmul.f32 0.5, %v13374_v24  ;;  %v13468_v17 = vadd.f32 %v3970_v49, %v15976_v50  ;;  %7558 = vmatmul.bf16.gmra.mxu3 %v6924_v62  ;;  %v13470_v40 = vpop.eup %9549  ;;  %v6209_v25 = vand.u32 2147483647, %v13391_v31  ;;  %v6463_v29 = vmul.f32 %v6462_v14, %v13377_v6 }
 0x99b   : > { %v6499_v41 = vmul.f32 2.1237322e-06, %v13419_v11  ;;  %v6514_v39 = vmul.f32 %v6513_v56, %v13419_v11  ;;  %v6825_v42 = vadd.f32 1.0, %v8657_v8  ;;  %v6241_v52 = vmul.f32 %v13458_v30, %v13417_v38 }
 0x99c   : > { %v6266_v24 = vadd.f32 0.18741608, %v6265_v43  ;;  %v6478_v60 = vmul.f32 %v6477_v45, %v13377_v6  ;;  %v13480_v50 = vmul.f32 %v6188_v36, %v13241_v58  ;;  %v6228_v3 = vadd.f32 1.1283791, %v6227_v53  ;;  %v13520_v43 = vld [vmem:[%s9969_s0] sm:$0xff] }
 0x99d   : > { %v13483_v0 = vmul.f32 0.5, %v13411_v15  ;;  %v6550_v54 = vmul.f32 3.8918573e-05, %v13461_v4  ;;  %v6203_v35 = vmul.f32 %v13432_v34, %v6202_v1  ;;  %v6212_v19 = vor.u32 1.1754944e-38, %v6211_v12  ;;  %v3982_v1 = vpop.f32.mrf.mxu0 }
 0x99e   : > { %v6281_v37 = vmul.f32 %v13470_v40, %v13423_v48  ;;  %v13490_v44 = vmul.f32 0.70710677, %v13468_v17  ;;  %vm6205_vm6 = vweird.f32 %v13391_v31  ;;  %v6464_v27 = vadd.f32 0.05243302, %v6463_v29 }
 0x99f   : > { %v6500_v58 = vadd.f32 0.00028619796, %v6499_v41  ;;  %v6515_v13 = vadd.f32 0.112945676, %v6514_v39  ;;  %v13493_v22 = vmul.f32 %v6825_v42, %v4137_v55  ;;  %v6242_v15 = vsub.f32 1.0, %v6241_v52 }
 0x9a0   : > { %v6267_v18 = vmul.f32 %v6266_v24, %v13326_v7  ;;  %v13496_v46 = vadd.f32 1.0, %v6478_v60  ;;  %vm6206_vm7 = vweird.f32 %v13432_v34  ;;  %vm13499_vm8 = vcmp.eq.f32.partialorder %v6209_v25, 8.507059e+37 }
 0x9a1   : > { %v13504_v10 = vmul.f32 %v6228_v3, %v13276_v59  ;;  %v6249_v63 = vand.u32 2147483647, %v13417_v38  ;;  %v6551_v33 = vadd.f32 0.001143296, %v6550_v54  ;;  %v6204_v55 = vadd.f32 %v13432_v34, %v6203_v35  ;;  %vm13529_vm9 = vmor %vm6205_vm6, %vm6206_vm7 }
 0x9a2   : > { %v6251_v26 = vand.u32 2147483648, %v13417_v38  ;;  %v6282_v7 = vsub.f32 1.0, %v6281_v37  ;;  %v6577_v16 = vmul.f32 %v13490_v44, %v13490_v44  ;;  %v6465_v2 = vmul.f32 %v6464_v27, %v13377_v6 }
 0x9a3   : > { %v6501_v14 = vmul.f32 %v6500_v58, %v13419_v11  ;;  %v6516_v47 = vmul.f32 %v6515_v13, %v13419_v11  ;;  %v6552_v59 = vmul.f32 %v6551_v33, %v13461_v4  ;;  %v6243_v49 = vmul.f32 %v13458_v30, %v6242_v15 }
 0x9a4   : > { %9551 = vrcp.f32 %v13496_v46  ;;  %v13517_v8 = vmin.f32 %v6577_v16, 16.0  ;;  %v13523_v45 = vperm.slane %v13520_v43, 4  ;;  %vm6245_vm10 = vweird.f32 %v13417_v38  ;;  %v4011_v16 = vpop.f32.mrf.mxu1 }
 0x9a5   : > { %v6268_v36 = vadd.f32 1.1283791, %v6267_v18  ;;  %v6539_v53 = vmul.f32 2.1237322e-06, %v13461_v4  ;;  %v6553_v56 = vadd.f32 0.014752088, %v6552_v59  ;;  %v6208_v12 = vsel %vm13529_vm9, %v13432_v34, %v6204_v55 }
 0x9a6   : > { %vm13538_vm11 = vcmp.eq.f32.partialorder %v6249_v63, 8.507059e+37  ;;  %v6252_v31 = vor.u32 1.1754944e-38, %v6251_v26  ;;  %v6283_v29 = vmul.f32 %v13470_v40, %v6282_v7  ;;  %v6289_v41 = vand.u32 2147483647, %v13423_v48 }
 0x9a7   : > { %v6502_v39 = vadd.f32 0.0036580483, %v6501_v14  ;;  %v6517_v42 = vadd.f32 0.4994258, %v6516_v47  ;;  %v6554_v52 = vmul.f32 %v6553_v56, %v13461_v4  ;;  %v6590_v24 = vmul.f32 3.8918573e-05, %v13517_v8 }
 0x9a8   : > { %v6244_v60 = vadd.f32 %v13458_v30, %v6243_v49  ;;  %vm6246_vm12 = vweird.f32 %v13458_v30  ;;  %v6466_v34 = vadd.f32 0.18741608, %v6465_v2  ;;  %v13549_v3 = vadd.f32 %v3982_v1, %v13523_v45 }
 0x9a9   : > { %vm6285_vm13 = vweird.f32 %v13423_v48  ;;  %v6291_v54 = vand.u32 2147483648, %v13423_v48  ;;  %v6540_v35 = vadd.f32 0.00028619796, %v6539_v53  ;;  %v6555_v37 = vadd.f32 0.112945676, %v6554_v52  ;;  %vm13561_vm15 = vmor %vm6245_vm10, %vm6246_vm12 }
 0x9aa   : > { %v13553_v27 = vpop.eup %9551  ;;  %v6213_v58 = vsel %vm13499_vm8, %v6212_v19, %v6208_v12  ;;  %v6284_v13 = vadd.f32 %v13470_v40, %v6283_v29  ;;  %vm6286_vm14 = vweird.f32 %v13470_v40  ;;  %v6591_v15 = vadd.f32 0.001143296, %v6590_v24 }
 0x9ab   : > { %v6503_v63 = vmul.f32 %v6502_v39, %v13419_v11  ;;  %v6518_v33 = vmul.f32 %v6517_v42, %v13419_v11  ;;  %v6556_v55 = vmul.f32 %v6555_v37, %v13461_v4  ;;  %v13569_v28 = vperm.slane %v13520_v43, 5  ;;  %vm13582_vm0 = vmor %vm6285_vm13, %vm6286_vm14 }
 0x9ac   : > { %v6248_v19 = vsel %vm13561_vm15, %v13458_v30, %v6244_v60  ;;  %v6467_v26 = vmul.f32 %v6466_v34, %v13377_v6  ;;  %v6592_v38 = vmul.f32 %v6591_v15, %v13517_v8  ;;  %v13577_v7 = vmul.f32 0.70710677, %v13549_v3 }
 0x9ad   : > { %v6214_v2 = vmul.f32 %v6213_v58, %v13480_v50  ;;  %v6292_v47 = vor.u32 1.1754944e-38, %v6291_v54  ;;  %v6481_v30 = vmul.f32 %v13553_v27, %v13496_v46  ;;  %v6541_v6 = vmul.f32 %v6540_v35, %v13461_v4 }
 0x9ae   : > { %v6288_v59 = vsel %vm13582_vm0, %v13470_v40, %v6284_v13  ;;  %v6557_v49 = vadd.f32 0.4994258, %v6556_v55  ;;  %v6593_v62 = vadd.f32 0.014752088, %v6592_v38  ;;  %v4377_v50 = vmul.f32 %v13577_v7, %v13577_v7 }
 0x9af   : > { %v6253_v48 = vsel %vm13538_vm11, %v6252_v31, %v6248_v19  ;;  %v6504_v53 = vadd.f32 0.05243302, %v6503_v63  ;;  %v13596_v56 = vadd.f32 1.0, %v6518_v33  ;;  %v13599_v1 = vadd.f32 %v4011_v16, %v13569_v28  ;;  %v4040_v19 = vpop.f32.mrf.mxu2 }
 0x9b0   : > { %vm6290_vm1 = vcmp.eq.f32.partialorder %v6289_v41, 8.507059e+37  ;;  %v6468_v12 = vadd.f32 1.1283791, %v6467_v26  ;;  %v6594_v29 = vmul.f32 %v6593_v62, %v13517_v8  ;;  %v13602_v39 = vmin.f32 %v4377_v50, 16.0 }
 0x9b1   : > { %v8658_v40 = vclamps-f32 %v6214_v2, 1.0  ;;  %v6269_v42 = vmul.f32 %v6268_v36, %v13291_v32  ;;  %v6293_v52 = vsel %vm6290_vm1, %v6292_v47, %v6288_v59  ;;  %v6482_v24 = vsub.f32 1.0, %v6481_v30 }
 0x9b2   : > { %v6254_v25 = vmul.f32 %v6253_v48, %v13504_v10  ;;  %v6542_v31 = vadd.f32 0.0036580483, %v6541_v6  ;;  %v6558_v60 = vmul.f32 %v6557_v49, %v13461_v4  ;;  %v6595_v34 = vadd.f32 0.112945676, %v6594_v29 }
 0x9b3   : > { %v6505_v54 = vmul.f32 %v6504_v53, %v13419_v11  ;;  %9553 = vrcp.f32 %v13596_v56  ;;  %v4390_v41 = vmul.f32 3.8918573e-05, %v13602_v39  ;;  %v13611_v35 = vmul.f32 0.70710677, %v13599_v1 }
 0x9b4   : > { %v6294_v37 = vmul.f32 %v6293_v52, %v6269_v42  ;;  %v13614_v32 = vmul.f32 %v6468_v12, %v13351_v57  ;;  %v13617_v36 = vmul.f32 0.5, %v13468_v17  ;;  %v6579_v10 = vmul.f32 2.1237322e-06, %v13517_v8  ;;  %v4069_v42 = vpop.f32.mrf.mxu3 }
 0x9b5   : > { %v6826_v58 = vadd.f32 1.0, %v8658_v40  ;;  %v6483_v13 = vmul.f32 %v13553_v27, %v6482_v24  ;;  %v6596_v15 = vmul.f32 %v6595_v34, %v13517_v8  ;;  %v13623_v18 = vperm.slane %v13520_v43, 6 }
 0x9b6   : > { %v8659_v63 = vclamps-f32 %v6254_v25, 1.0  ;;  %v6543_v33 = vmul.f32 %v6542_v31, %v13461_v4  ;;  %v13626_v55 = vadd.f32 1.0, %v6558_v60  ;;  %v4391_v57 = vadd.f32 0.001143296, %v4390_v41 }
 0x9b7   : > { %v6489_v17 = vand.u32 2147483647, %v13496_v46  ;;  %v6491_v26 = vand.u32 2147483648, %v13496_v46  ;;  %v6506_v38 = vadd.f32 0.18741608, %v6505_v54  ;;  %v4417_v16 = vmul.f32 %v13611_v35, %v13611_v35 }
 0x9b8   : > { %v8660_v2 = vclamps-f32 %v6294_v37, 1.0  ;;  %vm6486_vm2 = vweird.f32 %v13553_v27  ;;  %v6580_v14 = vadd.f32 0.00028619796, %v6579_v10  ;;  %v4392_v47 = vmul.f32 %v4391_v57, %v13602_v39 }
 0x9b9   : > { %v13634_v30 = vpop.eup %9553  ;;  %v6484_v6 = vadd.f32 %v13553_v27, %v6483_v13  ;;  %v6597_v59 = vadd.f32 0.4994258, %v6596_v15  ;;  %v13637_v49 = vmin.f32 %v4417_v16, 16.0  ;;  %v13640_v62 = vadd.f32 %v4040_v19, %v13623_v18 }
 0x9ba   : > { %v6544_v50 = vadd.f32 0.05243302, %v6543_v33  ;;  %9555 = vrcp.f32 %v13626_v55  ;;  %v4393_v48 = vadd.f32 0.014752088, %v4392_v47  ;;  %v13644_v53 = vperm.slane %v13520_v43, 7 }
 0x9bb   : > { %v6827_v12 = vadd.f32 1.0, %v8659_v63  ;;  %vm6485_vm3 = vweird.f32 %v13496_v46  ;;  %v6507_v29 = vmul.f32 %v6506_v38, %v13419_v11  ;;  %v4379_v40 = vmul.f32 2.1237322e-06, %v13602_v39 }
 0x9bc   : > { %vm13651_vm4 = vmor %vm6485_vm3, %vm6486_vm2  ;;  %vm13655_vm5 = vcmp.eq.f32.partialorder %v6489_v17, 8.507059e+37  ;;  %v6521_v43 = vmul.f32 %v13634_v30, %v13596_v56  ;;  %v6581_v46 = vmul.f32 %v6580_v14, %v13517_v8  ;;  %v4394_v11 = vmul.f32 %v4393_v48, %v13602_v39 }
 0x9bd   : > { %v6488_v25 = vsel %vm13651_vm4, %v13553_v27, %v6484_v6  ;;  %v6598_v31 = vmul.f32 %v6597_v59, %v13517_v8  ;;  %v4430_v60 = vmul.f32 3.8918573e-05, %v13637_v49  ;;  %v13669_v34 = vmul.f32 0.70710677, %v13640_v62 }
 0x9be   : > { %v6828_v54 = vadd.f32 1.0, %v8660_v2  ;;  %v6492_v41 = vor.u32 1.1754944e-38, %v6491_v26  ;;  %v6545_v37 = vmul.f32 %v6544_v50, %v13461_v4  ;;  %v13673_v10 = vadd.f32 %v4069_v42, %v13644_v53 }
 0x9bf   : > { %v13676_v13 = vmul.f32 %v6826_v58, %v13442_v9  ;;  %v6508_v15 = vadd.f32 1.1283791, %v6507_v29  ;;  %v4380_v63 = vadd.f32 0.00028619796, %v4379_v40  ;;  %v4395_v27 = vadd.f32 0.112945676, %v4394_v11 }
 0x9c0   : > { %v13678_v33 = vpop.eup %9555  ;;  %v13681_v57 = vmul.f32 %v6827_v12, %v13447_v20  ;;  %v6493_v19 = vsel %vm13655_vm5, %v6492_v41, %v6488_v25  ;;  %v6522_v17 = vsub.f32 1.0, %v6521_v43  ;;  %v4431_v26 = vadd.f32 0.001143296, %v4430_v60 }
 0x9c1   : > { %v6582_v38 = vadd.f32 0.0036580483, %v6581_v46  ;;  %v13685_v16 = vadd.f32 1.0, %v6598_v31  ;;  %v4396_v2 = vmul.f32 %v4395_v27, %v13602_v39  ;;  %v4457_v9 = vmul.f32 %v13669_v34, %v13669_v34 }
 0x9c2   : > { %v13691_v58 = vmul.f32 %v6828_v54, %v13451_v61  ;;  %v6546_v14 = vadd.f32 0.18741608, %v6545_v37  ;;  %v4432_v20 = vmul.f32 %v4431_v26, %v13637_v49  ;;  %v13695_v47 = vmul.f32 0.70710677, %v13673_v10 }
 0x9c3   : > { %v6494_v6 = vmul.f32 %v6493_v19, %v13614_v32  ;;  %v13699_v59 = vmul.f32 %v6508_v15, %v13389_v5  ;;  %v6561_v50 = vmul.f32 %v13678_v33, %v13626_v55  ;;  %v4381_v48 = vmul.f32 %v4380_v63, %v13602_v39 }
 0x9c4   : > { %16019 = vst [vmem:[#allocation37_spill] sm:$0xff] %v13691_v58  ;;  %v6523_v12 = vmul.f32 %v13634_v30, %v6522_v17  ;;  %v4397_v61 = vadd.f32 0.4994258, %v4396_v2  ;;  %v4433_v29 = vadd.f32 0.014752088, %v4432_v20  ;;  %v13705_v40 = vmin.f32 %v4457_v9, 16.0 }
 0x9c5   : > { %v6529_v42 = vand.u32 2147483647, %v13596_v56  ;;  %v6531_v52 = vand.u32 2147483648, %v13596_v56  ;;  %v6583_v32 = vmul.f32 %v6582_v38, %v13517_v8  ;;  %9557 = vrcp.f32 %v13685_v16 }
 0x9c6   : > { %v6547_v5 = vmul.f32 %v6546_v14, %v13461_v4  ;;  %v4419_v24 = vmul.f32 2.1237322e-06, %v13637_v49  ;;  %v4434_v43 = vmul.f32 %v4433_v29, %v13637_v49  ;;  %v4497_v46 = vmul.f32 %v13695_v47, %v13695_v47 }
 0x9c7   : > { %v8665_v11 = vclamps-f32 %v6494_v6, 1.0  ;;  %vm6525_vm6 = vweird.f32 %v13596_v56  ;;  %v6562_v25 = vsub.f32 1.0, %v6561_v50  ;;  %v4382_v31 = vadd.f32 0.0036580483, %v4381_v48 }
 0x9c8   : > { %v6524_v60 = vadd.f32 %v13634_v30, %v6523_v12  ;;  %vm6526_vm7 = vweird.f32 %v13634_v30  ;;  %v4398_v54 = vmul.f32 %v4397_v61, %v13602_v39  ;;  %v4470_v4 = vmul.f32 3.8918573e-05, %v13705_v40 }
 0x9c9   : > { %vm13721_vm8 = vcmp.eq.f32.partialorder %v6529_v42, 8.507059e+37  ;;  %v6532_v37 = vor.u32 1.1754944e-38, %v6531_v52  ;;  %v6584_v15 = vadd.f32 0.05243302, %v6583_v32  ;;  %v4435_v63 = vadd.f32 0.112945676, %v4434_v43  ;;  %vm13734_vm9 = vmor %vm6525_vm6, %vm6526_vm7 }
 0x9ca   : > { %v6548_v27 = vadd.f32 1.1283791, %v6547_v5  ;;  %v13726_v19 = vmul.f32 0.5, %v13549_v3  ;;  %v4420_v17 = vadd.f32 0.00028619796, %v4419_v24  ;;  %v13728_v26 = vmin.f32 %v4497_v46, 16.0 }
 0x9cb   : > { %v13730_v38 = vpop.eup %9557  ;;  %v6833_v2 = vadd.f32 1.0, %v8665_v11  ;;  %v6563_v14 = vmul.f32 %v13678_v33, %v6562_v25  ;;  %v4383_v20 = vmul.f32 %v4382_v31, %v13602_v39  ;;  %v13741_v6 = vmul.f32 0.5, %v13599_v1 }
 0x9cc   : > { %v6528_v3 = vsel %vm13734_vm9, %v13634_v30, %v6524_v60  ;;  %v13746_v50 = vadd.f32 1.0, %v4398_v54  ;;  %v4459_v48 = vmul.f32 2.1237322e-06, %v13705_v40  ;;  %v4471_v56 = vadd.f32 0.001143296, %v4470_v4  ;;  %v3984_v4 = vpop.f32.mrf.mxu0 }
 0x9cd   : > { %v6569_v12 = vand.u32 2147483647, %v13626_v55  ;;  %v6571_v61 = vand.u32 2147483648, %v13626_v55  ;;  %v6585_v29 = vmul.f32 %v6584_v15, %v13517_v8  ;;  %v4436_v42 = vmul.f32 %v4435_v63, %v13637_v49 }
 0x9ce   : > { %v6601_v1 = vmul.f32 %v13730_v38, %v13685_v16  ;;  %v4421_v52 = vmul.f32 %v4420_v17, %v13637_v49  ;;  %v4472_v30 = vmul.f32 %v4471_v56, %v13705_v40  ;;  %v4510_v32 = vmul.f32 3.8918573e-05, %v13728_v26 }
 0x9cf   : > { %v6533_v5 = vsel %vm13721_vm8, %v6532_v37, %v6528_v3  ;;  %v6564_v24 = vadd.f32 %v13678_v33, %v6563_v14  ;;  %vm6566_vm10 = vweird.f32 %v13678_v33  ;;  %v4384_v43 = vadd.f32 0.05243302, %v4383_v20 }
 0x9d0   : > { %9559 = vrcp.f32 %v13746_v50  ;;  %v4460_v46 = vadd.f32 0.00028619796, %v4459_v48  ;;  %v4473_v11 = vadd.f32 0.014752088, %v4472_v30  ;;  %v4511_v25 = vadd.f32 0.001143296, %v4510_v32 }
 0x9d1   : > { %v6549_v31 = vmul.f32 %v6548_v27, %v13426_v51  ;;  %vm6565_vm11 = vweird.f32 %v13626_v55  ;;  %v6586_v60 = vadd.f32 0.18741608, %v6585_v29  ;;  %v4437_v54 = vadd.f32 0.4994258, %v4436_v42 }
 0x9d2   : > { %v13766_v41 = vmul.f32 %v6833_v2, %v13454_v21  ;;  %vm13768_vm12 = vmor %vm6565_vm11, %vm6566_vm10  ;;  %v6602_v15 = vsub.f32 1.0, %v6601_v1  ;;  %v4422_v63 = vadd.f32 0.0036580483, %v4421_v52  ;;  %v4474_v17 = vmul.f32 %v4473_v11, %v13705_v40 }
 0x9d3   : > { %v6534_v9 = vmul.f32 %v6533_v5, %v13699_v59  ;;  %v6568_v51 = vsel %vm13768_vm12, %v13678_v33, %v6564_v24  ;;  %v4385_v55 = vmul.f32 %v4384_v43, %v13602_v39  ;;  %v4512_v27 = vmul.f32 %v4511_v25, %v13728_v26 }
 0x9d4   : > { %vm6570_vm13 = vcmp.eq.f32.partialorder %v6569_v12, 8.507059e+37  ;;  %v6572_v21 = vor.u32 1.1754944e-38, %v6571_v61  ;;  %v4461_v2 = vmul.f32 %v4460_v46, %v13705_v40  ;;  %v13781_v14 = vadd.f32 %v3984_v4, %v13523_v45 }
 0x9d5   : > { %v6587_v20 = vmul.f32 %v6586_v60, %v13517_v8  ;;  %v4438_v3 = vmul.f32 %v4437_v54, %v13637_v49  ;;  %v13786_v59 = vmul.f32 0.5, %v13640_v62  ;;  %v4475_v48 = vadd.f32 0.112945676, %v4474_v17 }
 0x9d6   : > { %v13788_v33 = vpop.eup %9559  ;;  %v6573_v56 = vsel %vm6570_vm13, %v6572_v21, %v6568_v51  ;;  %v6603_v29 = vmul.f32 %v13730_v38, %v6602_v15  ;;  %v4423_v12 = vmul.f32 %v4422_v63, %v13637_v49  ;;  %v4513_v61 = vadd.f32 0.014752088, %v4512_v27  ;;  %v4013_v51 = vpop.f32.mrf.mxu1 }
 0x9d7   : > { %v8666_v42 = vclamps-f32 %v6534_v9, 1.0  ;;  %v6611_v1 = vand.u32 2147483648, %v13685_v16  ;;  %v4386_v52 = vadd.f32 0.18741608, %v4385_v55  ;;  %v4476_v8 = vmul.f32 %v4475_v48, %v13705_v40  ;;  %v4042_v48 = vpop.f32.mrf.mxu2 }
 0x9d8   : > { %v4462_v30 = vadd.f32 0.0036580483, %v4461_v2  ;;  %v4499_v32 = vmul.f32 2.1237322e-06, %v13728_v26  ;;  %v4514_v62 = vmul.f32 %v4513_v61, %v13728_v26  ;;  %v13797_v5 = vmul.f32 0.70710677, %v13781_v14 }
 0x9d9   : > { %v6574_v24 = vmul.f32 %v6573_v56, %v6549_v31  ;;  %vm6606_vm14 = vweird.f32 %v13730_v38  ;;  %v4401_v43 = vmul.f32 %v13788_v33, %v13746_v50  ;;  %v13802_v46 = vadd.f32 1.0, %v4438_v3 }
 0x9da   : > { %v6604_v11 = vadd.f32 %v13730_v38, %v6603_v29  ;;  %v4424_v25 = vadd.f32 0.05243302, %v4423_v12  ;;  %v4477_v60 = vadd.f32 0.4994258, %v4476_v8  ;;  %v4697_v54 = vmul.f32 %v13797_v5, %v13797_v5 }
 0x9db   : > { %v6588_v4 = vadd.f32 1.1283791, %v6587_v20  ;;  %vm6605_vm15 = vweird.f32 %v13685_v16  ;;  %v4387_v37 = vmul.f32 %v4386_v52, %v13602_v39  ;;  %v4515_v31 = vadd.f32 0.112945676, %v4514_v62 }
 0x9dc   : > { %v6609_v15 = vand.u32 2147483647, %v13685_v16  ;;  %v4463_v63 = vmul.f32 %v4462_v30, %v13705_v40  ;;  %v4500_v17 = vadd.f32 0.00028619796, %v4499_v32  ;;  %v13811_v9 = vmin.f32 %v4697_v54, 16.0  ;;  %vm13815_vm0 = vmor %vm6605_vm15, %vm6606_vm14 }
 0x9dd   : > { %v6834_v55 = vadd.f32 1.0, %v8666_v42  ;;  %v6612_v21 = vor.u32 1.1754944e-38, %v6611_v1  ;;  %v4402_v2 = vsub.f32 1.0, %v4401_v43  ;;  %9561 = vrcp.f32 %v13802_v46 }
 0x9de   : > { %v8667_v39 = vclamps-f32 %v6574_v24, 1.0  ;;  %v6608_v16 = vsel %vm13815_vm0, %v13730_v38, %v6604_v11  ;;  %v4425_v20 = vmul.f32 %v4424_v25, %v13637_v49  ;;  %v4478_v3 = vmul.f32 %v4477_v60, %v13705_v40 }
 0x9df   : > { %v4388_v56 = vadd.f32 1.1283791, %v4387_v37  ;;  %v4516_v29 = vmul.f32 %v4515_v31, %v13728_v26  ;;  %v4710_v12 = vmul.f32 3.8918573e-05, %v13811_v9  ;;  %v13828_v61 = vadd.f32 %v4013_v51, %v13569_v28 }
 0x9e0   : > { %v6589_v42 = vmul.f32 %v6588_v4, %v13490_v44  ;;  %vm6610_vm1 = vcmp.eq.f32.partialorder %v6609_v15, 8.507059e+37  ;;  %v4464_v1 = vadd.f32 0.05243302, %v4463_v63  ;;  %v4501_v52 = vmul.f32 %v4500_v17, %v13728_v26 }
 0x9e1   : > { %v13833_v38 = vmul.f32 %v6834_v55, %v13465_v23  ;;  %v6613_v8 = vsel %vm6610_vm1, %v6612_v21, %v6608_v16  ;;  %v4403_v30 = vmul.f32 %v13788_v33, %v4402_v2  ;;  %v13837_v32 = vadd.f32 %v4042_v48, %v13623_v18 }
 0x9e2   : > { %v4426_v62 = vadd.f32 0.18741608, %v4425_v20  ;;  %v13839_v24 = vadd.f32 1.0, %v4478_v3  ;;  %v13842_v43 = vmul.f32 0.5, %v13673_v10  ;;  %v4711_v44 = vadd.f32 0.001143296, %v4710_v12 }
 0x9e3   : > { %v13844_v11 = vpop.eup %9561  ;;  %v6835_v25 = vadd.f32 1.0, %v8667_v39  ;;  %v4389_v60 = vmul.f32 %v4388_v56, %v13577_v7  ;;  %v4517_v23 = vadd.f32 0.4994258, %v4516_v29  ;;  %v13848_v54 = vmul.f32 0.70710677, %v13828_v61 }
 0x9e4   : > { %v6614_v4 = vmul.f32 %v6613_v8, %v6589_v42  ;;  %v4465_v37 = vmul.f32 %v4464_v1, %v13705_v40  ;;  %v4502_v31 = vadd.f32 0.0036580483, %v4501_v52  ;;  %v4712_v15 = vmul.f32 %v4711_v44, %v13811_v9 }
 0x9e5   : > { %v4404_v63 = vadd.f32 %v13788_v33, %v4403_v30  ;;  %vm4406_vm2 = vweird.f32 %v13788_v33  ;;  %v4411_v10 = vand.u32 2147483648, %v13746_v50  ;;  %v13856_v17 = vmul.f32 0.70710677, %v13837_v32 }
 0x9e6   : > { %v4427_v7 = vmul.f32 %v4426_v62, %v13637_v49  ;;  %v4441_v51 = vmul.f32 %v13844_v11, %v13802_v46  ;;  %9563 = vrcp.f32 %v13839_v24  ;;  %v4737_v55 = vmul.f32 %v13848_v54, %v13848_v54 }
 0x9e7   : > { %vm4405_vm3 = vweird.f32 %v13746_v50  ;;  %v4409_v27 = vand.u32 2147483647, %v13746_v50  ;;  %v4518_v21 = vmul.f32 %v4517_v23, %v13728_v26  ;;  %v4713_v2 = vadd.f32 0.014752088, %v4712_v15 }
 0x9e8   : > { %v8668_v39 = vclamps-f32 %v6614_v4, 1.0  ;;  %vm13867_vm4 = vmor %vm4405_vm3, %vm4406_vm2  ;;  %v4466_v49 = vadd.f32 0.18741608, %v4465_v37  ;;  %v4503_v20 = vmul.f32 %v4502_v31, %v13728_v26  ;;  %v13872_v3 = vmin.f32 %v4737_v55, 16.0 }
 0x9e9   : > { %v4408_v48 = vsel %vm13867_vm4, %v13788_v33, %v4404_v63  ;;  %v4699_v56 = vmul.f32 2.1237322e-06, %v13811_v9  ;;  %v4714_v50 = vmul.f32 %v4713_v2, %v13811_v9  ;;  %v4777_v29 = vmul.f32 %v13856_v17, %v13856_v17 }
 0x9ea   : > { %v4412_v12 = vor.u32 1.1754944e-38, %v4411_v10  ;;  %v4428_v42 = vadd.f32 1.1283791, %v4427_v7  ;;  %v4442_v1 = vsub.f32 1.0, %v4441_v51  ;;  %v4750_v52 = vmul.f32 3.8918573e-05, %v13872_v3 }
 0x9eb   : > { %vm4410_vm5 = vcmp.eq.f32.partialorder %v4409_v27, 8.507059e+37  ;;  %v13882_v8 = vadd.f32 1.0, %v4518_v21  ;;  %v4715_v30 = vadd.f32 0.112945676, %v4714_v50  ;;  %v13884_v62 = vmin.f32 %v4777_v29, 16.0 }
 0x9ec   : > { %v13886_v44 = vpop.eup %9563  ;;  %v13889_v33 = vmul.f32 %v6835_v25, %v13483_v0  ;;  %v6836_v23 = vadd.f32 1.0, %v8668_v39  ;;  %v4413_v4 = vsel %vm4410_vm5, %v4412_v12, %v4408_v48  ;;  %v4467_v37 = vmul.f32 %v4466_v49, %v13705_v40 }
 0x9ed   : > { %v4504_v31 = vadd.f32 0.05243302, %v4503_v20  ;;  %v4700_v15 = vadd.f32 0.00028619796, %v4699_v56  ;;  %v4716_v63 = vmul.f32 %v4715_v30, %v13811_v9  ;;  %v4751_v10 = vadd.f32 0.001143296, %v4750_v52 }
 0x9ee   : > { %16030 = vst [vmem:[#allocation30_spill] sm:$0xff] %v13889_v33  ;;  %v13894_v7 = vmul.f32 %v4428_v42, %v13611_v35  ;;  %v4443_v51 = vmul.f32 %v13844_v11, %v4442_v1  ;;  %v4449_v55 = vand.u32 2147483647, %v13802_v46  ;;  %v4790_v27 = vmul.f32 3.8918573e-05, %v13884_v62  ;;  %v4071_v42 = vpop.f32.mrf.mxu3 }
 0x9ef   : > { %v4481_v0 = vmul.f32 %v13886_v44, %v13839_v24  ;;  %9565 = vrcp.f32 %v13882_v8  ;;  %v4717_v40 = vadd.f32 0.4994258, %v4716_v63  ;;  %v4752_v25 = vmul.f32 %v4751_v10, %v13872_v3 }
 0x9f0   : > { %v13904_v21 = vmul.f32 %v6836_v23, %v13617_v36  ;;  %v4414_v2 = vmul.f32 %v4413_v4, %v4389_v60  ;;  %vm4445_vm6 = vweird.f32 %v13802_v46  ;;  %v4451_v35 = vand.u32 2147483648, %v13802_v46 }
 0x9f1   : > { %v4468_v39 = vadd.f32 1.1283791, %v4467_v37  ;;  %v4505_v16 = vmul.f32 %v4504_v31, %v13728_v26  ;;  %v4701_v49 = vmul.f32 %v4700_v15, %v13811_v9  ;;  %v4753_v20 = vadd.f32 0.014752088, %v4752_v25  ;;  %v3987_v25 = vpop.f32.mrf.mxu0 }
 0x9f2   : > { %16031 = vst [vmem:[#allocation21_spill] sm:$0xff] %v13904_v21  ;;  %v4444_v48 = vadd.f32 %v13844_v11, %v4443_v51  ;;  %vm4446_vm7 = vweird.f32 %v13844_v11  ;;  %v4739_v56 = vmul.f32 2.1237322e-06, %v13872_v3  ;;  %v4791_v50 = vadd.f32 0.001143296, %v4790_v27 }
 0x9f3   : > { %vm13913_vm8 = vcmp.eq.f32.partialorder %v4449_v55, 8.507059e+37  ;;  %v4482_v60 = vsub.f32 1.0, %v4481_v0  ;;  %v4718_v29 = vmul.f32 %v4717_v40, %v13811_v9  ;;  %v4754_v12 = vmul.f32 %v4753_v20, %v13872_v3  ;;  %vm13927_vm9 = vmor %vm4445_vm6, %vm4446_vm7 }
 0x9f4   : > { %v8613_v1 = vclamps-f32 %v4414_v2, 1.0  ;;  %v4452_v52 = vor.u32 1.1754944e-38, %v4451_v35  ;;  %v13920_v30 = vmul.f32 0.5, %v13781_v14  ;;  %v4792_v23 = vmul.f32 %v4791_v50, %v13884_v62 }
 0x9f5   : > { %v13923_v4 = vpop.eup %9565  ;;  %v13932_v31 = vmul.f32 %v4468_v39, %v13669_v34  ;;  %v4506_v15 = vadd.f32 0.18741608, %v4505_v16  ;;  %v4702_v63 = vadd.f32 0.0036580483, %v4701_v49  ;;  %v13935_v10 = vmul.f32 0.5, %v13828_v61 }
 0x9f6   : > { %v4448_v14 = vsel %vm13927_vm9, %v13844_v11, %v4444_v48  ;;  %v4740_v51 = vadd.f32 0.00028619796, %v4739_v56  ;;  %v13941_v55 = vmul.f32 0.5, %v13837_v32  ;;  %v13944_v46 = vadd.f32 %v4071_v42, %v13644_v53 }
 0x9f7   : > { %v4483_v27 = vmul.f32 %v13886_v44, %v4482_v60  ;;  %v13947_v34 = vadd.f32 1.0, %v4718_v29  ;;  %v4755_v0 = vadd.f32 0.112945676, %v4754_v12  ;;  %v4793_v40 = vadd.f32 0.014752088, %v4792_v23 }
 0x9f8   : > { %v6781_v61 = vadd.f32 1.0, %v8613_v1  ;;  %v4489_v2 = vand.u32 2147483647, %v13839_v24  ;;  %v4491_v35 = vand.u32 2147483648, %v13839_v24  ;;  %v4521_v11 = vmul.f32 %v13923_v4, %v13882_v8 }
 0x9f9   : > { %v4453_v32 = vsel %vm13913_vm8, %v4452_v52, %v4448_v14  ;;  %v4703_v39 = vmul.f32 %v4702_v63, %v13811_v9  ;;  %v4756_v16 = vmul.f32 %v4755_v0, %v13872_v3  ;;  %v4794_v49 = vmul.f32 %v4793_v40, %v13884_v62  ;;  %v4016_v0 = vpop.f32.mrf.mxu1 }
 0x9fa   : > { %vm4486_vm10 = vweird.f32 %v13886_v44  ;;  %v4741_v20 = vmul.f32 %v4740_v51, %v13872_v3  ;;  %v13961_v48 = vmul.f32 0.70710677, %v13944_v46  ;;  %v13964_v56 = vadd.f32 %v3987_v25, %v13523_v45 }
 0x9fb   : > { %v4484_v50 = vadd.f32 %v13886_v44, %v4483_v27  ;;  %9567 = vrcp.f32 %v13947_v34  ;;  %v4757_v36 = vadd.f32 0.4994258, %v4756_v16  ;;  %v4795_v60 = vadd.f32 0.112945676, %v4794_v49 }
 0x9fc   : > { %vm4485_vm11 = vweird.f32 %v13839_v24  ;;  %vm13969_vm12 = vcmp.eq.f32.partialorder %v4489_v2, 8.507059e+37  ;;  %v4507_v12 = vmul.f32 %v4506_v15, %v13728_v26  ;;  %v4522_v42 = vsub.f32 1.0, %v4521_v11 }
 0x9fd   : > { %v4454_v1 = vmul.f32 %v4453_v32, %v13894_v7  ;;  %v4704_v52 = vadd.f32 0.05243302, %v4703_v39  ;;  %v4758_v23 = vmul.f32 %v4757_v36, %v13872_v3  ;;  %v4817_v37 = vmul.f32 %v13961_v48, %v13961_v48  ;;  %vm13983_vm13 = vmor %vm4485_vm11, %vm4486_vm10 }
 0x9fe   : > { %v13979_v63 = vmul.f32 %v6781_v61, %v13726_v19  ;;  %v4742_v14 = vadd.f32 0.0036580483, %v4741_v20  ;;  %v4779_v26 = vmul.f32 2.1237322e-06, %v13884_v62  ;;  %v13989_v7 = vmul.f32 0.70710677, %v13964_v56 }
 0x9ff   : > { %v4488_v15 = vsel %vm13983_vm13, %v13886_v44, %v4484_v50  ;;  %v4492_v51 = vor.u32 1.1754944e-38, %v4491_v35  ;;  %v4796_v19 = vmul.f32 %v4795_v60, %v13884_v62  ;;  %v13995_v27 = vmin.f32 %v4817_v37, 16.0 }
 0xa00   : > { %v4508_v40 = vadd.f32 1.1283791, %v4507_v12  ;;  %v4523_v25 = vmul.f32 %v13923_v4, %v4522_v42  ;;  %v13998_v61 = vadd.f32 1.0, %v4758_v23  ;;  %v5017_v2 = vmul.f32 %v13989_v7, %v13989_v7 }
 0xa01   : > { %v14002_v11 = vpop.eup %9567  ;;  %v8614_v32 = vclamps-f32 %v4454_v1, 1.0  ;;  %vm4525_vm14 = vweird.f32 %v13882_v8  ;;  %v4529_v44 = vand.u32 2147483647, %v13882_v8  ;;  %v4705_v35 = vmul.f32 %v4704_v52, %v13811_v9 }
 0xa02   : > { %v4493_v39 = vsel %vm13969_vm12, %v4492_v51, %v4488_v15  ;;  %v4743_v16 = vmul.f32 %v4742_v14, %v13872_v3  ;;  %v4780_v49 = vadd.f32 0.00028619796, %v4779_v26  ;;  %v14011_v20 = vadd.f32 %v4016_v0, %v13569_v28 }
 0xa03   : > { %v4531_v50 = vand.u32 2147483648, %v13882_v8  ;;  %v4797_v36 = vadd.f32 0.4994258, %v4796_v19  ;;  %v4830_v60 = vmul.f32 3.8918573e-05, %v13995_v27  ;;  %v14015_v12 = vmin.f32 %v5017_v2, 16.0 }
 0xa04   : > { %v4524_v42 = vadd.f32 %v13923_v4, %v4523_v25  ;;  %vm4526_vm15 = vweird.f32 %v13923_v4  ;;  %v4721_v29 = vmul.f32 %v14002_v11, %v13947_v34  ;;  %9569 = vrcp.f32 %v13998_v61 }
 0xa05   : > { %v6782_v1 = vadd.f32 1.0, %v8614_v32  ;;  %v4494_v52 = vmul.f32 %v4493_v39, %v13932_v31  ;;  %v4706_v23 = vadd.f32 0.18741608, %v4705_v35  ;;  %v4831_v37 = vadd.f32 0.001143296, %v4830_v60  ;;  %vm14031_vm0 = vmor %vm4525_vm14, %vm4526_vm15 }
 0xa06   : > { %v4744_v24 = vadd.f32 0.05243302, %v4743_v16  ;;  %v4781_v14 = vmul.f32 %v4780_v49, %v13884_v62  ;;  %v5030_v26 = vmul.f32 3.8918573e-05, %v14015_v12  ;;  %v14026_v15 = vmul.f32 0.70710677, %v14011_v20 }
 0xa07   : > { %v4509_v51 = vmul.f32 %v4508_v40, %v13695_v47  ;;  %v4798_v31 = vmul.f32 %v4797_v36, %v13884_v62  ;;  %v4819_v0 = vmul.f32 2.1237322e-06, %v13995_v27  ;;  %v4832_v25 = vmul.f32 %v4831_v37, %v13995_v27 }
 0xa08   : > { %v4528_v2 = vsel %vm14031_vm0, %v13923_v4, %v4524_v42  ;;  %vm4530_vm1 = vcmp.eq.f32.partialorder %v4529_v44, 8.507059e+37  ;;  %v4532_v32 = vor.u32 1.1754944e-38, %v4531_v50  ;;  %v4722_v35 = vsub.f32 1.0, %v4721_v29 }
 0xa09   : > { %v14042_v47 = vmul.f32 %v6782_v1, %v13741_v6  ;;  %v8615_v8 = vclamps-f32 %v4494_v52, 1.0  ;;  %v4707_v40 = vmul.f32 %v4706_v23, %v13811_v9  ;;  %v4833_v39 = vadd.f32 0.014752088, %v4832_v25 }
 0xa0a   : > { %v14045_v16 = vpop.eup %9569  ;;  %v4745_v49 = vmul.f32 %v4744_v24, %v13872_v3  ;;  %v4782_v36 = vadd.f32 0.0036580483, %v4781_v14  ;;  %v5031_v60 = vadd.f32 0.001143296, %v5030_v26  ;;  %v5057_v37 = vmul.f32 %v14026_v15, %v14026_v15 }
 0xa0b   : > { %v4533_v4 = vsel %vm4530_vm1, %v4532_v32, %v4528_v2  ;;  %v14050_v44 = vadd.f32 1.0, %v4798_v31  ;;  %v4820_v50 = vadd.f32 0.00028619796, %v4819_v0  ;;  %v4834_v6 = vmul.f32 %v4833_v39, %v13995_v27 }
 0xa0c   : > { %v4723_v42 = vmul.f32 %v14002_v11, %v4722_v35  ;;  %v5019_v9 = vmul.f32 2.1237322e-06, %v14015_v12  ;;  %v5032_v29 = vmul.f32 %v5031_v60, %v14015_v12  ;;  %v14056_v1 = vmin.f32 %v5057_v37, 16.0 }
 0xa0d   : > { %v6783_v52 = vadd.f32 1.0, %v8615_v8  ;;  %v4708_v23 = vadd.f32 1.1283791, %v4707_v40  ;;  %v4761_v24 = vmul.f32 %v14045_v16, %v13998_v61  ;;  %v4835_v14 = vadd.f32 0.112945676, %v4834_v6 }
 0xa0e   : > { %v4534_v26 = vmul.f32 %v4533_v4, %v4509_v51  ;;  %v4746_v19 = vadd.f32 0.18741608, %v4745_v49  ;;  %v4783_v31 = vmul.f32 %v4782_v36, %v13884_v62  ;;  %v5033_v0 = vadd.f32 0.014752088, %v5032_v29 }
 0xa0f   : > { %vm4726_vm2 = vweird.f32 %v14002_v11  ;;  %9571 = vrcp.f32 %v14050_v44  ;;  %v4821_v25 = vmul.f32 %v4820_v50, %v13995_v27  ;;  %v4836_v2 = vmul.f32 %v4835_v14, %v13995_v27 }
 0xa10   : > { %v4724_v32 = vadd.f32 %v14002_v11, %v4723_v42  ;;  %v5020_v35 = vadd.f32 0.00028619796, %v5019_v9  ;;  %v5034_v8 = vmul.f32 %v5033_v0, %v14015_v12  ;;  %v5070_v40 = vmul.f32 3.8918573e-05, %v14056_v1  ;;  %v4045_v0 = vpop.f32.mrf.mxu2 }
 0xa11   : > { %v4709_v51 = vmul.f32 %v4708_v23, %v13797_v5  ;;  %v4731_v39 = vand.u32 2147483648, %v13947_v34  ;;  %v4762_v49 = vsub.f32 1.0, %v4761_v24  ;;  %v4837_v36 = vadd.f32 0.4994258, %v4836_v2 }
 0xa12   : > { %vm4725_vm3 = vweird.f32 %v13947_v34  ;;  %v4729_v60 = vand.u32 2147483647, %v13947_v34  ;;  %v4784_v37 = vadd.f32 0.05243302, %v4783_v31  ;;  %v5035_v4 = vadd.f32 0.112945676, %v5034_v8 }
 0xa13   : > { %v8616_v50 = vclamps-f32 %v4534_v26, 1.0  ;;  %vm14074_vm4 = vmor %vm4725_vm3, %vm4726_vm2  ;;  %v4747_v42 = vmul.f32 %v4746_v19, %v13872_v3  ;;  %v4822_v5 = vadd.f32 0.0036580483, %v4821_v25  ;;  %v5071_v9 = vadd.f32 0.001143296, %v5070_v40 }
 0xa14   : > { %v14080_v29 = vmul.f32 %v6783_v52, %v13786_v59  ;;  %v4728_v34 = vsel %vm14074_vm4, %v14002_v11, %v4724_v32  ;;  %v5021_v23 = vmul.f32 %v5020_v35, %v14015_v12  ;;  %v5036_v24 = vmul.f32 %v5035_v4, %v14015_v12 }
 0xa15   : > { %v14087_v14 = vpop.eup %9571  ;;  %v4732_v26 = vor.u32 1.1754944e-38, %v4731_v39  ;;  %v4763_v31 = vmul.f32 %v14045_v16, %v4762_v49  ;;  %v4838_v3 = vmul.f32 %v4837_v36, %v13995_v27  ;;  %v5072_v19 = vmul.f32 %v5071_v9, %v14056_v1 }
 0xa16   : > { %16044 = vst [vmem:[#allocation40_spill] sm:$0xff] %v14080_v29  ;;  %vm4730_vm5 = vcmp.eq.f32.partialorder %v4729_v60, 8.507059e+37  ;;  %v4785_v59 = vmul.f32 %v4784_v37, %v13884_v62  ;;  %v14094_v52 = vmul.f32 0.5, %v13944_v46  ;;  %v5037_v11 = vadd.f32 0.4994258, %v5036_v24 }
 0xa17   : > { %v6784_v25 = vadd.f32 1.0, %v8616_v50  ;;  %v4733_v2 = vsel %vm4730_vm5, %v4732_v26, %v4728_v34  ;;  %v4748_v32 = vadd.f32 1.1283791, %v4747_v42  ;;  %v4823_v35 = vmul.f32 %v4822_v5, %v13995_v27  ;;  %v4074_v42 = vpop.f32.mrf.mxu3 }
 0xa18   : > { %vm4766_vm6 = vweird.f32 %v14045_v16  ;;  %v4801_v8 = vmul.f32 %v14087_v14, %v14050_v44  ;;  %v5022_v40 = vadd.f32 0.0036580483, %v5021_v23  ;;  %v14101_v39 = vadd.f32 %v4045_v0, %v13623_v18 }
 0xa19   : > { %v4764_v49 = vadd.f32 %v14045_v16, %v4763_v31  ;;  %v14104_v36 = vadd.f32 1.0, %v4838_v3  ;;  %v5038_v46 = vmul.f32 %v5037_v11, %v14015_v12  ;;  %v5073_v60 = vadd.f32 0.014752088, %v5072_v19  ;;  %v3989_v19 = vpop.f32.mrf.mxu0 }
 0xa1a   : > { %v4734_v37 = vmul.f32 %v4733_v2, %v4709_v51  ;;  %v4769_v4 = vand.u32 2147483647, %v13998_v61  ;;  %v4771_v50 = vand.u32 2147483648, %v13998_v61  ;;  %v4786_v6 = vadd.f32 0.18741608, %v4785_v59 }
 0xa1b   : > { %v4749_v5 = vmul.f32 %v4748_v32, %v13848_v54  ;;  %vm4765_vm7 = vweird.f32 %v13998_v61  ;;  %v4824_v9 = vadd.f32 0.05243302, %v4823_v35  ;;  %v5074_v34 = vmul.f32 %v5073_v60, %v14056_v1 }
 0xa1c   : > { %vm14114_vm8 = vmor %vm4765_vm7, %vm4766_vm6  ;;  %v4802_v51 = vsub.f32 1.0, %v4801_v8  ;;  %v14119_v24 = vmul.f32 0.5, %v13964_v56  ;;  %v5023_v26 = vmul.f32 %v5022_v40, %v14015_v12  ;;  %v14123_v31 = vmul.f32 0.70710677, %v14101_v39 }
 0xa1d   : > { %v4768_v54 = vsel %vm14114_vm8, %v14045_v16, %v4764_v49  ;;  %9573 = vrcp.f32 %v14104_v36  ;;  %v14129_v61 = vadd.f32 1.0, %v5038_v46  ;;  %v14132_v3 = vadd.f32 %v4074_v42, %v13644_v53 }
 0xa1e   : > { %v8621_v0 = vclamps-f32 %v4734_v37, 1.0  ;;  %vm4770_vm9 = vcmp.eq.f32.partialorder %v4769_v4, 8.507059e+37  ;;  %v4772_v56 = vor.u32 1.1754944e-38, %v4771_v50  ;;  %v4787_v59 = vmul.f32 %v4786_v6, %v13884_v62 }
 0xa1f   : > { %v4825_v11 = vmul.f32 %v4824_v9, %v13995_v27  ;;  %v5059_v2 = vmul.f32 2.1237322e-06, %v14056_v1  ;;  %v5075_v32 = vadd.f32 0.112945676, %v5074_v34  ;;  %v5097_v16 = vmul.f32 %v14123_v31, %v14123_v31 }
 0xa20   : > { %v4773_v35 = vsel %vm4770_vm9, %v4772_v56, %v4768_v54  ;;  %v4803_v8 = vmul.f32 %v14087_v14, %v4802_v51  ;;  %v5024_v40 = vadd.f32 0.05243302, %v5023_v26  ;;  %v14141_v49 = vadd.f32 %v3989_v19, %v13523_v45 }
 0xa21   : > { %9575 = vrcp.f32 %v14129_v61  ;;  %v5076_v46 = vmul.f32 %v5075_v32, %v14056_v1  ;;  %v14145_v62 = vmin.f32 %v5097_v16, 16.0  ;;  %v14148_v60 = vmul.f32 0.70710677, %v14132_v3 }
 0xa22   : > { %v6789_v37 = vadd.f32 1.0, %v8621_v0  ;;  %v4788_v4 = vadd.f32 1.1283791, %v4787_v59  ;;  %v4811_v50 = vand.u32 2147483648, %v14050_v44  ;;  %v14152_v6 = vmul.f32 0.5, %v14011_v20 }
 0xa23   : > { %v14154_v42 = vpop.eup %9573  ;;  %v4826_v9 = vadd.f32 0.18741608, %v4825_v11  ;;  %v5060_v34 = vadd.f32 0.00028619796, %v5059_v2  ;;  %v5110_v23 = vmul.f32 3.8918573e-05, %v14145_v62  ;;  %v5137_v51 = vmul.f32 %v14148_v60, %v14148_v60 }
 0xa24   : > { %v4774_v26 = vmul.f32 %v4773_v35, %v4749_v5  ;;  %v4804_v54 = vadd.f32 %v14087_v14, %v4803_v8  ;;  %vm4806_vm10 = vweird.f32 %v14087_v14  ;;  %v5025_v19 = vmul.f32 %v5024_v40, %v14015_v12 }
 0xa25   : > { %v14163_v0 = vmul.f32 %v6784_v25, %v13842_v43  ;;  %v5077_v20 = vadd.f32 0.4994258, %v5076_v46  ;;  %v5111_v56 = vadd.f32 0.001143296, %v5110_v23  ;;  %v14166_v59 = vmul.f32 0.70710677, %v14141_v49 }
 0xa26   : > { %v4789_v11 = vmul.f32 %v4788_v4, %v13856_v17  ;;  %vm4805_vm11 = vweird.f32 %v14050_v44  ;;  %v4809_v5 = vand.u32 2147483647, %v14050_v44  ;;  %v4841_v2 = vmul.f32 %v14154_v42, %v14104_v36 }
 0xa27   : > { %16047 = vst [vmem:[#allocation27_spill] sm:$0xff] %v14163_v0  ;;  %v14173_v32 = vpop.eup %9575  ;;  %vm14175_vm12 = vmor %vm4805_vm11, %vm4806_vm10  ;;  %v4827_v43 = vmul.f32 %v4826_v9, %v13995_v27  ;;  %v5061_v25 = vmul.f32 %v5060_v34, %v14056_v1  ;;  %v5112_v35 = vmul.f32 %v5111_v56, %v14145_v62  ;;  %v14182_v17 = vmin.f32 %v5137_v51, 16.0 }
 0xa28   : > { %v14185_v8 = vmul.f32 %v6789_v37, %v13920_v30  ;;  %v8622_v44 = vclamps-f32 %v4774_v26, 1.0  ;;  %v4808_v40 = vsel %vm14175_vm12, %v14087_v14, %v4804_v54  ;;  %v5026_v46 = vadd.f32 0.18741608, %v5025_v19 }
 0xa29   : > { %v4812_v4 = vor.u32 1.1754944e-38, %v4811_v50  ;;  %v5078_v23 = vmul.f32 %v5077_v20, %v14056_v1  ;;  %v5099_v27 = vmul.f32 2.1237322e-06, %v14145_v62  ;;  %v5337_v9 = vmul.f32 %v14166_v59, %v14166_v59 }
 0xa2a   : > { %vm4810_vm13 = vcmp.eq.f32.partialorder %v4809_v5, 8.507059e+37  ;;  %v4842_v34 = vsub.f32 1.0, %v4841_v2  ;;  %v5041_v30 = vmul.f32 %v14173_v32, %v14129_v61  ;;  %v5113_v37 = vadd.f32 0.014752088, %v5112_v35 }
 0xa2b   : > { %v4813_v51 = vsel %vm4810_vm13, %v4812_v4, %v4808_v40  ;;  %v4828_v26 = vadd.f32 1.1283791, %v4827_v43  ;;  %v5062_v56 = vadd.f32 0.0036580483, %v5061_v25  ;;  %v5150_v14 = vmul.f32 3.8918573e-05, %v14182_v17 }
 0xa2c   : > { %v6790_v54 = vadd.f32 1.0, %v8622_v44  ;;  %v5027_v19 = vmul.f32 %v5026_v46, %v14015_v12  ;;  %v5114_v20 = vmul.f32 %v5113_v37, %v14145_v62  ;;  %v14201_v16 = vadd.f32 1.0, %v5078_v23 }
 0xa2d   : > { %v5100_v5 = vadd.f32 0.00028619796, %v5099_v27  ;;  %v5151_v2 = vadd.f32 0.001143296, %v5150_v14  ;;  %v14203_v21 = vmin.f32 %v5337_v9, 16.0  ;;  %v4814_v35 = vmul.f32 %v4813_v51, %v4789_v11  ;;  %v4018_v9 = vpop.f32.mrf.mxu1 }
 0xa2e   : > { %v4843_v43 = vmul.f32 %v14154_v42, %v4842_v34  ;;  %v5042_v25 = vsub.f32 1.0, %v5041_v30  ;;  %v5115_v40 = vadd.f32 0.112945676, %v5114_v20  ;;  %v4829_v4 = vmul.f32 %v4828_v26, %v13961_v48 }
 0xa2f   : > { %v5063_v50 = vmul.f32 %v5062_v56, %v14056_v1  ;;  %v5152_v44 = vmul.f32 %v5151_v2, %v14182_v17  ;;  %v5350_v12 = vmul.f32 3.8918573e-05, %v14203_v21  ;;  %vm4845_vm14 = vweird.f32 %v14104_v36 }
 0xa30   : > { %v4849_v46 = vand.u32 2147483647, %v14104_v36  ;;  %v4851_v23 = vand.u32 2147483648, %v14104_v36  ;;  %v5139_v11 = vmul.f32 2.1237322e-06, %v14182_v17  ;;  %vm4846_vm15 = vweird.f32 %v14154_v42 }
 0xa31   : > { %9577 = vrcp.f32 %v14201_v16  ;;  %v5101_v48 = vmul.f32 %v5100_v5, %v14145_v62  ;;  %v5153_v27 = vadd.f32 0.014752088, %v5152_v44  ;;  %v4844_v34 = vadd.f32 %v14154_v42, %v4843_v43  ;;  %vm14236_vm1 = vmor %vm4845_vm14, %vm4846_vm15 }
 0xa32   : > { %v5043_v30 = vmul.f32 %v14173_v32, %v5042_v25  ;;  %v5116_v37 = vmul.f32 %v5115_v40, %v14145_v62  ;;  %v5351_v51 = vadd.f32 0.001143296, %v5350_v12  ;;  %v14221_v26 = vmul.f32 %v6790_v54, %v13935_v10 }
 0xa33   : > { %v8623_v56 = vclamps-f32 %v4814_v35, 1.0  ;;  %v5064_v14 = vadd.f32 0.05243302, %v5063_v50  ;;  %v5154_v20 = vmul.f32 %v5153_v27, %v14182_v17  ;;  %vm14224_vm0 = vcmp.eq.f32.partialorder %v4849_v46, 8.507059e+37 }
 0xa34   : > { %v5140_v5 = vadd.f32 0.00028619796, %v5139_v11  ;;  %v5352_v44 = vmul.f32 %v5351_v51, %v14203_v21  ;;  %v14230_v43 = vadd.f32 %v4018_v9, %v13569_v28  ;;  %v4852_v50 = vor.u32 1.1754944e-38, %v4851_v23 }
 0xa35   : > { %vm5046_vm2 = vweird.f32 %v14173_v32  ;;  %v5102_v54 = vadd.f32 0.0036580483, %v5101_v48  ;;  %v5155_v35 = vadd.f32 0.112945676, %v5154_v20  ;;  %v4848_v25 = vsel %vm14236_vm1, %v14154_v42, %v4844_v34 }
 0xa36   : > { %v5044_v40 = vadd.f32 %v14173_v32, %v5043_v30  ;;  %v5117_v12 = vadd.f32 0.4994258, %v5116_v37  ;;  %v5353_v46 = vadd.f32 0.014752088, %v5352_v44  ;;  %vm5045_vm3 = vweird.f32 %v14129_v61 }
 0xa37   : > { %v14245_v11 = vpop.eup %9577  ;;  %v5049_v36 = vand.u32 2147483647, %v14129_v61  ;;  %v5051_v23 = vand.u32 2147483648, %v14129_v61  ;;  %v5065_v27 = vmul.f32 %v5064_v14, %v14056_v1  ;;  %v5141_v48 = vmul.f32 %v5140_v5, %v14182_v17  ;;  %vm14261_vm4 = vmor %vm5045_vm3, %vm5046_vm2 }
 0xa38   : > { %v5156_v9 = vmul.f32 %v5155_v35, %v14182_v17  ;;  %v5354_v42 = vmul.f32 %v5353_v46, %v14203_v21  ;;  %v14255_v34 = vmul.f32 0.70710677, %v14230_v43  ;;  %v6791_v30 = vadd.f32 1.0, %v8623_v56 }
 0xa39   : > { %v4853_v37 = vsel %vm14224_vm0, %v4852_v50, %v4848_v25  ;;  %v5028_v51 = vadd.f32 1.1283791, %v5027_v19  ;;  %v5103_v14 = vmul.f32 %v5102_v54, %v14145_v62  ;;  %v5048_v20 = vsel %vm14261_vm4, %v14173_v32, %v5044_v40 }
 0xa3a   : > { %v5081_v5 = vmul.f32 %v14245_v11, %v14201_v16  ;;  %v5118_v56 = vmul.f32 %v5117_v12, %v14145_v62  ;;  %v5339_v2 = vmul.f32 2.1237322e-06, %v14203_v21  ;;  %v5052_v19 = vor.u32 1.1754944e-38, %v5051_v23 }
 0xa3b   : > { %v5066_v44 = vadd.f32 0.18741608, %v5065_v27  ;;  %v5355_v10 = vadd.f32 0.112945676, %v5354_v42  ;;  %v5377_v50 = vmul.f32 %v14255_v34, %v14255_v34  ;;  %v4854_v35 = vmul.f32 %v4853_v37, %v4829_v4  ;;  %v4047_v42 = vpop.f32.mrf.mxu2 }
 0xa3c   : > { %vm5050_vm5 = vcmp.eq.f32.partialorder %v5049_v36, 8.507059e+37  ;;  %v5142_v54 = vadd.f32 0.0036580483, %v5141_v48  ;;  %v5157_v25 = vadd.f32 0.4994258, %v5156_v9  ;;  %v14276_v46 = vmul.f32 %v6791_v30, %v13941_v55 }
 0xa3d   : > { %v5053_v32 = vsel %vm5050_vm5, %v5052_v19, %v5048_v20  ;;  %v5104_v40 = vadd.f32 0.05243302, %v5103_v14  ;;  %v5356_v61 = vmul.f32 %v5355_v10, %v14203_v21  ;;  %v5029_v12 = vmul.f32 %v5028_v51, %v13989_v7  ;;  %v9081_v10 = vld [vmem:[%s9974_s1 + $0x138] sm:$0xff] }
 0xa3e   : > { %16056 = vst [vmem:[#allocation33_spill] sm:$0xff] %v14276_v46  ;;  %v5082_v58 = vsub.f32 1.0, %v5081_v5  ;;  %v14280_v23 = vadd.f32 1.0, %v5118_v56  ;;  %v5340_v27 = vadd.f32 0.00028619796, %v5339_v2  ;;  %v5067_v36 = vmul.f32 %v5066_v44, %v14056_v1  ;;  %7569 = vmatpush.bf16.msra.mxu0 %v9081_v10 }
 0xa3f   : > { %v14286_v48 = vmul.f32 0.5, %v14101_v39  ;;  %v14288_v55 = vmin.f32 %v5377_v50, 16.0  ;;  %v8624_v9 = vclamps-f32 %v4854_v35, 1.0  ;;  %v5054_v30 = vmul.f32 %v5053_v32, %v5029_v12 }
 0xa40   : > { %v5143_v7 = vmul.f32 %v5142_v54, %v14182_v17  ;;  %v5158_v37 = vmul.f32 %v5157_v25, %v14182_v17  ;;  %v5105_v14 = vmul.f32 %v5104_v40, %v14145_v62  ;;  %v5357_v20 = vadd.f32 0.4994258, %v5356_v61  ;;  %v4076_v25 = vpop.f32.mrf.mxu3 }
 0xa41   : > { %v14296_v1 = vadd.f32 %v4047_v42, %v13623_v18  ;;  %v5083_v39 = vmul.f32 %v14245_v11, %v5082_v58  ;;  %9579 = vrcp.f32 %v14280_v23  ;;  %v14301_v5 = vmul.f32 0.5, %v14132_v3  ;;  %v9089_v3 = vld [vmem:[%s9974_s1 + $0x178] sm:$0xff] }
 0xa42   : > { %v5341_v56 = vmul.f32 %v5340_v27, %v14203_v21  ;;  %v5068_v2 = vadd.f32 1.1283791, %v5067_v36  ;;  %vm5085_vm6 = vweird.f32 %v14201_v16  ;;  %v14306_v19 = vmul.f32 0.5, %v14141_v49  ;;  %7598 = vmatpush.bf16.msra.mxu1 %v9089_v3 }
 0xa43   : > { %v5390_v44 = vmul.f32 3.8918573e-05, %v14288_v55  ;;  %v6792_v50 = vadd.f32 1.0, %v8624_v9  ;;  %v8629_v35 = vclamps-f32 %v5054_v30, 1.0  ;;  %v5144_v54 = vadd.f32 0.05243302, %v5143_v7 }
 0xa44   : > { %v14310_v58 = vadd.f32 1.0, %v5158_v37  ;;  %v5106_v32 = vadd.f32 0.18741608, %v5105_v14  ;;  %v5358_v40 = vmul.f32 %v5357_v20, %v14203_v21  ;;  %v14315_v12 = vmul.f32 0.70710677, %v14296_v1  ;;  %v9080_v37 = vld [vmem:[%s9974_s1 + $0x130] sm:$0xff] }
 0xa45   : > { %v5391_v61 = vadd.f32 0.001143296, %v5390_v44  ;;  %v5084_v49 = vadd.f32 %v14245_v11, %v5083_v39  ;;  %vm5086_vm7 = vweird.f32 %v14245_v11  ;;  %v5089_v27 = vand.u32 2147483647, %v14201_v16  ;;  %v9088_v44 = vld [vmem:[%s9974_s1 + $0x170] sm:$0xff]  ;;  %7570 = vmatpush.bf16.msra.mxu0 %v9080_v37 }
 0xa46   : > { %v5342_v42 = vadd.f32 0.0036580483, %v5341_v56  ;;  %v5091_v36 = vand.u32 2147483648, %v14201_v16  ;;  %v5379_v9 = vmul.f32 2.1237322e-06, %v14288_v55  ;;  %v14324_v7 = vadd.f32 %v4076_v25, %v13644_v53  ;;  %vm14342_vm8 = vmor %vm5085_vm6, %vm5086_vm7  ;;  %7599 = vmatpush.bf16.msra.mxu1 %v9088_v44 }
 0xa47   : > { %v5392_v30 = vmul.f32 %v5391_v61, %v14288_v55  ;;  %v14327_v14 = vpop.eup %9579  ;;  %v14330_v20 = vmul.f32 %v6792_v50, %v14094_v52  ;;  %v5145_v39 = vmul.f32 %v5144_v54, %v14182_v17  ;;  %9581 = vrcp.f32 %v14310_v58 }
 0xa48   : > { %v5417_v56 = vmul.f32 %v14315_v12, %v14315_v12  ;;  %v6797_v10 = vadd.f32 1.0, %v8629_v35  ;;  %v5069_v3 = vmul.f32 %v5068_v2, %v14026_v15  ;;  %v5107_v52 = vmul.f32 %v5106_v32, %v14145_v62  ;;  %v3992_v32 = vpop.f32.mrf.mxu0 }
 0xa49   : > { %16057 = vst [vmem:[#allocation38_spill] sm:$0xff] %v14330_v20  ;;  %v14347_v50 = vadd.f32 1.0, %v5358_v40  ;;  %v5088_v54 = vsel %vm14342_vm8, %v14245_v11, %v5084_v49  ;;  %v5343_v35 = vmul.f32 %v5342_v42, %v14203_v21  ;;  %v5393_v15 = vadd.f32 0.014752088, %v5392_v30 }
 0xa4a   : > { %v14353_v2 = vmin.f32 %v5417_v56, 16.0  ;;  %v5092_v16 = vor.u32 1.1754944e-38, %v5091_v36  ;;  %v5121_v61 = vmul.f32 %v14327_v14, %v14280_v23  ;;  %v5380_v51 = vadd.f32 0.00028619796, %v5379_v9 }
 0xa4b   : > { %v14358_v62 = vmul.f32 0.70710677, %v14324_v7  ;;  %vm5090_vm9 = vcmp.eq.f32.partialorder %v5089_v27, 8.507059e+37  ;;  %v5146_v11 = vadd.f32 0.18741608, %v5145_v39  ;;  %v5394_v49 = vmul.f32 %v5393_v15, %v14288_v55 }
 0xa4c   : > { %v5093_v42 = vsel %vm5090_vm9, %v5092_v16, %v5088_v54  ;;  %v5108_v30 = vadd.f32 1.1283791, %v5107_v52  ;;  %9583 = vrcp.f32 %v14347_v50  ;;  %v5430_v36 = vmul.f32 3.8918573e-05, %v14353_v2 }
 0xa4d   : > { %v14365_v37 = vpop.eup %9581  ;;  %v14368_v9 = vmul.f32 %v6797_v10, %v14119_v24  ;;  %v5344_v56 = vadd.f32 0.05243302, %v5343_v35  ;;  %v5395_v44 = vadd.f32 0.112945676, %v5394_v49  ;;  %v14371_v25 = vadd.f32 %v3992_v32, %v13523_v45 }
 0xa4e   : > { %v5122_v27 = vsub.f32 1.0, %v5121_v61  ;;  %v5381_v39 = vmul.f32 %v5380_v51, %v14288_v55  ;;  %v5431_v15 = vadd.f32 0.001143296, %v5430_v36  ;;  %v5457_v52 = vmul.f32 %v14358_v62, %v14358_v62 }
 0xa4f   : > { %16060 = vst [vmem:[#allocation32_spill] sm:$0xff] %v14368_v9  ;;  %v5094_v54 = vmul.f32 %v5093_v42, %v5069_v3  ;;  %v5147_v16 = vmul.f32 %v5146_v11, %v14182_v17  ;;  %v14378_v40 = vmul.f32 0.5, %v14230_v43  ;;  %v5396_v24 = vmul.f32 %v5395_v44, %v14288_v55 }
 0xa50   : > { %v14382_v10 = vmul.f32 %v5108_v30, %v14123_v31  ;;  %v5129_v35 = vand.u32 2147483647, %v14280_v23  ;;  %v5161_v51 = vmul.f32 %v14365_v37, %v14310_v58  ;;  %v5432_v61 = vmul.f32 %v5431_v15, %v14353_v2 }
 0xa51   : > { %v5345_v32 = vmul.f32 %v5344_v56, %v14203_v21  ;;  %v5397_v3 = vadd.f32 0.4994258, %v5396_v24  ;;  %v14389_v49 = vmin.f32 %v5457_v52, 16.0  ;;  %v14392_v17 = vmul.f32 0.70710677, %v14371_v25 }
 0xa52   : > { %v14394_v43 = vpop.eup %9583  ;;  %v5123_v31 = vmul.f32 %v14327_v14, %v5122_v27  ;;  %vm5125_vm10 = vweird.f32 %v14280_v23  ;;  %v5382_v11 = vadd.f32 0.0036580483, %v5381_v39  ;;  %v5433_v42 = vadd.f32 0.014752088, %v5432_v61 }
 0xa53   : > { %v8630_v30 = vclamps-f32 %v5094_v54, 1.0  ;;  %v5131_v36 = vand.u32 2147483648, %v14280_v23  ;;  %v5148_v44 = vadd.f32 1.1283791, %v5147_v16  ;;  %v5419_v56 = vmul.f32 2.1237322e-06, %v14353_v2 }
 0xa54   : > { %v5162_v15 = vsub.f32 1.0, %v5161_v51  ;;  %v5398_v52 = vmul.f32 %v5397_v3, %v14288_v55  ;;  %v5434_v24 = vmul.f32 %v5433_v42, %v14353_v2  ;;  %v5470_v4 = vmul.f32 3.8918573e-05, %v14389_v49 }
 0xa55   : > { %vm5126_vm11 = vweird.f32 %v14327_v14  ;;  %vm14404_vm12 = vcmp.eq.f32.partialorder %v5129_v35, 8.507059e+37  ;;  %v5346_v39 = vadd.f32 0.18741608, %v5345_v32  ;;  %v5361_v54 = vmul.f32 %v14394_v43, %v14347_v50 }
 0xa56   : > { %v5657_v16 = vmul.f32 %v14392_v17, %v14392_v17  ;;  %v5124_v51 = vadd.f32 %v14327_v14, %v5123_v31  ;;  %v5383_v61 = vmul.f32 %v5382_v11, %v14288_v55  ;;  %v5435_v3 = vadd.f32 0.112945676, %v5434_v24  ;;  %vm14428_vm13 = vmor %vm5125_vm10, %vm5126_vm11 }
 0xa57   : > { %v5471_v42 = vadd.f32 0.001143296, %v5470_v4  ;;  %v14414_v9 = vadd.f32 1.0, %v8630_v30  ;;  %v5132_v0 = vor.u32 1.1754944e-38, %v5131_v36  ;;  %v5420_v35 = vadd.f32 0.00028619796, %v5419_v56 }
 0xa58   : > { %v5459_v20 = vmul.f32 2.1237322e-06, %v14389_v49  ;;  %v14418_v32 = vmul.f32 %v5148_v44, %v14148_v60  ;;  %v5163_v29 = vmul.f32 %v14365_v37, %v5162_v15  ;;  %v14421_v46 = vadd.f32 1.0, %v5398_v52 }
 0xa59   : > { %v5436_v33 = vmul.f32 %v5435_v3, %v14353_v2  ;;  %v5169_v31 = vand.u32 2147483647, %v14310_v58  ;;  %v5362_v11 = vsub.f32 1.0, %v5361_v54  ;;  %v5472_v60 = vmul.f32 %v5471_v42, %v14389_v49  ;;  %v4021_v54 = vpop.f32.mrf.mxu1 }
 0xa5a   : > { %v14434_v30 = vmin.f32 %v5657_v16, 16.0  ;;  %v5128_v36 = vsel %vm14428_vm13, %v14327_v14, %v5124_v51  ;;  %v5171_v44 = vand.u32 2147483648, %v14310_v58  ;;  %v5347_v23 = vmul.f32 %v5346_v39, %v14203_v21  ;;  %v9097_v14 = vld [vmem:[%s9974_s1 + $0x1b8] sm:$0xff] }
 0xa5b   : > { %v5384_v56 = vadd.f32 0.05243302, %v5383_v61  ;;  %vm5166_vm14 = vweird.f32 %v14365_v37  ;;  %v5421_v15 = vmul.f32 %v5420_v35, %v14353_v2  ;;  %v5460_v52 = vadd.f32 0.00028619796, %v5459_v20  ;;  %v9105_v51 = vld [vmem:[%s9974_s1 + $0x1f8] sm:$0xff]  ;;  %7627 = vmatpush.bf16.msra.mxu2 %v9097_v14  ;;  %v4050_v14 = vpop.f32.mrf.mxu2 }
 0xa5c   : > { %v5473_v24 = vadd.f32 0.014752088, %v5472_v60  ;;  %v5164_v3 = vadd.f32 %v14365_v37, %v5163_v29  ;;  %9585 = vrcp.f32 %v14421_v46  ;;  %v5437_v16 = vadd.f32 0.4994258, %v5436_v33  ;;  %7656 = vmatpush.bf16.msra.mxu3 %v9105_v51 }
 0xa5d   : > { %v5670_v42 = vmul.f32 3.8918573e-05, %v14434_v30  ;;  %vm5165_vm15 = vweird.f32 %v14310_v58  ;;  %vm14449_vm0 = vcmp.eq.f32.partialorder %v5169_v31, 8.507059e+37  ;;  %v5363_v39 = vmul.f32 %v14394_v43, %v5362_v11 }
 0xa5e   : > { %v5474_v20 = vmul.f32 %v5473_v24, %v14389_v49  ;;  %v5133_v29 = vsel %vm14404_vm12, %v5132_v0, %v5128_v36  ;;  %v5172_v61 = vor.u32 1.1754944e-38, %v5171_v44  ;;  %v5385_v33 = vmul.f32 %v5384_v56, %v14288_v55  ;;  %vm14463_vm1 = vmor %vm5165_vm15, %vm5166_vm14 }
 0xa5f   : > { %v14459_v35 = vadd.f32 %v4021_v54, %v13569_v28  ;;  %v5422_v4 = vadd.f32 0.0036580483, %v5421_v15  ;;  %v5461_v31 = vmul.f32 %v5460_v52, %v14389_v49  ;;  %v5671_v27 = vadd.f32 0.001143296, %v5670_v42 }
 0xa60   : > { %v5475_v11 = vadd.f32 0.112945676, %v5474_v20  ;;  %v5168_v0 = vsel %vm14463_vm1, %v14365_v37, %v5164_v3  ;;  %v5348_v60 = vadd.f32 1.1283791, %v5347_v23  ;;  %vm5365_vm2 = vweird.f32 %v14347_v50 }
 0xa61   : > { %v5438_v36 = vmul.f32 %v5437_v16, %v14353_v2  ;;  %v5134_v44 = vmul.f32 %v5133_v29, %v14382_v10  ;;  %v5364_v56 = vadd.f32 %v14394_v43, %v5363_v39  ;;  %vm5366_vm3 = vweird.f32 %v14394_v43 }
 0xa62   : > { %v5371_v15 = vand.u32 2147483648, %v14347_v50  ;;  %v14477_v52 = vpop.eup %9585  ;;  %v5369_v24 = vand.u32 2147483647, %v14347_v50  ;;  %v5476_v54 = vmul.f32 %v5475_v11, %v14389_v49  ;;  %v5672_v37 = vmul.f32 %v5671_v27, %v14434_v30  ;;  %vm14490_vm4 = vmor %vm5365_vm2, %vm5366_vm3 }
 0xa63   : > { %v14483_v23 = vmul.f32 0.70710677, %v14459_v35  ;;  %v5173_v10 = vsel %vm14449_vm0, %v5172_v61, %v5168_v0  ;;  %v5386_v3 = vadd.f32 0.18741608, %v5385_v33  ;;  %v5423_v16 = vmul.f32 %v5422_v4, %v14353_v2 }
 0xa64   : > { %v5462_v42 = vadd.f32 0.0036580483, %v5461_v31  ;;  %v14494_v39 = vadd.f32 1.0, %v5438_v36  ;;  %v5659_v20 = vmul.f32 2.1237322e-06, %v14434_v30  ;;  %v8631_v61 = vclamps-f32 %v5134_v44, 1.0 }
 0xa65   : > { %v5673_v29 = vadd.f32 0.014752088, %v5672_v37  ;;  %v5697_v21 = vmul.f32 %v14483_v23, %v14483_v23  ;;  %v5368_v33 = vsel %vm14490_vm4, %v14394_v43, %v5364_v56  ;;  %v5372_v50 = vor.u32 1.1754944e-38, %v5371_v15  ;;  %v9087_v37 = vld [vmem:[%s9974_s1 + $0x168] sm:$0xff] }
 0xa66   : > { %v5401_v58 = vmul.f32 %v14477_v52, %v14421_v46  ;;  %v5477_v4 = vadd.f32 0.4994258, %v5476_v54  ;;  %v14508_v27 = vadd.f32 %v4050_v14, %v13623_v18  ;;  %v5174_v0 = vmul.f32 %v5173_v10, %v14418_v32  ;;  %v9079_v54 = vld [vmem:[%s9974_s1 + $0x128] sm:$0xff]  ;;  %7600 = vmatpush.bf16.msra.mxu1 %v9087_v37 }
 0xa67   : > { %v5674_v31 = vmul.f32 %v5673_v29, %v14434_v30  ;;  %v14505_v11 = vmin.f32 %v5697_v21, 16.0  ;;  %vm5370_vm5 = vcmp.eq.f32.partialorder %v5369_v24, 8.507059e+37  ;;  %v5387_v36 = vmul.f32 %v5386_v3, %v14288_v55  ;;  %7571 = vmatpush.bf16.msra.mxu0 %v9079_v54 }
 0xa68   : > { %v5424_v44 = vadd.f32 0.05243302, %v5423_v16  ;;  %v5373_v43 = vsel %vm5370_vm5, %v5372_v50, %v5368_v33  ;;  %9587 = vrcp.f32 %v14494_v39  ;;  %v5463_v56 = vmul.f32 %v5462_v42, %v14389_v49  ;;  %v9096_v16 = vld [vmem:[%s9974_s1 + $0x1b0] sm:$0xff] }
 0xa69   : > { %v5660_v15 = vadd.f32 0.00028619796, %v5659_v20  ;;  %v6799_v51 = vadd.f32 1.0, %v8631_v61  ;;  %v5349_v14 = vmul.f32 %v5348_v60, %v14166_v59  ;;  %v5402_v29 = vsub.f32 1.0, %v5401_v58  ;;  %v9104_v42 = vld [vmem:[%s9974_s1 + $0x1f0] sm:$0xff]  ;;  %7628 = vmatpush.bf16.msra.mxu2 %v9096_v16  ;;  %v4079_v16 = vpop.f32.mrf.mxu3 }
 0xa6a   : > { %v5710_v32 = vmul.f32 3.8918573e-05, %v14505_v11  ;;  %v14520_v55 = vmul.f32 %v14414_v9, %v14152_v6  ;;  %v5478_v24 = vmul.f32 %v5477_v4, %v14389_v49  ;;  %v5675_v10 = vadd.f32 0.112945676, %v5674_v31  ;;  %7657 = vmatpush.bf16.msra.mxu3 %v9104_v42 }
 0xa6b   : > { %v14524_v3 = vmul.f32 0.70710677, %v14508_v27  ;;  %v8632_v59 = vclamps-f32 %v5174_v0, 1.0  ;;  %v5374_v60 = vmul.f32 %v5373_v43, %v5349_v14  ;;  %v5388_v20 = vadd.f32 1.1283791, %v5387_v36  ;;  %v9078_v0 = vld [vmem:[%s9974_s1 + $0x120] sm:$0xff] }
 0xa6c   : > { %16071 = vst [vmem:[#allocation28_spill] sm:$0xff] %v14520_v55  ;;  %v5425_v21 = vmul.f32 %v5424_v44, %v14353_v2  ;;  %v14530_v6 = vmul.f32 0.5, %v14296_v1  ;;  %v5464_v9 = vadd.f32 0.05243302, %v5463_v56  ;;  %v5661_v61 = vmul.f32 %v5660_v15, %v14434_v30  ;;  %v9086_v1 = vld [vmem:[%s9974_s1 + $0x160] sm:$0xff]  ;;  %7572 = vmatpush.bf16.msra.mxu0 %v9078_v0 }
 0xa6d   : > { %v5711_v33 = vadd.f32 0.001143296, %v5710_v32  ;;  %v14534_v50 = vmul.f32 %v6799_v51, %v14286_v48  ;;  %v5403_v58 = vmul.f32 %v14477_v52, %v5402_v29  ;;  %v14538_v4 = vmul.f32 0.5, %v14324_v7  ;;  %7601 = vmatpush.bf16.msra.mxu1 %v9086_v1 }
 0xa6e   : > { %v14541_v31 = vmul.f32 0.5, %v14371_v25  ;;  %v14545_v36 = vpop.eup %9587  ;;  %v14547_v44 = vadd.f32 1.0, %v5478_v24  ;;  %v5676_v43 = vmul.f32 %v5675_v10, %v14434_v30  ;;  %v5737_v48 = vmul.f32 %v14524_v3, %v14524_v3 }
 0xa6f   : > { %16072 = vst [vmem:[#allocation29_spill] sm:$0xff] %v14534_v50  ;;  %v5712_v56 = vmul.f32 %v5711_v33, %v14505_v11  ;;  %v6800_v15 = vadd.f32 1.0, %v8632_v59  ;;  %v8637_v54 = vclamps-f32 %v5374_v60, 1.0  ;;  %v5389_v7 = vmul.f32 %v5388_v20, %v14255_v34  ;;  %v4052_v50 = vpop.f32.mrf.mxu2 }
 0xa70   : > { %v5426_v37 = vadd.f32 0.18741608, %v5425_v21  ;;  %v5465_v25 = vmul.f32 %v5464_v9, %v14389_v49  ;;  %v5662_v51 = vadd.f32 0.0036580483, %v5661_v61  ;;  %v14555_v29 = vmin.f32 %v5737_v48, 16.0 }
 0xa71   : > { %v5713_v14 = vadd.f32 0.014752088, %v5712_v56  ;;  %vm5406_vm6 = vweird.f32 %v14477_v52  ;;  %v5409_v32 = vand.u32 2147483647, %v14421_v46  ;;  %v5441_v24 = vmul.f32 %v14545_v36, %v14494_v39 }
 0xa72   : > { %v5699_v10 = vmul.f32 2.1237322e-06, %v14505_v11  ;;  %v5404_v34 = vadd.f32 %v14477_v52, %v5403_v58  ;;  %9589 = vrcp.f32 %v14547_v44  ;;  %v5677_v42 = vadd.f32 0.4994258, %v5676_v43 }
 0xa73   : > { %v5714_v59 = vmul.f32 %v5713_v14, %v14505_v11  ;;  %v6805_v60 = vadd.f32 1.0, %v8637_v54  ;;  %v5411_v20 = vand.u32 2147483648, %v14421_v46  ;;  %v5427_v21 = vmul.f32 %v5426_v37, %v14353_v2 }
 0xa74   : > { %v5750_v9 = vmul.f32 3.8918573e-05, %v14555_v29  ;;  %vm5405_vm7 = vweird.f32 %v14421_v46  ;;  %v5466_v61 = vadd.f32 0.18741608, %v5465_v25  ;;  %v5663_v33 = vmul.f32 %v5662_v51, %v14434_v30 }
 0xa75   : > { %v14571_v0 = vadd.f32 %v4079_v16, %v13644_v53  ;;  %v14574_v58 = vmul.f32 %v6800_v15, %v14301_v5  ;;  %vm14578_vm8 = vmor %vm5405_vm7, %vm5406_vm6  ;;  %v5442_v2 = vsub.f32 1.0, %v5441_v24  ;;  %v5700_v43 = vadd.f32 0.00028619796, %v5699_v10 }
 0xa76   : > { %v5715_v56 = vadd.f32 0.112945676, %v5714_v59  ;;  %v5408_v46 = vsel %vm14578_vm8, %v14477_v52, %v5404_v34  ;;  %vm5410_vm9 = vcmp.eq.f32.partialorder %v5409_v32, 8.507059e+37  ;;  %v5678_v48 = vmul.f32 %v5677_v42, %v14434_v30 }
 0xa77   : > { %16073 = vst [vmem:[#allocation41_spill] sm:$0xff] %v14574_v58  ;;  %v5751_v54 = vadd.f32 0.001143296, %v5750_v9  ;;  %v14587_v5 = vmul.f32 %v6805_v60, %v14306_v19  ;;  %v5412_v15 = vor.u32 1.1754944e-38, %v5411_v20  ;;  %v5428_v37 = vadd.f32 1.1283791, %v5427_v21 }
 0xa78   : > { %v5716_v25 = vmul.f32 %v5715_v56, %v14505_v11  ;;  %v14590_v51 = vpop.eup %9589  ;;  %v5664_v14 = vadd.f32 0.05243302, %v5663_v33  ;;  %v14593_v24 = vmul.f32 0.5, %v14459_v35  ;;  %v14597_v52 = vmul.f32 0.70710677, %v14571_v0 }
 0xa79   : > { %16076 = vst [vmem:[#allocation39_spill] sm:$0xff] %v14587_v5  ;;  %v5752_v10 = vmul.f32 %v5751_v54, %v14555_v29  ;;  %v5413_v32 = vsel %vm5410_vm9, %v5412_v15, %v5408_v46  ;;  %v5443_v16 = vmul.f32 %v14545_v36, %v5442_v2  ;;  %v5467_v19 = vmul.f32 %v5466_v61, %v14389_v49  ;;  %v3994_v2 = vpop.f32.mrf.mxu0 }
 0xa7a   : > { %v5701_v34 = vmul.f32 %v5700_v43, %v14505_v11  ;;  %v14602_v42 = vadd.f32 1.0, %v5678_v48  ;;  %v5717_v59 = vadd.f32 0.4994258, %v5716_v25  ;;  %v5777_v35 = vmul.f32 %v14597_v52, %v14597_v52  ;;  %v4023_v48 = vpop.f32.mrf.mxu1 }
 0xa7b   : > { %v5753_v60 = vadd.f32 0.014752088, %v5752_v10  ;;  %v5429_v20 = vmul.f32 %v5428_v37, %v14315_v12  ;;  %v5449_v21 = vand.u32 2147483647, %v14494_v39  ;;  %v5451_v9 = vand.u32 2147483648, %v14494_v39 }
 0xa7c   : > { %v5481_v33 = vmul.f32 %v14590_v51, %v14547_v44  ;;  %v5414_v1 = vmul.f32 %v5413_v32, %v5389_v7  ;;  %vm5446_vm10 = vweird.f32 %v14545_v36  ;;  %v5665_v49 = vmul.f32 %v5664_v14, %v14434_v30 }
 0xa7d   : > { %v5754_v61 = vmul.f32 %v5753_v60, %v14555_v29  ;;  %v5444_v43 = vadd.f32 %v14545_v36, %v5443_v16  ;;  %v5468_v56 = vadd.f32 1.1283791, %v5467_v19  ;;  %v5702_v12 = vadd.f32 0.0036580483, %v5701_v34  ;;  %v9095_v34 = vld [vmem:[%s9974_s1 + $0x1a8] sm:$0xff] }
 0xa7e   : > { %v5739_v46 = vmul.f32 2.1237322e-06, %v14555_v29  ;;  %9591 = vrcp.f32 %v14602_v42  ;;  %v5718_v7 = vmul.f32 %v5717_v59, %v14505_v11  ;;  %v14618_v15 = vmin.f32 %v5777_v35, 16.0  ;;  %v9103_v59 = vld [vmem:[%s9974_s1 + $0x1e8] sm:$0xff]  ;;  %7629 = vmatpush.bf16.msra.mxu2 %v9095_v34 }
 0xa7f   : > { %v5755_v54 = vadd.f32 0.112945676, %v5754_v61  ;;  %vm5445_vm11 = vweird.f32 %v14494_v39  ;;  %vm14621_vm12 = vcmp.eq.f32.partialorder %v5449_v21, 8.507059e+37  ;;  %v5482_v25 = vsub.f32 1.0, %v5481_v33  ;;  %7658 = vmatpush.bf16.msra.mxu3 %v9103_v59 }
 0xa80   : > { %v14626_v14 = vadd.f32 %v3994_v2, %v13523_v45  ;;  %v8638_v10 = vclamps-f32 %v5414_v1, 1.0  ;;  %v5452_v32 = vor.u32 1.1754944e-38, %v5451_v9  ;;  %v5666_v16 = vadd.f32 0.18741608, %v5665_v49  ;;  %vm14635_vm13 = vmor %vm5445_vm11, %vm5446_vm10 }
 0xa81   : > { %v14629_v19 = vadd.f32 %v4023_v48, %v13569_v28  ;;  %v14640_v60 = vmul.f32 %v5468_v56, %v14358_v62  ;;  %v5703_v35 = vmul.f32 %v5702_v12, %v14505_v11  ;;  %v14644_v21 = vmul.f32 0.5, %v14508_v27 }
 0xa82   : > { %v5740_v9 = vadd.f32 0.00028619796, %v5739_v46  ;;  %v5448_v33 = vsel %vm14635_vm13, %v14545_v36, %v5444_v43  ;;  %v14649_v1 = vadd.f32 1.0, %v5718_v7  ;;  %v5756_v49 = vmul.f32 %v5755_v54, %v14555_v29 }
 0xa83   : > { %v5790_v61 = vmul.f32 3.8918573e-05, %v14618_v15  ;;  %v5483_v62 = vmul.f32 %v14590_v51, %v5482_v25  ;;  %v5489_v2 = vand.u32 2147483647, %v14547_v44  ;;  %v5491_v27 = vand.u32 2147483648, %v14547_v44 }
 0xa84   : > { %v14657_v56 = vmul.f32 0.70710677, %v14626_v14  ;;  %v14659_v12 = vpop.eup %9591  ;;  %v6806_v36 = vadd.f32 1.0, %v8638_v10  ;;  %v5667_v43 = vmul.f32 %v5666_v16, %v14434_v30  ;;  %v14663_v48 = vmul.f32 0.70710677, %v14629_v19 }
 0xa85   : > { %v5791_v46 = vadd.f32 0.001143296, %v5790_v61  ;;  %v5453_v7 = vsel %vm14621_vm12, %v5452_v32, %v5448_v33  ;;  %v5704_v54 = vadd.f32 0.05243302, %v5703_v35  ;;  %v5741_v25 = vmul.f32 %v5740_v9, %v14555_v29 }
 0xa86   : > { %v5977_v34 = vmul.f32 %v14657_v56, %v14657_v56  ;;  %9593 = vrcp.f32 %v14649_v1  ;;  %v5757_v59 = vadd.f32 0.4994258, %v5756_v49  ;;  %v6017_v30 = vmul.f32 %v14663_v48, %v14663_v48 }
 0xa87   : > { %v5792_v10 = vmul.f32 %v5791_v46, %v14618_v15  ;;  %v5484_v16 = vadd.f32 %v14590_v51, %v5483_v62  ;;  %vm5486_vm14 = vweird.f32 %v14590_v51  ;;  %v5681_v37 = vmul.f32 %v14659_v12, %v14602_v42 }
 0xa88   : > { %v5779_v32 = vmul.f32 2.1237322e-06, %v14618_v15  ;;  %v5454_v39 = vmul.f32 %v5453_v7, %v5429_v20  ;;  %v5668_v35 = vadd.f32 1.1283791, %v5667_v43  ;;  %v14679_v33 = vmin.f32 %v5977_v34, 16.0 }
 0xa89   : > { %v5793_v9 = vadd.f32 0.014752088, %v5792_v10  ;;  %vm5485_vm15 = vweird.f32 %v14547_v44  ;;  %vm14682_vm0 = vcmp.eq.f32.partialorder %v5489_v2, 8.507059e+37  ;;  %v5705_v61 = vmul.f32 %v5704_v54, %v14505_v11 }
 0xa8a   : > { %v5742_v62 = vadd.f32 0.0036580483, %v5741_v25  ;;  %v14688_v46 = vmul.f32 %v6806_v36, %v14378_v40  ;;  %vm14690_vm1 = vmor %vm5485_vm15, %vm5486_vm14  ;;  %v5492_v20 = vor.u32 1.1754944e-38, %v5491_v27  ;;  %v5758_v43 = vmul.f32 %v5757_v59, %v14555_v29 }
 0xa8b   : > { %v14695_v7 = vmin.f32 %v6017_v30, 16.0  ;;  %v5488_v44 = vsel %vm14690_vm1, %v14590_v51, %v5484_v16  ;;  %v5682_v2 = vsub.f32 1.0, %v5681_v37  ;;  %v5780_v34 = vadd.f32 0.00028619796, %v5779_v32 }
 0xa8c   : > { %16083 = vst [vmem:[#allocation42_spill] sm:$0xff] %v14688_v46  ;;  %v5794_v54 = vmul.f32 %v5793_v9, %v14618_v15  ;;  %v14701_v25 = vpop.eup %9593  ;;  %v8639_v40 = vclamps-f32 %v5454_v39, 1.0  ;;  %v14704_v36 = vmul.f32 %v5668_v35, %v14392_v17  ;;  %v14707_v27 = vmul.f32 0.5, %v14571_v0  ;;  %v9102_v46 = vld [vmem:[%s9974_s1 + $0x1e0] sm:$0xff] }
 0xa8d   : > { %v5990_v59 = vmul.f32 3.8918573e-05, %v14679_v33  ;;  %v5689_v10 = vand.u32 2147483647, %v14602_v42  ;;  %v5706_v30 = vadd.f32 0.18741608, %v5705_v61  ;;  %v5743_v58 = vmul.f32 %v5742_v62, %v14555_v29  ;;  %7659 = vmatpush.bf16.msra.mxu3 %v9102_v46 }
 0xa8e   : > { %v5795_v51 = vadd.f32 0.112945676, %v5794_v54  ;;  %v5493_v16 = vsel %vm14682_vm0, %v5492_v20, %v5488_v44  ;;  %v14714_v37 = vadd.f32 1.0, %v5758_v43  ;;  %v6030_v17 = vmul.f32 3.8918573e-05, %v14695_v7 }
 0xa8f   : > { %v5991_v32 = vadd.f32 0.001143296, %v5990_v59  ;;  %v5683_v39 = vmul.f32 %v14659_v12, %v5682_v2  ;;  %vm5685_vm2 = vweird.f32 %v14602_v42  ;;  %v5721_v0 = vmul.f32 %v14701_v25, %v14649_v1 }
 0xa90   : > { %v5781_v35 = vmul.f32 %v5780_v34, %v14618_v15  ;;  %v6807_v9 = vadd.f32 1.0, %v8639_v40  ;;  %v5691_v61 = vand.u32 2147483648, %v14602_v42  ;;  %v6031_v62 = vadd.f32 0.001143296, %v6030_v17 }
 0xa91   : > { %v5992_v49 = vmul.f32 %v5991_v32, %v14679_v33  ;;  %v5494_v20 = vmul.f32 %v5493_v16, %v14640_v60  ;;  %vm14725_vm3 = vcmp.eq.f32.partialorder %v5689_v10, 8.507059e+37  ;;  %v5744_v44 = vadd.f32 0.05243302, %v5743_v58 }
 0xa92   : > { %v5796_v2 = vmul.f32 %v5795_v51, %v14618_v15  ;;  %vm5686_vm4 = vweird.f32 %v14659_v12  ;;  %v5707_v54 = vmul.f32 %v5706_v30, %v14505_v11  ;;  %9595 = vrcp.f32 %v14714_v37 }
 0xa93   : > { %v5993_v34 = vadd.f32 0.014752088, %v5992_v49  ;;  %v5684_v40 = vadd.f32 %v14659_v12, %v5683_v39  ;;  %v5722_v59 = vsub.f32 1.0, %v5721_v0  ;;  %v5782_v32 = vadd.f32 0.0036580483, %v5781_v35  ;;  %v4081_v39 = vpop.f32.mrf.mxu3  ;;  %vm14746_vm5 = vmor %vm5685_vm2, %vm5686_vm4 }
 0xa94   : > { %v6032_v60 = vmul.f32 %v6031_v62, %v14695_v7  ;;  %v14736_v10 = vmul.f32 %v6807_v9, %v14530_v6  ;;  %v5692_v16 = vor.u32 1.1754944e-38, %v5691_v61  ;;  %v5979_v58 = vmul.f32 2.1237322e-06, %v14679_v33 }
 0xa95   : > { %v5994_v51 = vmul.f32 %v5993_v34, %v14679_v33  ;;  %v5745_v17 = vmul.f32 %v5744_v44, %v14555_v29  ;;  %v5797_v11 = vadd.f32 0.4994258, %v5796_v2  ;;  %v6019_v30 = vmul.f32 2.1237322e-06, %v14695_v7 }
 0xa96   : > { %16088 = vst [vmem:[#allocation43_spill] sm:$0xff] %v14736_v10  ;;  %v6033_v49 = vadd.f32 0.014752088, %v6032_v60  ;;  %v8640_v0 = vclamps-f32 %v5494_v20, 1.0  ;;  %v14750_v35 = vadd.f32 1.1283791, %v5707_v54  ;;  %vm5725_vm6 = vweird.f32 %v14649_v1 }
 0xa97   : > { %v5995_v9 = vadd.f32 0.112945676, %v5994_v51  ;;  %v5688_v61 = vsel %vm14746_vm5, %v14659_v12, %v5684_v40  ;;  %v5723_v62 = vmul.f32 %v14701_v25, %v5722_v59  ;;  %v5783_v20 = vmul.f32 %v5782_v32, %v14618_v15  ;;  %v9094_v10 = vld [vmem:[%s9974_s1 + $0x1a0] sm:$0xff] }
 0xa98   : > { %v6034_v44 = vmul.f32 %v6033_v49, %v14695_v7  ;;  %v14759_v42 = vpop.eup %9595  ;;  %v5729_v2 = vand.u32 2147483647, %v14649_v1  ;;  %v5980_v34 = vadd.f32 0.00028619796, %v5979_v58  ;;  %v14763_v54 = vadd.f32 %v4052_v50, %v13623_v18  ;;  %7630 = vmatpush.bf16.msra.mxu2 %v9094_v10 }
 0xa99   : > { %v14766_v60 = vadd.f32 %v4081_v39, %v13644_v53  ;;  %v5746_v51 = vadd.f32 0.18741608, %v5745_v17  ;;  %v5798_v12 = vmul.f32 %v5797_v11, %v14618_v15  ;;  %v5996_v40 = vmul.f32 %v5995_v9, %v14679_v33 }
 0xa9a   : > { %v6020_v59 = vadd.f32 0.00028619796, %v6019_v30  ;;  %v5693_v32 = vsel %vm14725_vm3, %v5692_v16, %v5688_v61  ;;  %vm5726_vm7 = vweird.f32 %v14701_v25  ;;  %v5731_v49 = vand.u32 2147483648, %v14649_v1 }
 0xa9b   : > { %v6035_v58 = vadd.f32 0.112945676, %v6034_v44  ;;  %v5724_v50 = vadd.f32 %v14701_v25, %v5723_v62  ;;  %v5761_v39 = vmul.f32 %v14759_v42, %v14714_v37  ;;  %v5784_v17 = vadd.f32 0.05243302, %v5783_v20  ;;  %vm14794_vm8 = vmor %vm5725_vm6, %vm5726_vm7 }
 0xa9c   : > { %v5997_v11 = vadd.f32 0.4994258, %v5996_v40  ;;  %v5981_v6 = vmul.f32 %v5980_v34, %v14679_v33  ;;  %v14780_v43 = vmul.f32 0.70710677, %v14763_v54  ;;  %v14783_v16 = vmul.f32 0.70710677, %v14766_v60 }
 0xa9d   : > { %v6036_v30 = vmul.f32 %v6035_v58, %v14695_v7  ;;  %v5694_v9 = vmul.f32 %v5693_v32, %v14704_v36  ;;  %v5747_v61 = vmul.f32 %v5746_v51, %v14555_v29  ;;  %v14787_v62 = vadd.f32 1.0, %v5798_v12  ;;  %v9077_v51 = vld [vmem:[%s9974_s1 + $0x118] sm:$0xff] }
 0xa9e   : > { %v6021_v20 = vmul.f32 %v6020_v59, %v14695_v7  ;;  %v6808_v44 = vadd.f32 1.0, %v8640_v0  ;;  %v5998_v40 = vmul.f32 %v5997_v11, %v14679_v33  ;;  %v6057_v29 = vmul.f32 %v14780_v43, %v14780_v43  ;;  %v9085_v12 = vld [vmem:[%s9974_s1 + $0x158] sm:$0xff]  ;;  %7573 = vmatpush.bf16.msra.mxu0 %v9077_v51 }
 0xa9f   : > { %v6037_v36 = vadd.f32 0.4994258, %v6036_v30  ;;  %v5728_v0 = vsel %vm14794_vm8, %v14701_v25, %v5724_v50  ;;  %vm5730_vm9 = vcmp.eq.f32.partialorder %v5729_v2, 8.507059e+37  ;;  %v5762_v1 = vsub.f32 1.0, %v5761_v39  ;;  %7602 = vmatpush.bf16.msra.mxu1 %v9085_v12 }
 0xaa0   : > { %v6097_v59 = vmul.f32 %v14783_v16, %v14783_v16  ;;  %v5732_v32 = vor.u32 1.1754944e-38, %v5731_v49  ;;  %v5785_v58 = vmul.f32 %v5784_v17, %v14618_v15  ;;  %v5982_v11 = vadd.f32 0.0036580483, %v5981_v6  ;;  %v9076_v17 = vld [vmem:[%s9974_s1 + $0x110] sm:$0xff] }
 0xaa1   : > { %v14809_v30 = vmin.f32 %v6057_v29, 16.0  ;;  %v8645_v55 = vclamps-f32 %v5694_v9, 1.0  ;;  %v5748_v34 = vadd.f32 1.1283791, %v5747_v61  ;;  %9597 = vrcp.f32 %v14787_v62  ;;  %v9084_v6 = vld [vmem:[%s9974_s1 + $0x150] sm:$0xff] }
 0xaa2   : > { %v6022_v25 = vadd.f32 0.0036580483, %v6021_v20  ;;  %v5733_v2 = vsel %vm5730_vm9, %v5732_v32, %v5728_v0  ;;  %v14815_v50 = vmul.f32 0.5, %v14626_v14  ;;  %v14817_v49 = vadd.f32 1.0, %v5998_v40  ;;  %v3997_v14 = vpop.f32.mrf.mxu0  ;;  %7574 = vmatpush.bf16.msra.mxu0 %v9076_v17 }
 0xaa3   : > { %v6038_v39 = vmul.f32 %v6037_v36, %v14695_v7  ;;  %v5709_v29 = vmul.f32 %v14750_v35, %v14483_v23  ;;  %v5763_v9 = vmul.f32 %v14759_v42, %v5762_v1  ;;  %v14826_v61 = vmul.f32 0.5, %v14629_v19  ;;  %7603 = vmatpush.bf16.msra.mxu1 %v9084_v6 }
 0xaa4   : > { %v14828_v20 = vmin.f32 %v6097_v59, 16.0  ;;  %v14831_v40 = vmul.f32 %v6808_v44, %v14538_v4  ;;  %v5786_v51 = vadd.f32 0.18741608, %v5785_v58  ;;  %v5983_v10 = vmul.f32 %v5982_v11, %v14679_v33 }
 0xaa5   : > { %v6070_v46 = vmul.f32 3.8918573e-05, %v14809_v30  ;;  %v6813_v36 = vadd.f32 1.0, %v8645_v55  ;;  %v5734_v23 = vmul.f32 %v5733_v2, %v5709_v29  ;;  %v5749_v35 = vmul.f32 %v5748_v34, %v14524_v3 }
 0xaa6   : > { %16093 = vst [vmem:[#allocation44_spill] sm:$0xff] %v14831_v40  ;;  %v6023_v19 = vmul.f32 %v6022_v25, %v14695_v7  ;;  %vm5766_vm10 = vweird.f32 %v14759_v42  ;;  %9599 = vrcp.f32 %v14817_v49  ;;  %v14839_v12 = vadd.f32 1.0, %v6038_v39 }
 0xaa7   : > { %v14842_v4 = vadd.f32 %v3997_v14, %v13523_v45  ;;  %v14844_v44 = vpop.eup %9597  ;;  %v5764_v0 = vadd.f32 %v14759_v42, %v5763_v9  ;;  %v6059_v55 = vmul.f32 2.1237322e-06, %v14809_v30  ;;  %v6071_v1 = vadd.f32 0.001143296, %v6070_v46 }
 0xaa8   : > { %v6110_v3 = vmul.f32 3.8918573e-05, %v14828_v20  ;;  %v5769_v59 = vand.u32 2147483647, %v14714_v37  ;;  %v5771_v32 = vand.u32 2147483648, %v14714_v37  ;;  %v5787_v58 = vmul.f32 %v5786_v51, %v14618_v15 }
 0xaa9   : > { %v5984_v11 = vadd.f32 0.05243302, %v5983_v10  ;;  %v8646_v34 = vclamps-f32 %v5734_v23, 1.0  ;;  %vm5765_vm11 = vweird.f32 %v14714_v37  ;;  %v6024_v25 = vadd.f32 0.05243302, %v6023_v19 }
 0xaaa   : > { %v6072_v2 = vmul.f32 %v6071_v1, %v14809_v30  ;;  %v14855_v39 = vmul.f32 %v6813_v36, %v14541_v31  ;;  %vm14859_vm12 = vmor %vm5765_vm11, %vm5766_vm10  ;;  %v5801_v6 = vmul.f32 %v14844_v44, %v14787_v62  ;;  %v6111_v15 = vadd.f32 0.001143296, %v6110_v3 }
 0xaab   : > { %v14866_v29 = vmul.f32 0.70710677, %v14842_v4  ;;  %v5768_v37 = vsel %vm14859_vm12, %v14759_v42, %v5764_v0  ;;  %9601 = vrcp.f32 %v14839_v12  ;;  %v6060_v31 = vadd.f32 0.00028619796, %v6059_v55 }
 0xaac   : > { %16094 = vst [vmem:[#allocation45_spill] sm:$0xff] %v14855_v39  ;;  %v6073_v9 = vadd.f32 0.014752088, %v6072_v2  ;;  %v14872_v14 = vpop.eup %9599  ;;  %vm5770_vm13 = vcmp.eq.f32.partialorder %v5769_v59, 8.507059e+37  ;;  %v5772_v51 = vor.u32 1.1754944e-38, %v5771_v32  ;;  %v5985_v46 = vmul.f32 %v5984_v11, %v14679_v33  ;;  %v9101_v39 = vld [vmem:[%s9974_s1 + $0x1d8] sm:$0xff] }
 0xaad   : > { %v5788_v10 = vadd.f32 1.1283791, %v5787_v58  ;;  %v14875_v36 = vadd.f32 1.0, %v8646_v34  ;;  %v6025_v23 = vmul.f32 %v6024_v25, %v14695_v7  ;;  %v6112_v1 = vmul.f32 %v6111_v15, %v14828_v20  ;;  %7660 = vmatpush.bf16.msra.mxu3 %v9101_v39 }
 0xaae   : > { %v6074_v19 = vmul.f32 %v6073_v9, %v14809_v30  ;;  %v5773_v42 = vsel %vm5770_vm13, %v5772_v51, %v5768_v37  ;;  %v5802_v0 = vsub.f32 1.0, %v5801_v6  ;;  %v6099_v55 = vmul.f32 2.1237322e-06, %v14828_v20 }
 0xaaf   : > { %v6297_v3 = vmul.f32 %v14866_v29, %v14866_v29  ;;  %v6001_v59 = vmul.f32 %v14872_v14, %v14817_v49  ;;  %v6061_v32 = vmul.f32 %v6060_v31, %v14809_v30  ;;  %v6113_v11 = vadd.f32 0.014752088, %v6112_v1 }
 0xab0   : > { %v6075_v58 = vadd.f32 0.112945676, %v6074_v19  ;;  %v5809_v34 = vand.u32 2147483647, %v14787_v62  ;;  %v5811_v25 = vand.u32 2147483648, %v14787_v62  ;;  %v14892_v15 = vmul.f32 %v5773_v42, %v5749_v35 }
 0xab1   : > { %v5986_v2 = vadd.f32 0.18741608, %v5985_v46  ;;  %v14888_v17 = vmin.f32 %v6297_v3, 16.0  ;;  %v14890_v6 = vpop.eup %9601  ;;  %v6026_v37 = vadd.f32 0.18741608, %v6025_v23  ;;  %v6114_v51 = vmul.f32 %v6113_v11, %v14828_v20  ;;  %v4026_v3 = vpop.f32.mrf.mxu1 }
 0xab2   : > { %v6076_v9 = vmul.f32 %v6075_v58, %v14809_v30  ;;  %v14897_v31 = vmul.f32 %v5788_v10, %v14597_v52  ;;  %v5803_v19 = vmul.f32 %v14844_v44, %v5802_v0  ;;  %v14901_v1 = vmul.f32 0.5, %v14763_v54 }
 0xab3   : > { %v6100_v46 = vadd.f32 0.00028619796, %v6099_v55  ;;  %vm5805_vm14 = vweird.f32 %v14787_v62  ;;  %v6002_v35 = vsub.f32 1.0, %v6001_v59  ;;  %v6062_v42 = vadd.f32 0.0036580483, %v6061_v32 }
 0xab4   : > { %v6115_v23 = vadd.f32 0.112945676, %v6114_v51  ;;  %v5987_v58 = vmul.f32 %v5986_v2, %v14679_v33  ;;  %v6041_v52 = vmul.f32 %v14890_v6, %v14839_v12  ;;  %v6077_v10 = vadd.f32 0.4994258, %v6076_v9  ;;  %v9093_v51 = vld [vmem:[%s9974_s1 + $0x198] sm:$0xff] }
 0xab5   : > { %v6310_v0 = vmul.f32 3.8918573e-05, %v14888_v17  ;;  %vm14909_vm15 = vcmp.eq.f32.partialorder %v5809_v34, 8.507059e+37  ;;  %v5812_v55 = vor.u32 1.1754944e-38, %v5811_v25  ;;  %v6027_v59 = vmul.f32 %v6026_v37, %v14695_v7  ;;  %7631 = vmatpush.bf16.msra.mxu2 %v9093_v51 }
 0xab6   : > { %v6116_v32 = vmul.f32 %v6115_v23, %v14828_v20  ;;  %v5804_v33 = vadd.f32 %v14844_v44, %v5803_v19  ;;  %vm5806_vm0 = vweird.f32 %v14844_v44  ;;  %v6101_v2 = vmul.f32 %v6100_v46, %v14828_v20 }
 0xab7   : > { %v14921_v9 = vadd.f32 %v4026_v3, %v13569_v28  ;;  %v6003_v34 = vmul.f32 %v14872_v14, %v6002_v35  ;;  %v6063_v54 = vmul.f32 %v6062_v42, %v14809_v30  ;;  %v6311_v40 = vadd.f32 0.001143296, %v6310_v0  ;;  %vm14929_vm1 = vmor %vm5805_vm14, %vm5806_vm0 }
 0xab8   : > { %v6117_v25 = vadd.f32 0.4994258, %v6116_v32  ;;  %v5988_v7 = vadd.f32 1.1283791, %v5987_v58  ;;  %v6042_v37 = vsub.f32 1.0, %v6041_v52  ;;  %v6078_v23 = vmul.f32 %v6077_v10, %v14809_v30 }
 0xab9   : > { %v6299_v19 = vmul.f32 2.1237322e-06, %v14888_v17  ;;  %vm6005_vm2 = vweird.f32 %v14817_v49  ;;  %v6009_v35 = vand.u32 2147483647, %v14817_v49  ;;  %v6011_v42 = vand.u32 2147483648, %v14817_v49 }
 0xaba   : > { %v14936_v3 = vadd.f32 1.1283791, %v6027_v59  ;;  %v5808_v39 = vsel %vm14929_vm1, %v14844_v44, %v5804_v33  ;;  %vm6006_vm3 = vweird.f32 %v14872_v14  ;;  %v6102_v58 = vadd.f32 0.0036580483, %v6101_v2  ;;  %v4055_v33 = vpop.f32.mrf.mxu2 }
 0xabb   : > { %v6118_v62 = vmul.f32 %v6117_v25, %v14828_v20  ;;  %v6004_v52 = vadd.f32 %v14872_v14, %v6003_v34  ;;  %v6064_v10 = vadd.f32 0.05243302, %v6063_v54  ;;  %v6312_v0 = vmul.f32 %v6311_v40, %v14888_v17  ;;  %vm14967_vm4 = vmor %vm6005_vm2, %vm6006_vm3 }
 0xabc   : > { %v14946_v32 = vmul.f32 0.70710677, %v14921_v9  ;;  %v6043_v59 = vmul.f32 %v14890_v6, %v6042_v37  ;;  %v14949_v51 = vadd.f32 1.0, %v6078_v23  ;;  %v6300_v5 = vadd.f32 0.00028619796, %v6299_v19 }
 0xabd   : > { %v6929_v44 = vpack.c.bf16 %v13766_v41, %v13493_v22  ;;  %v14953_v2 = vadd.f32 1.0, %v6118_v62  ;;  %v6313_v25 = vadd.f32 0.014752088, %v6312_v0  ;;  %v6930_v40 = vpack.c.bf16 %v13833_v38, %v13676_v13  ;;  %v9083_v0 = vld [vmem:[%s9974_s1 + $0x148] sm:$0xff] }
 0xabe   : > { %v6337_v54 = vmul.f32 %v14946_v32, %v14946_v32  ;;  %v5813_v34 = vsel %vm14909_vm15, %v5812_v55, %v5808_v39  ;;  %v6012_v37 = vor.u32 1.1754944e-38, %v6011_v42  ;;  %v6051_v23 = vand.u32 2147483648, %v14839_v12  ;;  %7604 = vmatpush.bf16.msra.mxu1 %v9083_v0 }
 0xabf   : > { %v6103_v19 = vmul.f32 %v6102_v58, %v14828_v20  ;;  %7476 = vmatmul.bf16.gmra.mxu0 %v6929_v44  ;;  %vm6046_vm5 = vweird.f32 %v14890_v6  ;;  %v6314_v13 = vmul.f32 %v6313_v25, %v14888_v17  ;;  %7505 = vmatmul.bf16.gmra.mxu1 %v6930_v40  ;;  %v14976_v38 = vadd.f32 %v4055_v33, %v13623_v18  ;;  %v4084_v44 = vpop.f32.mrf.mxu3 }
 0xac0   : > { %v14973_v41 = vmin.f32 %v6337_v54, 16.0  ;;  %v6008_v49 = vsel %vm14967_vm4, %v14872_v14, %v6004_v52  ;;  %v6044_v11 = vadd.f32 %v14890_v6, %v6043_v59  ;;  %v6065_v55 = vmul.f32 %v6064_v10, %v14809_v30  ;;  %v9075_v10 = vld [vmem:[%s9974_s1 + $0x108] sm:$0xff]  ;;  %v9100_v54 = vld [vmem:[%s9974_s1 + $0x1d0] sm:$0xff] }
 0xac1   : > { %9603 = vrcp.f32 %v14949_v51  ;;  %v6301_v46 = vmul.f32 %v6300_v5, %v14888_v17  ;;  %v6315_v42 = vadd.f32 0.112945676, %v6314_v13  ;;  %v14989_v58 = vmul.f32 %v14875_v36, %v14593_v24  ;;  %7575 = vmatpush.bf16.msra.mxu0 %v9075_v10  ;;  %7661 = vmatpush.bf16.msra.mxu3 %v9100_v54  ;;  %v9074_v13 = vld [vmem:[%s9974_s1 + $0x100] sm:$0xff] }
 0xac2   : > { %9605 = vrcp.f32 %v14953_v2  ;;  %v6350_v39 = vmul.f32 3.8918573e-05, %v14973_v41  ;;  %v5814_v62 = vmul.f32 %v5813_v34, %v14897_v31  ;;  %v6104_v14 = vadd.f32 0.05243302, %v6103_v19 }
 0xac3   : > { %v14993_v52 = vmul.f32 0.70710677, %v14976_v38  ;;  %vm6010_vm6 = vcmp.eq.f32.partialorder %v6009_v35, 8.507059e+37  ;;  %vm6045_vm7 = vweird.f32 %v14839_v12  ;;  %v6049_v5 = vand.u32 2147483647, %v14839_v12  ;;  %v9092_v35 = vld [vmem:[%s9974_s1 + $0x190] sm:$0xff] }
 0xac4   : > { %v6351_v59 = vadd.f32 0.001143296, %v6350_v39  ;;  %v5989_v24 = vmul.f32 %v5988_v7, %v14657_v56  ;;  %v6013_v36 = vsel %vm6010_vm6, %v6012_v37, %v6008_v49  ;;  %vm15002_vm8 = vmor %vm6045_vm7, %vm6046_vm5  ;;  %v6052_v33 = vor.u32 1.1754944e-38, %v6051_v23  ;;  %7632 = vmatpush.bf16.msra.mxu2 %v9092_v35 }
 0xac5   : > { %v6066_v25 = vadd.f32 0.18741608, %v6065_v55  ;;  %v6048_v12 = vsel %vm15002_vm8, %v14890_v6, %v6044_v11  ;;  %v6302_v56 = vadd.f32 0.0036580483, %v6301_v46  ;;  %v6316_v7 = vmul.f32 %v6315_v42, %v14888_v17  ;;  %v9082_v6 = vld [vmem:[%s9974_s1 + $0x140] sm:$0xff]  ;;  %7576 = vmatpush.bf16.msra.mxu0 %v9074_v13 }
 0xac6   : > { %v6377_v40 = vmul.f32 %v14993_v52, %v14993_v52  ;;  %v8648_v37 = vclamps-f32 %v5814_v62, 1.0  ;;  %v6105_v23 = vmul.f32 %v6104_v14, %v14828_v20  ;;  %v6352_v19 = vmul.f32 %v6351_v59, %v14973_v41  ;;  %7605 = vmatpush.bf16.msra.mxu1 %v9082_v6 }
 0xac7   : > { %v15014_v34 = vpop.eup %9603  ;;  %v15019_v22 = vadd.f32 %v4084_v44, %v13644_v53  ;;  %v16106_v11 = vclamps-f32 %v14892_v15, 1.0  ;;  %v6014_v46 = vmul.f32 %v6013_v36, %v5989_v24  ;;  %v6029_v42 = vmul.f32 %v14936_v3, %v14663_v48 }
 0xac8   : > { %v15023_v49 = vpop.eup %9605  ;;  %vm6050_vm9 = vcmp.eq.f32.partialorder %v6049_v5, 8.507059e+37  ;;  %v6067_v62 = vmul.f32 %v6066_v25, %v14809_v30  ;;  %v6339_v14 = vmul.f32 2.1237322e-06, %v14973_v41  ;;  %v6353_v10 = vadd.f32 0.014752088, %v6352_v19 }
 0xac9   : > { %16105 = vst [vmem:[#allocation46_spill] sm:$0xff] %v15019_v22  ;;  %v6815_v55 = vadd.f32 1.0, %v16106_v11  ;;  %v6053_v39 = vsel %vm6050_vm9, %v6052_v33, %v6048_v12  ;;  %v6081_v0 = vmul.f32 %v15014_v34, %v14949_v51  ;;  %v6303_v59 = vmul.f32 %v6302_v56, %v14888_v17 }
 0xaca   : > { %v6317_v15 = vadd.f32 0.4994258, %v6316_v7  ;;  %v15034_v44 = vmin.f32 %v6377_v40, 16.0  ;;  %v6816_v24 = vadd.f32 1.0, %v8648_v37  ;;  %v6106_v36 = vadd.f32 0.18741608, %v6105_v23 }
 0xacb   : > { %v6121_v48 = vmul.f32 %v15023_v49, %v14953_v2  ;;  %v15039_v30 = vmul.f32 0.70710677, %v15019_v22  ;;  %v15042_v3 = vmul.f32 %v6815_v55, %v14644_v21  ;;  %v8653_v5 = vclamps-f32 %v6014_v46, 1.0  ;;  %v16149_v22 = vld [vmem:[#allocation42_spill] sm:$0xff] }
 0xacc   : > { %v15045_v31 = vmul.f32 0.5, %v14766_v60  ;;  %v6354_v33 = vmul.f32 %v6353_v10, %v14973_v41  ;;  %v6054_v25 = vmul.f32 %v6053_v39, %v6029_v42  ;;  %v6068_v35 = vadd.f32 1.1283791, %v6067_v62 }
 0xacd   : > { %v15049_v54 = vmul.f32 0.5, %v14842_v4  ;;  %v6340_v12 = vadd.f32 0.00028619796, %v6339_v14  ;;  %v6082_v56 = vsub.f32 1.0, %v6081_v0  ;;  %v6304_v7 = vadd.f32 0.05243302, %v6303_v59 }
 0xace   : > { %v6318_v40 = vmul.f32 %v6317_v15, %v14888_v17  ;;  %v6390_v37 = vmul.f32 3.8918573e-05, %v15034_v44  ;;  %v15054_v21 = vmul.f32 %v6816_v24, %v14707_v27  ;;  %v6107_v60 = vmul.f32 %v6106_v36, %v14828_v20  ;;  %v16111_v36 = vld [vmem:[#allocation37_spill] sm:$0xff] }
 0xacf   : > { %v6122_v23 = vsub.f32 1.0, %v6121_v48  ;;  %v6417_v19 = vmul.f32 %v15039_v30, %v15039_v30  ;;  %v16107_v4 = vpack.c.bf16 %v14185_v8, %v13979_v63  ;;  %v15062_v13 = vadd.f32 1.0, %v8653_v5  ;;  %v16110_v63 = vld [vmem:[#allocation30_spill] sm:$0xff]  ;;  %v16112_v48 = vld [vmem:[#allocation21_spill] sm:$0xff] }
 0xad0   : > { %v15065_v6 = vmul.f32 0.5, %v14921_v9  ;;  %v6355_v11 = vadd.f32 0.112945676, %v6354_v33  ;;  %v6391_v55 = vadd.f32 0.001143296, %v6390_v37  ;;  %v16109_v27 = vpack.c.bf16 %v14221_v26, %v14042_v47 }
 0xad1   : > { %7577 = vmatmul.bf16.vlgmr.msra.gmra.mxu0 %v16107_v4  ;;  %v8654_v20 = vclamps-f32 %v6054_v25, 1.0  ;;  %v15071_v46 = vmul.f32 %v6068_v35, %v14780_v43  ;;  %v6341_v42 = vmul.f32 %v6340_v12, %v14973_v41  ;;  %v6931_v8 = vpack.c.bf16 %v16110_v63, %v13681_v57 }
 0xad2   : > { %16108 = vst [vmem:[#allocation47_spill] sm:$0xff] %v15065_v6  ;;  %7606 = vmatmul.bf16.vlgmr.msra.gmra.mxu1 %v16109_v27  ;;  %v6083_v39 = vmul.f32 %v15014_v34, %v6082_v56  ;;  %v6305_v9 = vmul.f32 %v6304_v7, %v14888_v17  ;;  %v15078_v62 = vadd.f32 1.0, %v6318_v40  ;;  %v6392_v14 = vmul.f32 %v6391_v55, %v15034_v44  ;;  %v3999_v40 = vpop.f32.mrf.mxu0 }
 0xad3   : > { %v6108_v10 = vadd.f32 1.1283791, %v6107_v60  ;;  %v6123_v47 = vmul.f32 %v15023_v49, %v6122_v23  ;;  %v6379_v26 = vmul.f32 2.1237322e-06, %v15034_v44  ;;  %v15083_v43 = vmin.f32 %v6417_v19, 16.0  ;;  %7534 = vmatmul.bf16.gmra.mxu2 %v6931_v8 }
 0xad4   : > { %vm6085_vm10 = vweird.f32 %v14949_v51  ;;  %v6089_v57 = vand.u32 2147483647, %v14949_v51  ;;  %v6356_v0 = vmul.f32 %v6355_v11, %v14973_v41  ;;  %v6393_v59 = vadd.f32 0.014752088, %v6392_v14 }
 0xad5   : > { %vm6086_vm11 = vweird.f32 %v15014_v34  ;;  %v6091_v15 = vand.u32 2147483648, %v14949_v51  ;;  %v6342_v24 = vadd.f32 0.0036580483, %v6341_v42  ;;  %v6932_v5 = vpack.c.bf16 %v16112_v48, %v16111_v36  ;;  %v9099_v36 = vld [vmem:[%s9974_s1 + $0x1c8] sm:$0xff]  ;;  %v4057_v51 = vpop.f32.mrf.mxu2 }
 0xad6   : > { %v6084_v33 = vadd.f32 %v15014_v34, %v6083_v39  ;;  %v6306_v25 = vadd.f32 0.18741608, %v6305_v9  ;;  %9607 = vrcp.f32 %v15078_v62  ;;  %v6394_v35 = vmul.f32 %v6393_v59, %v15034_v44  ;;  %vm15104_vm14 = vmor %vm6085_vm10, %vm6086_vm11  ;;  %v4028_v39 = vpop.f32.mrf.mxu1  ;;  %7662 = vmatpush.bf16.msra.mxu3 %v9099_v36 }
 0xad7   : > { %v6124_v12 = vadd.f32 %v15023_v49, %v6123_v47  ;;  %vm6126_vm12 = vweird.f32 %v15023_v49  ;;  %v6380_v56 = vadd.f32 0.00028619796, %v6379_v26  ;;  %v6430_v7 = vmul.f32 3.8918573e-05, %v15083_v43  ;;  %7563 = vmatmul.bf16.gmra.mxu3 %v6932_v5 }
 0xad8   : > { %v6822_v37 = vadd.f32 1.0, %v8654_v20  ;;  %v6109_v60 = vmul.f32 %v6108_v10, %v14783_v16  ;;  %vm6125_vm13 = vweird.f32 %v14953_v2  ;;  %v6357_v23 = vadd.f32 0.4994258, %v6356_v0 }
 0xad9   : > { %v6129_v4 = vand.u32 2147483647, %v14953_v2  ;;  %v6131_v11 = vand.u32 2147483648, %v14953_v2  ;;  %v6343_v55 = vmul.f32 %v6342_v24, %v14973_v41  ;;  %v6395_v27 = vadd.f32 0.112945676, %v6394_v35  ;;  %vm15116_vm0 = vmor %vm6125_vm13, %vm6126_vm12  ;;  %v9091_v24 = vld [vmem:[%s9974_s1 + $0x188] sm:$0xff] }
 0xada   : > { %v6088_v16 = vsel %vm15104_vm14, %v15014_v34, %v6084_v33  ;;  %vm6090_vm15 = vcmp.eq.f32.partialorder %v6089_v57, 8.507059e+37  ;;  %v6431_v20 = vadd.f32 0.001143296, %v6430_v7  ;;  %v15121_v42 = vadd.f32 %v3999_v40, %v13523_v45  ;;  %7633 = vmatpush.bf16.msra.mxu2 %v9091_v24 }
 0xadb   : > { %v6092_v63 = vor.u32 1.1754944e-38, %v6091_v15  ;;  %v6128_v2 = vsel %vm15116_vm0, %v15023_v49, %v6124_v12  ;;  %v6307_v8 = vmul.f32 %v6306_v25, %v14888_v17  ;;  %v6381_v34 = vmul.f32 %v6380_v56, %v15034_v44 }
 0xadc   : > { %v15128_v9 = vpop.eup %9607  ;;  %v6358_v14 = vmul.f32 %v6357_v23, %v14973_v41  ;;  %v6396_v10 = vmul.f32 %v6395_v27, %v15034_v44  ;;  %v6432_v45 = vmul.f32 %v6431_v20, %v15083_v43  ;;  %v15134_v47 = vmul.f32 0.70710677, %v15121_v42 }
 0xadd   : > { %v6093_v26 = vsel %vm6090_vm15, %v6092_v63, %v6088_v16  ;;  %vm6130_vm1 = vcmp.eq.f32.partialorder %v6129_v4, 8.507059e+37  ;;  %v6132_v49 = vor.u32 1.1754944e-38, %v6131_v11  ;;  %v6344_v17 = vadd.f32 0.05243302, %v6343_v55  ;;  %v9090_v4 = vld [vmem:[%s9974_s1 + $0x180] sm:$0xff] }
 0xade   : > { %v6419_v57 = vmul.f32 2.1237322e-06, %v15083_v43  ;;  %v6433_v0 = vadd.f32 0.014752088, %v6432_v45  ;;  %v6617_v59 = vmul.f32 %v15134_v47, %v15134_v47  ;;  %v15140_v15 = vadd.f32 %v4028_v39, %v13569_v28  ;;  %7634 = vmatpush.bf16.msra.mxu2 %v9090_v4 }
 0xadf   : > { %v6133_v48 = vsel %vm6130_vm1, %v6132_v49, %v6128_v2  ;;  %v6308_v5 = vadd.f32 1.1283791, %v6307_v8  ;;  %v6321_v33 = vmul.f32 %v15128_v9, %v15078_v62  ;;  %v6382_v25 = vadd.f32 0.0036580483, %v6381_v34 }
 0xae0   : > { %v15146_v35 = vadd.f32 1.0, %v6358_v14  ;;  %v6397_v12 = vadd.f32 0.4994258, %v6396_v10  ;;  %v6434_v56 = vmul.f32 %v6433_v0, %v15083_v43  ;;  %v15149_v7 = vmin.f32 %v6617_v59, 16.0  ;;  %v16118_v0 = vld [vmem:[#allocation33_spill] sm:$0xff]  ;;  %v16119_v59 = vld [vmem:[#allocation40_spill] sm:$0xff] }
 0xae1   : > { %v15153_v28 = vmul.f32 %v15062_v13, %v14815_v50  ;;  %v15156_v40 = vmul.f32 %v6822_v37, %v14826_v61  ;;  %v6094_v23 = vmul.f32 %v6093_v26, %v15071_v46  ;;  %v6345_v19 = vmul.f32 %v6344_v17, %v14973_v41  ;;  %v9098_v13 = vld [vmem:[%s9974_s1 + $0x1c0] sm:$0xff] }
 0xae2   : > { %v6134_v11 = vmul.f32 %v6133_v48, %v6109_v60  ;;  %v6420_v55 = vadd.f32 0.00028619796, %v6419_v57  ;;  %v6435_v27 = vadd.f32 0.112945676, %v6434_v56  ;;  %v15162_v16 = vmul.f32 0.70710677, %v15140_v15  ;;  %7663 = vmatpush.bf16.msra.mxu3 %v9098_v13  ;;  %v15185_v57 = vpop.f32.mrf.mxu3 }
 0xae3   : > { %v6322_v20 = vsub.f32 1.0, %v6321_v33  ;;  %v6383_v63 = vmul.f32 %v6382_v25, %v15034_v44  ;;  %v6619_v50 = vmul.f32 2.1237322e-06, %v15149_v7  ;;  %v6630_v61 = vmul.f32 3.8918573e-05, %v15149_v7  ;;  %v16121_v33 = vld [vmem:[#allocation38_spill] sm:$0xff] }
 0xae4   : > { %v15169_v46 = vmul.f32 %v6308_v5, %v14866_v29  ;;  %9609 = vrcp.f32 %v15146_v35  ;;  %v15173_v37 = vmul.f32 0.5, %v14976_v38  ;;  %v6398_v60 = vmul.f32 %v6397_v12, %v15034_v44  ;;  %v16122_v25 = vld [vmem:[#allocation27_spill] sm:$0xff] }
 0xae5   : > { %v8655_v2 = vclamps-f32 %v6094_v23, 1.0  ;;  %v6329_v8 = vand.u32 2147483647, %v15078_v62  ;;  %v6346_v34 = vadd.f32 0.18741608, %v6345_v19  ;;  %v15178_v39 = vadd.f32 %v4057_v51, %v13623_v18 }
 0xae6   : > { %16117 = vst [vmem:[#allocation30_spill] sm:$0xff] %v15173_v37  ;;  %v6421_v14 = vmul.f32 %v6420_v55, %v15083_v43  ;;  %v6620_v29 = vadd.f32 0.00028619796, %v6619_v50  ;;  %v6631_v10 = vadd.f32 0.001143296, %v6630_v61  ;;  %v6657_v45 = vmul.f32 %v15162_v16, %v15162_v16  ;;  %v16151_v37 = vld [vmem:[#allocation43_spill] sm:$0xff] }
 0xae7   : > { %v8656_v38 = vclamps-f32 %v6134_v11, 1.0  ;;  %v6323_v26 = vmul.f32 %v15128_v9, %v6322_v20  ;;  %v6384_v49 = vadd.f32 0.05243302, %v6383_v63  ;;  %v6436_v17 = vmul.f32 %v6435_v27, %v15083_v43 }
 0xae8   : > { %v16120_v18 = vpack.c.bf16 %v16118_v0, %v16119_v59  ;;  %v6331_v24 = vand.u32 2147483648, %v15078_v62  ;;  %v15191_v36 = vadd.f32 1.0, %v6398_v60  ;;  %v6632_v48 = vmul.f32 %v6631_v10, %v15149_v7  ;;  %v15224_v10 = vpop.f32.mrf.mxu1 }
 0xae9   : > { %v15194_v5 = vmin.f32 %v6657_v45, 16.0  ;;  %v16123_v12 = vpack.c.bf16 %v16121_v33, %v16122_v25  ;;  %v6823_v56 = vadd.f32 1.0, %v8655_v2  ;;  %vm6326_vm2 = vweird.f32 %v15128_v9  ;;  %v15213_v2 = vpop.f32.mrf.mxu0  ;;  %16127 = vst [vmem:[#allocation21_spill] sm:$0xff] %v15224_v10  ;;  %v15244_v25 = vpop.f32.mrf.mxu2 }
 0xaea   : > { %7635 = vmatmul.bf16.vlgmr.msra.gmra.mxu2 %v16120_v18  ;;  %v6347_v23 = vmul.f32 %v6346_v34, %v14973_v41  ;;  %v15202_v19 = vmul.f32 0.70710677, %v15178_v39  ;;  %v15204_v4 = vpop.eup %9609  ;;  %v6422_v11 = vadd.f32 0.0036580483, %v6421_v14  ;;  %v6621_v55 = vmul.f32 %v6620_v29, %v15149_v7  ;;  %16124 = vst [vmem:[#allocation37_spill] sm:$0xff] %v15213_v2 }
 0xaeb   : > { %7664 = vmatmul.bf16.vlgmr.msra.gmra.mxu3 %v16123_v12  ;;  %v6633_v27 = vadd.f32 0.014752088, %v6632_v48  ;;  %v6670_v51 = vmul.f32 3.8918573e-05, %v15194_v5  ;;  %v6824_v20 = vadd.f32 1.0, %v8656_v38  ;;  %v6324_v63 = vadd.f32 %v15128_v9, %v6323_v26  ;;  %16130 = vst [vmem:[#allocation33_spill] sm:$0xff] %v15244_v25 }
 0xaec   : > { %v6385_v50 = vmul.f32 %v6384_v49, %v15034_v44  ;;  %v6437_v61 = vadd.f32 0.4994258, %v6436_v17  ;;  %9611 = vrcp.f32 %v15191_v36  ;;  %v6659_v13 = vmul.f32 2.1237322e-06, %v15194_v5 }
 0xaed   : > { %v6634_v41 = vmul.f32 %v6633_v27, %v15149_v7  ;;  %v6671_v60 = vadd.f32 0.001143296, %v6670_v51  ;;  %vm6325_vm3 = vweird.f32 %v15078_v62  ;;  %vm15216_vm4 = vcmp.eq.f32.partialorder %v6329_v8, 8.507059e+37 }
 0xaee   : > { %v6361_v14 = vmul.f32 %v15204_v4, %v15146_v35  ;;  %v6697_v29 = vmul.f32 %v15202_v19, %v15202_v19  ;;  %vm15228_vm5 = vmor %vm6325_vm3, %vm6326_vm2  ;;  %v6332_v38 = vor.u32 1.1754944e-38, %v6331_v24  ;;  %v6348_v62 = vadd.f32 1.1283791, %v6347_v23 }
 0xaef   : > { %v6423_v8 = vmul.f32 %v6422_v11, %v15083_v43  ;;  %v6622_v26 = vadd.f32 0.0036580483, %v6621_v55  ;;  %v6328_v49 = vsel %vm15228_vm5, %v15128_v9, %v6324_v63  ;;  %v6438_v17 = vmul.f32 %v6437_v61, %v15083_v43  ;;  %v15249_v55 = vpop.f32.mrf.mxu3 }
 0xaf0   : > { %v6635_v0 = vadd.f32 0.112945676, %v6634_v41  ;;  %v6672_v59 = vmul.f32 %v6671_v60, %v15194_v5  ;;  %v15239_v18 = vmul.f32 %v6823_v56, %v14901_v1  ;;  %v15242_v48 = vmul.f32 %v6824_v20, %v15045_v31  ;;  %16131 = vst [vmem:[#allocation40_spill] sm:$0xff] %v15249_v55 }
 0xaf1   : > { %v6386_v24 = vadd.f32 0.18741608, %v6385_v50  ;;  %v6660_v33 = vadd.f32 0.00028619796, %v6659_v13  ;;  %v6362_v12 = vsub.f32 1.0, %v6361_v14  ;;  %v15247_v9 = vmin.f32 %v6697_v29, 16.0 }
 0xaf2   : > { %v6636_v23 = vmul.f32 %v6635_v0, %v15149_v7  ;;  %v6673_v11 = vadd.f32 0.014752088, %v6672_v59  ;;  %v15251_v27 = vpop.eup %9611  ;;  %v6333_v1 = vsel %vm15216_vm4, %v6332_v38, %v6328_v49  ;;  %v15256_v31 = vmul.f32 %v6348_v62, %v14946_v32  ;;  %v15282_v0 = vpop.f32.mrf.mxu1 }
 0xaf3   : > { %v6424_v56 = vadd.f32 0.05243302, %v6423_v8  ;;  %v6623_v51 = vmul.f32 %v6622_v26, %v15149_v7  ;;  %v15259_v20 = vadd.f32 1.0, %v6438_v17  ;;  %v6699_v61 = vmul.f32 2.1237322e-06, %v15247_v9  ;;  %v15275_v26 = vpop.f32.mrf.mxu0  ;;  %16133 = vst [vmem:[#allocation27_spill] sm:$0xff] %v15282_v0 }
 0xaf4   : > { %v6637_v63 = vadd.f32 0.4994258, %v6636_v23  ;;  %v6674_v50 = vmul.f32 %v6673_v11, %v15194_v5  ;;  %vm6365_vm6 = vweird.f32 %v15146_v35  ;;  %v6369_v41 = vand.u32 2147483647, %v15146_v35  ;;  %16132 = vst [vmem:[#allocation38_spill] sm:$0xff] %v15275_v26  ;;  %v16145_v26 = vld [vmem:[#allocation39_spill] sm:$0xff] }
 0xaf5   : > { %v6387_v13 = vmul.f32 %v6386_v24, %v15034_v44  ;;  %v6661_v60 = vmul.f32 %v6660_v33, %v15194_v5  ;;  %v6363_v32 = vmul.f32 %v15204_v4, %v6362_v12  ;;  %v6401_v34 = vmul.f32 %v15251_v27, %v15191_v36 }
 0xaf6   : > { %v6638_v14 = vmul.f32 %v6637_v63, %v15149_v7  ;;  %v6675_v29 = vadd.f32 0.112945676, %v6674_v50  ;;  %v15272_v45 = vmul.f32 %v6333_v1, %v15169_v46  ;;  %v6371_v38 = vand.u32 2147483648, %v15146_v35  ;;  %v15298_v63 = vpop.f32.mrf.mxu2 }
 0xaf7   : > { %v6624_v62 = vadd.f32 0.05243302, %v6623_v51  ;;  %v6700_v8 = vadd.f32 0.00028619796, %v6699_v61  ;;  %v6425_v44 = vmul.f32 %v6424_v56, %v15083_v43  ;;  %9613 = vrcp.f32 %v15259_v20  ;;  %16137 = vst [vmem:[#allocation49_spill] sm:$0xff] %v15298_v63 }
 0xaf8   : > { %v15279_v49 = vadd.f32 1.0, %v6638_v14  ;;  %v6676_v17 = vmul.f32 %v6675_v29, %v15194_v5  ;;  %vm6366_vm7 = vweird.f32 %v15204_v4  ;;  %v6388_v46 = vadd.f32 1.1283791, %v6387_v13 }
 0xaf9   : > { %v6662_v59 = vadd.f32 0.0036580483, %v6661_v60  ;;  %v6710_v24 = vmul.f32 3.8918573e-05, %v15247_v9  ;;  %v6364_v33 = vadd.f32 %v15204_v4, %v6363_v32  ;;  %v6402_v12 = vsub.f32 1.0, %v6401_v34  ;;  %v15303_v32 = vpop.f32.mrf.mxu3  ;;  %vm15310_vm9 = vmor %vm6365_vm6, %vm6366_vm7 }
 0xafa   : > { %9615 = vrcp.f32 %v15279_v49  ;;  %v15290_v23 = vadd.f32 %v15185_v57, %v13644_v53  ;;  %vm15292_vm8 = vcmp.eq.f32.partialorder %v6369_v41, 8.507059e+37  ;;  %v6625_v1 = vmul.f32 %v6624_v62, %v15149_v7  ;;  %16138 = vst [vmem:[#allocation50_spill] sm:$0xff] %v15303_v32  ;;  %v7496_v11 = vpop.f32.mrf.mxu1  ;;  %v15367_v53 = vld [vmem:[%s731_s2] ss:$0 sm:$0xff] }
 0xafb   : > { %v6677_v56 = vadd.f32 0.4994258, %v6676_v17  ;;  %v6701_v51 = vmul.f32 %v6700_v8, %v15247_v9  ;;  %v6372_v50 = vor.u32 1.1754944e-38, %v6371_v38  ;;  %v6426_v61 = vadd.f32 0.18741608, %v6425_v44 }
 0xafc   : > { %16134 = vst [vmem:[#allocation48_spill] sm:$0xff] %v15290_v23  ;;  %v15301_v13 = vmul.f32 0.5, %v15121_v42  ;;  %v6711_v60 = vadd.f32 0.001143296, %v6710_v24  ;;  %v15315_v41 = vmul.f32 %v6388_v46, %v14993_v52  ;;  %v6663_v34 = vmul.f32 %v6662_v59, %v15194_v5 }
 0xafd   : > { %v6678_v42 = vmul.f32 %v6677_v56, %v15194_v5  ;;  %v15319_v14 = vpop.eup %9613  ;;  %v6368_v29 = vsel %vm15310_vm9, %v15204_v4, %v6364_v33  ;;  %v6403_v38 = vmul.f32 %v15251_v27, %v6402_v12  ;;  %v15327_v62 = vmul.f32 0.70710677, %v15290_v23  ;;  %v16148_v23 = vld [vmem:[#allocation28_spill] sm:$0xff] }
 0xafe   : > { %v6712_v35 = vmul.f32 %v6711_v60, %v15247_v9  ;;  %vm6405_vm10 = vweird.f32 %v15191_v36  ;;  %v6626_v52 = vadd.f32 0.18741608, %v6625_v1  ;;  %v6702_v44 = vadd.f32 0.0036580483, %v6701_v51  ;;  %v7467_v51 = vpop.f32.mrf.mxu0 }
 0xaff   : > { %16141 = vst [vmem:[#allocation51_spill] sm:$0xff] %v15327_v62  ;;  %v15330_v8 = vadd.f32 1.0, %v6678_v42  ;;  %v6411_v46 = vand.u32 2147483648, %v15191_v36  ;;  %v6427_v59 = vmul.f32 %v6426_v61, %v15083_v43  ;;  %v6737_v24 = vmul.f32 %v15327_v62, %v15327_v62  ;;  %v16150_v62 = vld [vmem:[#allocation29_spill] sm:$0xff] }
 0xb00   : > { %v15332_v17 = vpop.eup %9615  ;;  %v6713_v4 = vadd.f32 0.014752088, %v6712_v35  ;;  %v6373_v33 = vsel %vm15292_vm8, %v6372_v50, %v6368_v29  ;;  %v6441_v12 = vmul.f32 %v15319_v14, %v15259_v20  ;;  %v6664_v56 = vadd.f32 0.05243302, %v6663_v34 }
 0xb01   : > { %v6641_v1 = vmul.f32 %v15332_v17, %v15279_v49  ;;  %v15345_v60 = vadd.f32 %v15251_v27, %v6403_v38  ;;  %vm6406_vm11 = vweird.f32 %v15251_v27  ;;  %v6409_v43 = vand.u32 2147483647, %v15191_v36 }
 0xb02   : > { %9617 = vrcp.f32 %v15330_v8  ;;  %v6627_v50 = vmul.f32 %v6626_v52, %v15149_v7  ;;  %v6703_v57 = vmul.f32 %v6702_v44, %v15247_v9  ;;  %v6714_v42 = vmul.f32 %v6713_v4, %v15247_v9  ;;  %vm15371_vm12 = vmor %vm6405_vm10, %vm6406_vm11  ;;  %v16144_v4 = vld [vmem:[#allocation32_spill] sm:$0xff] }
 0xb03   : > { %v6642_v61 = vsub.f32 1.0, %v6641_v1  ;;  %v15354_v34 = vmul.f32 %v6373_v33, %v15256_v31  ;;  %v15356_v29 = vor.u32 1.1754944e-38, %v6411_v46  ;;  %v15358_v38 = vadd.f32 1.1283791, %v6427_v59  ;;  %v7525_v59 = vpop.f32.mrf.mxu2  ;;  %v7554_v1 = vpop.f32.mrf.mxu3 }
 0xb04   : > { %v15360_v35 = vmin.f32 %v6737_v24, 16.0  ;;  %v6442_v31 = vsub.f32 1.0, %v6441_v12  ;;  %v6665_v44 = vmul.f32 %v6664_v56, %v15194_v5  ;;  %v6715_v46 = vadd.f32 0.112945676, %v6714_v42 }
 0xb05   : > { %v6628_v32 = vadd.f32 1.1283791, %v6627_v50  ;;  %v6643_v12 = vmul.f32 %v15332_v17, %v6642_v61  ;;  %v6704_v52 = vadd.f32 0.05243302, %v6703_v57  ;;  %v7468_v55 = vadd.f32 %v15367_v53, %v7467_v51 }
 0xb06   : > { %v6739_v36 = vmul.f32 2.1237322e-06, %v15360_v35  ;;  %v6750_v33 = vmul.f32 3.8918573e-05, %v15360_v35  ;;  %v6716_v56 = vmul.f32 %v6715_v46, %v15247_v9  ;;  %v6917_v24 = vpack.c.bf16 %v16145_v26, %v16144_v4  ;;  %v7469_v4 = vpop.f32.mrf.mxu0 }
 0xb07   : > { %v15392_v25 = vmul.f32 %v15319_v14, %v6442_v31  ;;  %vm6645_vm13 = vweird.f32 %v15279_v49  ;;  %v6666_v50 = vadd.f32 0.18741608, %v6665_v44  ;;  %v6649_v57 = vand.u32 2147483647, %v15279_v49 }
 0xb08   : > { %v15386_v42 = vpop.eup %9617  ;;  %v6740_v63 = vadd.f32 0.00028619796, %v6739_v36  ;;  %v6751_v0 = vadd.f32 0.001143296, %v6750_v33  ;;  %v6717_v46 = vadd.f32 0.4994258, %v6716_v56  ;;  %7582 = vmatmul.bf16.gmra.mxu0 %v6917_v24  ;;  %v6644_v26 = vadd.f32 %v15332_v17, %v6643_v12 }
 0xb09   : > { %v6681_v61 = vmul.f32 %v15386_v42, %v15330_v8  ;;  %vm15400_vm14 = vcmp.eq.f32.partialorder %v6409_v43, 8.507059e+37  ;;  %vm6646_vm15 = vweird.f32 %v15332_v17  ;;  %v6651_v31 = vand.u32 2147483648, %v15279_v49 }
 0xb0a   : > { %v6741_v36 = vmul.f32 %v6740_v63, %v15360_v35  ;;  %v6752_v33 = vmul.f32 %v6751_v0, %v15360_v35  ;;  %v6705_v10 = vmul.f32 %v6704_v52, %v15247_v9  ;;  %v6718_v56 = vmul.f32 %v6717_v46, %v15247_v9  ;;  %v7498_v0 = vpop.f32.mrf.mxu1  ;;  %vm15417_vm0 = vmor %vm6645_vm13, %vm6646_vm15 }
 0xb0b   : > { %v6682_v44 = vsub.f32 1.0, %v6681_v61  ;;  %v7497_v2 = vadd.f32 %v7496_v11, %v7468_v55  ;;  %v6667_v43 = vmul.f32 %v6666_v50, %v15194_v5  ;;  %v6918_v12 = vpack.c.bf16 %v16149_v22, %v16148_v23  ;;  %v16155_v23 = vld [vmem:[#allocation44_spill] sm:$0xff]  ;;  %v7527_v46 = vpop.f32.mrf.mxu2 }
 0xb0c   : > { %v6753_v63 = vadd.f32 0.014752088, %v6752_v33  ;;  %v6919_v6 = vpack.c.bf16 %v16151_v37, %v16150_v62  ;;  %v15421_v52 = vadd.f32 1.0, %v6718_v56  ;;  %v6742_v55 = vadd.f32 0.0036580483, %v6741_v36  ;;  %v16154_v37 = vld [vmem:[#allocation41_spill] sm:$0xff] }
 0xb0d   : > { %v6683_v24 = vmul.f32 %v15386_v42, %v6682_v44  ;;  %v7526_v5 = vadd.f32 %v7525_v59, %v7497_v2  ;;  %v6648_v50 = vsel %vm15417_vm0, %v15332_v17, %v6644_v26  ;;  %v6652_v22 = vor.u32 1.1754944e-38, %v6651_v31  ;;  %7611 = vmatmul.bf16.gmra.mxu1 %v6918_v12  ;;  %v7556_v2 = vpop.f32.mrf.mxu3 }
 0xb0e   : > { %v6754_v11 = vmul.f32 %v6753_v63, %v15360_v35  ;;  %7640 = vmatmul.bf16.gmra.mxu2 %v6919_v6  ;;  %v6920_v49 = vpack.c.bf16 %v16155_v23, %v16154_v37  ;;  %v7470_v62 = vadd.f32 %v15367_v53, %v7469_v4  ;;  %vm6686_vm1 = vweird.f32 %v15386_v42 }
 0xb0f   : > { %v6684_v33 = vadd.f32 %v15386_v42, %v6683_v24  ;;  %v6706_v36 = vadd.f32 0.18741608, %v6705_v10  ;;  %9619 = vrcp.f32 %v15421_v52  ;;  %vm6650_vm2 = vcmp.eq.f32.partialorder %v6649_v57, 8.507059e+37  ;;  %v7472_v24 = vpop.f32.mrf.mxu0 }
 0xb10   : > { %vm6685_vm3 = vweird.f32 %v15330_v8  ;;  %v6691_v17 = vand.u32 2147483648, %v15330_v8  ;;  %v6755_v6 = vadd.f32 0.112945676, %v6754_v11  ;;  %7669 = vmatmul.bf16.gmra.mxu3 %v6920_v49  ;;  %vm6445_vm4 = vweird.f32 %v15259_v20 }
 0xb11   : > { %v6653_v59 = vsel %vm6650_vm2, %v6652_v22, %v6648_v50  ;;  %v6689_v26 = vand.u32 2147483647, %v15330_v8  ;;  %v6743_v31 = vmul.f32 %v6742_v55, %v15360_v35  ;;  %v15438_v44 = vadd.f32 %v7554_v1, %v7526_v5  ;;  %vm15443_vm5 = vmor %vm6685_vm3, %vm6686_vm1 }
 0xb12   : > { %v6629_v10 = vmul.f32 %v6628_v32, %v15134_v47  ;;  %v6668_v4 = vadd.f32 1.1283791, %v6667_v43  ;;  %v6756_v56 = vmul.f32 %v6755_v6, %v15360_v35  ;;  %v7499_v63 = vadd.f32 %v7498_v0, %v7470_v62  ;;  %v7501_v43 = vpop.f32.mrf.mxu1 }
 0xb13   : > { %v16158_v8 = vsel %vm15371_vm12, %v15251_v27, %v15345_v60  ;;  %vm6446_vm6 = vweird.f32 %v15319_v14  ;;  %v6688_v32 = vsel %vm15443_vm5, %v15386_v42, %v6684_v33  ;;  %v6707_v1 = vmul.f32 %v6706_v36, %v15247_v9  ;;  %v16159_v60 = vld [vmem:[#allocation45_spill] sm:$0xff]  ;;  %v7530_v50 = vpop.f32.mrf.mxu2 }
 0xb14   : > { %v6413_v47 = vsel %vm15400_vm14, %v15356_v29, %v16158_v8  ;;  %v6654_v0 = vmul.f32 %v6653_v59, %v6629_v10  ;;  %v6692_v12 = vor.u32 1.1754944e-38, %v6691_v17  ;;  %v6757_v61 = vadd.f32 0.4994258, %v6756_v56  ;;  %vm15480_vm8 = vmor %vm6445_vm4, %vm6446_vm6 }
 0xb15   : > { %v7528_v7 = vadd.f32 %v7527_v46, %v7499_v63  ;;  %v9620_v55 = vpop.eup %9619  ;;  %vm6690_vm7 = vcmp.eq.f32.partialorder %v6689_v26, 8.507059e+37  ;;  %v6744_v27 = vadd.f32 0.05243302, %v6743_v31  ;;  %v6925_v51 = vpack.c.bf16 %v15153_v28, %v16159_v60  ;;  %v7559_v62 = vpop.f32.mrf.mxu3 }
 0xb16   : > { %v7473_v29 = vadd.f32 %v15367_v53, %v7472_v24  ;;  %v6444_v11 = vadd.f32 %v15319_v14, %v15392_v25  ;;  %v6669_v42 = vmul.f32 %v6668_v4, %v15162_v16  ;;  %v6693_v5 = vsel %vm6690_vm7, %v6692_v12, %v6688_v32 }
 0xb17   : > { %v6721_v9 = vmul.f32 %v9620_v55, %v15421_v52  ;;  %v6708_v22 = vadd.f32 1.1283791, %v6707_v1  ;;  %v6758_v37 = vmul.f32 %v6757_v61, %v15360_v35  ;;  %v15469_v23 = vadd.f32 %v7556_v2, %v7528_v7  ;;  %v7474_v10 = vpop.f32.mrf.mxu0 }
 0xb18   : > { %v7502_v49 = vadd.f32 %v7501_v43, %v7473_v29  ;;  %v8669_v46 = vclamps-f32 %v6654_v0, 1.0  ;;  %v6729_v33 = vand.u32 2147483647, %v15421_v52  ;;  %v6731_v36 = vand.u32 2147483648, %v15421_v52  ;;  %7587 = vmatmul.bf16.gmra.mxu0 %v6925_v51 }
 0xb19   : > { %v6722_v28 = vsub.f32 1.0, %v6721_v9  ;;  %v6694_v25 = vmul.f32 %v6693_v5, %v6669_v42  ;;  %v6745_v16 = vmul.f32 %v6744_v27, %v15360_v35  ;;  %v15474_v17 = vadd.f32 1.0, %v6758_v37 }
 0xb1a   : > { %v7531_v6 = vadd.f32 %v7530_v50, %v7502_v49  ;;  %vm6726_vm9 = vweird.f32 %v9620_v55  ;;  %v6926_v26 = vpack.c.bf16 %v15156_v40, %v14989_v58  ;;  %v6927_v31 = vpack.c.bf16 %v15239_v18, %v15042_v3  ;;  %v7503_v8 = vpop.f32.mrf.mxu1 }
 0xb1b   : > { %v6723_v59 = vmul.f32 %v9620_v55, %v6722_v28  ;;  %v6414_v4 = vmul.f32 %v6413_v47, %v15315_v41  ;;  %v6448_v57 = vsel %vm15480_vm8, %v15319_v14, %v6444_v11  ;;  %vm6725_vm10 = vweird.f32 %v15421_v52  ;;  %v7532_v32 = vpop.f32.mrf.mxu2 }
 0xb1c   : > { %9621 = vrcp.f32 %v15474_v17  ;;  %v6928_v63 = vpack.c.bf16 %v15242_v48, %v15054_v21  ;;  %v7475_v58 = vadd.f32 %v15367_v53, %v7474_v10  ;;  %v15497_v40 = vadd.f32 %v7559_v62, %v7531_v6  ;;  %vm6727_vm11 = vmor %vm6725_vm10, %vm6726_vm9  ;;  %v16166_v6 = vld [vmem:[#allocation30_spill] sm:$0xff] }
 0xb1d   : > { %v6724_v56 = vadd.f32 %v9620_v55, %v6723_v59  ;;  %v6837_v3 = vadd.f32 1.0, %v8669_v46  ;;  %v8670_v18 = vclamps-f32 %v6694_v25, 1.0  ;;  %v6732_v41 = vor.u32 1.1754944e-38, %v6731_v36  ;;  %7616 = vmatmul.bf16.gmra.mxu1 %v6926_v26  ;;  %v7561_v11 = vpop.f32.mrf.mxu3  ;;  %v16167_v59 = vld [vmem:[#allocation51_spill] sm:$0xff] }
 0xb1e   : > { %v6746_v24 = vadd.f32 0.18741608, %v6745_v16  ;;  %v6709_v14 = vmul.f32 %v6708_v22, %v15202_v19  ;;  %vm6730_vm12 = vcmp.eq.f32.partialorder %v6729_v33, 8.507059e+37  ;;  %7645 = vmatmul.bf16.gmra.mxu2 %v6927_v31  ;;  %v7504_v52 = vadd.f32 %v7503_v8, %v7475_v58 }
 0xb1f   : > { %v6728_v47 = vsel %vm6727_vm11, %v9620_v55, %v6724_v56  ;;  %v16162_v21 = vclamps-f32 %v15272_v45, 1.0  ;;  %v8662_v1 = vclamps-f32 %v15354_v34, 1.0  ;;  %v16163_v43 = vand.u32 2147483648, %v15259_v20 }
 0xb20   : > { %v6733_v12 = vsel %vm6730_vm12, %v6732_v41, %v6728_v47  ;;  %v8663_v61 = vclamps-f32 %v6414_v4, 1.0  ;;  %v16164_v7 = vand.u32 2147483647, %v15259_v20  ;;  %7674 = vmatmul.bf16.gmra.mxu3 %v6928_v63  ;;  %v7533_v55 = vadd.f32 %v7532_v32, %v7504_v52 }
 0xb21   : > { %v6829_v48 = vadd.f32 1.0, %v16162_v21  ;;  %v6452_v0 = vor.u32 1.1754944e-38, %v16163_v43  ;;  %v6734_v19 = vmul.f32 %v6733_v12, %v6709_v14  ;;  %v6901_v51 = vmul.f32 %v6837_v3, %v15301_v13 }
 0xb22   : > { %vm6450_vm13 = vcmp.eq.f32.partialorder %v16164_v7, 8.507059e+37  ;;  %v9622_v27 = vpop.eup %9621  ;;  %v6838_v29 = vadd.f32 1.0, %v8670_v18  ;;  %v6747_v45 = vmul.f32 %v6746_v24, %v15360_v35  ;;  %v6429_v34 = vmul.f32 %v15358_v38, %v15039_v30  ;;  %v16168_v18 = vld [vmem:[#allocation46_spill] sm:$0xff]  ;;  %v16169_v24 = vld [vmem:[#allocation48_spill] sm:$0xff] }
 0xb23   : > { %v6453_v60 = vsel %vm6450_vm13, %v6452_v0, %v6448_v57  ;;  %v8671_v42 = vclamps-f32 %v6734_v19, 1.0  ;;  %v6761_v5 = vmul.f32 %v9622_v27, %v15474_v17  ;;  %v15512_v9 = vadd.f32 %v7561_v11, %v7533_v55  ;;  %v16170_v55 = vld [vmem:[#allocation37_spill] sm:$0xff] }
 0xb24   : > { %v6893_v20 = vmul.f32 %v6829_v48, %v15049_v54  ;;  %v6830_v50 = vadd.f32 1.0, %v8662_v1  ;;  %v4150_v22 = vmul.f32 0.5, %v15140_v15  ;;  %v4151_v37 = vmul.f32 0.5, %v15178_v39  ;;  %v16165_v54 = vld [vmem:[#allocation47_spill] sm:$0xff] }
 0xb25   : > { %v6831_v13 = vadd.f32 1.0, %v8663_v61  ;;  %v6454_v49 = vmul.f32 %v6453_v60, %v6429_v34  ;;  %v6839_v62 = vadd.f32 1.0, %v8671_v42  ;;  %v6762_v35 = vsub.f32 1.0, %v6761_v5  ;;  %v16172_v34 = vld [vmem:[#allocation33_spill] sm:$0xff] }
 0xb26   : > { %v6902_v46 = vmul.f32 %v6838_v29, %v4150_v22  ;;  %v6748_v28 = vadd.f32 1.1283791, %v6747_v45  ;;  %v6771_v30 = vand.u32 2147483648, %v15474_v17  ;;  %v6933_v38 = vpack.c.bf16 %v6901_v51, %v6893_v20  ;;  %v16171_v29 = vld [vmem:[#allocation21_spill] sm:$0xff] }
 0xb27   : > { %v6903_v33 = vmul.f32 %v6839_v62, %v4151_v37  ;;  %v6763_v36 = vmul.f32 %v9622_v27, %v6762_v35  ;;  %vm6766_vm14 = vweird.f32 %v9622_v27  ;;  %v6769_v25 = vand.u32 2147483647, %v15474_v17  ;;  %v16175_v35 = vld [vmem:[#allocation27_spill] sm:$0xff] }
 0xb28   : > { %v6894_v16 = vmul.f32 %v6830_v50, %v16165_v54  ;;  %v6895_v15 = vmul.f32 %v6831_v13, %v16166_v6  ;;  %vm6765_vm15 = vweird.f32 %v15474_v17  ;;  %v8664_v39 = vclamps-f32 %v6454_v49, 1.0  ;;  %7592 = vmatmul.bf16.gmra.mxu0 %v6933_v38  ;;  %v16173_v50 = vld [vmem:[#allocation38_spill] sm:$0xff]  ;;  %v16174_v13 = vld [vmem:[#allocation40_spill] sm:$0xff]  ;;  %v16176_v38 = vld [vmem:[#allocation49_spill] sm:$0xff] }
 0xb29   : > { %v6764_v2 = vadd.f32 %v9622_v27, %v6763_v36  ;;  %v6749_v26 = vmul.f32 %v6748_v28, %v16167_v59  ;;  %vm6767_vm0 = vmor %vm6765_vm15, %vm6766_vm14  ;;  %v6772_v31 = vor.u32 1.1754944e-38, %v6771_v30  ;;  %vm6770_vm1 = vcmp.eq.f32.partialorder %v6769_v25, 8.507059e+37  ;;  %v16178_v59 = vld [vmem:[#allocation26_spill] sm:$0xff] }
 0xb2a   : > { %v6934_v4 = vpack.c.bf16 %v6902_v46, %v6894_v16  ;;  %v6935_v57 = vpack.c.bf16 %v6903_v33, %v6895_v15  ;;  %v6832_v58 = vadd.f32 1.0, %v8664_v39  ;;  %v4144_v41 = vmul.f32 0.5, %v16168_v18  ;;  %v16177_v16 = vld [vmem:[#allocation50_spill] sm:$0xff] }
 0xb2b   : > { %v6768_v10 = vsel %vm6767_vm0, %v9622_v27, %v6764_v2  ;;  %v4152_v17 = vmul.f32 0.5, %v16169_v24  ;;  %v7463_v27 = vadd.f32 %v15367_v53, %v16170_v55  ;;  %v7465_v22 = vadd.f32 %v15367_v53, %v16173_v50  ;;  %v16182_v50 = vld [vmem:[#allocation35_spill] sm:$0xff] }
 0xb2c   : > { %v6773_v56 = vsel %vm6770_vm1, %v6772_v31, %v6768_v10  ;;  %v6896_v14 = vmul.f32 %v6832_v58, %v4144_v41  ;;  %v16179_v58 = vld [vmem:[#allocation34_spill] sm:$0xff] }
 0xb2d   : > { %v6774_v63 = vmul.f32 %v6773_v56, %v6749_v26  ;;  %7621 = vmatmul.bf16.gmra.mxu1 %v6934_v4  ;;  %v7492_v45 = vadd.f32 %v16171_v29, %v7463_v27  ;;  %v7494_v46 = vadd.f32 %v16175_v35, %v7465_v22 }
 0xb2e   : > { %7650 = vmatmul.bf16.gmra.mxu2 %v6935_v57 }
 0xb2f   : > { %v8672_v3 = vclamps-f32 %v6774_v63, 1.0  ;;  %v7521_v42 = vadd.f32 %v16172_v34, %v7492_v45  ;;  %v7523_v33 = vadd.f32 %v16176_v38, %v7494_v46 }
 0xb31   : > { %v6840_v8 = vadd.f32 1.0, %v8672_v3  ;;  %v7550_v49 = vadd.f32 %v16174_v13, %v7521_v42  ;;  %v7552_v6 = vadd.f32 %v16177_v16, %v7523_v33 }
 0xb33   : > { %v6904_v47 = vmul.f32 %v6840_v8, %v4152_v17 }
 0xb35   : > { %v6936_v52 = vpack.c.bf16 %v6904_v47, %v6896_v14 }
 0xb37   : > { %7679 = vmatmul.bf16.gmra.mxu3 %v6936_v52 }
 0xb3c   : > { %v7477_v32 = vpop.f32.mrf.mxu0  ;;  %v7506_v48 = vpop.f32.mrf.mxu1 }
 0xb3d   : > { %v7478_v21 = vadd.f32 %v15367_v53, %v7477_v32 }
 0xb3f   : > { %v7507_v1 = vadd.f32 %v7506_v48, %v7478_v21 }
 0xb44   : > { %v7479_v43 = vpop.f32.mrf.mxu0  ;;  %v7508_v12 = vpop.f32.mrf.mxu1 }
 0xb45   : > { %v7480_v0 = vadd.f32 %v15367_v53, %v7479_v43 }
 0xb47   : > { %v7509_v61 = vadd.f32 %v7508_v12, %v7480_v0 }
 0xb4e   : > { %v7578_v20 = vpop.f32.mrf.mxu0 }
 0xb4f   : > { %v7579_v28 = vadd.f32 %v7578_v20, %v7550_v49  ;;  %v7607_v30 = vpop.f32.mrf.mxu1 }
 0xb51   : > { %v7608_v36 = vadd.f32 %v7607_v30, %v7579_v28  ;;  %v16183_v30 = vld [vmem:[#allocation36_spill] sm:$0xff] }
 0xb56   : > { %v7535_v7 = vpop.f32.mrf.mxu2  ;;  %v7580_v25 = vpop.f32.mrf.mxu0 }
 0xb57   : > { %v7536_v19 = vadd.f32 %v7535_v7, %v7507_v1  ;;  %v7581_v39 = vadd.f32 %v7580_v25, %v7552_v6  ;;  %v7609_v31 = vpop.f32.mrf.mxu1  ;;  %v16180_v1 = vld [vmem:[#allocation24_spill] sm:$0xff] }
 0xb59   : > { %v7610_v10 = vadd.f32 %v7609_v31, %v7581_v39  ;;  %v16184_v31 = vld [vmem:[#allocation22_spill] sm:$0xff] }
 0xb5a   : > { %v7564_v60 = vpop.f32.mrf.mxu3 }
 0xb5b   : > { %v15529_v51 = vadd.f32 %v7564_v60, %v7536_v19  ;;  %v16181_v60 = vld [vmem:[#allocation23_spill] sm:$0xff] }
 0xb5e   : > { %v7537_v11 = vpop.f32.mrf.mxu2 }
 0xb5f   : > { %v7538_v5 = vadd.f32 %v7537_v11, %v7509_v61 }
 0xb62   : > { %v7566_v37 = vpop.f32.mrf.mxu3 }
 0xb63   : > { %v15536_v62 = vadd.f32 %v7566_v37, %v7538_v5 }
 0xb6d   : > { %v7636_v54 = vpop.f32.mrf.mxu2 }
 0xb6e   : > { %v7637_v15 = vadd.f32 %v7636_v54, %v7608_v36  ;;  %v7665_v2 = vpop.f32.mrf.mxu3 }
 0xb70   : > { %v7666_v53 = vadd.f32 %v7665_v2, %v7637_v15 }
 0xb72   : > { %v15542_v26 = vadd.f32 %v7666_v53, %v16178_v59 }
 0xb74   : > { %7695 = vadd.xlane.f32.xlu2 %v15542_v26 }
 0xb75   : > { %v7638_v4 = vpop.f32.mrf.mxu2 }
 0xb76   : > { %v7639_v57 = vadd.f32 %v7638_v4, %v7610_v10  ;;  %v7667_v56 = vpop.f32.mrf.mxu3 }
 0xb78   : > { %v7668_v63 = vadd.f32 %v7667_v56, %v7639_v57 }
 0xb7a   : > { %v15546_v3 = vadd.f32 %v7668_v63, %v16179_v58 }
 0xb7c   : > { %7697 = vadd.xlane.f32.xlu0 %v15546_v3 }
 0xb85   : > { %v7583_v18 = vpop.f32.mrf.mxu0 }
 0xb86   : > { %v7584_v24 = vadd.f32 %v7583_v18, %v15438_v44  ;;  %v16186_v18 = vld [vmem:[#allocation25_spill] sm:$0xff] }
 0xb8a   : > { %v7612_v41 = vpop.f32.mrf.mxu1 }
 0xb8b   : > { %v7613_v8 = vadd.f32 %v7612_v41, %v7584_v24 }
 0xb8d   : > { %v7585_v17 = vpop.f32.mrf.mxu0 }
 0xb8e   : > { %v7586_v21 = vadd.f32 %v7585_v17, %v15469_v23 }
 0xb91   : > { %v7641_v14 = vpop.f32.mrf.mxu2 }
 0xb92   : > { %v7642_v47 = vadd.f32 %v7641_v14, %v7613_v8  ;;  %v7614_v52 = vpop.f32.mrf.mxu1 }
 0xb93   : > { %v7670_v32 = vpop.f32.mrf.mxu3  ;;  %v7615_v12 = vadd.f32 %v7614_v52, %v7586_v21 }
 0xb94   : > { %v7671_v48 = vadd.f32 %v7670_v32, %v7642_v47 }
 0xb95   : > { %v7588_v0 = vpop.f32.mrf.mxu0 }
 0xb96   : > { %v7687_v43 = vadd.f32 %v7671_v48, %v16180_v1  ;;  %v7589_v55 = vadd.f32 %v7588_v0, %v15497_v40 }
 0xb98   : > { %7699 = vadd.xlane.f32.xlu1 %v7687_v43 }
 0xb99   : > { %v7643_v61 = vpop.f32.mrf.mxu2 }
 0xb9a   : > { %v7644_v7 = vadd.f32 %v7643_v61, %v7615_v12  ;;  %v7617_v27 = vpop.f32.mrf.mxu1 }
 0xb9b   : > { %v7672_v19 = vpop.f32.mrf.mxu3  ;;  %v7618_v45 = vadd.f32 %v7617_v27, %v7589_v55 }
 0xb9c   : > { %v7673_v44 = vadd.f32 %v7672_v19, %v7644_v7 }
 0xb9d   : > { %v7590_v11 = vpop.f32.mrf.mxu0 }
 0xb9e   : > { %v7688_v29 = vadd.f32 %v7673_v44, %v16181_v60  ;;  %v7591_v5 = vadd.f32 %v7590_v11, %v15512_v9 }
 0xba0   : > { %7701 = vadd.xlane.f32.xlu2 %v7688_v29 }
 0xba1   : > { %v7646_v34 = vpop.f32.mrf.mxu2 }
 0xba2   : > { %v7647_v23 = vadd.f32 %v7646_v34, %v7618_v45  ;;  %v7619_v37 = vpop.f32.mrf.mxu1 }
 0xba3   : > { %v7675_v42 = vpop.f32.mrf.mxu3  ;;  %v7620_v13 = vadd.f32 %v7619_v37, %v7591_v5 }
 0xba4   : > { %v7676_v20 = vadd.f32 %v7675_v42, %v7647_v23 }
 0xba5   : > { %v7593_v35 = vpop.f32.mrf.mxu0 }
 0xba6   : > { %v7689_v22 = vadd.f32 %v7676_v20, %v16182_v50  ;;  %v7594_v33 = vadd.f32 %v7593_v35, %v15529_v51  ;;  %v16185_v51 = vld [vmem:[#allocation31_spill] sm:$0xff] }
 0xba8   : > { %7703 = vadd.xlane.f32.xlu0 %v7689_v22 }
 0xba9   : > { %v7648_v49 = vpop.f32.mrf.mxu2 }
 0xbaa   : > { %v7649_v40 = vadd.f32 %v7648_v49, %v7620_v13  ;;  %v7622_v36 = vpop.f32.mrf.mxu1 }
 0xbab   : > { %v7677_v46 = vpop.f32.mrf.mxu3  ;;  %v7623_v54 = vadd.f32 %v7622_v36, %v7594_v33 }
 0xbac   : > { %v7678_v28 = vadd.f32 %v7677_v46, %v7649_v40 }
 0xbad   : > { %v7595_v9 = vpop.f32.mrf.mxu0 }
 0xbae   : > { %v7690_v38 = vadd.f32 %v7678_v28, %v16183_v30  ;;  %v7596_v6 = vadd.f32 %v7595_v9, %v15536_v62 }
 0xbb0   : > { %7705 = vadd.xlane.f32.xlu1 %v7690_v38 }
 0xbb1   : > { %v7651_v25 = vpop.f32.mrf.mxu2 }
 0xbb2   : > { %v7652_v16 = vadd.f32 %v7651_v25, %v7623_v54  ;;  %v7624_v39 = vpop.f32.mrf.mxu1  ;;  %v15606_v25 = vld [vmem:[%s16187_s5] ss:$0 sm:$0xff] }
 0xbb3   : > { %v7625_v59 = vadd.f32 %v7624_v39, %v7596_v6 }
 0xbb9   : > { %v7653_v53 = vpop.f32.mrf.mxu2 }
 0xbba   : > { %v7680_v15 = vpop.f32.mrf.mxu3  ;;  %v7654_v4 = vadd.f32 %v7653_v53, %v7625_v59 }
 0xbbb   : > { %v7681_v2 = vadd.f32 %v7680_v15, %v7652_v16  ;;  %v15613_v16 = vld [vmem:[%s16188_s21] ss:$0 sm:$0xff] }
 0xbbd   : > { %v7691_v10 = vadd.f32 %v7681_v2, %v16184_v31 }
 0xbbf   : > { %7707 = vadd.xlane.f32.xlu2 %v7691_v10 }
 0xbc2   : > { %v7682_v57 = vpop.f32.mrf.mxu3 }
 0xbc3   : > { %v7683_v56 = vadd.f32 %v7682_v57, %v7654_v4 }
 0xbc5   : > { %v7692_v63 = vadd.f32 %v7683_v56, %v16185_v51 }
 0xbc7   : > { %7709 = vadd.xlane.f32.xlu0 %v7692_v63 }
 0xbe7   : > { %v7696_v58 = vpop.xlane.xlu2 %7695 }
 0xbe8   : > { %v7711_v41 = vmul.f32 %v7696_v58, %v16186_v18 }
 0xbea   : > { %v7719_v24 = vsub.f32 %v15542_v26, %v7711_v41 }
 0xbec   : > { %v7727_v62 = vmul.f32 %v7719_v24, %v7719_v24 }
 0xbee   : > { %7735 = vadd.xlane.f32.xlu1 %v7727_v62 }
 0xbef   : > { %v7698_v17 = vpop.xlane.xlu0 %7697 }
 0xbf0   : > { %v7712_v8 = vmul.f32 %v7698_v17, %v16186_v18 }
 0xbf2   : > { %v15565_v14 = vsub.f32 %v15546_v3, %v7712_v8 }
 0xbf4   : > { %v7728_v47 = vmul.f32 %v15565_v14, %v15565_v14 }
 0xbf6   : > { %7737 = vadd.xlane.f32.xlu2 %v7728_v47 }
 0xc0b   : > { %v7700_v52 = vpop.xlane.xlu1 %7699 }
 0xc0c   : > { %v7713_v32 = vmul.f32 %v7700_v52, %v16186_v18 }
 0xc0e   : > { %v15570_v21 = vsub.f32 %v7687_v43, %v7713_v32 }
 0xc10   : > { %v7729_v26 = vmul.f32 %v15570_v21, %v15570_v21 }
 0xc12   : > { %7739 = vadd.xlane.f32.xlu0 %v7729_v26 }
 0xc13   : > { %v7702_v48 = vpop.xlane.xlu2 %7701 }
 0xc14   : > { %v7714_v1 = vmul.f32 %v7702_v48, %v16186_v18 }
 0xc16   : > { %v15575_v0 = vsub.f32 %v7688_v29, %v7714_v1 }
 0xc18   : > { %v7730_v3 = vmul.f32 %v15575_v0, %v15575_v0 }
 0xc1a   : > { %7741 = vadd.xlane.f32.xlu1 %v7730_v3 }
 0xc1b   : > { %v7704_v12 = vpop.xlane.xlu0 %7703 }
 0xc1c   : > { %v7715_v61 = vmul.f32 %v7704_v12, %v16186_v18 }
 0xc1e   : > { %v15580_v7 = vsub.f32 %v7689_v22, %v7715_v61 }
 0xc20   : > { %v7731_v43 = vmul.f32 %v15580_v7, %v15580_v7 }
 0xc22   : > { %7743 = vadd.xlane.f32.xlu2 %v7731_v43 }
 0xc23   : > { %v7706_v19 = vpop.xlane.xlu1 %7705 }
 0xc24   : > { %v7716_v55 = vmul.f32 %v7706_v19, %v16186_v18 }
 0xc26   : > { %v15585_v44 = vsub.f32 %v7690_v38, %v7716_v55 }
 0xc28   : > { %v7732_v27 = vmul.f32 %v15585_v44, %v15585_v44 }
 0xc2a   : > { %7745 = vadd.xlane.f32.xlu0 %v7732_v27 }
 0xc32   : > { %v7708_v60 = vpop.xlane.xlu2 %7707 }
 0xc33   : > { %v7717_v29 = vmul.f32 %v7708_v60, %v16186_v18 }
 0xc35   : > { %v15590_v45 = vsub.f32 %v7691_v10, %v7717_v29 }
 0xc37   : > { %v7733_v11 = vmul.f32 %v15590_v45, %v15590_v45 }
 0xc39   : > { %7747 = vadd.xlane.f32.xlu1 %v7733_v11 }
 0xc3a   : > { %v7710_v34 = vpop.xlane.xlu0 %7709 }
 0xc3b   : > { %v7718_v23 = vmul.f32 %v7710_v34, %v16186_v18 }
 0xc3d   : > { %v15595_v42 = vsub.f32 %v7692_v63, %v7718_v23 }
 0xc3f   : > { %v7734_v5 = vmul.f32 %v15595_v42, %v15595_v42 }
 0xc41   : > { %7749 = vadd.xlane.f32.xlu2 %v7734_v5 }
 0xc61   : > { %v7736_v20 = vpop.xlane.xlu1 %7735 }
 0xc62   : > { %v7751_v50 = vmul.f32 %v7736_v20, %v16186_v18 }
 0xc64   : > { %v7759_v22 = vadd.f32 1e-05, %v7751_v50 }
 0xc66   : > { %9623 = vrsqrt.f32 %v7759_v22  ;;  %vm7773_vm3 = vweird.f32 %v7759_v22 }
 0xc69   : > { %v7738_v37 = vpop.xlane.xlu2 %7737 }
 0xc6a   : > { %v7752_v13 = vmul.f32 %v7738_v37, %v16186_v18 }
 0xc6c   : > { %v9624_v49 = vpop.eup %9623  ;;  %v7760_v40 = vadd.f32 1e-05, %v7752_v13 }
 0xc6d   : > { %v7768_v35 = vmul.f32 %v9624_v49, %v7759_v22  ;;  %vm7774_vm2 = vweird.f32 %v9624_v49 }
 0xc6e   : > { %9625 = vrsqrt.f32 %v7760_v40  ;;  %vm7775_vm4 = vmor %vm7773_vm3, %vm7774_vm2  ;;  %vm7783_vm6 = vweird.f32 %v7760_v40 }
 0xc6f   : > { %v7769_v46 = vmul.f32 %v9624_v49, %v7768_v35 }
 0xc71   : > { %v7770_v28 = vmul.f32 0.5, %v7769_v46 }
 0xc73   : > { %v7771_v30 = vsub.f32 1.5, %v7770_v28 }
 0xc74   : > { %v9626_v38 = vpop.eup %9625 }
 0xc75   : > { %v7772_v33 = vmul.f32 %v9624_v49, %v7771_v30  ;;  %v7778_v36 = vmul.f32 %v9626_v38, %v7760_v40  ;;  %vm7784_vm5 = vweird.f32 %v9626_v38 }
 0xc76   : > { %vm7785_vm7 = vmor %vm7783_vm6, %vm7784_vm5 }
 0xc77   : > { %v7776_v54 = vsel %vm7775_vm4, %v9624_v49, %v7772_v33  ;;  %v7779_v9 = vmul.f32 %v9626_v38, %v7778_v36 }
 0xc78   : > { %v7847_v6 = vmul.f32 %v7776_v54, %v7719_v24 }
 0xc79   : > { %v7780_v15 = vmul.f32 0.5, %v7779_v9 }
 0xc7a   : > { %v7858_v2 = vmul.f32 %v15606_v25, %v7847_v6 }
 0xc7b   : > { %v7781_v39 = vsub.f32 1.5, %v7780_v15 }
 0xc7c   : > { %v15617_v53 = vadd.f32 %v15613_v16, %v7858_v2 }
 0xc7d   : > { %v7782_v59 = vmul.f32 %v9626_v38, %v7781_v39 }
 0xc7e   : > { %7877 = vst [vmem:[#allocation2 + $0x30] sm:$0xff] %v15617_v53 }
 0xc7f   : > { %v7786_v31 = vsel %vm7785_vm7, %v9626_v38, %v7782_v59 }
 0xc80   : > { %v7848_v10 = vmul.f32 %v7786_v31, %v15565_v14 }
 0xc82   : > { %v7859_v4 = vmul.f32 %v15606_v25, %v7848_v10 }
 0xc84   : > { %v15623_v57 = vadd.f32 %v15613_v16, %v7859_v4 }
 0xc85   : > { %v7740_v56 = vpop.xlane.xlu0 %7739 }
 0xc86   : > { %7878 = vst [vmem:[#allocation2] sm:$0xff] %v15623_v57  ;;  %v7753_v51 = vmul.f32 %v7740_v56, %v16186_v18 }
 0xc88   : > { %v7761_v63 = vadd.f32 1e-05, %v7753_v51 }
 0xc8a   : > { %9627 = vrsqrt.f32 %v7761_v63  ;;  %vm7793_vm9 = vweird.f32 %v7761_v63 }
 0xc8d   : > { %v7742_v58 = vpop.xlane.xlu1 %7741 }
 0xc8e   : > { %v7754_v41 = vmul.f32 %v7742_v58, %v16186_v18 }
 0xc90   : > { %v9628_v24 = vpop.eup %9627  ;;  %v7762_v62 = vadd.f32 1e-05, %v7754_v41 }
 0xc91   : > { %v7788_v17 = vmul.f32 %v9628_v24, %v7761_v63  ;;  %vm7794_vm8 = vweird.f32 %v9628_v24 }
 0xc92   : > { %9629 = vrsqrt.f32 %v7762_v62  ;;  %vm7795_vm10 = vmor %vm7793_vm9, %vm7794_vm8  ;;  %vm7803_vm12 = vweird.f32 %v7762_v62 }
 0xc93   : > { %v7789_v8 = vmul.f32 %v9628_v24, %v7788_v17 }
 0xc95   : > { %v7790_v14 = vmul.f32 0.5, %v7789_v8  ;;  %v7744_v47 = vpop.xlane.xlu2 %7743 }
 0xc96   : > { %v7755_v52 = vmul.f32 %v7744_v47, %v16186_v18 }
 0xc97   : > { %v7791_v32 = vsub.f32 1.5, %v7790_v14 }
 0xc98   : > { %v9630_v26 = vpop.eup %9629  ;;  %v7763_v48 = vadd.f32 1e-05, %v7755_v52 }
 0xc99   : > { %v7792_v1 = vmul.f32 %v9628_v24, %v7791_v32  ;;  %v7798_v3 = vmul.f32 %v9630_v26, %v7762_v62  ;;  %vm7804_vm11 = vweird.f32 %v9630_v26 }
 0xc9a   : > { %9631 = vrsqrt.f32 %v7763_v48  ;;  %vm7805_vm13 = vmor %vm7803_vm12, %vm7804_vm11  ;;  %vm7813_vm15 = vweird.f32 %v7763_v48 }
 0xc9b   : > { %v7796_v12 = vsel %vm7795_vm10, %v9628_v24, %v7792_v1  ;;  %v7799_v61 = vmul.f32 %v9630_v26, %v7798_v3 }
 0xc9c   : > { %v7849_v43 = vmul.f32 %v7796_v12, %v15570_v21 }
 0xc9d   : > { %v7800_v19 = vmul.f32 0.5, %v7799_v61  ;;  %v7746_v55 = vpop.xlane.xlu0 %7745 }
 0xc9e   : > { %v7860_v27 = vmul.f32 %v15606_v25, %v7849_v43  ;;  %v7756_v60 = vmul.f32 %v7746_v55, %v16186_v18 }
 0xc9f   : > { %v7801_v29 = vsub.f32 1.5, %v7800_v19 }
 0xca0   : > { %v9632_v11 = vpop.eup %9631  ;;  %v15633_v34 = vadd.f32 %v15613_v16, %v7860_v27  ;;  %v7764_v23 = vadd.f32 1e-05, %v7756_v60 }
 0xca1   : > { %v7802_v5 = vmul.f32 %v9630_v26, %v7801_v29  ;;  %v7808_v20 = vmul.f32 %v9632_v11, %v7763_v48  ;;  %vm7814_vm14 = vweird.f32 %v9632_v11 }
 0xca2   : > { %7879 = vst [vmem:[#allocation2 + $0x18] sm:$0xff] %v15633_v34  ;;  %9633 = vrsqrt.f32 %v7764_v23  ;;  %vm7815_vm0 = vmor %vm7813_vm15, %vm7814_vm14  ;;  %vm7823_vm2 = vweird.f32 %v7764_v23 }
 0xca3   : > { %v7806_v21 = vsel %vm7805_vm13, %v9630_v26, %v7802_v5  ;;  %v7809_v50 = vmul.f32 %v9632_v11, %v7808_v20 }
 0xca4   : > { %v7850_v22 = vmul.f32 %v7806_v21, %v15575_v0 }
 0xca5   : > { %v7810_v37 = vmul.f32 0.5, %v7809_v50 }
 0xca6   : > { %v7861_v13 = vmul.f32 %v15606_v25, %v7850_v22 }
 0xca7   : > { %v7811_v49 = vsub.f32 1.5, %v7810_v37 }
 0xca8   : > { %v9634_v40 = vpop.eup %9633  ;;  %v15639_v35 = vadd.f32 %v15613_v16, %v7861_v13 }
 0xca9   : > { %v7812_v46 = vmul.f32 %v9632_v11, %v7811_v49  ;;  %v7818_v28 = vmul.f32 %v9634_v40, %v7764_v23  ;;  %vm7824_vm1 = vweird.f32 %v9634_v40 }
 0xcaa   : > { %7880 = vst [vmem:[#allocation2 + $0x10] sm:$0xff] %v15639_v35  ;;  %vm7825_vm3 = vmor %vm7823_vm2, %vm7824_vm1 }
 0xcab   : > { %v7816_v30 = vsel %vm7815_vm0, %v9632_v11, %v7812_v46  ;;  %v7819_v38 = vmul.f32 %v9634_v40, %v7818_v28 }
 0xcac   : > { %v7748_v33 = vpop.xlane.xlu1 %7747  ;;  %v7851_v0 = vmul.f32 %v7816_v30, %v15580_v7 }
 0xcad   : > { %v7757_v36 = vmul.f32 %v7748_v33, %v16186_v18  ;;  %v7820_v54 = vmul.f32 0.5, %v7819_v38 }
 0xcae   : > { %v7862_v9 = vmul.f32 %v15606_v25, %v7851_v0 }
 0xcaf   : > { %v7765_v6 = vadd.f32 1e-05, %v7757_v36  ;;  %v7821_v15 = vsub.f32 1.5, %v7820_v54 }
 0xcb0   : > { %v7873_v2 = vadd.f32 %v15613_v16, %v7862_v9 }
 0xcb1   : > { %9635 = vrsqrt.f32 %v7765_v6  ;;  %v7822_v39 = vmul.f32 %v9634_v40, %v7821_v15  ;;  %vm7833_vm5 = vweird.f32 %v7765_v6 }
 0xcb2   : > { %7881 = vst [vmem:[#allocation2 + $0x8] sm:$0xff] %v7873_v2 }
 0xcb3   : > { %v7826_v59 = vsel %vm7825_vm3, %v9634_v40, %v7822_v39 }
 0xcb4   : > { %v7750_v31 = vpop.xlane.xlu2 %7749  ;;  %v7852_v10 = vmul.f32 %v7826_v59, %v15585_v44 }
 0xcb5   : > { %v7758_v7 = vmul.f32 %v7750_v31, %v16186_v18 }
 0xcb6   : > { %v7863_v56 = vmul.f32 %v15606_v25, %v7852_v10 }
 0xcb7   : > { %v9636_v4 = vpop.eup %9635  ;;  %v7766_v51 = vadd.f32 1e-05, %v7758_v7 }
 0xcb8   : > { %v7828_v63 = vmul.f32 %v9636_v4, %v7765_v6  ;;  %v7874_v58 = vadd.f32 %v15613_v16, %v7863_v56  ;;  %vm7834_vm4 = vweird.f32 %v9636_v4 }
 0xcb9   : > { %9637 = vrsqrt.f32 %v7766_v51  ;;  %vm7835_vm6 = vmor %vm7833_vm5, %vm7834_vm4  ;;  %vm7843_vm8 = vweird.f32 %v7766_v51 }
 0xcba   : > { %v7829_v41 = vmul.f32 %v9636_v4, %v7828_v63  ;;  %7882 = vst [vmem:[#allocation2 + $0x20] sm:$0xff] %v7874_v58 }
 0xcbc   : > { %v7830_v24 = vmul.f32 0.5, %v7829_v41 }
 0xcbe   : > { %v7831_v62 = vsub.f32 1.5, %v7830_v24 }
 0xcbf   : > { %v9638_v17 = vpop.eup %9637 }
 0xcc0   : > { %v7832_v8 = vmul.f32 %v9636_v4, %v7831_v62  ;;  %v7838_v14 = vmul.f32 %v9638_v17, %v7766_v51  ;;  %vm7844_vm7 = vweird.f32 %v9638_v17 }
 0xcc1   : > { %vm7845_vm9 = vmor %vm7843_vm8, %vm7844_vm7 }
 0xcc2   : > { %v7836_v44 = vsel %vm7835_vm6, %v9636_v4, %v7832_v8  ;;  %v7839_v18 = vmul.f32 %v9638_v17, %v7838_v14 }
 0xcc3   : > { %v7853_v47 = vmul.f32 %v7836_v44, %v15590_v45 }
 0xcc4   : > { %v7840_v52 = vmul.f32 0.5, %v7839_v18 }
 0xcc5   : > { %v7864_v32 = vmul.f32 %v15606_v25, %v7853_v47 }
 0xcc6   : > { %v7841_v26 = vsub.f32 1.5, %v7840_v52 }
 0xcc7   : > { %v7875_v48 = vadd.f32 %v15613_v16, %v7864_v32 }
 0xcc8   : > { %v7842_v1 = vmul.f32 %v9638_v17, %v7841_v26 }
 0xcc9   : > { %7883 = vst [vmem:[#allocation2 + $0x28] sm:$0xff] %v7875_v48 }
 0xcca   : > { %v7846_v3 = vsel %vm7845_vm9, %v9638_v17, %v7842_v1 }
 0xccb   : > { %v7854_v12 = vmul.f32 %v7846_v3, %v15595_v42 }
 0xccd   : > { %v7865_v61 = vmul.f32 %v15606_v25, %v7854_v12  ;;  %7888 = sbr.rel (%p8929_p1) target bundleno = 3290 (0xcda), region = 92 }
 0xccf   : > { %v7876_v43 = vadd.f32 %v15613_v16, %v7865_v61 }
 0xcd1   : > { %7884 = vst [vmem:[#allocation2 + $0x38] sm:$0xff] %v7876_v43 }
 0xcd2   : > { %7889 = vst [vmem:[%s9980_s23] sm:$0xff] %v15617_v53 }
 0xcd3   : > { %7890 = vst [vmem:[%s9980_s23 + $0x8] sm:$0xff] %v15623_v57 }
 0xcd4   : > { %7891 = vst [vmem:[%s9980_s23 + $0x10] sm:$0xff] %v15633_v34 }
 0xcd5   : > { %7892 = vst [vmem:[%s9980_s23 + $0x18] sm:$0xff] %v15639_v35 }
 0xcd6   : > { %7893 = vst [vmem:[%s9980_s23 + $0x20] sm:$0xff] %v7873_v2 }
 0xcd7   : > { %7894 = vst [vmem:[%s9980_s23 + $0x28] sm:$0xff] %v7874_v58 }
 0xcd8   : > { %7895 = vst [vmem:[%s9980_s23 + $0x30] sm:$0xff] %v7875_v48 }
 0xcd9   : > { %7896 = vst [vmem:[%s9980_s23 + $0x38] sm:$0xff] %v7876_v43 }
 0xcda PF: > { %s16190_s28 = sld [smem:[#allocation11_spill]]  ;;  %s7910_s17 = sshll.u32 %s9980_s23, 4  ;;  %s7911_s17 = int_to_ptr.vmem [resolvable:$true] %s7910_s17 }
 0xcdb   : > { %s16191_s3 = sld [smem:[#allocation8_spill]] }
 0xcdc   : > { %s16193_s27 = sld [smem:[#allocation59_spill]] }
 0xce0   : > { %s9106_s18 = sshll.u32 %s16190_s28, 6 }
 0xce1   : > { %s16195_s0 = sand.u32 1, %s16191_s3  }
 0xce2   : > { %s16194_s20 = smov %s16193_s27  ;;  %s7909_s22 = scalar_lea.hbm %s16193_s27, %s9106_s18 }
 0xce3   : > { %s7912_s29 = sshll.u32 %s7909_s22, 4  ;;  %s7898_s1 = scalar_lea.sflag [#allocation5], %s16195_s0  ;;  %s7913_s29 = int_to_ptr.hbm [resolvable:$true] %s7912_s29 }
 0xce4   : > { %s9662_s2 = sshra.s32 %s7913_s29, 4  ;;  %s9668_s21 = scalar_lea.hbm %s16194_s20, 256  ;;  %s9663_s2 = int_to_ptr.hbm [resolvable:$true] %s9662_s2 }
 0xce5   : > { %s9664_s5 = scalar_lea.hbm %s9663_s2, 64  ;;  %p9669_p6 = scmp.lt.s32.totalorder %s9663_s2, %s16194_s20 }
 0xce6   : > { %p9665_p2 = scmp.ne.s32.totalorder %s9663_s2, %s9664_s5  ;;  %p9670_p7 = scmp.lt.s32.totalorder %s9668_s21, %s9664_s5 }
 0xce8   : > { %p9666_p4 = pnand %p9665_p2, %p9888_p3  ;;  %p9671_p8 = por %p9670_p7, %p9669_p6 }
 0xcea   : > { %p9667_p5 = pneg %p9666_p4 }
 0xcec   : > { %p9672_p10 = pnand %p9671_p8, %p9667_p5 }
 0xcee   : > { %9675 = shalt.err (!%p9672_p10)
}
 0xcef   : > { %s9752_s23 = smov 128   ;;  %s9753_s3 = smov 8  }
 0xcf0   : > { %9133 = dma.vmem_to_hbm [thread:$0]  (%p9888_p3), %s7911_s17, 1024, %s7913_s29, %s7898_s1, %s9752_s23, %s9752_s23, %s9753_s3  }
 0xcf1 PF: > { %s16196_s18 = sld [smem:[#allocation14_spill]] }
 0xcf2   : > { %s16197_s25 = sld [smem:[#allocation7_spill]] }
 0xcf7   : > { %p9139_p11 = scmp.ge.s32.totalorder %s16196_s18, 2 }
 0xcf8   : > { %s7927_s27 = sand.u32 1, %s16197_s25  }
 0xcf9   : > { %p9136_p12 = pnand %p9139_p11, %p9898_p9  ;;  %s7928_s22 = scalar_lea.sflag [#allocation5], %s7927_s27 }
 0xcfb   : > { %p9137_p13 = pneg %p9136_p12 }
 0xcfd   : > { %9709 = dma.done.wait (%p9137_p13), %s7928_s22, 1024  }
 0xcfe   : > { %9711 = vsyncadd (%p9137_p13), %s7928_s22, 4294966272  ;;  %s29_s28 = sadd.s32 1, %s16196_s18   ;;  %s16199_s21 = sld [smem:[#allocation8_spill]] }
 0xcff   : > { %p26_p0 = scmp.ge.s32.totalorder %s29_s28, 18   ;;  %s16200_s22 = sld [smem:[#allocation9_spill]] }
 0xd00   : > { %s16201_s23 = sld [smem:[#allocation19_spill]] }
 0xd01   : > { %s16202_s24 = sld [smem:[#allocation12_spill]]  ;;  %28 = sbr.rel (!%p26_p0) target bundleno = 14 (0xe), region = 163 }
 0xd02   : > { %s16203_s25 = sld [smem:[#allocation13_spill]] }
 0xd03   : > { %s16204_s26 = sld [smem:[#allocation15_spill]] }
 0xd04   : > { %s16205_s27 = sld [smem:[#allocation17_spill]] }
 0xd06   :  { %7934 = vsyncpa [#allocation5], 1 }
 0xd07   :  { %7936 = vsyncpa [#allocation5 + $0x1], 1 }

</bundles_post_ra>
